<compile_context>
chip_gen: v7x
topology: tpu7x:2x2x1
jax: 0.10.0
libtpu: 0.0.40
codegen_flags: <defaults>
</compile_context>

<pallas_src>
import numpy as np
import jax
import jax.numpy as jnp
from jax.experimental import pallas as pl
from jax.experimental.pallas import tpu as pltpu

N = 4                    # nodes per graph
NBR = N - 1              # 3 neighbours per node (forced by torch.split(..., 3))
E = N * NBR              # 12 directed edges per graph
NF = 8                   # input_nf == output_nf (residual)
H = 2 * 3 * NBR + 1      # 19 == hidden_nf (forced by the sort-embedding width)

KIN = 2 * NF + 9 + H     # 44  edge-MLP input width
KND = NF + H             # 27  node-MLP input width
NV = 12                  # columns of the small f32 vector slab
WCA_ROWS = 48            # stacked [Wc1^T ; pad ; A2^T] rows (8-aligned slices)
A2_ROW = 24

BT_MAX = 256             # graphs per grid step cap -> up to 1024 node / 3072 edge lanes
# TODO(synk): if BT_MAX is pushed past ~1024 (edge width >= 12288 lanes), also set
# pltpu.CompilerParams(vmem_limit_bytes=...) and cap BT lower on v7x (64 MiB VMEM).

MXU_DTYPE = jnp.bfloat16  # set to jnp.float32 for near-bit-exact matmuls vs the reference


# ----------------------------------------------------------------------------- kernel
def egcl_kernel(x_ref, we1_ref, we2_ref, wca_ref, wn1_ref, wn2_ref, a1_ref, v_ref, o_ref):
    f32 = jnp.float32
    nr = x_ref.shape[-1]                 # node lanes in this tile (multiple of 128)

    def mdot(w, a):                      # bf16 MXU matmul, f32 accumulation
        return jnp.dot(w, a.astype(w.dtype), preferred_element_type=f32)

    def silu(t):                         # EUP approx reciprocal frees VALU slots
        return t * pl.reciprocal(1.0 + jnp.exp(-t), approx=True)

    x = x_ref[...]                       # (NF+3, nr): rows 0:NF = h, NF:NF+3 = coord
    hn = x[0:NF, :]                      # (NF, nr)
    cn = x[NF:NF + 3, :]                 # (3, nr)

    V = v_ref[...]                       # (H, NV) f32 small broadcast vectors
    w1t = V[:, 0:3]
    w2t = V[:, 3:6]
    be1 = V[:, 6:7]
    be2 = V[:, 7:8]
    bc1 = V[:, 8:9]
    bn1 = V[:, 9:10]
    wc2 = V[:, 10:11]
    bn2 = V[0:NF, 11:12]

    # ---- in-kernel neighbour construction (cyclic within each 4-lane graph group):
    # slot k holds the features of node (i + k) mod 4 for the node in lane i (i = L % 4).
    node_idx = jax.lax.broadcasted_iota(jnp.int32, (1, nr), 1) % N
    def cyc(k):
        main = pltpu.roll(x, shift=nr - k, axis=1)   # out[L] = x[L + k]
        wrap = pltpu.roll(x, shift=N - k, axis=1)    # out[L] = x[L + k - N]
        return jnp.where(node_idx < (N - k), main, wrap)
    slots = [cyc(k) for k in (1, 2, 3)]              # 3 x (NF+3, nr)
    hcs = [s[0:NF, :] for s in slots]                # h of the k-th cyclic neighbour
    ccs = [s[NF:NF + 3, :] for s in slots]           # coord of the k-th cyclic neighbour

    # ---- per-edge lane layout: column order [slot1 | slot2 | slot3], et = 3*nr lanes
    hr_e = jnp.concatenate([hn, hn, hn], axis=1)     # (NF, et) h[source]
    hc_e = jnp.concatenate(hcs, axis=1)              # (NF, et) h[target]
    cr_e = jnp.concatenate([cn, cn, cn], axis=1)     # (3, et)  coord[source]
    cc_e = jnp.concatenate(ccs, axis=1)              # (3, et)  coord[target]
    nb_e = [jnp.concatenate([c] * NBR, axis=1) for c in ccs]   # all neighbours of source

    def rows3(v):                                    # (3, W) -> three lane-dense (1, W) rows
        return (v[0:1, :], v[1:2, :], v[2:3, :])

    def norm3(a):
        return jnp.sqrt(a[0] * a[0] + a[1] * a[1] + a[2] * a[2])

    def dist3(a, b):
        return jnp.sqrt((a[0] - b[0]) ** 2 + (a[1] - b[1]) ** 2 + (a[2] - b[2]) ** 2)

    crow = rows3(cr_e)
    ccol = rows3(cc_e)
    perp = (crow[1] * ccol[2] - crow[2] * ccol[1],   # cross(coord[src], coord[tgt])
            crow[2] * ccol[0] - crow[0] * ccol[2],
            crow[0] * ccol[1] - crow[1] * ccol[0])

    # ---- coord2gram: upper gram matrix (norms on the diagonal), 9 lane-dense rows
    n0, n1, n2 = norm3(perp), norm3(crow), norm3(ccol)
    d01 = dist3(perp, crow)
    d02 = dist3(perp, ccol)
    d12 = dist3(crow, ccol)

    # ---- sort-embedding over the 3 neighbours (embed_vec_sort d=3, n=3, d_out=H)
    prods = []
    for j in range(NBR):
        nbj = rows3(nb_e[j])
        pj = jnp.concatenate([dist3(perp, nbj), dist3(crow, nbj), dist3(ccol, nbj)],
                             axis=0)                 # (3, et)
        prods.append(mdot(a1_ref[...], pj))          # (H, et)
    lo = jnp.minimum(jnp.minimum(prods[0], prods[1]), prods[2])
    hi = jnp.maximum(jnp.maximum(prods[0], prods[1]), prods[2])
    mid = prods[0] + prods[1] + prods[2] - lo - hi   # 3-way sort = (lo, mid, hi)
    emb = lo * w1t[:, 0:1] + mid * w1t[:, 1:2] + hi * w1t[:, 2:3]            # (H, et)

    # ---- edge MLP: single fused matmul on the concatenated (44, et) input
    edge_in = jnp.concatenate(
        [hr_e, hc_e, n0, d01, d02, d01, n1, d12, d02, d12, n2, emb], axis=0)
    x1 = silu(mdot(we1_ref[...], edge_in) + be1)     # (H, et)
    edge_feat = silu(mdot(we2_ref[...], x1) + be2)   # (H, et)

    # ---- coord-MLP layer 1 and node sort-embedding A2 share one stacked MXU matmul
    ya = mdot(wca_ref[...], edge_feat)               # (48, et)
    y = silu(ya[0:H, :] + bc1)                       # coord branch (rows 0:19)
    P = ya[A2_ROW:A2_ROW + H, :]                     # A2^T @ edge_feat (rows 24:43)

    # ---- coord model: trans = coord_diff * coord_mlp(edge_feat); mean over 3 edges/node
    scale = jnp.sum(y * wc2, axis=0, keepdims=True)  # H->1 head as a sublane reduce
    trans = (cr_e - cc_e) * scale                    # (3, et)
    agg_c = (trans[:, 0:nr] + trans[:, nr:2 * nr] + trans[:, 2 * nr:3 * nr]) * (1.0 / NBR)
    c_out = cn + agg_c                               # (3, nr)

    # ---- node model: per-node 3-way sort-embedding + fused node MLP
    p0 = P[:, 0:nr]
    p1 = P[:, nr:2 * nr]
    p2 = P[:, 2 * nr:3 * nr]
    lo2 = jnp.minimum(jnp.minimum(p0, p1), p2)
    hi2 = jnp.maximum(jnp.maximum(p0, p1), p2)
    mid2 = p0 + p1 + p2 - lo2 - hi2
    node_emb = lo2 * w2t[:, 0:1] + mid2 * w2t[:, 1:2] + hi2 * w2t[:, 2:3]    # (H, nr)

    z = silu(mdot(wn1_ref[...], jnp.concatenate([hn, node_emb], axis=0)) + bn1)  # (H, nr)
    h_out = hn + (mdot(wn2_ref[...], z) + bn2)       # residual, (NF, nr)

    o_ref[...] = jnp.concatenate([h_out, c_out], axis=0)   # (NF+3, nr) lane-dense slab


# ----------------------------------------------------------------------------- packing
def pack_params(p, mxu_dtype=MXU_DTYPE):
    we1 = p["We1"].T.astype(mxu_dtype)                               # (H, 44)
    we2 = p["We2"].T.astype(mxu_dtype)                               # (H, H)
    wca = jnp.zeros((WCA_ROWS, H), jnp.float32)
    wca = wca.at[0:H, :].set(p["Wc1"].T).at[A2_ROW:A2_ROW + H, :].set(p["A2"].T)
    wca = wca.astype(mxu_dtype)                                      # (48, H)
    wn1 = p["Wn1"].T.astype(mxu_dtype)                               # (H, NF + H)
    wn2 = p["Wn2"].T.astype(mxu_dtype)                               # (NF, H)
    a1 = p["A1"].T.astype(mxu_dtype)                                 # (H, 3)
    vec = jnp.zeros((H, NV), jnp.float32)
    vec = vec.at[:, 0:3].set(p["w1"].T)
    vec = vec.at[:, 3:6].set(p["w2"].T)
    vec = vec.at[:, 6].set(p["be1"][0])
    vec = vec.at[:, 7].set(p["be2"][0])
    vec = vec.at[:, 8].set(p["bc1"][0])
    vec = vec.at[:, 9].set(p["bn1"][0])
    vec = vec.at[:, 10].set(p["Wc2"][:, 0])
    vec = vec.at[0:NF, 11].set(p["bn2"][0])
    return we1, we2, wca, wn1, wn2, a1, vec


def pick_bt(B):
    """Largest BT <= BT_MAX that divides B, is a multiple of 32 (128-lane node tiles),
    while leaving >= 8 grid steps when possible (feeds both v7x TensorCores)."""
    assert B % 32 == 0, "batch of graphs must be a multiple of 32"
    cap = min(BT_MAX, max(32, (B // 8) // 32 * 32))
    bt = 32
    for cand in range(32, cap + 1, 32):
        if B % cand == 0:
            bt = cand
    return bt


# ----------------------------------------------------------------------------- wrapper
def e_gcl_forward(params, h, coord, bt=None):
    """h: (B, N, NF), coord: (B, N, 3) -> (h_new, coord_new); edge_attr is None."""
    B = h.shape[0]
    assert h.shape == (B, N, NF) and coord.shape == (B, N, 3)
    if bt is None:
        bt = pick_bt(B)
    assert B % bt == 0 and (bt * N) % 128 == 0
    NN = B * N
    nr = bt * N

    # single lane-dense input slab: rows 0:NF = h^T, rows NF:NF+3 = coord^T
    xin = jnp.concatenate([h.reshape(NN, NF), coord.reshape(NN, 3)],
                          axis=1).T.astype(jnp.float32)              # (NF+3, NN)
    we1, we2, wca, wn1, wn2, a1, vec = pack_params(params)

    full = lambda t: (0, 0)
    tile = lambda t: (0, t)
    fn = pl.pallas_call(
        egcl_kernel,
        grid=(B // bt,),
        in_specs=[
            pl.BlockSpec((NF + 3, nr), tile),        # per-node slab (h | coord)
            pl.BlockSpec((H, KIN), full),            # We1^T
            pl.BlockSpec((H, H), full),              # We2^T
            pl.BlockSpec((WCA_ROWS, H), full),       # [Wc1^T ; pad ; A2^T]
            pl.BlockSpec((H, KND), full),            # [Wn1h^T | Wn1e^T]
            pl.BlockSpec((NF, H), full),             # Wn2^T
            pl.BlockSpec((H, 3), full),              # A1^T
            pl.BlockSpec((H, NV), full),             # small f32 vectors / biases
        ],
        out_specs=pl.BlockSpec((NF + 3, nr), tile),
        out_shape=jax.ShapeDtypeStruct((NF + 3, NN), jnp.float32),
        compiler_params=pltpu.CompilerParams(dimension_semantics=("parallel",)),
    )
    out = fn(xin, we1, we2, wca, wn1, wn2, a1, vec)
    h_new = out[0:NF, :].T.reshape(B, N, NF)
    coord_new = out[NF:NF + 3, :].T.reshape(B, N, 3)
    return h_new, coord_new


# ----------------------------------------------------------------------------- params
def init_params(key):
    ks = jax.random.split(key, 10)

    def linear(k, fin, fout):
        kw, kb = jax.random.split(k)
        bound = 1.0 / np.sqrt(fin)
        w = jax.random.uniform(kw, (fin, fout), jnp.float32, -bound, bound)
        b = jax.random.uniform(kb, (1, fout), jnp.float32, -bound, bound)
        return w, b

    p = {}
    # sort-embedding (embed_vec_sort) weights — fixed random buffers in the PyTorch module
    p["A1"] = jax.random.normal(ks[0], (3, H), jnp.float32)
    p["w1"] = jax.random.normal(ks[1], (3, H), jnp.float32)
    p["A2"] = jax.random.normal(ks[2], (H, H), jnp.float32)
    p["w2"] = jax.random.normal(ks[3], (3, H), jnp.float32)
    # edge_mlp: Linear(2*NF + 9 + H, H) -> SiLU -> Linear(H, H) -> SiLU
    p["We1"], p["be1"] = linear(ks[4], 2 * NF + 9 + H, H)
    p["We2"], p["be2"] = linear(ks[5], H, H)
    # coord_mlp: Linear(H, H) -> SiLU -> Linear(H, 1, bias=False) (xavier gain 0.001)
    p["Wc1"], p["bc1"] = linear(ks[6], H, H)
    p["Wc2"] = 0.001 * jax.random.normal(ks[7], (H, 1), jnp.float32)
    # node_mlp: Linear(H + NF, H) -> SiLU -> Linear(H, NF)
    p["Wn1"], p["bn1"] = linear(ks[8], H + NF, H)
    p["Wn2"], p["bn2"] = linear(ks[9], H, NF)
    return p


# -------------------------------------------------- pure-JAX reference (single graph)
def reference_forward(params, h, coord, row, col):
    hp = jax.lax.Precision.HIGHEST
    silu = lambda x: x / (1.0 + jnp.exp(-x))

    cr, cc = coord[row], coord[col]
    coord_diff = cr - cc
    perp = jnp.cross(cr, cc)
    nbrs = coord[col.reshape(N, NBR)[row]]                              # (E, NBR, 3)
    vecs = jnp.concatenate([perp[:, None], cr[:, None], cc[:, None], nbrs], axis=1)
    frame = vecs[:, :3, :]
    cdist = jnp.sqrt(jnp.sum((frame[:, :, None, :] - vecs[:, None, :, :]) ** 2, axis=-1))
    norms = jnp.sqrt(jnp.sum(frame ** 2, axis=-1))
    ug = cdist.at[:, :, :3].add(jnp.eye(3)[None] * norms[:, :, None])
    gram = ug[:, :, :3].reshape(E, 9)
    proj = ug[:, :, 3:]                                                 # (E, 3, NBR)

    def embed(X, A, w):                                                 # X:(B,d,n) A:(d,dout) w:(n,dout)
        prod = jnp.einsum("bij,ik->bkj", X, A, precision=hp)
        prod_sort = jnp.sort(prod, axis=2)
        return jnp.sum(prod_sort * jnp.transpose(w)[None], axis=2)

    emb1 = embed(proj, params["A1"], params["w1"])
    edge_in = jnp.concatenate([h[row], h[col], gram, emb1], axis=1)
    x1 = silu(jnp.dot(edge_in, params["We1"], precision=hp) + params["be1"])
    edge_feat = silu(jnp.dot(x1, params["We2"], precision=hp) + params["be2"])

    y = silu(jnp.dot(edge_feat, params["Wc1"], precision=hp) + params["bc1"])
    trans = coord_diff * jnp.dot(y, params["Wc2"], precision=hp)
    agg_c = jnp.zeros((N, 3), jnp.float32).at[row].add(trans) / NBR
    coord_new = coord + agg_c

    X2 = jnp.transpose(edge_feat.reshape(N, NBR, H), (0, 2, 1))         # (N, H, NBR)
    node_emb = embed(X2, params["A2"], params["w2"])
    node_in = jnp.concatenate([h, node_emb], axis=1)
    z = silu(jnp.dot(node_in, params["Wn1"], precision=hp) + params["bn1"])
    out = jnp.dot(z, params["Wn2"], precision=hp) + params["bn2"]
    return h + out, coord_new


# ----------------------------------------------------------------------------- main
if __name__ == "__main__":
    key = jax.random.PRNGKey(0)
    k_h, k_c, k_p = jax.random.split(key, 3)
    B = 1024                                          # 1024 graphs of 4 nodes per call
    h = jax.random.normal(k_h, (B, N, NF), jnp.float32)
    coord = jax.random.normal(k_c, (B, N, 3), jnp.float32)
    params = init_params(k_p)

    h_new, coord_new = jax.jit(e_gcl_forward)(params, h, coord)
    jax.block_until_ready((h_new, coord_new))

    # fully connected directed edges per graph, sorted by source node
    row = jnp.asarray(np.repeat(np.arange(N), NBR), dtype=jnp.int32)
    col = jnp.asarray([j for i in range(N) for j in range(N) if j != i], dtype=jnp.int32)
    h_ref, coord_ref = jax.vmap(
        lambda hh, cc: reference_forward(params, hh, cc, row, col))(h, coord)

    assert h_new.shape == (B, N, NF) and coord_new.shape == (B, N, 3)
    # bf16 MXU operands (f32 accumulation) + approx-reciprocal SiLU: compare the max
    # absolute error against the output scale.
    h_err = float(jnp.max(jnp.abs(h_new - h_ref)) / (jnp.max(jnp.abs(h_ref)) + 1e-6))
    c_err = float(jnp.max(jnp.abs(coord_new - coord_ref)) /
                  (jnp.max(jnp.abs(coord_ref)) + 1e-6))
    assert h_err < 4e-2, f"h mismatch: max scaled error {h_err}"
    assert c_err < 1e-2, f"coord mismatch: max scaled error {c_err}"
    print("KERNEL_OK")
</pallas_src>

<mosaic_0001>
module attributes {stable_mosaic.version = 11 : i64} {
  func.func @egcl_kernel(%arg0: i32, %arg1: memref<11x512xf32, #tpu.memory_space<vmem>>, %arg2: memref<19x44xbf16, #tpu.memory_space<vmem>>, %arg3: memref<19x19xbf16, #tpu.memory_space<vmem>>, %arg4: memref<48x19xbf16, #tpu.memory_space<vmem>>, %arg5: memref<19x27xbf16, #tpu.memory_space<vmem>>, %arg6: memref<8x19xbf16, #tpu.memory_space<vmem>>, %arg7: memref<19x3xbf16, #tpu.memory_space<vmem>>, %arg8: memref<19x12xf32, #tpu.memory_space<vmem>>, %arg9: memref<11x512xf32, #tpu.memory_space<vmem>>) attributes {dimension_semantics = [#tpu.dimension_semantics<parallel>], iteration_bounds = array<i64: 8>, scalar_prefetch = 0 : i64, scratch_operands = 0 : i64, tpu.core_type = #tpu.core_type<tc>, window_params = [{transform_indices = @transform_0, window_bounds = array<i64: 11, 512>}, {pipeline_mode = #tpu.pipeline_mode<synchronous>, transform_indices = @transform_1, window_bounds = array<i64: 19, 44>}, {pipeline_mode = #tpu.pipeline_mode<synchronous>, transform_indices = @transform_2, window_bounds = array<i64: 19, 19>}, {pipeline_mode = #tpu.pipeline_mode<synchronous>, transform_indices = @transform_3, window_bounds = array<i64: 48, 19>}, {pipeline_mode = #tpu.pipeline_mode<synchronous>, transform_indices = @transform_4, window_bounds = array<i64: 19, 27>}, {pipeline_mode = #tpu.pipeline_mode<synchronous>, transform_indices = @transform_5, window_bounds = array<i64: 8, 19>}, {pipeline_mode = #tpu.pipeline_mode<synchronous>, transform_indices = @transform_6, window_bounds = array<i64: 19, 3>}, {pipeline_mode = #tpu.pipeline_mode<synchronous>, transform_indices = @transform_7, window_bounds = array<i64: 19, 12>}, {transform_indices = @transform_8, window_bounds = array<i64: 11, 512>}]} {
    %c0 = arith.constant 0 : index
    %c0_0 = arith.constant 0 : index
    %0 = vector.load %arg1[%c0, %c0_0] : memref<11x512xf32, #tpu.memory_space<vmem>>, vector<11x512xf32>
    %1 = vector.extract_strided_slice %0 {offsets = [0, 0], sizes = [8, 512], strides = [1, 1]} : vector<11x512xf32> to vector<8x512xf32>
    %2 = vector.extract_strided_slice %0 {offsets = [8, 0], sizes = [3, 512], strides = [1, 1]} : vector<11x512xf32> to vector<3x512xf32>
    %c0_1 = arith.constant 0 : index
    %c0_2 = arith.constant 0 : index
    %3 = vector.load %arg8[%c0_1, %c0_2] : memref<19x12xf32, #tpu.memory_space<vmem>>, vector<19x12xf32>
    %4 = vector.extract_strided_slice %3 {offsets = [0, 0], sizes = [19, 3], strides = [1, 1]} : vector<19x12xf32> to vector<19x3xf32>
    %5 = vector.extract_strided_slice %3 {offsets = [0, 3], sizes = [19, 3], strides = [1, 1]} : vector<19x12xf32> to vector<19x3xf32>
    %6 = vector.extract_strided_slice %3 {offsets = [0, 6], sizes = [19, 1], strides = [1, 1]} : vector<19x12xf32> to vector<19x1xf32>
    %7 = vector.extract_strided_slice %3 {offsets = [0, 7], sizes = [19, 1], strides = [1, 1]} : vector<19x12xf32> to vector<19x1xf32>
    %8 = vector.extract_strided_slice %3 {offsets = [0, 8], sizes = [19, 1], strides = [1, 1]} : vector<19x12xf32> to vector<19x1xf32>
    %9 = vector.extract_strided_slice %3 {offsets = [0, 9], sizes = [19, 1], strides = [1, 1]} : vector<19x12xf32> to vector<19x1xf32>
    %10 = vector.extract_strided_slice %3 {offsets = [0, 10], sizes = [19, 1], strides = [1, 1]} : vector<19x12xf32> to vector<19x1xf32>
    %11 = vector.extract_strided_slice %3 {offsets = [0, 11], sizes = [8, 1], strides = [1, 1]} : vector<19x12xf32> to vector<8x1xf32>
    %12 = tpu.iota {dimensions = array<i32: 1>} : vector<1x512xi32>
    %c4_i32 = arith.constant 4 : i32
    %c0_i32 = arith.constant 0 : i32
    %13 = arith.cmpi eq, %c4_i32, %c0_i32 : i32
    %c1_i32 = arith.constant 1 : i32
    %14 = arith.select %13, %c1_i32, %c4_i32 : i32
    %15 = vector.broadcast %14 : i32 to vector<1x512xi32>
    %16 = arith.remsi %12, %15 : vector<1x512xi32>
    %c0_i32_3 = arith.constant 0 : i32
    %17 = vector.broadcast %c0_i32_3 : i32 to vector<1x512xi32>
    %18 = arith.cmpi ne, %16, %17 : vector<1x512xi32>
    %c0_i32_4 = arith.constant 0 : i32
    %19 = vector.broadcast %c0_i32_4 : i32 to vector<1x512xi32>
    %20 = arith.cmpi slt, %16, %19 : vector<1x512xi32>
    %c0_i32_5 = arith.constant 0 : i32
    %21 = arith.cmpi slt, %14, %c0_i32_5 : i32
    %22 = vector.broadcast %21 : i1 to vector<1x512xi1>
    %23 = vector.broadcast %22 : vector<1x512xi1> to vector<1x512xi1>
    %24 = arith.xori %20, %23 : vector<1x512xi1>
    %25 = arith.andi %24, %18 : vector<1x512xi1>
    %26 = vector.broadcast %14 : i32 to vector<1x512xi32>
    %27 = arith.addi %16, %26 : vector<1x512xi32>
    %28 = arith.select %25, %27, %16 : vector<1x512xi1>, vector<1x512xi32>
    %c511_i32 = arith.constant 511 : i32
    %29 = tpu.dynamic_rotate %0 by %c511_i32 dim 1 : vector<11x512xf32>, i32 -> vector<11x512xf32>
    %c3_i32 = arith.constant 3 : i32
    %30 = tpu.dynamic_rotate %0 by %c3_i32 dim 1 : vector<11x512xf32>, i32 -> vector<11x512xf32>
    %c3_i32_6 = arith.constant 3 : i32
    %31 = vector.broadcast %c3_i32_6 : i32 to vector<1x512xi32>
    %32 = arith.cmpi slt, %28, %31 : vector<1x512xi32>
    %33 = vector.shape_cast %32 : vector<1x512xi1> to vector<1x512xi1>
    %34 = vector.broadcast %33 : vector<1x512xi1> to vector<11x512xi1>
    %35 = arith.select %34, %29, %30 : vector<11x512xi1>, vector<11x512xf32>
    %c510_i32 = arith.constant 510 : i32
    %36 = tpu.dynamic_rotate %0 by %c510_i32 dim 1 : vector<11x512xf32>, i32 -> vector<11x512xf32>
    %c2_i32 = arith.constant 2 : i32
    %37 = tpu.dynamic_rotate %0 by %c2_i32 dim 1 : vector<11x512xf32>, i32 -> vector<11x512xf32>
    %c2_i32_7 = arith.constant 2 : i32
    %38 = vector.broadcast %c2_i32_7 : i32 to vector<1x512xi32>
    %39 = arith.cmpi slt, %28, %38 : vector<1x512xi32>
    %40 = vector.shape_cast %39 : vector<1x512xi1> to vector<1x512xi1>
    %41 = vector.broadcast %40 : vector<1x512xi1> to vector<11x512xi1>
    %42 = arith.select %41, %36, %37 : vector<11x512xi1>, vector<11x512xf32>
    %c509_i32 = arith.constant 509 : i32
    %43 = tpu.dynamic_rotate %0 by %c509_i32 dim 1 : vector<11x512xf32>, i32 -> vector<11x512xf32>
    %c1_i32_8 = arith.constant 1 : i32
    %44 = tpu.dynamic_rotate %0 by %c1_i32_8 dim 1 : vector<11x512xf32>, i32 -> vector<11x512xf32>
    %c1_i32_9 = arith.constant 1 : i32
    %45 = vector.broadcast %c1_i32_9 : i32 to vector<1x512xi32>
    %46 = arith.cmpi slt, %28, %45 : vector<1x512xi32>
    %47 = vector.shape_cast %46 : vector<1x512xi1> to vector<1x512xi1>
    %48 = vector.broadcast %47 : vector<1x512xi1> to vector<11x512xi1>
    %49 = arith.select %48, %43, %44 : vector<11x512xi1>, vector<11x512xf32>
    %50 = vector.extract_strided_slice %35 {offsets = [0, 0], sizes = [8, 512], strides = [1, 1]} : vector<11x512xf32> to vector<8x512xf32>
    %51 = vector.extract_strided_slice %42 {offsets = [0, 0], sizes = [8, 512], strides = [1, 1]} : vector<11x512xf32> to vector<8x512xf32>
    %52 = vector.extract_strided_slice %49 {offsets = [0, 0], sizes = [8, 512], strides = [1, 1]} : vector<11x512xf32> to vector<8x512xf32>
    %53 = vector.extract_strided_slice %35 {offsets = [8, 0], sizes = [3, 512], strides = [1, 1]} : vector<11x512xf32> to vector<3x512xf32>
    %54 = vector.extract_strided_slice %42 {offsets = [8, 0], sizes = [3, 512], strides = [1, 1]} : vector<11x512xf32> to vector<3x512xf32>
    %55 = vector.extract_strided_slice %49 {offsets = [8, 0], sizes = [3, 512], strides = [1, 1]} : vector<11x512xf32> to vector<3x512xf32>
    %56 = tpu.concatenate %1, %1, %1 in 1 : vector<8x512xf32>, vector<8x512xf32>, vector<8x512xf32> -> vector<8x1536xf32>
    %57 = tpu.concatenate %50, %51, %52 in 1 : vector<8x512xf32>, vector<8x512xf32>, vector<8x512xf32> -> vector<8x1536xf32>
    %58 = tpu.concatenate %2, %2, %2 in 1 : vector<3x512xf32>, vector<3x512xf32>, vector<3x512xf32> -> vector<3x1536xf32>
    %59 = tpu.concatenate %53, %54, %55 in 1 : vector<3x512xf32>, vector<3x512xf32>, vector<3x512xf32> -> vector<3x1536xf32>
    %60 = tpu.concatenate %53, %53, %53 in 1 : vector<3x512xf32>, vector<3x512xf32>, vector<3x512xf32> -> vector<3x1536xf32>
    %61 = tpu.concatenate %54, %54, %54 in 1 : vector<3x512xf32>, vector<3x512xf32>, vector<3x512xf32> -> vector<3x1536xf32>
    %62 = tpu.concatenate %55, %55, %55 in 1 : vector<3x512xf32>, vector<3x512xf32>, vector<3x512xf32> -> vector<3x1536xf32>
    %63 = vector.extract_strided_slice %58 {offsets = [0, 0], sizes = [1, 1536], strides = [1, 1]} : vector<3x1536xf32> to vector<1x1536xf32>
    %64 = vector.extract_strided_slice %58 {offsets = [1, 0], sizes = [1, 1536], strides = [1, 1]} : vector<3x1536xf32> to vector<1x1536xf32>
    %65 = vector.extract_strided_slice %58 {offsets = [2, 0], sizes = [1, 1536], strides = [1, 1]} : vector<3x1536xf32> to vector<1x1536xf32>
    %66 = vector.extract_strided_slice %59 {offsets = [0, 0], sizes = [1, 1536], strides = [1, 1]} : vector<3x1536xf32> to vector<1x1536xf32>
    %67 = vector.extract_strided_slice %59 {offsets = [1, 0], sizes = [1, 1536], strides = [1, 1]} : vector<3x1536xf32> to vector<1x1536xf32>
    %68 = vector.extract_strided_slice %59 {offsets = [2, 0], sizes = [1, 1536], strides = [1, 1]} : vector<3x1536xf32> to vector<1x1536xf32>
    %69 = arith.mulf %64, %68 : vector<1x1536xf32>
    %70 = arith.mulf %65, %67 : vector<1x1536xf32>
    %71 = arith.subf %69, %70 : vector<1x1536xf32>
    %72 = arith.mulf %65, %66 : vector<1x1536xf32>
    %73 = arith.mulf %63, %68 : vector<1x1536xf32>
    %74 = arith.subf %72, %73 : vector<1x1536xf32>
    %75 = arith.mulf %63, %67 : vector<1x1536xf32>
    %76 = arith.mulf %64, %66 : vector<1x1536xf32>
    %77 = arith.subf %75, %76 : vector<1x1536xf32>
    %78 = arith.mulf %71, %71 : vector<1x1536xf32>
    %79 = arith.mulf %74, %74 : vector<1x1536xf32>
    %80 = arith.addf %78, %79 : vector<1x1536xf32>
    %81 = arith.mulf %77, %77 : vector<1x1536xf32>
    %82 = arith.addf %80, %81 : vector<1x1536xf32>
    %83 = math.sqrt %82 : vector<1x1536xf32>
    %84 = arith.mulf %63, %63 : vector<1x1536xf32>
    %85 = arith.mulf %64, %64 : vector<1x1536xf32>
    %86 = arith.addf %84, %85 : vector<1x1536xf32>
    %87 = arith.mulf %65, %65 : vector<1x1536xf32>
    %88 = arith.addf %86, %87 : vector<1x1536xf32>
    %89 = math.sqrt %88 : vector<1x1536xf32>
    %90 = arith.mulf %66, %66 : vector<1x1536xf32>
    %91 = arith.mulf %67, %67 : vector<1x1536xf32>
    %92 = arith.addf %90, %91 : vector<1x1536xf32>
    %93 = arith.mulf %68, %68 : vector<1x1536xf32>
    %94 = arith.addf %92, %93 : vector<1x1536xf32>
    %95 = math.sqrt %94 : vector<1x1536xf32>
    %96 = arith.subf %71, %63 : vector<1x1536xf32>
    %97 = arith.mulf %96, %96 : vector<1x1536xf32>
    %98 = arith.subf %74, %64 : vector<1x1536xf32>
    %99 = arith.mulf %98, %98 : vector<1x1536xf32>
    %100 = arith.addf %97, %99 : vector<1x1536xf32>
    %101 = arith.subf %77, %65 : vector<1x1536xf32>
    %102 = arith.mulf %101, %101 : vector<1x1536xf32>
    %103 = arith.addf %100, %102 : vector<1x1536xf32>
    %104 = math.sqrt %103 : vector<1x1536xf32>
    %105 = arith.subf %71, %66 : vector<1x1536xf32>
    %106 = arith.mulf %105, %105 : vector<1x1536xf32>
    %107 = arith.subf %74, %67 : vector<1x1536xf32>
    %108 = arith.mulf %107, %107 : vector<1x1536xf32>
    %109 = arith.addf %106, %108 : vector<1x1536xf32>
    %110 = arith.subf %77, %68 : vector<1x1536xf32>
    %111 = arith.mulf %110, %110 : vector<1x1536xf32>
    %112 = arith.addf %109, %111 : vector<1x1536xf32>
    %113 = math.sqrt %112 : vector<1x1536xf32>
    %114 = arith.subf %63, %66 : vector<1x1536xf32>
    %115 = arith.mulf %114, %114 : vector<1x1536xf32>
    %116 = arith.subf %64, %67 : vector<1x1536xf32>
    %117 = arith.mulf %116, %116 : vector<1x1536xf32>
    %118 = arith.addf %115, %117 : vector<1x1536xf32>
    %119 = arith.subf %65, %68 : vector<1x1536xf32>
    %120 = arith.mulf %119, %119 : vector<1x1536xf32>
    %121 = arith.addf %118, %120 : vector<1x1536xf32>
    %122 = math.sqrt %121 : vector<1x1536xf32>
    %123 = vector.extract_strided_slice %60 {offsets = [0, 0], sizes = [1, 1536], strides = [1, 1]} : vector<3x1536xf32> to vector<1x1536xf32>
    %124 = vector.extract_strided_slice %60 {offsets = [1, 0], sizes = [1, 1536], strides = [1, 1]} : vector<3x1536xf32> to vector<1x1536xf32>
    %125 = vector.extract_strided_slice %60 {offsets = [2, 0], sizes = [1, 1536], strides = [1, 1]} : vector<3x1536xf32> to vector<1x1536xf32>
    %126 = arith.subf %71, %123 : vector<1x1536xf32>
    %127 = arith.mulf %126, %126 : vector<1x1536xf32>
    %128 = arith.subf %74, %124 : vector<1x1536xf32>
    %129 = arith.mulf %128, %128 : vector<1x1536xf32>
    %130 = arith.addf %127, %129 : vector<1x1536xf32>
    %131 = arith.subf %77, %125 : vector<1x1536xf32>
    %132 = arith.mulf %131, %131 : vector<1x1536xf32>
    %133 = arith.addf %130, %132 : vector<1x1536xf32>
    %134 = math.sqrt %133 : vector<1x1536xf32>
    %135 = arith.subf %63, %123 : vector<1x1536xf32>
    %136 = arith.mulf %135, %135 : vector<1x1536xf32>
    %137 = arith.subf %64, %124 : vector<1x1536xf32>
    %138 = arith.mulf %137, %137 : vector<1x1536xf32>
    %139 = arith.addf %136, %138 : vector<1x1536xf32>
    %140 = arith.subf %65, %125 : vector<1x1536xf32>
    %141 = arith.mulf %140, %140 : vector<1x1536xf32>
    %142 = arith.addf %139, %141 : vector<1x1536xf32>
    %143 = math.sqrt %142 : vector<1x1536xf32>
    %144 = arith.subf %66, %123 : vector<1x1536xf32>
    %145 = arith.mulf %144, %144 : vector<1x1536xf32>
    %146 = arith.subf %67, %124 : vector<1x1536xf32>
    %147 = arith.mulf %146, %146 : vector<1x1536xf32>
    %148 = arith.addf %145, %147 : vector<1x1536xf32>
    %149 = arith.subf %68, %125 : vector<1x1536xf32>
    %150 = arith.mulf %149, %149 : vector<1x1536xf32>
    %151 = arith.addf %148, %150 : vector<1x1536xf32>
    %152 = math.sqrt %151 : vector<1x1536xf32>
    %153 = tpu.concatenate %134, %143, %152 in 0 : vector<1x1536xf32>, vector<1x1536xf32>, vector<1x1536xf32> -> vector<3x1536xf32>
    %c0_10 = arith.constant 0 : index
    %c0_11 = arith.constant 0 : index
    %154 = vector.load %arg7[%c0_10, %c0_11] : memref<19x3xbf16, #tpu.memory_space<vmem>>, vector<19x3xbf16>
    %155 = arith.truncf %153 : vector<3x1536xf32> to vector<3x1536xbf16>
    %cst = arith.constant dense<0.000000e+00> : vector<19x1536xf32>
    %156 = tpu.matmul %154, %155, %cst {dimension_numbers = #tpu.dot_dimension_numbers<[1], [0], [0], [1], [0, 0, 1, 1], [], []>} : vector<19x3xbf16>, vector<3x1536xbf16>, vector<19x1536xf32> -> vector<19x1536xf32>
    %157 = vector.extract_strided_slice %61 {offsets = [0, 0], sizes = [1, 1536], strides = [1, 1]} : vector<3x1536xf32> to vector<1x1536xf32>
    %158 = vector.extract_strided_slice %61 {offsets = [1, 0], sizes = [1, 1536], strides = [1, 1]} : vector<3x1536xf32> to vector<1x1536xf32>
    %159 = vector.extract_strided_slice %61 {offsets = [2, 0], sizes = [1, 1536], strides = [1, 1]} : vector<3x1536xf32> to vector<1x1536xf32>
    %160 = arith.subf %71, %157 : vector<1x1536xf32>
    %161 = arith.mulf %160, %160 : vector<1x1536xf32>
    %162 = arith.subf %74, %158 : vector<1x1536xf32>
    %163 = arith.mulf %162, %162 : vector<1x1536xf32>
    %164 = arith.addf %161, %163 : vector<1x1536xf32>
    %165 = arith.subf %77, %159 : vector<1x1536xf32>
    %166 = arith.mulf %165, %165 : vector<1x1536xf32>
    %167 = arith.addf %164, %166 : vector<1x1536xf32>
    %168 = math.sqrt %167 : vector<1x1536xf32>
    %169 = arith.subf %63, %157 : vector<1x1536xf32>
    %170 = arith.mulf %169, %169 : vector<1x1536xf32>
    %171 = arith.subf %64, %158 : vector<1x1536xf32>
    %172 = arith.mulf %171, %171 : vector<1x1536xf32>
    %173 = arith.addf %170, %172 : vector<1x1536xf32>
    %174 = arith.subf %65, %159 : vector<1x1536xf32>
    %175 = arith.mulf %174, %174 : vector<1x1536xf32>
    %176 = arith.addf %173, %175 : vector<1x1536xf32>
    %177 = math.sqrt %176 : vector<1x1536xf32>
    %178 = arith.subf %66, %157 : vector<1x1536xf32>
    %179 = arith.mulf %178, %178 : vector<1x1536xf32>
    %180 = arith.subf %67, %158 : vector<1x1536xf32>
    %181 = arith.mulf %180, %180 : vector<1x1536xf32>
    %182 = arith.addf %179, %181 : vector<1x1536xf32>
    %183 = arith.subf %68, %159 : vector<1x1536xf32>
    %184 = arith.mulf %183, %183 : vector<1x1536xf32>
    %185 = arith.addf %182, %184 : vector<1x1536xf32>
    %186 = math.sqrt %185 : vector<1x1536xf32>
    %187 = tpu.concatenate %168, %177, %186 in 0 : vector<1x1536xf32>, vector<1x1536xf32>, vector<1x1536xf32> -> vector<3x1536xf32>
    %c0_12 = arith.constant 0 : index
    %c0_13 = arith.constant 0 : index
    %188 = vector.load %arg7[%c0_12, %c0_13] : memref<19x3xbf16, #tpu.memory_space<vmem>>, vector<19x3xbf16>
    %189 = arith.truncf %187 : vector<3x1536xf32> to vector<3x1536xbf16>
    %cst_14 = arith.constant dense<0.000000e+00> : vector<19x1536xf32>
    %190 = tpu.matmul %188, %189, %cst_14 {dimension_numbers = #tpu.dot_dimension_numbers<[1], [0], [0], [1], [0, 0, 1, 1], [], []>} : vector<19x3xbf16>, vector<3x1536xbf16>, vector<19x1536xf32> -> vector<19x1536xf32>
    %191 = vector.extract_strided_slice %62 {offsets = [0, 0], sizes = [1, 1536], strides = [1, 1]} : vector<3x1536xf32> to vector<1x1536xf32>
    %192 = vector.extract_strided_slice %62 {offsets = [1, 0], sizes = [1, 1536], strides = [1, 1]} : vector<3x1536xf32> to vector<1x1536xf32>
    %193 = vector.extract_strided_slice %62 {offsets = [2, 0], sizes = [1, 1536], strides = [1, 1]} : vector<3x1536xf32> to vector<1x1536xf32>
    %194 = arith.subf %71, %191 : vector<1x1536xf32>
    %195 = arith.mulf %194, %194 : vector<1x1536xf32>
    %196 = arith.subf %74, %192 : vector<1x1536xf32>
    %197 = arith.mulf %196, %196 : vector<1x1536xf32>
    %198 = arith.addf %195, %197 : vector<1x1536xf32>
    %199 = arith.subf %77, %193 : vector<1x1536xf32>
    %200 = arith.mulf %199, %199 : vector<1x1536xf32>
    %201 = arith.addf %198, %200 : vector<1x1536xf32>
    %202 = math.sqrt %201 : vector<1x1536xf32>
    %203 = arith.subf %63, %191 : vector<1x1536xf32>
    %204 = arith.mulf %203, %203 : vector<1x1536xf32>
    %205 = arith.subf %64, %192 : vector<1x1536xf32>
    %206 = arith.mulf %205, %205 : vector<1x1536xf32>
    %207 = arith.addf %204, %206 : vector<1x1536xf32>
    %208 = arith.subf %65, %193 : vector<1x1536xf32>
    %209 = arith.mulf %208, %208 : vector<1x1536xf32>
    %210 = arith.addf %207, %209 : vector<1x1536xf32>
    %211 = math.sqrt %210 : vector<1x1536xf32>
    %212 = arith.subf %66, %191 : vector<1x1536xf32>
    %213 = arith.mulf %212, %212 : vector<1x1536xf32>
    %214 = arith.subf %67, %192 : vector<1x1536xf32>
    %215 = arith.mulf %214, %214 : vector<1x1536xf32>
    %216 = arith.addf %213, %215 : vector<1x1536xf32>
    %217 = arith.subf %68, %193 : vector<1x1536xf32>
    %218 = arith.mulf %217, %217 : vector<1x1536xf32>
    %219 = arith.addf %216, %218 : vector<1x1536xf32>
    %220 = math.sqrt %219 : vector<1x1536xf32>
    %221 = tpu.concatenate %202, %211, %220 in 0 : vector<1x1536xf32>, vector<1x1536xf32>, vector<1x1536xf32> -> vector<3x1536xf32>
    %c0_15 = arith.constant 0 : index
    %c0_16 = arith.constant 0 : index
    %222 = vector.load %arg7[%c0_15, %c0_16] : memref<19x3xbf16, #tpu.memory_space<vmem>>, vector<19x3xbf16>
    %223 = arith.truncf %221 : vector<3x1536xf32> to vector<3x1536xbf16>
    %cst_17 = arith.constant dense<0.000000e+00> : vector<19x1536xf32>
    %224 = tpu.matmul %222, %223, %cst_17 {dimension_numbers = #tpu.dot_dimension_numbers<[1], [0], [0], [1], [0, 0, 1, 1], [], []>} : vector<19x3xbf16>, vector<3x1536xbf16>, vector<19x1536xf32> -> vector<19x1536xf32>
    %225 = arith.minimumf %156, %190 : vector<19x1536xf32>
    %226 = arith.minimumf %225, %224 : vector<19x1536xf32>
    %227 = arith.maximumf %156, %190 : vector<19x1536xf32>
    %228 = arith.maximumf %227, %224 : vector<19x1536xf32>
    %229 = arith.addf %156, %190 : vector<19x1536xf32>
    %230 = arith.addf %229, %224 : vector<19x1536xf32>
    %231 = arith.subf %230, %226 : vector<19x1536xf32>
    %232 = arith.subf %231, %228 : vector<19x1536xf32>
    %233 = vector.extract_strided_slice %4 {offsets = [0, 0], sizes = [19, 1], strides = [1, 1]} : vector<19x3xf32> to vector<19x1xf32>
    %234 = vector.broadcast %233 : vector<19x1xf32> to vector<19x1536xf32>
    %235 = arith.mulf %226, %234 : vector<19x1536xf32>
    %236 = vector.extract_strided_slice %4 {offsets = [0, 1], sizes = [19, 1], strides = [1, 1]} : vector<19x3xf32> to vector<19x1xf32>
    %237 = vector.broadcast %236 : vector<19x1xf32> to vector<19x1536xf32>
    %238 = arith.mulf %232, %237 : vector<19x1536xf32>
    %239 = arith.addf %235, %238 : vector<19x1536xf32>
    %240 = vector.extract_strided_slice %4 {offsets = [0, 2], sizes = [19, 1], strides = [1, 1]} : vector<19x3xf32> to vector<19x1xf32>
    %241 = vector.broadcast %240 : vector<19x1xf32> to vector<19x1536xf32>
    %242 = arith.mulf %228, %241 : vector<19x1536xf32>
    %243 = arith.addf %239, %242 : vector<19x1536xf32>
    %244 = tpu.concatenate %56, %57, %83, %104, %113, %104, %89, %122, %113, %122, %95, %243 in 0 : vector<8x1536xf32>, vector<8x1536xf32>, vector<1x1536xf32>, vector<1x1536xf32>, vector<1x1536xf32>, vector<1x1536xf32>, vector<1x1536xf32>, vector<1x1536xf32>, vector<1x1536xf32>, vector<1x1536xf32>, vector<1x1536xf32>, vector<19x1536xf32> -> vector<44x1536xf32>
    %c0_18 = arith.constant 0 : index
    %c0_19 = arith.constant 0 : index
    %245 = vector.load %arg2[%c0_18, %c0_19] : memref<19x44xbf16, #tpu.memory_space<vmem>>, vector<19x44xbf16>
    %246 = arith.truncf %244 : vector<44x1536xf32> to vector<44x1536xbf16>
    %cst_20 = arith.constant dense<0.000000e+00> : vector<19x1536xf32>
    %247 = tpu.matmul %245, %246, %cst_20 {dimension_numbers = #tpu.dot_dimension_numbers<[1], [0], [0], [1], [0, 0, 1, 1], [], []>} : vector<19x44xbf16>, vector<44x1536xbf16>, vector<19x1536xf32> -> vector<19x1536xf32>
    %248 = vector.broadcast %6 : vector<19x1xf32> to vector<19x1536xf32>
    %249 = arith.addf %247, %248 : vector<19x1536xf32>
    %cst_21 = arith.constant 0.000000e+00 : f32
    %250 = vector.broadcast %cst_21 : f32 to vector<19x1536xf32>
    %251 = arith.subf %250, %249 : vector<19x1536xf32>
    %252 = math.exp %251 : vector<19x1536xf32>
    %cst_22 = arith.constant 1.000000e+00 : f32
    %253 = vector.broadcast %cst_22 : f32 to vector<19x1536xf32>
    %254 = arith.addf %253, %252 : vector<19x1536xf32>
    %255 = tpu.reciprocal %254 {approx = true} : vector<19x1536xf32> -> vector<19x1536xf32>
    %256 = arith.mulf %249, %255 : vector<19x1536xf32>
    %c0_23 = arith.constant 0 : index
    %c0_24 = arith.constant 0 : index
    %257 = vector.load %arg3[%c0_23, %c0_24] : memref<19x19xbf16, #tpu.memory_space<vmem>>, vector<19x19xbf16>
    %258 = arith.truncf %256 : vector<19x1536xf32> to vector<19x1536xbf16>
    %cst_25 = arith.constant dense<0.000000e+00> : vector<19x1536xf32>
    %259 = tpu.matmul %257, %258, %cst_25 {dimension_numbers = #tpu.dot_dimension_numbers<[1], [0], [0], [1], [0, 0, 1, 1], [], []>} : vector<19x19xbf16>, vector<19x1536xbf16>, vector<19x1536xf32> -> vector<19x1536xf32>
    %260 = vector.broadcast %7 : vector<19x1xf32> to vector<19x1536xf32>
    %261 = arith.addf %259, %260 : vector<19x1536xf32>
    %cst_26 = arith.constant 0.000000e+00 : f32
    %262 = vector.broadcast %cst_26 : f32 to vector<19x1536xf32>
    %263 = arith.subf %262, %261 : vector<19x1536xf32>
    %264 = math.exp %263 : vector<19x1536xf32>
    %cst_27 = arith.constant 1.000000e+00 : f32
    %265 = vector.broadcast %cst_27 : f32 to vector<19x1536xf32>
    %266 = arith.addf %265, %264 : vector<19x1536xf32>
    %267 = tpu.reciprocal %266 {approx = true} : vector<19x1536xf32> -> vector<19x1536xf32>
    %268 = arith.mulf %261, %267 : vector<19x1536xf32>
    %c0_28 = arith.constant 0 : index
    %c0_29 = arith.constant 0 : index
    %269 = vector.load %arg4[%c0_28, %c0_29] : memref<48x19xbf16, #tpu.memory_space<vmem>>, vector<48x19xbf16>
    %270 = arith.truncf %268 : vector<19x1536xf32> to vector<19x1536xbf16>
    %cst_30 = arith.constant dense<0.000000e+00> : vector<48x1536xf32>
    %271 = tpu.matmul %269, %270, %cst_30 {dimension_numbers = #tpu.dot_dimension_numbers<[1], [0], [0], [1], [0, 0, 1, 1], [], []>} : vector<48x19xbf16>, vector<19x1536xbf16>, vector<48x1536xf32> -> vector<48x1536xf32>
    %272 = vector.extract_strided_slice %271 {offsets = [0, 0], sizes = [19, 1536], strides = [1, 1]} : vector<48x1536xf32> to vector<19x1536xf32>
    %273 = vector.broadcast %8 : vector<19x1xf32> to vector<19x1536xf32>
    %274 = arith.addf %272, %273 : vector<19x1536xf32>
    %cst_31 = arith.constant 0.000000e+00 : f32
    %275 = vector.broadcast %cst_31 : f32 to vector<19x1536xf32>
    %276 = arith.subf %275, %274 : vector<19x1536xf32>
    %277 = math.exp %276 : vector<19x1536xf32>
    %cst_32 = arith.constant 1.000000e+00 : f32
    %278 = vector.broadcast %cst_32 : f32 to vector<19x1536xf32>
    %279 = arith.addf %278, %277 : vector<19x1536xf32>
    %280 = tpu.reciprocal %279 {approx = true} : vector<19x1536xf32> -> vector<19x1536xf32>
    %281 = arith.mulf %274, %280 : vector<19x1536xf32>
    %282 = vector.extract_strided_slice %271 {offsets = [24, 0], sizes = [19, 1536], strides = [1, 1]} : vector<48x1536xf32> to vector<19x1536xf32>
    %283 = vector.broadcast %10 : vector<19x1xf32> to vector<19x1536xf32>
    %284 = arith.mulf %281, %283 : vector<19x1536xf32>
    %cst_33 = arith.constant dense<0.000000e+00> : vector<1536xf32>
    %285 = vector.multi_reduction <add>, %284, %cst_33 [0] : vector<19x1536xf32> to vector<1536xf32>
    %286 = vector.shape_cast %285 : vector<1536xf32> to vector<1x1536xf32>
    %287 = arith.subf %58, %59 : vector<3x1536xf32>
    %288 = vector.broadcast %286 : vector<1x1536xf32> to vector<3x1536xf32>
    %289 = arith.mulf %287, %288 : vector<3x1536xf32>
    %290 = vector.extract_strided_slice %289 {offsets = [0, 0], sizes = [3, 512], strides = [1, 1]} : vector<3x1536xf32> to vector<3x512xf32>
    %291 = vector.extract_strided_slice %289 {offsets = [0, 512], sizes = [3, 512], strides = [1, 1]} : vector<3x1536xf32> to vector<3x512xf32>
    %292 = arith.addf %290, %291 : vector<3x512xf32>
    %293 = vector.extract_strided_slice %289 {offsets = [0, 1024], sizes = [3, 512], strides = [1, 1]} : vector<3x1536xf32> to vector<3x512xf32>
    %294 = arith.addf %292, %293 : vector<3x512xf32>
    %cst_34 = arith.constant 0.333333343 : f32
    %295 = vector.broadcast %cst_34 : f32 to vector<3x512xf32>
    %296 = arith.mulf %294, %295 : vector<3x512xf32>
    %297 = arith.addf %2, %296 : vector<3x512xf32>
    %298 = vector.extract_strided_slice %282 {offsets = [0, 0], sizes = [19, 512], strides = [1, 1]} : vector<19x1536xf32> to vector<19x512xf32>
    %299 = vector.extract_strided_slice %282 {offsets = [0, 512], sizes = [19, 512], strides = [1, 1]} : vector<19x1536xf32> to vector<19x512xf32>
    %300 = vector.extract_strided_slice %282 {offsets = [0, 1024], sizes = [19, 512], strides = [1, 1]} : vector<19x1536xf32> to vector<19x512xf32>
    %301 = arith.minimumf %298, %299 : vector<19x512xf32>
    %302 = arith.minimumf %301, %300 : vector<19x512xf32>
    %303 = arith.maximumf %298, %299 : vector<19x512xf32>
    %304 = arith.maximumf %303, %300 : vector<19x512xf32>
    %305 = arith.addf %298, %299 : vector<19x512xf32>
    %306 = arith.addf %305, %300 : vector<19x512xf32>
    %307 = arith.subf %306, %302 : vector<19x512xf32>
    %308 = arith.subf %307, %304 : vector<19x512xf32>
    %309 = vector.extract_strided_slice %5 {offsets = [0, 0], sizes = [19, 1], strides = [1, 1]} : vector<19x3xf32> to vector<19x1xf32>
    %310 = vector.broadcast %309 : vector<19x1xf32> to vector<19x512xf32>
    %311 = arith.mulf %302, %310 : vector<19x512xf32>
    %312 = vector.extract_strided_slice %5 {offsets = [0, 1], sizes = [19, 1], strides = [1, 1]} : vector<19x3xf32> to vector<19x1xf32>
    %313 = vector.broadcast %312 : vector<19x1xf32> to vector<19x512xf32>
    %314 = arith.mulf %308, %313 : vector<19x512xf32>
    %315 = arith.addf %311, %314 : vector<19x512xf32>
    %316 = vector.extract_strided_slice %5 {offsets = [0, 2], sizes = [19, 1], strides = [1, 1]} : vector<19x3xf32> to vector<19x1xf32>
    %317 = vector.broadcast %316 : vector<19x1xf32> to vector<19x512xf32>
    %318 = arith.mulf %304, %317 : vector<19x512xf32>
    %319 = arith.addf %315, %318 : vector<19x512xf32>
    %c0_35 = arith.constant 0 : index
    %c0_36 = arith.constant 0 : index
    %320 = vector.load %arg5[%c0_35, %c0_36] : memref<19x27xbf16, #tpu.memory_space<vmem>>, vector<19x27xbf16>
    %321 = tpu.concatenate %1, %319 in 0 : vector<8x512xf32>, vector<19x512xf32> -> vector<27x512xf32>
    %322 = arith.truncf %321 : vector<27x512xf32> to vector<27x512xbf16>
    %cst_37 = arith.constant dense<0.000000e+00> : vector<19x512xf32>
    %323 = tpu.matmul %320, %322, %cst_37 {dimension_numbers = #tpu.dot_dimension_numbers<[1], [0], [0], [1], [0, 0, 1, 1], [], []>} : vector<19x27xbf16>, vector<27x512xbf16>, vector<19x512xf32> -> vector<19x512xf32>
    %324 = vector.broadcast %9 : vector<19x1xf32> to vector<19x512xf32>
    %325 = arith.addf %323, %324 : vector<19x512xf32>
    %cst_38 = arith.constant 0.000000e+00 : f32
    %326 = vector.broadcast %cst_38 : f32 to vector<19x512xf32>
    %327 = arith.subf %326, %325 : vector<19x512xf32>
    %328 = math.exp %327 : vector<19x512xf32>
    %cst_39 = arith.constant 1.000000e+00 : f32
    %329 = vector.broadcast %cst_39 : f32 to vector<19x512xf32>
    %330 = arith.addf %329, %328 : vector<19x512xf32>
    %331 = tpu.reciprocal %330 {approx = true} : vector<19x512xf32> -> vector<19x512xf32>
    %332 = arith.mulf %325, %331 : vector<19x512xf32>
    %c0_40 = arith.constant 0 : index
    %c0_41 = arith.constant 0 : index
    %333 = vector.load %arg6[%c0_40, %c0_41] : memref<8x19xbf16, #tpu.memory_space<vmem>>, vector<8x19xbf16>
    %334 = arith.truncf %332 : vector<19x512xf32> to vector<19x512xbf16>
    %cst_42 = arith.constant dense<0.000000e+00> : vector<8x512xf32>
    %335 = tpu.matmul %333, %334, %cst_42 {dimension_numbers = #tpu.dot_dimension_numbers<[1], [0], [0], [1], [0, 0, 1, 1], [], []>} : vector<8x19xbf16>, vector<19x512xbf16>, vector<8x512xf32> -> vector<8x512xf32>
    %336 = vector.broadcast %11 : vector<8x1xf32> to vector<8x512xf32>
    %337 = arith.addf %335, %336 : vector<8x512xf32>
    %338 = arith.addf %1, %337 : vector<8x512xf32>
    %339 = tpu.concatenate %338, %297 in 0 : vector<8x512xf32>, vector<3x512xf32> -> vector<11x512xf32>
    %c0_43 = arith.constant 0 : index
    %c0_44 = arith.constant 0 : index
    %340 = vector.load %arg9[%c0_43, %c0_44] : memref<11x512xf32, #tpu.memory_space<vmem>>, vector<11x512xf32>
    tpu.vector_store %arg9[%c0_43, %c0_44], %339 {strides = array<i32>} : memref<11x512xf32, #tpu.memory_space<vmem>>, vector<11x512xf32>,
    return
  }
  func.func @transform_0(%arg0: i32) -> (i32, i32) {
    %c0_i32 = arith.constant 0 : i32
    %c0_i32_0 = arith.constant 0 : i32
    return %c0_i32, %arg0 : i32, i32
  }
  func.func @transform_1(%arg0: i32) -> (i32, i32) {
    %c0_i32 = arith.constant 0 : i32
    %c0_i32_0 = arith.constant 0 : i32
    %c0_i32_1 = arith.constant 0 : i32
    return %c0_i32, %c0_i32_0 : i32, i32
  }
  func.func @transform_2(%arg0: i32) -> (i32, i32) {
    %c0_i32 = arith.constant 0 : i32
    %c0_i32_0 = arith.constant 0 : i32
    %c0_i32_1 = arith.constant 0 : i32
    return %c0_i32, %c0_i32_0 : i32, i32
  }
  func.func @transform_3(%arg0: i32) -> (i32, i32) {
    %c0_i32 = arith.constant 0 : i32
    %c0_i32_0 = arith.constant 0 : i32
    %c0_i32_1 = arith.constant 0 : i32
    return %c0_i32, %c0_i32_0 : i32, i32
  }
  func.func @transform_4(%arg0: i32) -> (i32, i32) {
    %c0_i32 = arith.constant 0 : i32
    %c0_i32_0 = arith.constant 0 : i32
    %c0_i32_1 = arith.constant 0 : i32
    return %c0_i32, %c0_i32_0 : i32, i32
  }
  func.func @transform_5(%arg0: i32) -> (i32, i32) {
    %c0_i32 = arith.constant 0 : i32
    %c0_i32_0 = arith.constant 0 : i32
    %c0_i32_1 = arith.constant 0 : i32
    return %c0_i32, %c0_i32_0 : i32, i32
  }
  func.func @transform_6(%arg0: i32) -> (i32, i32) {
    %c0_i32 = arith.constant 0 : i32
    %c0_i32_0 = arith.constant 0 : i32
    %c0_i32_1 = arith.constant 0 : i32
    return %c0_i32, %c0_i32_0 : i32, i32
  }
  func.func @transform_7(%arg0: i32) -> (i32, i32) {
    %c0_i32 = arith.constant 0 : i32
    %c0_i32_0 = arith.constant 0 : i32
    %c0_i32_1 = arith.constant 0 : i32
    return %c0_i32, %c0_i32_0 : i32, i32
  }
  func.func @transform_8(%arg0: i32) -> (i32, i32) {
    %c0_i32 = arith.constant 0 : i32
    %c0_i32_0 = arith.constant 0 : i32
    return %c0_i32, %arg0 : i32, i32
  }
}

</mosaic_0001>

<bundles_post_ra>
// kernel: e_gcl_forward.1
= control target key start
LH: loop header
LB: loop body
LE: loop exit
PB: predicated region body
PF: predicated region fallthrough
CT: control target
= control target key end

     0   :  { %s9327_s27 = smov 0   ;;  %s9329_s28 = smov 0   ;;  %s15756_s0 = inlined_call_operand.vmem [shape: f32[11,4096], index: 0, kind: input, shape index: {}]   ;;  %s15757_s1 = inlined_call_operand.vmem [shape: bf16[19,44], index: 1, kind: input, shape index: {}]   ;;  %s15758_s2 = inlined_call_operand.vmem [shape: bf16[19,19], index: 2, kind: input, shape index: {}]   ;;  %s15759_s3 = inlined_call_operand.vmem [shape: bf16[48,19], index: 3, kind: input, shape index: {}]   ;;  %s15760_s4 = inlined_call_operand.vmem [shape: bf16[19,27], index: 4, kind: input, shape index: {}]   ;;  %s15761_s5 = inlined_call_operand.vmem [shape: bf16[8,19], index: 5, kind: input, shape index: {}]   ;;  %s15762_s6 = inlined_call_operand.vmem [shape: bf16[19,3], index: 6, kind: input, shape index: {}]   ;;  %s15763_s7 = inlined_call_operand.vmem [shape: f32[19,12], index: 7, kind: input, shape index: {}]   ;;  %s15764_s8 = inlined_call_operand.vmem [shape: f32[11,4096], index: 8, kind: output, shape index: {}]  }
   0x1   :  { %s9331_s29 = smov 0  }
   0x2 LB: > { %s8220_s30 = sadd.s32 4294967295, %s9261_s29   ;;  %s9344_s9 = sadd.s32 1, %s9261_s29   ;;  %s9261_s29 = sphi %s9331_s29, %s17115_s29   ;;  %s9257_s28 = sphi %s9329_s28, %s17114_s28   ;;  %s9253_s27 = sphi %s9327_s27, %s17113_s27  }
   0x3   : > { %s22_s10 = ssub.s32 %s9261_s29, %s9344_s9  ;;  %s25_s11 = sadd.s32 1, %s9257_s28 }
   0x4   : > { %p23_p0 = scmp.eq.s32.totalorder %s22_s10, 0  ;;  %p32_p1 = scmp.ne.s32.totalorder %s9257_s28, %s9253_s27 }
   0x5   : > { %p33_p2 = scmp.eq.s32.totalorder %s9261_s29, 0  ;;  %p209_p3 = scmp.eq.s32.totalorder %s8220_s30, 7 }
   0x6   : > { %s9355_s12 = scalar_select %p23_p0, %s9257_s28, %s25_s11  }
   0x7   : > { %p34_p4 = por %p33_p2, %p32_p1  ;;  %p9357_p5 = por %p209_p3, %p32_p1 }
   0x8   : > { %p8223_p6 = scmp.ge.s32.totalorder %s9261_s29, 8 }
   0xa   : > { %252 = sbr.rel (%p8223_p6) target bundleno = 25 (0x19), region = 44 }
  0x11   : > { %255 = sbr.rel (!%p34_p4) target bundleno = 25 (0x19), region = 48  ;;  %s257_s14 = sand.u32 (%p34_p4), 1, %s9257_s28  }
  0x12   : > { %s8336_s15 = sshll.u32 (%p34_p4), %s9261_s29, 5  ;;  %s8224_s16 = sshll.u32 (%p34_p4), %s257_s14, 6 }
  0x13   : > { %s262_s19 = scalar_lea.vmem (%p34_p4), %s15756_s0, %s8336_s15  ;;  %s259_s20 = scalar_lea.vmem (%p34_p4), [#allocation2], %s8224_s16 }
  0x14   : > { %v275_v0 = vld [vmem:[%s262_s19] sm:$0xff] (%p34_p4)  ;;  %v277_v1 = vld [vmem:[%s262_s19 + $0x8] sm:$0xff] (%p34_p4)  ;;  %v279_v2 = vld [vmem:[%s262_s19 + $0x10] sm:$0xff] (%p34_p4) }
  0x15   : > { %276 = vst [vmem:[%s259_s20] sm:$0xff] (%p34_p4), %v275_v0  ;;  %278 = vst [vmem:[%s259_s20 + $0x8] sm:$0xff] (%p34_p4), %v277_v1  ;;  %v281_v3 = vld [vmem:[%s262_s19 + $0x18] sm:$0xff] (%p34_p4)  ;;  %v283_v4 = vld [vmem:[%s262_s19 + $0x100] sm:$0xff] (%p34_p4) }
  0x16   : > { %280 = vst [vmem:[%s259_s20 + $0x10] sm:$0xff] (%p34_p4), %v279_v2  ;;  %v285_v5 = vld [vmem:[%s262_s19 + $0x108] sm:$0xff] (%p34_p4)  ;;  %282 = vst [vmem:[%s259_s20 + $0x18] sm:$0xff] (%p34_p4), %v281_v3  ;;  %v287_v6 = vld [vmem:[%s262_s19 + $0x110] sm:$0xff] (%p34_p4) }
  0x17   : > { %284 = vst [vmem:[%s259_s20 + $0x20] sm:$0xff] (%p34_p4), %v283_v4  ;;  %286 = vst [vmem:[%s259_s20 + $0x28] sm:$0xff] (%p34_p4), %v285_v5  ;;  %v289_v7 = vld [vmem:[%s262_s19 + $0x118] sm:$0xff] (%p34_p4) }
  0x18   : > { %288 = vst [vmem:[%s259_s20 + $0x30] sm:$0xff] %v287_v6  ;;  %290 = vst [vmem:[%s259_s20 + $0x38] sm:$0xff] %v289_v7 }
  0x19 PF: > { %p8227_p7 = scmp.ge.s32.totalorder %s9261_s29, 1  ;;  %p295_p8 = scmp.lt.s32.totalorder %s9261_s29, 9 }
  0x1b   : > { %p296_p9 = pnand %p8227_p7, %p295_p8 }
  0x1d   : > { %299 = sbr.rel (%p296_p9) target bundleno = 2275 (0x8e3), region = 71 }
  0x24   : > { %s302_s21 = sand.u32 1, %s9253_s27   ;;  %s9263_s24 = smov 127   ;;  %v348_v12 = vlaneseq  ;;  %vm2467_vm4 = vcmask 1040384   ;;  %v15765_v40 = vmov 65535   ;;  %vm2480_vm8 = vcmask 1041408  }
  0x25   : > { %s9370_s22 = sshll.u32 %s302_s21, 6  ;;  %s9264_s25 = smov 3   ;;  %v2523_v41 = vsel %vm2467_vm4, 4294967295, %v15765_v40 }
  0x26   : > { %s9373_s23 = scalar_lea.vmem [#allocation2], %s9370_s22  ;;  %s9265_s26 = smov 126   ;;  %v9435_v13 = vand.u32 127, %v348_v12  ;;  %v9511_v53 = vsel %vm2480_vm8, %v2523_v41, 0 }
  0x27   : > { %v9376_v8 = vld [vmem:[%s9373_s23 + $0x30] sm:$0x7]  ;;  %v9379_v9 = vld [vmem:[%s9373_s23 + $0x20] sm:$0x7]  ;;  %v9386_v10 = vld [vmem:[%s9373_s23 + $0x38] sm:$0x7] }
  0x28   : > { %411 = vrot.lane.b32.xlu1 %v9376_v8, %s9263_s24  ;;  %403 = vrot.lane.b32.xlu0 %v9379_v9, %s9263_s24  ;;  %v9389_v11 = vld [vmem:[%s9373_s23 + $0x28] sm:$0x7]  ;;  %s9266_s27 = smov 2   ;;  %s9267_s10 = smov 125   ;;  %16203 = vst [vmem:[#allocation4_spill] sm:$0xff] %v9435_v13  ;;  %v350_v16 = vadd.s32 128, %v9435_v13 }
  0x29   : > { %s9268_s11 = smov 1   ;;  %vm442_vm0 = vcmp.lt.s32.totalorder %v9435_v13, 3  ;;  %vm16048_vm1 = vcmp.lt.s32.totalorder %v9435_v13, 127  ;;  %v9446_v23 = vand.u32 3, %v9435_v13  ;;  %v351_v25 = vadd.s32 256, %v9435_v13  ;;  %16211 = vst [vmem:[#allocation12_spill] sm:$0xff] %v9511_v53 }
  0x2a   : > { %v9438_v19 = vand.u32 3, %v350_v16  ;;  %v352_v26 = vadd.s32 384, %v9435_v13  ;;  %vm512_vm7 = vcmp.lt.s32.totalorder %v9435_v13, 2  ;;  %v9493_v45 = vrot.slane %v9379_v9, 7  ;;  %s15529_s16 = scalar_lea.vmem [#allocation3], %s9370_s22 }
  0x2b   : > { %16205 = vst [vmem:[#allocation6_spill] sm:$0xff] %v9446_v23  ;;  %vm15933_vm3 = vcmp.lt.s32.totalorder %v9446_v23, 3  ;;  %v9459_v31 = vand.u32 3, %v351_v25  ;;  %v9503_v49 = vrot.slane %v9379_v9, 2  ;;  %vm487_vm10 = vcmp.lt.s32.totalorder %v9435_v13, 126 }
  0x2c   : > { %415 = vrot.lane.b32.xlu1 %v9386_v10, %s9263_s24  ;;  %407 = vrot.lane.b32.xlu0 %v9389_v11, %s9263_s24  ;;  %16204 = vst [vmem:[#allocation5_spill] sm:$0xff] %v9438_v19  ;;  %vm15934_vm2 = vcmp.lt.s32.totalorder %v9438_v19, 3  ;;  %v9461_v32 = vand.u32 3, %v352_v26  ;;  %16209 = vst [vmem:[#allocation10_spill] sm:$0xff] %v9493_v45  ;;  %vm15887_vm9 = vcmp.lt.s32.totalorder %v9438_v19, 2  ;;  %vm15886_vm11 = vcmp.lt.s32.totalorder %v9446_v23, 2 }
  0x2d   : > { %16207 = vst [vmem:[#allocation8_spill] sm:$0xff] %v9459_v31  ;;  %vm15889_vm5 = vcmp.lt.s32.totalorder %v9459_v31, 3  ;;  %16210 = vst [vmem:[#allocation11_spill] sm:$0xff] %v9503_v49  ;;  %v9535_v62 = vrot.slane %v9376_v8, 7  ;;  %v9545_v2 = vrot.slane %v9376_v8, 2  ;;  %vm15793_vm12 = vcmp.lt.s32.totalorder %v9459_v31, 2 }
  0x2e   : > { %16208 = vst [vmem:[#allocation9_spill] sm:$0xff] %v9461_v32  ;;  %vm15932_vm6 = vcmp.lt.s32.totalorder %v9461_v32, 3  ;;  %vm15794_vm13 = vcmp.lt.s32.totalorder %v9461_v32, 2  ;;  %vm15888_vm14 = vcmp.lt.s32.totalorder %v9435_v13, 1  ;;  %vm16049_vm15 = vcmp.lt.s32.totalorder %v9435_v13, 125 }
  0x2f   : > { %16214 = vst [vmem:[#allocation15_spill] sm:$0xff] %v9535_v62  ;;  %16215 = vst [vmem:[#allocation16_spill] sm:$0xff] %v9545_v2 }
  0x30   : > { %432 = vrot.lane.b32.xlu1 %v9389_v11, %s9264_s25  ;;  %428 = vrot.lane.b32.xlu0 %v9379_v9, %s9264_s25 }
  0x34   : > { %440 = vrot.lane.b32.xlu1 %v9386_v10, %s9264_s25  ;;  %436 = vrot.lane.b32.xlu0 %v9376_v8, %s9264_s25 }
  0x38   : > { %477 = vrot.lane.b32.xlu1 %v9389_v11, %s9265_s26  ;;  %473 = vrot.lane.b32.xlu0 %v9379_v9, %s9265_s26 }
  0x3c   : > { %485 = vrot.lane.b32.xlu1 %v9386_v10, %s9265_s26  ;;  %481 = vrot.lane.b32.xlu0 %v9376_v8, %s9265_s26 }
  0x40   : > { %502 = vrot.lane.b32.xlu1 %v9389_v11, %s9266_s27  ;;  %498 = vrot.lane.b32.xlu0 %v9379_v9, %s9266_s27 }
  0x44   : > { %510 = vrot.lane.b32.xlu1 %v9386_v10, %s9266_s27  ;;  %506 = vrot.lane.b32.xlu0 %v9376_v8, %s9266_s27 }
  0x48   : > { %547 = vrot.lane.b32.xlu1 %v9389_v11, %s9267_s10  ;;  %543 = vrot.lane.b32.xlu0 %v9379_v9, %s9267_s10 }
  0x4c   : > { %555 = vrot.lane.b32.xlu1 %v9386_v10, %s9267_s10  ;;  %551 = vrot.lane.b32.xlu0 %v9376_v8, %s9267_s10 }
  0x50   : > { %572 = vrot.lane.b32.xlu1 %v9389_v11, %s9268_s11  ;;  %568 = vrot.lane.b32.xlu0 %v9379_v9, %s9268_s11 }
  0x54   : > { %580 = vrot.lane.b32.xlu1 %v9386_v10, %s9268_s11  ;;  %576 = vrot.lane.b32.xlu0 %v9376_v8, %s9268_s11 }
  0x9a   : > { %v412_v14 = vpop.permute.xlu1 %411  ;;  %v404_v15 = vpop.permute.xlu0 %403 }
  0x9e   : > { %v416_v17 = vpop.permute.xlu1 %415  ;;  %v408_v18 = vpop.permute.xlu0 %407 }
  0x9f   : > { %v421_v28 = vsel %vm16048_vm1, %v408_v18, %v412_v14  ;;  %v423_v37 = vsel %vm16048_vm1, %v404_v15, %v408_v18  ;;  %v419_v50 = vsel %vm16048_vm1, %v412_v14, %v416_v17  ;;  %v425_v54 = vsel %vm16048_vm1, %v416_v17, %v404_v15 }
  0xa2   : > { %v433_v20 = vpop.permute.xlu1 %432  ;;  %v429_v21 = vpop.permute.xlu0 %428 }
  0xa3   : > { %v448_v22 = vsel %vm442_vm0, %v429_v21, %v433_v20 }
  0xa4   : > { %v9454_v29 = vsel %vm15934_vm2, %v421_v28, %v448_v22 }
  0xa5   : > { %16206 = vst [vmem:[#allocation7_spill] sm:$0xff] %v9454_v29  ;;  %v9468_v35 = vrot.slane %v9454_v29, 7  ;;  %v9471_v36 = vrot.slane %v9454_v29, 2  ;;  %v624_v51 = vrot.slane %v9454_v29, 1  ;;  %v744_v52 = vrot.slane %v9454_v29, 6 }
  0xa6   : > { %v441_v24 = vpop.permute.xlu1 %440  ;;  %v437_v27 = vpop.permute.xlu0 %436  ;;  %v9517_v55 = vsub.f32 %v9389_v11, %v9454_v29  ;;  %v9542_v1 = vsub.f32 %v9454_v29, %v9454_v29 }
  0xa7   : > { %v450_v30 = vsel %vm442_vm0, %v441_v24, %v429_v21  ;;  %v684_v42 = vmul.f32 %v9468_v35, %v9389_v11  ;;  %v804_v43 = vmul.f32 %v9471_v36, %v9389_v11  ;;  %v446_v44 = vsel %vm442_vm0, %v433_v20, %v437_v27 }
  0xa8   : > { %v9477_v38 = vsel %vm15933_vm3, %v423_v37, %v450_v30  ;;  %v444_v47 = vsel %vm442_vm0, %v437_v27, %v441_v24  ;;  %16212 = vst [vmem:[#allocation13_spill] sm:$0xff] %v9517_v55  ;;  %v9524_v57 = vsel %vm15889_vm5, %v419_v50, %v446_v44  ;;  %v648_v3 = vmul.f32 %v624_v51, %v9389_v11 }
  0xa9   : > { %v9496_v46 = vrot.slane %v9477_v38, 2  ;;  %v9520_v56 = vrot.slane %v9477_v38, 7  ;;  %v708_v59 = vrot.slane %v684_v42, 1  ;;  %v828_v60 = vrot.slane %v804_v43, 6 }
  0xaa   : > { %v9463_v33 = vpop.permute.xlu1 %477  ;;  %v9465_v34 = vpop.permute.xlu0 %473  ;;  %v9531_v61 = vsel %vm15932_vm6, %v425_v54, %v444_v47  ;;  %v623_v63 = vrot.slane %v9477_v38, 1  ;;  %v768_v4 = vmul.f32 %v744_v52, %v9389_v11  ;;  %v743_v5 = vrot.slane %v9477_v38, 6 }
  0xab   : > { %16213 = vst [vmem:[#allocation14_spill] sm:$0xff] %v9531_v61  ;;  %v803_v0 = vmul.f32 %v9496_v46, %v9379_v9  ;;  %v9551_v6 = vrot.slane %v9524_v57, 7  ;;  %v9555_v7 = vmul.f32 %v9517_v55, %v9517_v55  ;;  %v683_v12 = vmul.f32 %v9520_v56, %v9379_v9 }
  0xac   : > { %v9561_v14 = vsub.f32 %v9379_v9, %v9477_v38  ;;  %v9564_v15 = vrot.slane %v9531_v61, 7  ;;  %v9566_v17 = vsub.f32 %v648_v3, %v708_v59  ;;  %v9568_v18 = vsub.f32 %v768_v4, %v828_v60 }
  0xad   : > { %16216 = vst [vmem:[#allocation17_spill] sm:$0xff] %v9551_v6  ;;  %v2191_v20 = vsub.f32 %v9477_v38, %v9477_v38  ;;  %v625_v21 = vrot.slane %v9524_v57, 1  ;;  %v647_v22 = vmul.f32 %v623_v63, %v9379_v9  ;;  %v827_v24 = vrot.slane %v803_v0, 6 }
  0xae   : > { %v9481_v39 = vpop.permute.xlu1 %485  ;;  %v9500_v48 = vpop.permute.xlu0 %481  ;;  %16217 = vst [vmem:[#allocation18_spill] sm:$0xff] %v9561_v14  ;;  %v9576_v25 = vmul.f32 %v9477_v38, %v9477_v38  ;;  %v9579_v26 = vrot.slane %v9524_v57, 2  ;;  %v767_v28 = vmul.f32 %v743_v5, %v9379_v9  ;;  %v685_v30 = vmul.f32 %v9551_v6, %v9376_v8 }
  0xaf   : > { %v9585_v37 = vrot.slane %v9531_v61, 2  ;;  %v707_v42 = vrot.slane %v683_v12, 1  ;;  %v9592_v43 = vmul.f32 %v9561_v14, %v9561_v14  ;;  %v626_v44 = vrot.slane %v9531_v61, 1 }
  0xb0   : > { %16218 = vst [vmem:[#allocation19_spill] sm:$0xff] %v9576_v25  ;;  %16219 = vst [vmem:[#allocation20_spill] sm:$0xff] %v9579_v26  ;;  %v686_v47 = vmul.f32 %v9564_v15, %v9386_v10  ;;  %v9597_v50 = vmul.f32 %v2191_v20, %v2191_v20  ;;  %v649_v51 = vmul.f32 %v625_v21, %v9376_v8  ;;  %v745_v60 = vrot.slane %v9524_v57, 6 }
  0xb1   : > { %16220 = vst [vmem:[#allocation21_spill] sm:$0xff] %v9585_v37  ;;  %v491_v52 = vsel %vm487_vm10, %v9463_v33, %v9500_v48  ;;  %v9606_v59 = vsub.f32 %v767_v28, %v827_v24  ;;  %v805_v63 = vmul.f32 %v9579_v26, %v9376_v8  ;;  %v709_v3 = vrot.slane %v685_v30, 1 }
  0xb2   : > { %v9527_v58 = vpop.permute.xlu1 %502  ;;  %v499_v16 = vpop.permute.xlu0 %498  ;;  %v746_v4 = vrot.slane %v9531_v61, 6  ;;  %v806_v5 = vmul.f32 %v9585_v37, %v9386_v10  ;;  %v493_v12 = vsel %vm487_vm10, %v9465_v34, %v9463_v33  ;;  %v9624_v20 = vsub.f32 %v9376_v8, %v9524_v57 }
  0xb3   : > { %v518_v41 = vsel %vm512_vm7, %v499_v16, %v9527_v58  ;;  %16221 = vst [vmem:[#allocation22_spill] sm:$0xff] %v9606_v59  ;;  %v9628_v21 = vsub.f32 %v9386_v10, %v9531_v61  ;;  %v9635_v28 = vsub.f32 %v647_v22, %v707_v42  ;;  %v650_v30 = vmul.f32 %v626_v44, %v9386_v10 }
  0xb4   : > { %v9613_v0 = vsel %vm15887_vm9, %v491_v52, %v518_v41  ;;  %16223 = vst [vmem:[#allocation24_spill] sm:$0xff] %v9624_v20  ;;  %v2193_v33 = vsub.f32 %v9524_v57, %v9524_v57  ;;  %v9646_v52 = vmul.f32 %v9606_v59, %v9606_v59  ;;  %v770_v44 = vmul.f32 %v746_v4, %v9386_v10 }
  0xb5   : > { %16222 = vst [vmem:[#allocation23_spill] sm:$0xff] %v9613_v0  ;;  %16224 = vst [vmem:[#allocation25_spill] sm:$0xff] %v9628_v21  ;;  %v9641_v41 = vrot.slane %v9613_v0, 7  ;;  %v9650_v22 = vrot.slane %v9613_v0, 2  ;;  %v830_v40 = vrot.slane %v806_v5, 6  ;;  %v9657_v55 = vmul.f32 %v9524_v57, %v9524_v57 }
  0xb6   : > { %v511_v27 = vpop.permute.xlu1 %510  ;;  %16225 = vst [vmem:[#allocation26_spill] sm:$0xff] %v9635_v28  ;;  %v9663_v25 = vsub.f32 %v649_v51, %v709_v3  ;;  %v9673_v4 = vmul.f32 %v9628_v21, %v9628_v21  ;;  %v9675_v5 = vmul.f32 %v2193_v33, %v2193_v33  ;;  %v748_v21 = vrot.slane %v9613_v0, 6 }
  0xb7   : > { %v520_v54 = vsel %vm512_vm7, %v511_v27, %v499_v16  ;;  %v710_v16 = vrot.slane %v686_v47, 1  ;;  %16226 = vst [vmem:[#allocation27_spill] sm:$0xff] %v9641_v41  ;;  %v507_v47 = vpop.permute.xlu0 %506  ;;  %16227 = vst [vmem:[#allocation28_spill] sm:$0xff] %v9650_v22  ;;  %v688_v51 = vmul.f32 %v9641_v41, %v9389_v11  ;;  %v808_v33 = vmul.f32 %v9650_v22, %v9389_v11 }
  0xb8   : > { %v9632_v24 = vsel %vm15886_vm11, %v493_v12, %v520_v54  ;;  %v769_v54 = vmul.f32 %v745_v60, %v9376_v8  ;;  %v829_v12 = vrot.slane %v805_v63, 6  ;;  %16228 = vst [vmem:[#allocation29_spill] sm:$0xff] %v9657_v55  ;;  %16229 = vst [vmem:[#allocation30_spill] sm:$0xff] %v9663_v25  ;;  %v9669_v63 = vmul.f32 %v9624_v20, %v9624_v20 }
  0xb9   : > { %v9661_v14 = vsub.f32 %v9477_v38, %v9632_v24  ;;  %v9665_v60 = vsub.f32 %v650_v30, %v710_v16  ;;  %16232 = vst [vmem:[#allocation33_spill] sm:$0xff] %v9673_v4  ;;  %16233 = vst [vmem:[#allocation34_spill] sm:$0xff] %v9675_v5  ;;  %v495_v55 = vsel %vm487_vm10, %v9481_v39, %v9465_v34  ;;  %v9684_v3 = vrot.slane %v9632_v24, 2 }
  0xba   : > { %v9652_v42 = vpop.permute.xlu1 %547  ;;  %16231 = vst [vmem:[#allocation32_spill] sm:$0xff] %v9669_v63  ;;  %v9686_v16 = vsub.f32 %v769_v54, %v829_v12  ;;  %v628_v30 = vrot.slane %v9613_v0, 1  ;;  %v9692_v20 = vsub.f32 %v770_v44, %v830_v40  ;;  %v489_v34 = vsel %vm487_vm10, %v9500_v48, %v9481_v39 }
  0xbb   : > { %16230 = vst [vmem:[#allocation31_spill] sm:$0xff] %v9665_v60  ;;  %16234 = vst [vmem:[#allocation35_spill] sm:$0xff] %v9684_v3  ;;  %v9700_v41 = vsub.f32 %v9389_v11, %v9613_v0  ;;  %v9703_v54 = vrot.slane %v9632_v24, 7  ;;  %v9705_v12 = vpop.permute.xlu0 %543  ;;  %v2196_v2 = vsub.f32 %v9613_v0, %v9454_v29  ;;  %v9711_v40 = vsub.f32 %v9379_v9, %v9632_v24 }
  0xbc   : > { %16235 = vst [vmem:[#allocation36_spill] sm:$0xff] %v9686_v16  ;;  %v514_v44 = vsel %vm512_vm7, %v507_v47, %v511_v27  ;;  %v516_v39 = vsel %vm512_vm7, %v9527_v58, %v507_v47  ;;  %v712_v22 = vrot.slane %v688_v51, 1  ;;  %v3036_v62 = vsub.f32 %v9454_v29, %v9613_v0 }
  0xbd   : > { %16236 = vst [vmem:[#allocation37_spill] sm:$0xff] %v9700_v41  ;;  %16237 = vst [vmem:[#allocation38_spill] sm:$0xff] %v9703_v54  ;;  %v3040_v5 = vsub.f32 %v9613_v0, %v9613_v0  ;;  %v807_v63 = vmul.f32 %v9684_v3, %v9379_v9  ;;  %v9728_v25 = vmul.f32 %v9686_v16, %v9686_v16  ;;  %v832_v47 = vrot.slane %v808_v33, 6 }
  0xbe   : > { %16238 = vst [vmem:[#allocation39_spill] sm:$0xff] %v9711_v40  ;;  %v9718_v48 = vpop.permute.xlu1 %555  ;;  %v652_v27 = vmul.f32 %v628_v30, %v9389_v11  ;;  %v772_v58 = vmul.f32 %v748_v21, %v9389_v11  ;;  %v9734_v51 = vmul.f32 %v9700_v41, %v9700_v41  ;;  %v687_v26 = vmul.f32 %v9703_v54, %v9379_v9 }
  0xbf   : > { %16239 = vst [vmem:[#allocation40_spill] sm:$0xff] %v9728_v25  ;;  %v747_v6 = vrot.slane %v9632_v24, 6  ;;  %v9741_v3 = vsel %vm15793_vm12, %v489_v34, %v516_v39  ;;  %v9744_v25 = vmul.f32 %v2196_v2, %v2196_v2  ;;  %v627_v21 = vrot.slane %v9632_v24, 1 }
  0xc0   : > { %16240 = vst [vmem:[#allocation41_spill] sm:$0xff] %v9734_v51  ;;  %v9749_v30 = vmul.f32 %v9711_v40, %v9711_v40  ;;  %v9753_v33 = vsel %vm15794_vm13, %v495_v55, %v514_v44  ;;  %v9755_v41 = vsub.f32 %v652_v27, %v712_v22  ;;  %v9757_v54 = vmul.f32 %v3036_v62, %v3036_v62  ;;  %v9761_v51 = vpop.permute.xlu0 %551 }
  0xc1   : > { %16241 = vst [vmem:[#allocation42_spill] sm:$0xff] %v9744_v25  ;;  %16243 = vst [vmem:[#allocation44_spill] sm:$0xff] %v9753_v33  ;;  %v9759_v34 = vmul.f32 %v3040_v5, %v3040_v5  ;;  %v831_v39 = vrot.slane %v807_v63, 6  ;;  %v9763_v2 = vsub.f32 %v772_v58, %v832_v47  ;;  %v9767_v25 = vmul.f32 %v9632_v24, %v9632_v24 }
  0xc2   : > { %16242 = vst [vmem:[#allocation43_spill] sm:$0xff] %v9749_v30  ;;  %16244 = vst [vmem:[#allocation45_spill] sm:$0xff] %v9755_v41  ;;  %v9770_v40 = vrot.slane %v9741_v3, 7  ;;  %v9773_v55 = vrot.slane %v9741_v3, 2  ;;  %v9776_v62 = vpop.permute.xlu1 %572  ;;  %vm15825_vm12 = vcmp.lt.s32.totalorder %v9438_v19, 1  ;;  %v711_v22 = vrot.slane %v687_v26, 1 }
  0xc3   : > { %16245 = vst [vmem:[#allocation46_spill] sm:$0xff] %v9757_v54  ;;  %16246 = vst [vmem:[#allocation47_spill] sm:$0xff] %v9759_v34  ;;  %v771_v63 = vmul.f32 %v747_v6, %v9379_v9  ;;  %v2195_v5 = vsub.f32 %v9632_v24, %v9477_v38  ;;  %v9783_v44 = vrot.slane %v9753_v33, 7  ;;  %vm15824_vm13 = vcmp.lt.s32.totalorder %v9446_v23, 1 }
  0xc4   : > { %16247 = vst [vmem:[#allocation48_spill] sm:$0xff] %v9763_v2  ;;  %16248 = vst [vmem:[#allocation49_spill] sm:$0xff] %v9767_v25  ;;  %v651_v27 = vmul.f32 %v627_v21, %v9379_v9  ;;  %v1871_v58 = vrot.slane %v9749_v30, 1  ;;  %v3039_v47 = vsub.f32 %v9632_v24, %v9632_v24  ;;  %v3037_v26 = vsub.f32 %v9524_v57, %v9741_v3  ;;  %v569_v2 = vpop.permute.xlu0 %568 }
  0xc5   : > { %16249 = vst [vmem:[#allocation50_spill] sm:$0xff] %v9770_v40  ;;  %16250 = vst [vmem:[#allocation51_spill] sm:$0xff] %v9773_v55  ;;  %v9792_v25 = vsub.f32 %v771_v63, %v831_v39  ;;  %v629_v6 = vrot.slane %v9741_v3, 1  ;;  %v630_v34 = vrot.slane %v9753_v33, 1  ;;  %v9797_v54 = vrot.slane %v9753_v33, 2 }
  0xc6   : > { %16251 = vst [vmem:[#allocation52_spill] sm:$0xff] %v9783_v44  ;;  %v689_v21 = vmul.f32 %v9770_v40, %v9376_v8  ;;  %v809_v41 = vmul.f32 %v9773_v55, %v9376_v8  ;;  %v9806_v16 = vsub.f32 %v9376_v8, %v9741_v3  ;;  %v9808_v39 = vsub.f32 %v651_v27, %v711_v22  ;;  %v581_v27 = vpop.permute.xlu1 %580 }
  0xc7   : > { %16252 = vst [vmem:[#allocation53_spill] sm:$0xff] %v9792_v25  ;;  %16253 = vst [vmem:[#allocation54_spill] sm:$0xff] %v9797_v54  ;;  %v9810_v63 = vmul.f32 %v2195_v5, %v2195_v5  ;;  %v690_v53 = vmul.f32 %v9783_v44, %v9386_v10  ;;  %v749_v4 = vrot.slane %v9741_v3, 6  ;;  %v9816_v37 = vadd.f32 %v1871_v58, %v9749_v30 }
  0xc8   : > { %16254 = vst [vmem:[#allocation55_spill] sm:$0xff] %v9806_v16  ;;  %16255 = vst [vmem:[#allocation56_spill] sm:$0xff] %v9808_v39  ;;  %v9820_v55 = vmul.f32 %v9661_v14, %v9661_v14  ;;  %v9822_v40 = vmul.f32 %v3039_v47, %v3039_v47  ;;  %v750_v22 = vrot.slane %v9753_v33, 6  ;;  %v9827_v5 = vmul.f32 %v9792_v25, %v9792_v25  ;;  %v577_v19 = vpop.permute.xlu0 %576 }
  0xc9   : > { %16256 = vst [vmem:[#allocation57_spill] sm:$0xff] %v9810_v63  ;;  %16257 = vst [vmem:[#allocation58_spill] sm:$0xff] %v9816_v37  ;;  %v653_v44 = vmul.f32 %v629_v6, %v9376_v8  ;;  %v654_v63 = vmul.f32 %v630_v34, %v9386_v10  ;;  %v810_v58 = vmul.f32 %v9797_v54, %v9386_v10  ;;  %v713_v30 = vrot.slane %v689_v21, 1 }
  0xca   : > { %16258 = vst [vmem:[#allocation59_spill] sm:$0xff] %v9820_v55  ;;  %16259 = vst [vmem:[#allocation60_spill] sm:$0xff] %v9822_v40  ;;  %v833_v37 = vrot.slane %v809_v41, 6  ;;  %v9835_v14 = vmul.f32 %v9806_v16, %v9806_v16  ;;  %v588_v47 = vsel %vm15888_vm14, %v569_v2, %v9776_v62  ;;  %v714_v40 = vrot.slane %v690_v53, 1 }
  0xcb   : > { %16260 = vst [vmem:[#allocation61_spill] sm:$0xff] %v9827_v5  ;;  %v773_v5 = vmul.f32 %v749_v4, %v9376_v8  ;;  %v9843_v6 = vsub.f32 %v9386_v10, %v9753_v33  ;;  %v590_v34 = vsel %vm15888_vm14, %v581_v27, %v569_v2  ;;  %v774_v41 = vmul.f32 %v750_v22, %v9386_v10 }
  0xcc   : > { %16261 = vst [vmem:[#allocation62_spill] sm:$0xff] %v9835_v14  ;;  %v2197_v21 = vsub.f32 %v9741_v3, %v9524_v57  ;;  %v2198_v16 = vsub.f32 %v9753_v33, %v9531_v61  ;;  %v561_v53 = vsel %vm16049_vm15, %v9652_v42, %v9761_v51  ;;  %v834_v4 = vrot.slane %v810_v58, 6 }
  0xcd   : > { %16262 = vst [vmem:[#allocation63_spill] sm:$0xff] %v9843_v6  ;;  %v9858_v55 = vmul.f32 %v9741_v3, %v9741_v3  ;;  %v563_v2 = vsel %vm16049_vm15, %v9705_v12, %v9652_v42  ;;  %v9866_v22 = vsel %vm15825_vm12, %v561_v53, %v588_v47  ;;  %v9868_v54 = vsub.f32 %v653_v44, %v713_v30 }
  0xce   : > { %16264 = vst [vmem:[#allocation65_spill] sm:$0xff] %v9866_v22  ;;  %v9870_v39 = vsub.f32 %v773_v5, %v833_v37  ;;  %v1873_v25 = vrot.slane %v9835_v14, 1  ;;  %v9875_v58 = vsel %vm15824_vm13, %v563_v2, %v590_v34  ;;  %v9881_v60 = vmul.f32 %v9843_v6, %v9843_v6 }
  0xcf   : > { %16263 = vst [vmem:[#allocation64_spill] sm:$0xff] %v9858_v55  ;;  %16265 = vst [vmem:[#allocation66_spill] sm:$0xff] %v9868_v54  ;;  %v9877_v55 = vsub.f32 %v654_v63, %v714_v40  ;;  %v3038_v42 = vsub.f32 %v9531_v61, %v9753_v33  ;;  %v3041_v30 = vsub.f32 %v9741_v3, %v9741_v3  ;;  %v9893_v47 = vrot.slane %v9866_v22, 7 }
  0xd0   : > { %16266 = vst [vmem:[#allocation67_spill] sm:$0xff] %v9870_v39  ;;  %16268 = vst [vmem:[#allocation69_spill] sm:$0xff] %v9881_v60  ;;  %v9888_v44 = vmul.f32 %v2197_v21, %v2197_v21  ;;  %v9890_v5 = vmul.f32 %v2198_v16, %v2198_v16  ;;  %v9895_v40 = vsub.f32 %v774_v41, %v834_v4  ;;  %v9900_v34 = vrot.slane %v9866_v22, 2 }
  0xd1   : > { %16267 = vst [vmem:[#allocation68_spill] sm:$0xff] %v9877_v55  ;;  %16270 = vst [vmem:[#allocation71_spill] sm:$0xff] %v9893_v47  ;;  %v3042_v63 = vsub.f32 %v9753_v33, %v9753_v33  ;;  %v3043_v53 = vsub.f32 %v9875_v58, %v9632_v24  ;;  %vm15873_vm13 = vcmp.lt.s32.totalorder %v9459_v31, 1  ;;  %vm15877_vm12 = vcmp.lt.s32.totalorder %v9461_v32, 1 }
  0xd2   : > { %16269 = vst [vmem:[#allocation70_spill] sm:$0xff] %v9888_v44  ;;  %16271 = vst [vmem:[#allocation72_spill] sm:$0xff] %v9895_v40  ;;  %v9908_v16 = vmul.f32 %v9870_v39, %v9870_v39  ;;  %v9911_v41 = vadd.f32 %v1873_v25, %v9835_v14  ;;  %v9913_v21 = vmul.f32 %v3037_v26, %v3037_v26  ;;  %v9922_v6 = vrot.slane %v9875_v58, 2 }
  0xd3   : > { %16272 = vst [vmem:[#allocation73_spill] sm:$0xff] %v9900_v34  ;;  %v3857_v4 = vsub.f32 %v9477_v38, %v9875_v58  ;;  %v9917_v2 = vmul.f32 %v3038_v42, %v3038_v42  ;;  %v9919_v37 = vmul.f32 %v3041_v30, %v3041_v30  ;;  %v3861_v23 = vsub.f32 %v9632_v24, %v9875_v58 }
  0xd4   : > { %16273 = vst [vmem:[#allocation74_spill] sm:$0xff] %v9908_v16  ;;  %16274 = vst [vmem:[#allocation75_spill] sm:$0xff] %v9911_v41  ;;  %v565_v25 = vsel %vm16049_vm15, %v9718_v48, %v9705_v12  ;;  %v632_v26 = vrot.slane %v9866_v22, 1  ;;  %v692_v42 = vmul.f32 %v9893_v47, %v9389_v11  ;;  %v752_v30 = vrot.slane %v9866_v22, 6 }
  0xd5   : > { %16275 = vst [vmem:[#allocation76_spill] sm:$0xff] %v9913_v21  ;;  %16276 = vst [vmem:[#allocation77_spill] sm:$0xff] %v9917_v2  ;;  %v9934_v16 = vmul.f32 %v3042_v63, %v3042_v63  ;;  %v559_v24 = vsel %vm16049_vm15, %v9761_v51, %v9718_v48  ;;  %v9944_v12 = vsub.f32 %v9389_v11, %v9866_v22  ;;  %v9949_v47 = vrot.slane %v9875_v58, 7 }
  0xd6   : > { %16277 = vst [vmem:[#allocation78_spill] sm:$0xff] %v9919_v37  ;;  %16278 = vst [vmem:[#allocation79_spill] sm:$0xff] %v9922_v6  ;;  %v812_v37 = vmul.f32 %v9900_v34, %v9389_v11  ;;  %v2200_v21 = vsub.f32 %v9866_v22, %v9454_v29  ;;  %v9953_v63 = vsub.f32 %v9379_v9, %v9875_v58  ;;  %v716_v2 = vrot.slane %v692_v42, 1 }
  0xd7   : > { %16279 = vst [vmem:[#allocation80_spill] sm:$0xff] %v9934_v16  ;;  %16280 = vst [vmem:[#allocation81_spill] sm:$0xff] %v9944_v12  ;;  %v584_v48 = vsel %vm15888_vm14, %v577_v19, %v581_v27  ;;  %v3044_v51 = vsub.f32 %v9866_v22, %v9613_v0  ;;  %v3858_v34 = vsub.f32 %v9454_v29, %v9866_v22  ;;  %v751_v29 = vrot.slane %v9875_v58, 6 }
  0xd8   : > { %16281 = vst [vmem:[#allocation82_spill] sm:$0xff] %v9949_v47  ;;  %16282 = vst [vmem:[#allocation83_spill] sm:$0xff] %v9953_v63  ;;  %v3862_v16 = vsub.f32 %v9613_v0, %v9866_v22  ;;  %v811_v14 = vmul.f32 %v9922_v6, %v9379_v9  ;;  %v656_v41 = vmul.f32 %v632_v26, %v9389_v11  ;;  %v836_v44 = vrot.slane %v812_v37, 6 }
  0xd9   : > { %v776_v60 = vmul.f32 %v752_v30, %v9389_v11  ;;  %v586_v27 = vsel %vm15888_vm14, %v9776_v62, %v577_v19  ;;  %v9972_v39 = vmul.f32 %v9944_v12, %v9944_v12  ;;  %v3866_v0 = vsub.f32 %v9866_v22, %v9866_v22 }
  0xda   : > { %v9977_v6 = vmul.f32 %v2200_v21, %v2200_v21  ;;  %v631_v26 = vrot.slane %v9875_v58, 1  ;;  %v691_v11 = vmul.f32 %v9949_v47, %v9379_v9  ;;  %v9984_v19 = vmul.f32 %v9953_v63, %v9953_v63 }
  0xdb   : > { %16283 = vst [vmem:[#allocation84_spill] sm:$0xff] %v9972_v39  ;;  %v9986_v62 = vmul.f32 %v3044_v51, %v3044_v51  ;;  %v9988_v37 = vmul.f32 %v3858_v34, %v3858_v34  ;;  %v9990_v42 = vmul.f32 %v3862_v16, %v3862_v16  ;;  %v835_v30 = vrot.slane %v811_v14, 6 }
  0xdc   : > { %16284 = vst [vmem:[#allocation85_spill] sm:$0xff] %v9984_v19  ;;  %v9992_v12 = vsub.f32 %v656_v41, %v716_v2  ;;  %v2199_v21 = vsub.f32 %v9875_v58, %v9477_v38  ;;  %v9998_v13 = vsel %vm15873_vm13, %v559_v24, %v586_v27  ;;  %v10002_v63 = vsel %vm15877_vm12, %v565_v25, %v584_v48 }
  0xdd   : > { %16285 = vst [vmem:[#allocation86_spill] sm:$0xff] %v9986_v62  ;;  %16286 = vst [vmem:[#allocation87_spill] sm:$0xff] %v9988_v37  ;;  %v10004_v51 = vsub.f32 %v776_v60, %v836_v44  ;;  %v10006_v34 = vmul.f32 %v3866_v0, %v3866_v0  ;;  %v775_v16 = vmul.f32 %v751_v29, %v9379_v9  ;;  %v715_v41 = vrot.slane %v691_v11, 1 }
  0xde   : > { %16287 = vst [vmem:[#allocation88_spill] sm:$0xff] %v9990_v42  ;;  %16288 = vst [vmem:[#allocation89_spill] sm:$0xff] %v9992_v12  ;;  %v10011_v14 = vmul.f32 %v9875_v58, %v9875_v58  ;;  %v655_v38 = vmul.f32 %v631_v26, %v9379_v9  ;;  %v1875_v2 = vrot.slane %v9984_v19, 1  ;;  %v3865_v24 = vsub.f32 %v9875_v58, %v9875_v58 }
  0xdf   : > { %16289 = vst [vmem:[#allocation90_spill] sm:$0xff] %v10002_v63  ;;  %16290 = vst [vmem:[#allocation91_spill] sm:$0xff] %v10004_v51  ;;  %v10017_v25 = vsub.f32 %v775_v16, %v835_v30  ;;  %v633_v60 = vrot.slane %v9998_v13, 1  ;;  %v634_v0 = vrot.slane %v10002_v63, 1  ;;  %v10023_v29 = vsub.f32 %v9998_v13, %v9741_v3 }
  0xe0   : > { %16291 = vst [vmem:[#allocation92_spill] sm:$0xff] %v10006_v34  ;;  %16292 = vst [vmem:[#allocation93_spill] sm:$0xff] %v10011_v14  ;;  %v10025_v44 = vmul.f32 %v2199_v21, %v2199_v21  ;;  %v10027_v48 = vmul.f32 %v3043_v53, %v3043_v53  ;;  %v10029_v9 = vmul.f32 %v3857_v4, %v3857_v4  ;;  %v10037_v26 = vrot.slane %v9998_v13, 7 }
  0xe1   : > { %16293 = vst [vmem:[#allocation94_spill] sm:$0xff] %v10017_v25  ;;  %v10033_v27 = vsub.f32 %v9524_v57, %v9998_v13  ;;  %v10040_v11 = vrot.slane %v10002_v63, 7  ;;  %v10044_v30 = vsub.f32 %v9741_v3, %v9998_v13  ;;  %v10046_v53 = vsub.f32 %v655_v38, %v715_v41 }
  0xe2   : > { %16294 = vst [vmem:[#allocation95_spill] sm:$0xff] %v10027_v48  ;;  %16295 = vst [vmem:[#allocation96_spill] sm:$0xff] %v10029_v9  ;;  %v10049_v4 = vadd.f32 %v1875_v2, %v9984_v19  ;;  %v10051_v21 = vmul.f32 %v3861_v23, %v3861_v23  ;;  %v10053_v16 = vmul.f32 %v3865_v24, %v3865_v24  ;;  %v753_v3 = vrot.slane %v9998_v13, 6 }
  0xe3   : > { %16296 = vst [vmem:[#allocation97_spill] sm:$0xff] %v10037_v26  ;;  %16297 = vst [vmem:[#allocation98_spill] sm:$0xff] %v10040_v11  ;;  %v10057_v58 = vmul.f32 %v10017_v25, %v10017_v25  ;;  %v657_v31 = vmul.f32 %v633_v60, %v9376_v8  ;;  %v658_v32 = vmul.f32 %v634_v0, %v9386_v10  ;;  %v754_v38 = vrot.slane %v10002_v63, 6 }
  0xe4   : > { %16298 = vst [vmem:[#allocation99_spill] sm:$0xff] %v10046_v53  ;;  %16299 = vst [vmem:[#allocation100_spill] sm:$0xff] %v10049_v4  ;;  %v1580_v41 = vsub.f32 %v9566_v17, %v9468_v35  ;;  %v1604_v23 = vsub.f32 %v9568_v18, %v9468_v35  ;;  %v1676_v2 = vsub.f32 %v9566_v17, %v9471_v36  ;;  %v1868_v0 = vrot.slane %v9555_v7, 1 }
  0xe5   : > { %16300 = vst [vmem:[#allocation101_spill] sm:$0xff] %v10051_v21  ;;  %16301 = vst [vmem:[#allocation102_spill] sm:$0xff] %v10053_v16  ;;  %v693_v24 = vmul.f32 %v10037_v26, %v9376_v8  ;;  %v694_v60 = vmul.f32 %v10040_v11, %v9386_v10  ;;  %v2204_v14 = vmul.f32 %v9542_v1, %v9542_v1  ;;  %v10080_v22 = vrot.slane %v10002_v63, 2 }
  0xe6   : > { %16302 = vst [vmem:[#allocation103_spill] sm:$0xff] %v10057_v58  ;;  %v10077_v58 = vrot.slane %v9998_v13, 2  ;;  %v1616_v16 = vmul.f32 %v1604_v23, %v1604_v23  ;;  %v1688_v34 = vmul.f32 %v1676_v2, %v1676_v2  ;;  %v10083_v21 = vmul.f32 %v753_v3, %v9376_v8 }
  0xe7   : > { %16304 = vst [vmem:[#allocation105_spill] sm:$0xff] %v10080_v22  ;;  %v1892_v42 = vadd.f32 %v1868_v0, %v9555_v7  ;;  %v1904_v26 = vrot.slane %v9555_v7, 2  ;;  %v2228_v9 = vrot.slane %v2204_v14, 1  ;;  %v10088_v47 = vmul.f32 %v754_v38, %v9386_v10 }
  0xe8   : > { %16303 = vst [vmem:[#allocation104_spill] sm:$0xff] %v10077_v58  ;;  %v10092_v1 = vmul.f32 %v9998_v13, %v9998_v13  ;;  %v1592_v19 = vmul.f32 %v1580_v41, %v1580_v41  ;;  %v1640_v4 = vrot.slane %v1616_v16, 1  ;;  %v717_v11 = vrot.slane %v693_v24, 1 }
  0xe9   : > { %v10096_v23 = vsub.f32 %v9376_v8, %v9998_v13  ;;  %v10098_v3 = vadd.f32 %v1904_v26, %v1892_v42  ;;  %v2252_v2 = vadd.f32 %v2228_v9, %v2204_v14  ;;  %v1712_v7 = vrot.slane %v1688_v34, 7 }
  0xea   : > { %16305 = vst [vmem:[#allocation106_spill] sm:$0xff] %v10092_v1  ;;  %v1664_v0 = vadd.f32 %v1640_v4, %v1592_v19  ;;  %v2264_v37 = vrot.slane %v2204_v14, 2  ;;  %v899_v38 = vrot.slane %v9646_v52, 1  ;;  %v718_v39 = vrot.slane %v694_v60, 1 }
  0xeb   : > { %16306 = vst [vmem:[#allocation107_spill] sm:$0xff] %v10096_v23  ;;  %v10103_v48 = vmul.f32 %v10077_v58, %v9376_v8  ;;  %v10107_v16 = vmul.f32 %v10080_v22, %v9386_v10  ;;  %8479 = vrsqrt.f32 %v10098_v3  ;;  %v10112_v42 = vsub.f32 %v9386_v10, %v10002_v63 }
  0xec   : > { %v10114_v19 = vadd.f32 %v1712_v7, %v1664_v0  ;;  %v10116_v34 = vadd.f32 %v2264_v37, %v2252_v2  ;;  %v863_v52 = vmul.f32 %v9635_v28, %v9635_v28  ;;  %v10120_v14 = vsub.f32 %v657_v31, %v717_v11 }
  0xed   : > { %16307 = vst [vmem:[#allocation108_spill] sm:$0xff] %v10112_v42  ;;  %v10124_v8 = vmul.f32 %v10096_v23, %v10096_v23  ;;  %v10128_v9 = vsub.f32 %v9998_v13, %v9524_v57  ;;  %v10132_v10 = vsub.f32 %v10002_v63, %v9531_v61  ;;  %v1319_v26 = vsub.f32 %v9635_v28, %v9493_v45 }
  0xee   : > { %16308 = vst [vmem:[#allocation109_spill] sm:$0xff] %v10120_v14  ;;  %8481 = vrsqrt.f32 %v10114_v19  ;;  %v923_v37 = vadd.f32 %v899_v38, %v863_v52  ;;  %v1343_v31 = vsub.f32 %v9606_v59, %v9493_v45  ;;  %v10139_v11 = vsub.f32 %v658_v32, %v718_v39 }
  0xef   : > { %16309 = vst [vmem:[#allocation110_spill] sm:$0xff] %v10124_v8  ;;  %8483 = vrsqrt.f32 %v10116_v34  ;;  %v10146_v41 = vmul.f32 %v10112_v42, %v10112_v42  ;;  %v947_v24 = vrot.slane %v863_v52, 7  ;;  %v1423_v60 = vsub.f32 %v9635_v28, %v9503_v49 }
  0xf0   : > { %16310 = vst [vmem:[#allocation111_spill] sm:$0xff] %v10139_v11  ;;  %v1603_v2 = vsub.f32 %v9606_v59, %v9520_v56  ;;  %v1579_v32 = vsub.f32 %v9635_v28, %v9520_v56  ;;  %v1675_v39 = vsub.f32 %v9635_v28, %v9496_v46  ;;  %v1867_v0 = vrot.slane %v9592_v43, 1 }
  0xf1   : > { %16311 = vst [vmem:[#allocation112_spill] sm:$0xff] %v10146_v41  ;;  %v2227_v7 = vrot.slane %v9597_v50, 1  ;;  %v10158_v38 = vadd.f32 %v947_v24, %v923_v37  ;;  %v1331_v57 = vmul.f32 %v1319_v26, %v1319_v26  ;;  %v1355_v52 = vmul.f32 %v1343_v31, %v1343_v31  ;;  %v16314_v41 = vld [vmem:[#allocation21_spill] sm:$0xff] }
  0xf2   : > { %v1615_v4 = vmul.f32 %v1603_v2, %v1603_v2  ;;  %vm1948_vm13 = vcmp.eq.f32.partialorder %v10098_v3, inf  ;;  %v1687_v42 = vmul.f32 %v1675_v39, %v1675_v39  ;;  %v1891_v23 = vadd.f32 %v1867_v0, %v9592_v43 }
  0xf3   : > { %v1903_v1 = vrot.slane %v9592_v43, 2  ;;  %vm1950_vm12 = vcmp.eq.f32.partialorder %v10098_v3, 0.0  ;;  %v1951_v49 = vand.u32 2147483648, %v10098_v3  ;;  %v2251_v58 = vadd.f32 %v2227_v7, %v9597_v50 }
  0xf4   : > { %v1639_v45 = vrot.slane %v1615_v4, 1  ;;  %vm1756_vm11 = vcmp.eq.f32.partialorder %v10114_v19, inf  ;;  %v1435_v37 = vmul.f32 %v1423_v60, %v1423_v60  ;;  %v1591_v26 = vmul.f32 %v1579_v32, %v1579_v32 }
  0xf5   : > { %v8480_v22 = vpop.eup %8479  ;;  %v10167_v31 = vadd.f32 %v1903_v1, %v1891_v23  ;;  %vm1758_vm9 = vcmp.eq.f32.partialorder %v10114_v19, 0.0  ;;  %v1379_v2 = vrot.slane %v1355_v52, 1  ;;  %v2263_v43 = vrot.slane %v9597_v50, 2 }
  0xf6   : > { %v1947_v24 = vmul.f32 %v8480_v22, %v10098_v3  ;;  %v1663_v39 = vadd.f32 %v1639_v45, %v1591_v26  ;;  %v1711_v0 = vrot.slane %v1687_v42, 7  ;;  %v1606_v4 = vsub.f32 %v9692_v20, %v9564_v15 }
  0xf7   : > { %8485 = vrsqrt.f32 %v10167_v31  ;;  %v1759_v60 = vand.u32 2147483648, %v10114_v19  ;;  %vm2308_vm14 = vcmp.eq.f32.partialorder %v10116_v34, inf  ;;  %v10180_v22 = vadd.f32 %v2263_v43, %v2251_v58 }
  0xf8   : > { %v8482_v7 = vpop.eup %8481  ;;  %v1949_v1 = vsel %vm1948_vm13, %v10098_v3, %v1947_v24  ;;  %vm2310_vm5 = vcmp.eq.f32.partialorder %v10116_v34, 0.0  ;;  %v2311_v50 = vand.u32 2147483648, %v10116_v34  ;;  %v10185_v42 = vadd.f32 %v1711_v0, %v1663_v39  ;;  %v16313_v24 = vld [vmem:[#allocation31_spill] sm:$0xff] }
  0xf9   : > { %v8484_v23 = vpop.eup %8483  ;;  %v1755_v45 = vmul.f32 %v8482_v7, %v10114_v19  ;;  %v10189_v32 = vsel %vm1950_vm12, %v1951_v49, %v1949_v1  ;;  %v1403_v26 = vadd.f32 %v1379_v2, %v1331_v57  ;;  %v1582_v58 = vsub.f32 %v16313_v24, %v9564_v15 }
  0xfa   : > { %16312 = vst [vmem:[#allocation113_spill] sm:$0xff] %v10189_v32  ;;  %v2307_v52 = vmul.f32 %v8484_v23, %v10116_v34  ;;  %8487 = vrsqrt.f32 %v10185_v42  ;;  %v1618_v7 = vmul.f32 %v1606_v4, %v1606_v4  ;;  %v1678_v39 = vsub.f32 %v16313_v24, %v16314_v41 }
  0xfb   : > { %v1757_v43 = vsel %vm1756_vm11, %v10114_v19, %v1755_v45  ;;  %v1459_v57 = vrot.slane %v1435_v37, 7  ;;  %8489 = vrsqrt.f32 %v10180_v22  ;;  %v1877_v2 = vrot.slane %v10124_v8, 1 }
  0xfc   : > { %v10202_v49 = vsel %vm1758_vm9, %v1759_v60, %v1757_v43  ;;  %v2309_v3 = vsel %vm2308_vm14, %v10116_v34, %v2307_v52  ;;  %v10213_v1 = vrot.slane %v10189_v32, 7  ;;  %8491 = vrsqrt.f32 %v10158_v38  ;;  %v16316_v43 = vld [vmem:[#allocation33_spill] sm:$0xff] }
  0xfd   : > { %16315 = vst [vmem:[#allocation31_spill] sm:$0xff] %v10202_v49  ;;  %v2312_v0 = vsel %vm2310_vm5, %v2311_v50, %v2309_v3  ;;  %v2396_v4 = vrot.slane %v10202_v49, 1  ;;  %v10216_v60 = vadd.f32 %v1459_v57, %v1403_v26  ;;  %v1594_v23 = vmul.f32 %v1582_v58, %v1582_v58 }
  0xfe   : > { %v2444_v19 = vrot.slane %v2312_v0, 6  ;;  %v1642_v45 = vrot.slane %v1618_v7, 1  ;;  %v1690_v52 = vmul.f32 %v1678_v39, %v1678_v39  ;;  %v1870_v62 = vrot.slane %v16316_v43, 1 }
  0xff   : > { %v2469_v37 = vsel %vm2467_vm4, %v2396_v4, %v10213_v1  ;;  %v10224_v50 = vmul.f32 %v10128_v9, %v10128_v9  ;;  %v2194_v26 = vsub.f32 %v9531_v61, %v9531_v61  ;;  %v16317_v58 = vrot.slane %v10103_v48, 6 }
 0x100   : > { %v2482_v3 = vsel %vm2480_vm8, %v2469_v37, %v2444_v19  ;;  %v1666_v39 = vadd.f32 %v1642_v45, %v1594_v23  ;;  %v1714_v4 = vrot.slane %v1690_v52, 7  ;;  %v1894_v28 = vadd.f32 %v1870_v62, %v16316_v43  ;;  %v16319_v19 = vld [vmem:[#allocation12_spill] sm:$0xff] }
 0x101   : > { %v8486_v57 = vpop.eup %8485  ;;  %v10232_v0 = vsub.f32 %v10083_v21, %v16317_v58  ;;  %v2497_v7 = vpack.c.bf16 %v2482_v3, %v2482_v3  ;;  %v1906_v9 = vrot.slane %v16316_v43, 2  ;;  %v2206_v59 = vmul.f32 %v2194_v26, %v2194_v26 }
 0x102   : > { %v1940_v34 = vmul.f32 %v8486_v57, %v10167_v31  ;;  %8493 = vrsqrt.f32 %v10216_v60  ;;  %vm1941_vm5 = vcmp.eq.f32.partialorder %v10167_v31, inf  ;;  %v10240_v48 = vadd.f32 %v1714_v4, %v1666_v39 }
 0x103   : > { %16318 = vst [vmem:[#allocation21_spill] sm:$0xff] %v10232_v0  ;;  %v2529_v37 = vand.u32 %v16319_v19, %v2497_v7  ;;  %v16320_v21 = vrot.slane %v10107_v16, 6  ;;  %v10248_v52 = vadd.f32 %v1906_v9, %v1894_v28  ;;  %v2230_v62 = vrot.slane %v2206_v59, 1 }
 0x104   : > { %v1942_v45 = vsel %vm1941_vm5, %v10167_v31, %v1940_v34  ;;  %v8488_v43 = vpop.eup %8487  ;;  %v10252_v3 = vmul.f32 %v10132_v10, %v10132_v10  ;;  %v3046_v26 = vsub.f32 %v10002_v63, %v9753_v33  ;;  %v1944_v57 = vand.u32 2147483648, %v10167_v31 }
 0x105   : > { %v10245_v23 = vsub.f32 %v10088_v47, %v16320_v21  ;;  %2561 = vmatprep.subr.bf16.mxu0 %v2529_v37  ;;  %8495 = vrsqrt.f32 %v10240_v48  ;;  %v8490_v47 = vpop.eup %8489  ;;  %v1748_v16 = vmul.f32 %v8488_v43, %v10185_v42  ;;  %vm1749_vm9 = vcmp.eq.f32.partialorder %v10185_v42, inf }
 0x106   : > { %vm1751_vm11 = vcmp.eq.f32.partialorder %v10185_v42, 0.0  ;;  %vm1943_vm12 = vcmp.eq.f32.partialorder %v10167_v31, 0.0  ;;  %v1752_v28 = vand.u32 2147483648, %v10185_v42  ;;  %v2300_v34 = vmul.f32 %v8490_v47, %v10180_v22  ;;  %v8492_v58 = vpop.eup %8491 }
 0x107   : > { %16321 = vst [vmem:[#allocation33_spill] sm:$0xff] %v10245_v23  ;;  %v10263_v10 = vsel %vm1943_vm12, %v1944_v57, %v1942_v45  ;;  %8497 = vrsqrt.f32 %v10248_v52  ;;  %v1750_v7 = vsel %vm1749_vm9, %v10185_v42, %v1748_v16  ;;  %vm2301_vm13 = vcmp.eq.f32.partialorder %v10180_v22, inf }
 0x108   : > { %16322 = vst [vmem:[#allocation114_spill] sm:$0xff] %v10263_v10  ;;  %v2304_v39 = vand.u32 2147483648, %v10180_v22  ;;  %v2254_v4 = vadd.f32 %v2230_v62, %v2206_v59  ;;  %v10270_v9 = vsel %vm1751_vm11, %v1752_v28, %v1750_v7  ;;  %v2302_v31 = vsel %vm2301_vm13, %v10180_v22, %v2300_v34 }
 0x109   : > { %16323 = vst [vmem:[#allocation115_spill] sm:$0xff] %v10270_v9  ;;  %vm2303_vm14 = vcmp.eq.f32.partialorder %v10180_v22, 0.0  ;;  %v2266_v37 = vrot.slane %v2206_v59, 2  ;;  %v3860_v21 = vsub.f32 %v9531_v61, %v10002_v63  ;;  %v2395_v43 = vrot.slane %v10270_v9, 1  ;;  %v16336_v61 = vld [vmem:[#allocation32_spill] sm:$0xff] }
 0x10a   : > { %v2305_v45 = vsel %vm2303_vm14, %v2304_v39, %v2302_v31  ;;  %v10278_v42 = vrot.slane %v10263_v10, 7  ;;  %v10281_v57 = vadd.f32 %v1877_v2, %v10124_v8  ;;  %v3864_v62 = vsub.f32 %v9753_v33, %v10002_v63 }
 0x10b   : > { %v2443_v47 = vrot.slane %v2305_v45, 6  ;;  %v10285_v16 = vadd.f32 %v2266_v37, %v2254_v4  ;;  %v10289_v59 = vmul.f32 %v10232_v0, %v10232_v0  ;;  %v10293_v22 = vmul.f32 %v10023_v29, %v10023_v29 }
 0x10c   : > { %16324 = vst [vmem:[#allocation116_spill] sm:$0xff] %v10281_v57  ;;  %v984_v28 = vmul.f32 %v8492_v58, %v10158_v38  ;;  %v2468_v2 = vsel %vm2467_vm4, %v2395_v43, %v10278_v42  ;;  %v8494_v34 = vpop.eup %8493  ;;  %v10298_v7 = vmul.f32 %v3046_v26, %v3046_v26  ;;  %v10302_v39 = vsub.f32 %v9998_v13, %v9998_v13 }
 0x10d   : > { %16325 = vst [vmem:[#allocation117_spill] sm:$0xff] %v10289_v59  ;;  %16326 = vst [vmem:[#allocation118_spill] sm:$0xff] %v10293_v22  ;;  %v2481_v4 = vsel %vm2480_vm8, %v2468_v2, %v2443_v47  ;;  %8499 = vrsqrt.f32 %v10285_v16  ;;  %v10308_v29 = vsub.f32 %v10002_v63, %v10002_v63  ;;  %v10312_v58 = vmul.f32 %v10033_v27, %v10033_v27  ;;  %v16335_v63 = vld [vmem:[#allocation30_spill] sm:$0xff] }
 0x10e   : > { %16327 = vst [vmem:[#allocation119_spill] sm:$0xff] %v10298_v7  ;;  %v10314_v31 = vmul.f32 %v3860_v21, %v3860_v21  ;;  %v2496_v26 = vpack.c.bf16 %v2481_v4, %v2481_v4  ;;  %v10318_v13 = vmul.f32 %v10044_v30, %v10044_v30  ;;  %v10320_v45 = vmul.f32 %v3864_v62, %v3864_v62  ;;  %v16332_v4 = vld [vmem:[#allocation17_spill] sm:$0xff]  ;;  %v16333_v30 = vld [vmem:[#allocation36_spill] sm:$0xff] }
 0x10f   : > { %16328 = vst [vmem:[#allocation120_spill] sm:$0xff] %v10312_v58  ;;  %v8496_v37 = vpop.eup %8495  ;;  %vm985_vm5 = vcmp.eq.f32.partialorder %v10158_v38, inf  ;;  %vm987_vm9 = vcmp.eq.f32.partialorder %v10158_v38, 0.0  ;;  %v1496_v47 = vmul.f32 %v8494_v34, %v10216_v60  ;;  %vm1770_vm11 = vcmp.eq.f32.partialorder %v10240_v48, inf  ;;  %v16334_v62 = vld [vmem:[#allocation20_spill] sm:$0xff] }
 0x110   : > { %16329 = vst [vmem:[#allocation121_spill] sm:$0xff] %v10314_v31  ;;  %16330 = vst [vmem:[#allocation122_spill] sm:$0xff] %v10318_v13  ;;  %v986_v43 = vsel %vm985_vm5, %v10158_v38, %v984_v28  ;;  %v2526_v27 = vand.u32 %v16319_v19, %v2496_v26  ;;  %v1769_v21 = vmul.f32 %v8496_v37, %v10240_v48  ;;  %v1869_v9 = vrot.slane %v16336_v61, 1 }
 0x111   : > { %16331 = vst [vmem:[#allocation123_spill] sm:$0xff] %v10320_v45  ;;  %v8498_v2 = vpop.eup %8497  ;;  %v1605_v59 = vsub.f32 %v16333_v30, %v16332_v4  ;;  %v1677_v33 = vsub.f32 %v16335_v63, %v16334_v62  ;;  %v1773_v34 = vand.u32 2147483648, %v10240_v48  ;;  %v1581_v37 = vsub.f32 %v16335_v63, %v16332_v4 }
 0x112   : > { %2562 = vmatpush1.bf16.msra.mxu0 %v2526_v27  ;;  %v1771_v28 = vsel %vm1770_vm11, %v10240_v48, %v1769_v21  ;;  %v1961_v26 = vmul.f32 %v8498_v2, %v10248_v52  ;;  %vm1772_vm12 = vcmp.eq.f32.partialorder %v10240_v48, 0.0  ;;  %vm1962_vm13 = vcmp.eq.f32.partialorder %v10248_v52, inf }
 0x113   : > { %v1965_v13 = vand.u32 2147483648, %v10248_v52  ;;  %v1617_v45 = vmul.f32 %v1605_v59, %v1605_v59  ;;  %v10342_v58 = vsel %vm1772_vm12, %v1773_v34, %v1771_v28  ;;  %v1689_v8 = vmul.f32 %v1677_v33, %v1677_v33  ;;  %v16339_v59 = vld [vmem:[#allocation34_spill] sm:$0xff] }
 0x114   : > { %16337 = vst [vmem:[#allocation17_spill] sm:$0xff] %v10342_v58  ;;  %v1963_v27 = vsel %vm1962_vm13, %v10248_v52, %v1961_v26  ;;  %v1893_v21 = vadd.f32 %v1869_v9, %v16336_v61  ;;  %v988_v57 = vand.u32 2147483648, %v10158_v38  ;;  %vm1497_vm14 = vcmp.eq.f32.partialorder %v10216_v60, inf }
 0x115   : > { %vm1964_vm5 = vcmp.eq.f32.partialorder %v10248_v52, 0.0  ;;  %v1641_v2 = vrot.slane %v1617_v45, 1  ;;  %v1593_v31 = vmul.f32 %v1581_v37, %v1581_v37  ;;  %v1905_v22 = vrot.slane %v16336_v61, 2 }
 0x116   : > { %v10349_v48 = vsel %vm1964_vm5, %v1965_v13, %v1963_v27  ;;  %v2229_v28 = vrot.slane %v16339_v59, 1  ;;  %v989_v33 = vsel %vm987_vm9, %v988_v57, %v986_v43  ;;  %v1498_v9 = vsel %vm1497_vm14, %v10216_v60, %v1496_v47 }
 0x117   : > { %16338 = vst [vmem:[#allocation36_spill] sm:$0xff] %v10349_v48  ;;  %v8500_v34 = vpop.eup %8499  ;;  %vm2322_vm11 = vcmp.eq.f32.partialorder %v10285_v16, inf  ;;  %v2398_v26 = vrot.slane %v10342_v58, 1  ;;  %v1665_v45 = vadd.f32 %v1641_v2, %v1593_v31  ;;  %v1713_v13 = vrot.slane %v1689_v8, 7  ;;  %v16349_v58 = vld [vmem:[#allocation56_spill] sm:$0xff] }
 0x118   : > { %v2321_v52 = vmul.f32 %v8500_v34, %v10285_v16  ;;  %v10359_v27 = vadd.f32 %v1905_v22, %v1893_v21  ;;  %v2325_v61 = vand.u32 2147483648, %v10285_v16  ;;  %v10363_v37 = vrot.slane %v10349_v48, 7 }
 0x119   : > { %v2253_v38 = vadd.f32 %v2229_v28, %v16339_v59  ;;  %vm2324_vm9 = vcmp.eq.f32.partialorder %v10285_v16, 0.0  ;;  %v10368_v43 = vadd.f32 %v1713_v13, %v1665_v45  ;;  %v15913_v47 = vmov 0  }
 0x11a   : > { %v2323_v57 = vsel %vm2322_vm11, %v10285_v16, %v2321_v52  ;;  %8501 = vrsqrt.f32 %v10359_v27  ;;  %2593 = vmatprep.mubr.bf16.mxu0 %v15913_v47  ;;  %2644 = vmatprep.mubr.bf16.mxu1 %v15913_v47  ;;  %v1500_v8 = vand.u32 2147483648, %v10216_v60  ;;  %v2471_v31 = vsel %vm2467_vm4, %v2398_v26, %v10363_v37  ;;  %v10380_v16 = vld [vmem:[%s15762_s6] sm:$0xff]  }
 0x11b   : > { %v2326_v22 = vsel %vm2324_vm9, %v2325_v61, %v2323_v57  ;;  %v2265_v21 = vrot.slane %v16339_v59, 2  ;;  %8381 = vset.pattern.permute.xlu0 %v15913_v47  ;;  %v10385_v2 = vmul.f32 %v10302_v39, %v10302_v39  ;;  %vm1499_vm12 = vcmp.eq.f32.partialorder %v10216_v60, 0.0  ;;  %v16342_v39 = vld [vmem:[#allocation45_spill] sm:$0xff]  ;;  %v16343_v60 = vld [vmem:[#allocation48_spill] sm:$0xff] }
 0x11c   : > { %v2446_v28 = vrot.slane %v2326_v22, 6  ;;  %8503 = vrsqrt.f32 %v10368_v43  ;;  %v10389_v34 = vsel %vm1499_vm12, %v1500_v8, %v1498_v9  ;;  %v5030_v26 = vrot.slane %v989_v33, 1  ;;  %v16345_v8 = vld [vmem:[#allocation40_spill] sm:$0xff]  ;;  %v16347_v33 = vld [vmem:[#allocation42_spill] sm:$0xff] }
 0x11d   : > { %16340 = vst [vmem:[#allocation20_spill] sm:$0xff] %v10385_v2  ;;  %16341 = vst [vmem:[#allocation30_spill] sm:$0xff] %v10389_v34  ;;  %v10393_v59 = vmul.f32 %v16335_v63, %v16335_v63  ;;  %v10395_v52 = vadd.f32 %v2265_v21, %v2253_v38  ;;  %vm2516_vm13 = vcmask 23552   ;;  %v2024_v13 = vsub.f32 %v16342_v39, %v9468_v35 }
 0x11e   : > { %v2484_v45 = vsel %vm2480_vm8, %v2471_v31, %v2446_v28  ;;  %v2040_v61 = vsub.f32 %v16343_v60, %v9468_v35  ;;  %v10404_v9 = vmul.f32 %v10308_v29, %v10308_v29  ;;  %8232 = vmatmul.mubr.msk.bf16.vlgmr.msra.gmra.mrb[0].mxu0 %vm2516_vm13, %v10380_v16  ;;  %v901_v22 = vrot.slane %v16345_v8, 1  ;;  %v16348_v8 = vld [vmem:[#allocation53_spill] sm:$0xff] }
 0x11f   : > { %v2499_v57 = vpack.c.bf16 %v2484_v45, %v2484_v45  ;;  %8505 = vrsqrt.f32 %v10395_v52  ;;  %2603 = vmatprep.mubr.bf16.mxu0 %v15913_v47  ;;  %v2088_v21 = vsub.f32 %v16342_v39, %v9471_v36  ;;  %v10417_v29 = vsel %vm2467_vm4, %v5030_v26, %v10389_v34  ;;  %v10429_v26 = vld [vmem:[%s15762_s6 + $0x8] ss:$0 sps:$4 sm:$0x33]  }
 0x120   : > { %16344 = vst [vmem:[#allocation32_spill] sm:$0xff] %v10404_v9  ;;  %v2048_v31 = vmul.f32 %v2040_v61, %v2040_v61  ;;  %16346 = vst [vmem:[#allocation34_spill] sm:$0xff] %v10417_v29  ;;  %v2232_v32 = vrot.slane %v16347_v33, 1  ;;  %v2032_v48 = vmul.f32 %v2024_v13, %v2024_v13  ;;  %v2039_v47 = vsub.f32 %v16348_v8, %v9520_v56 }
 0x121   : > { %v2535_v28 = vand.u32 %v16319_v19, %v2499_v57  ;;  %v2096_v49 = vmul.f32 %v2088_v21, %v2088_v21  ;;  %vm1955_vm14 = vcmp.eq.f32.partialorder %v10359_v27, inf  ;;  %v2268_v45 = vrot.slane %v16347_v33, 2 }
 0x122   : > { %v2064_v38 = vrot.slane %v2048_v31, 1  ;;  %v2256_v57 = vadd.f32 %v2232_v32, %v16347_v33  ;;  %v2047_v34 = vmul.f32 %v2039_v47, %v2039_v47  ;;  %v2087_v29 = vsub.f32 %v16349_v58, %v9496_v46 }
 0x123   : > { %2612 = vmatprep.subr.bf16.mxu1 %v2535_v28  ;;  %v2112_v21 = vrot.slane %v2096_v49, 7  ;;  %vm1957_vm5 = vcmp.eq.f32.partialorder %v10359_v27, 0.0  ;;  %v2023_v10 = vsub.f32 %v16349_v58, %v9520_v56  ;;  %vm1763_vm11 = vcmp.eq.f32.partialorder %v10368_v43, inf  ;;  %v16350_v49 = vld [vmem:[#allocation57_spill] sm:$0xff] }
 0x124   : > { %v8502_v13 = vpop.eup %8501  ;;  %v2080_v31 = vadd.f32 %v2064_v38, %v2032_v48  ;;  %v10437_v61 = vadd.f32 %v2268_v45, %v2256_v57  ;;  %v1958_v32 = vand.u32 2147483648, %v10359_v27  ;;  %v2231_v47 = vrot.slane %v16350_v49, 1 }
 0x125   : > { %v1954_v28 = vmul.f32 %v8502_v13, %v10359_v27  ;;  %v2063_v45 = vrot.slane %v2047_v34, 1  ;;  %v1766_v57 = vand.u32 2147483648, %v10368_v43  ;;  %v925_v9 = vadd.f32 %v901_v22, %v10393_v59 }
 0x126   : > { %v8504_v2 = vpop.eup %8503  ;;  %v10443_v48 = vadd.f32 %v2112_v21, %v2080_v31  ;;  %8233 = vmatmul.mubr.msk.bf16.gmra.mrb[4].mxu0 %vm2516_vm13, %v10429_v26  ;;  %8507 = vrsqrt.f32 %v10437_v61  ;;  %v2095_v31 = vmul.f32 %v2087_v29, %v2087_v29  ;;  %v16352_v21 = vmov 0  }
 0x127   : > { %v1762_v33 = vmul.f32 %v8504_v2, %v10368_v43  ;;  %v1956_v38 = vsel %vm1955_vm14, %v10359_v27, %v1954_v28  ;;  %2695 = vmatprep.mubr.bf16.mxu0 %v16352_v21  ;;  %vm1765_vm9 = vcmp.eq.f32.partialorder %v10368_v43, 0.0  ;;  %v2031_v28 = vmul.f32 %v2023_v10, %v2023_v10 }
 0x128   : > { %v10454_v13 = vsel %vm1957_vm5, %v1958_v32, %v1956_v38  ;;  %8509 = vrsqrt.f32 %v10443_v48  ;;  %vm2315_vm12 = vcmp.eq.f32.partialorder %v10395_v52, inf  ;;  %v2255_v29 = vadd.f32 %v2231_v47, %v16350_v49 }
 0x129   : > { %16351 = vst [vmem:[#allocation40_spill] sm:$0xff] %v10454_v13  ;;  %v8506_v2 = vpop.eup %8505  ;;  %v1764_v27 = vsel %vm1763_vm11, %v10368_v43, %v1762_v33  ;;  %v2318_v38 = vand.u32 2147483648, %v10395_v52  ;;  %v10471_v22 = vrot.slane %v10454_v13, 7  ;;  %v2079_v8 = vadd.f32 %v2063_v45, %v2031_v28 }
 0x12a   : > { %v10463_v34 = vsel %vm1765_vm9, %v1766_v57, %v1764_v27  ;;  %v2314_v32 = vmul.f32 %v8506_v2, %v10395_v52  ;;  %vm2317_vm14 = vcmp.eq.f32.partialorder %v10395_v52, 0.0  ;;  %v2111_v10 = vrot.slane %v2095_v31, 7 }
 0x12b   : > { %16353 = vst [vmem:[#allocation42_spill] sm:$0xff] %v10463_v34  ;;  %v2397_v7 = vrot.slane %v10463_v34, 1  ;;  %v2267_v43 = vrot.slane %v16350_v49, 2  ;;  %vm2336_vm5 = vcmp.eq.f32.partialorder %v10437_v61, inf  ;;  %v2042_v47 = vsub.f32 %v9895_v40, %v9564_v15 }
 0x12c   : > { %v2316_v33 = vsel %vm2315_vm12, %v10395_v52, %v2314_v32  ;;  %v10481_v13 = vadd.f32 %v2111_v10, %v2079_v8  ;;  %v2026_v52 = vsub.f32 %v9877_v55, %v9564_v15  ;;  %vm2144_vm11 = vcmp.eq.f32.partialorder %v10443_v48, inf }
 0x12d   : > { %v2319_v57 = vsel %vm2317_vm14, %v2318_v38, %v2316_v33  ;;  %v2470_v2 = vsel %vm2467_vm4, %v2397_v7, %v10471_v22  ;;  %v10483_v45 = vadd.f32 %v2267_v43, %v2255_v29  ;;  %v2050_v49 = vmul.f32 %v2042_v47, %v2042_v47 }
 0x12e   : > { %v2445_v27 = vrot.slane %v2319_v57, 6  ;;  %v2090_v31 = vsub.f32 %v9877_v55, %v16314_v41  ;;  %v2234_v7 = vrot.slane %v9890_v5, 1  ;;  %vm2146_vm9 = vcmp.eq.f32.partialorder %v10443_v48, 0.0 }
 0x12f   : > { %v2147_v8 = vand.u32 2147483648, %v10443_v48  ;;  %8511 = vrsqrt.f32 %v10481_v13  ;;  %vm2338_vm12 = vcmp.eq.f32.partialorder %v10437_v61, 0.0  ;;  %v2339_v38 = vand.u32 2147483648, %v10437_v61 }
 0x130   : > { %v2483_v28 = vsel %vm2480_vm8, %v2470_v2, %v2445_v27  ;;  %v8508_v32 = vpop.eup %8507  ;;  %8513 = vrsqrt.f32 %v10483_v45  ;;  %v2034_v43 = vmul.f32 %v2026_v52, %v2026_v52  ;;  %v2066_v57 = vrot.slane %v2050_v49, 1  ;;  %v16354_v52 = vld [vmem:[#allocation67_spill] sm:$0xff] }
 0x131   : > { %v2498_v29 = vpack.c.bf16 %v2483_v28, %v2483_v28  ;;  %v2335_v10 = vmul.f32 %v8508_v32, %v10437_v61  ;;  %v2270_v2 = vrot.slane %v9890_v5, 2  ;;  %v2098_v34 = vmul.f32 %v2090_v31, %v2090_v31 }
 0x132   : > { %v8510_v33 = vpop.eup %8509  ;;  %v2258_v28 = vadd.f32 %v2234_v7, %v9890_v5  ;;  %v2082_v55 = vadd.f32 %v2066_v57, %v2034_v43  ;;  %v2025_v40 = vsub.f32 %v9868_v54, %v16332_v4  ;;  %v2041_v49 = vsub.f32 %v16354_v52, %v16332_v4 }
 0x133   : > { %v2532_v47 = vand.u32 %v16319_v19, %v2498_v29  ;;  %v2143_v27 = vmul.f32 %v8510_v33, %v10443_v48  ;;  %v2337_v58 = vsel %vm2336_vm5, %v10437_v61, %v2335_v10  ;;  %v2114_v5 = vrot.slane %v2098_v34, 7 }
 0x134   : > { %v2340_v31 = vsel %vm2338_vm12, %v2339_v38, %v2337_v58  ;;  %v10515_v7 = vadd.f32 %v2270_v2, %v2258_v28  ;;  %v16355_v29 = vrot.slane %v10393_v59, 7  ;;  %vm2137_vm14 = vcmp.eq.f32.partialorder %v10481_v13, inf }
 0x135   : > { %2613 = vmatpush1.bf16.msra.mxu1 %v2532_v47  ;;  %v2145_v32 = vsel %vm2144_vm11, %v10443_v48, %v2143_v27  ;;  %v2049_v43 = vmul.f32 %v2041_v49, %v2041_v49  ;;  %vm2139_vm5 = vcmp.eq.f32.partialorder %v10481_v13, 0.0  ;;  %v10525_v47 = vadd.f32 %v2114_v5, %v2082_v55 }
 0x136   : > { %v10519_v33 = vadd.f32 %v16355_v29, %v925_v9  ;;  %v2148_v10 = vsel %vm2146_vm9, %v2147_v8, %v2145_v32  ;;  %8515 = vrsqrt.f32 %v10515_v7  ;;  %v2448_v58 = vrot.slane %v2340_v31, 6  ;;  %v16356_v32 = vld [vmem:[#allocation70_spill] sm:$0xff] }
 0x137   : > { %v2400_v57 = vrot.slane %v2148_v10, 1  ;;  %v2033_v59 = vmul.f32 %v2025_v40, %v2025_v40  ;;  %v2065_v9 = vrot.slane %v2049_v43, 1  ;;  %v2089_v61 = vsub.f32 %v9868_v54, %v16334_v62 }
 0x138   : > { %8234 = vmatmul.mubr.msk.bf16.vlgmr.msra.gmra.mrb[0].mxu1 %vm2516_vm13, %v10380_v16  ;;  %v2140_v34 = vand.u32 2147483648, %v10481_v13  ;;  %vm2329_vm11 = vcmp.eq.f32.partialorder %v10483_v45, inf  ;;  %8517 = vrsqrt.f32 %v10525_v47  ;;  %vm2331_vm9 = vcmp.eq.f32.partialorder %v10483_v45, 0.0 }
 0x139   : > { %2654 = vmatprep.mubr.bf16.mxu1 %v16352_v21  ;;  %v2473_v48 = vsel %vm2467_vm4, %v2400_v57, %v10213_v1  ;;  %v8512_v55 = vpop.eup %8511  ;;  %v2081_v40 = vadd.f32 %v2065_v9, %v2033_v59  ;;  %v2097_v38 = vmul.f32 %v2089_v61, %v2089_v61  ;;  %v2332_v49 = vand.u32 2147483648, %v10483_v45 }
 0x13a   : > { %v2486_v8 = vsel %vm2480_vm8, %v2473_v48, %v2448_v58  ;;  %v8514_v2 = vpop.eup %8513  ;;  %v2136_v28 = vmul.f32 %v8512_v55, %v10481_v13  ;;  %v2233_v31 = vrot.slane %v16356_v32, 1  ;;  %v2269_v10 = vrot.slane %v16356_v32, 2 }
 0x13b   : > { %v2501_v27 = vpack.c.bf16 %v2486_v8, %v2486_v8  ;;  %v2328_v5 = vmul.f32 %v8514_v2, %v10483_v45  ;;  %v2113_v29 = vrot.slane %v2097_v38, 7  ;;  %v2044_v43 = vsub.f32 %v10004_v51, %v9468_v35 }
 0x13c   : > { %v2138_v58 = vsel %vm2137_vm14, %v10481_v13, %v2136_v28  ;;  %v2257_v59 = vadd.f32 %v2233_v31, %v16356_v32  ;;  %v2028_v9 = vsub.f32 %v9992_v12, %v9468_v35  ;;  %v2092_v8 = vsub.f32 %v9992_v12, %v9471_v36 }
 0x13d   : > { %v2541_v57 = vand.u32 %v16319_v19, %v2501_v27  ;;  %v2141_v61 = vsel %vm2139_vm5, %v2140_v34, %v2138_v58  ;;  %v2330_v48 = vsel %vm2329_vm11, %v10483_v45, %v2328_v5  ;;  %v10559_v55 = vadd.f32 %v2113_v29, %v2081_v40 }
 0x13e   : > { %v2333_v38 = vsel %vm2331_vm9, %v2332_v49, %v2330_v48  ;;  %v2399_v2 = vrot.slane %v2141_v61, 1  ;;  %v10565_v27 = vadd.f32 %v2269_v10, %v2257_v59  ;;  %v2052_v35 = vmul.f32 %v2044_v43, %v2044_v43 }
 0x13f   : > { %2663 = vmatprep.subr.bf16.mxu0 %v2541_v57  ;;  %v2447_v13 = vrot.slane %v2333_v38, 6  ;;  %vm2350_vm12 = vcmp.eq.f32.partialorder %v10515_v7, inf  ;;  %vm2352_vm14 = vcmp.eq.f32.partialorder %v10515_v7, 0.0  ;;  %8519 = vrsqrt.f32 %v10559_v55 }
 0x140   : > { %8235 = vmatmul.mubr.msk.bf16.gmra.mrb[4].mxu1 %vm2516_vm13, %v10429_v26  ;;  %v8516_v34 = vpop.eup %8515  ;;  %v2472_v36 = vsel %vm2467_vm4, %v2399_v2, %v10278_v42  ;;  %vm2158_vm5 = vcmp.eq.f32.partialorder %v10525_v47, inf  ;;  %v2353_v45 = vand.u32 2147483648, %v10515_v7  ;;  %8521 = vrsqrt.f32 %v10565_v27 }
 0x141   : > { %2746 = vmatprep.mubr.bf16.mxu1 %v16352_v21  ;;  %v2485_v40 = vsel %vm2480_vm8, %v2472_v36, %v2447_v13  ;;  %vm2160_vm11 = vcmp.eq.f32.partialorder %v10525_v47, 0.0  ;;  %v2349_v28 = vmul.f32 %v8516_v34, %v10515_v7  ;;  %v2036_v49 = vmul.f32 %v2028_v9, %v2028_v9 }
 0x142   : > { %v8518_v32 = vpop.eup %8517  ;;  %v2500_v31 = vpack.c.bf16 %v2485_v40, %v2485_v40  ;;  %v2068_v5 = vrot.slane %v2052_v35, 1  ;;  %v2100_v29 = vmul.f32 %v2092_v8, %v2092_v8  ;;  %v2236_v10 = vrot.slane %v9977_v6, 1 }
 0x143   : > { %v2157_v43 = vmul.f32 %v8518_v32, %v10525_v47  ;;  %v2161_v57 = vand.u32 2147483648, %v10525_v47  ;;  %v2351_v58 = vsel %vm2350_vm12, %v10515_v7, %v2349_v28  ;;  %vm2151_vm9 = vcmp.eq.f32.partialorder %v10559_v55, inf }
 0x144   : > { %v2538_v59 = vand.u32 %v16319_v19, %v2500_v31  ;;  %vm2153_vm6 = vcmp.eq.f32.partialorder %v10559_v55, 0.0  ;;  %v2084_v9 = vadd.f32 %v2068_v5, %v2036_v49  ;;  %v2116_v61 = vrot.slane %v2100_v29, 7 }
 0x145   : > { %v2272_v48 = vrot.slane %v9977_v6, 2  ;;  %v2159_v8 = vsel %vm2158_vm5, %v10525_v47, %v2157_v43  ;;  %v2354_v38 = vsel %vm2352_vm14, %v2353_v45, %v2351_v58  ;;  %v2260_v2 = vadd.f32 %v2236_v10, %v9977_v6 }
 0x146   : > { %v2027_v35 = vsub.f32 %v10046_v53, %v9520_v56  ;;  %2664 = vmatpush1.bf16.msra.mxu0 %v2538_v59  ;;  %v2162_v13 = vsel %vm2160_vm11, %v2161_v57, %v2159_v8  ;;  %v2154_v34 = vand.u32 2147483648, %v10559_v55  ;;  %v10602_v36 = vadd.f32 %v2116_v61, %v2084_v9 }
 0x147   : > { %v2043_v40 = vsub.f32 %v10017_v25, %v9520_v56  ;;  %v2402_v28 = vrot.slane %v2162_v13, 1  ;;  %v10606_v49 = vadd.f32 %v2272_v48, %v2260_v2  ;;  %v2091_v6 = vsub.f32 %v10046_v53, %v9496_v46 }
 0x148   : > { %v2235_v7 = vrot.slane %v10025_v44, 1  ;;  %v2450_v45 = vrot.slane %v2354_v38, 6  ;;  %vm2343_vm12 = vcmp.eq.f32.partialorder %v10565_v27, inf  ;;  %vm2345_vm14 = vcmp.eq.f32.partialorder %v10565_v27, 0.0 }
 0x149   : > { %8523 = vrsqrt.f32 %v10602_v36  ;;  %v8520_v47 = vpop.eup %8519  ;;  %v2475_v32 = vsel %vm2467_vm4, %v2402_v28, %v10363_v37  ;;  %v2346_v56 = vand.u32 2147483648, %v10565_v27  ;;  %8236 = vmatmul.mubr.msk.bf16.vlgmr.msra.gmra.mrb[8].mxu0 %vm2516_vm13, %v10380_v16  ;;  %v2035_v46 = vmul.f32 %v2027_v35, %v2027_v35 }
 0x14a   : > { %8525 = vrsqrt.f32 %v10606_v49  ;;  %v8522_v31 = vpop.eup %8521  ;;  %v2488_v5 = vsel %vm2480_vm8, %v2475_v32, %v2450_v45  ;;  %v2150_v29 = vmul.f32 %v8520_v47, %v10559_v55  ;;  %2705 = vmatprep.mubr.bf16.mxu0 %v16352_v21  ;;  %v2051_v10 = vmul.f32 %v2043_v40, %v2043_v40  ;;  %v16357_v45 = vld [vmem:[#allocation15_spill] sm:$0xff] }
 0x14b   : > { %v2271_v43 = vrot.slane %v10025_v44, 2  ;;  %v2503_v57 = vpack.c.bf16 %v2488_v5, %v2488_v5  ;;  %v2342_v58 = vmul.f32 %v8522_v31, %v10565_v27  ;;  %v2099_v59 = vmul.f32 %v2091_v6, %v2091_v6 }
 0x14c   : > { %v2259_v9 = vadd.f32 %v2235_v7, %v10025_v44  ;;  %v2152_v61 = vsel %vm2151_vm9, %v10559_v55, %v2150_v29  ;;  %v2067_v48 = vrot.slane %v2051_v10, 1  ;;  %v2030_v8 = vsub.f32 %v10139_v11, %v9564_v15 }
 0x14d   : > { %v2046_v38 = vsub.f32 %v10245_v23, %v9564_v15  ;;  %v2547_v2 = vand.u32 %v16319_v19, %v2503_v57  ;;  %v2155_v35 = vsel %vm2153_vm6, %v2154_v34, %v2152_v61  ;;  %v2344_v44 = vsel %vm2343_vm12, %v10565_v27, %v2342_v58 }
 0x14e   : > { %v2115_v13 = vrot.slane %v2099_v59, 7  ;;  %v2347_v40 = vsel %vm2345_vm14, %v2346_v56, %v2344_v44  ;;  %v2401_v28 = vrot.slane %v2155_v35, 1  ;;  %v2083_v6 = vadd.f32 %v2067_v48, %v2035_v46 }
 0x14f   : > { %v10641_v7 = vadd.f32 %v2271_v43, %v2259_v9  ;;  %v10645_v15 = vsub.f32 %v16335_v63, %v16357_v45  ;;  %2714 = vmatprep.subr.bf16.mxu1 %v2547_v2  ;;  %v2449_v47 = vrot.slane %v2347_v40, 6  ;;  %v2054_v55 = vmul.f32 %v2046_v38, %v2046_v38 }
 0x150   : > { %v2094_v34 = vsub.f32 %v10139_v11, %v16314_v41  ;;  %v2474_v32 = vsel %vm2467_vm4, %v2401_v28, %v10471_v22  ;;  %vm2172_vm6 = vcmp.eq.f32.partialorder %v10602_v36, inf  ;;  %v10652_v27 = vadd.f32 %v2115_v13, %v2083_v6 }
 0x151   : > { %8527 = vrsqrt.f32 %v10641_v7  ;;  %v2487_v56 = vsel %vm2480_vm8, %v2474_v32, %v2449_v47  ;;  %8237 = vmatmul.mubr.msk.bf16.gmra.mrb[12].mxu0 %vm2516_vm13, %v10429_v26  ;;  %vm2174_vm5 = vcmp.eq.f32.partialorder %v10602_v36, 0.0  ;;  %v2038_v46 = vmul.f32 %v2030_v8, %v2030_v8 }
 0x152   : > { %v2070_v31 = vrot.slane %v2054_v55, 1  ;;  %v2502_v41 = vpack.c.bf16 %v2487_v56, %v2487_v56  ;;  %v2175_v29 = vand.u32 2147483648, %v10602_v36  ;;  %vm2364_vm11 = vcmp.eq.f32.partialorder %v10606_v49, inf  ;;  %2797 = vmatprep.mubr.bf16.mxu0 %v16352_v21 }
 0x153   : > { %v8524_v5 = vpop.eup %8523  ;;  %8529 = vrsqrt.f32 %v10652_v27  ;;  %vm2366_vm9 = vcmp.eq.f32.partialorder %v10606_v49, 0.0  ;;  %v2102_v58 = vmul.f32 %v2094_v34, %v2094_v34  ;;  %v2367_v61 = vand.u32 2147483648, %v10606_v49 }
 0x154   : > { %v8526_v10 = vpop.eup %8525  ;;  %v2171_v43 = vmul.f32 %v8524_v5, %v10602_v36  ;;  %v2086_v57 = vadd.f32 %v2070_v31, %v2038_v46  ;;  %v2544_v59 = vand.u32 %v16319_v19, %v2502_v41  ;;  %v2238_v48 = vrot.slane %v10252_v3, 1 }
 0x155   : > { %v2363_v9 = vmul.f32 %v8526_v10, %v10606_v49  ;;  %v2118_v38 = vrot.slane %v2102_v58, 7  ;;  %v2274_v2 = vrot.slane %v10252_v3, 2  ;;  %v2045_v35 = vsub.f32 %v10232_v0, %v16332_v4 }
 0x156   : > { %v2173_v8 = vsel %vm2172_vm6, %v10602_v36, %v2171_v43  ;;  %2715 = vmatpush1.bf16.msra.mxu1 %v2544_v59  ;;  %v2262_v40 = vadd.f32 %v2238_v48, %v10252_v3  ;;  %v2093_v28 = vsub.f32 %v10120_v14, %v16334_v62  ;;  %v10685_v6 = vsub.f32 %v16333_v30, %v16357_v45 }
 0x157   : > { %v2176_v44 = vsel %vm2174_vm5, %v2175_v29, %v2173_v8  ;;  %v2365_v13 = vsel %vm2364_vm11, %v10606_v49, %v2363_v9  ;;  %v10689_v34 = vadd.f32 %v2118_v38, %v2086_v57  ;;  %v2029_v56 = vsub.f32 %v10120_v14, %v16332_v4 }
 0x158   : > { %v2368_v47 = vsel %vm2366_vm9, %v2367_v61, %v2365_v13  ;;  %v2404_v55 = vrot.slane %v2176_v44, 1  ;;  %v10691_v32 = vadd.f32 %v2274_v2, %v2262_v40  ;;  %v2053_v3 = vmul.f32 %v2045_v35, %v2045_v35  ;;  %v16358_v61 = vld [vmem:[#allocation41_spill] sm:$0xff] }
 0x159   : > { %v2452_v36 = vrot.slane %v2368_v47, 6  ;;  %8238 = vmatmul.mubr.msk.bf16.vlgmr.msra.gmra.mrb[8].mxu1 %vm2516_vm13, %v10380_v16  ;;  %vm2357_vm12 = vcmp.eq.f32.partialorder %v10641_v7, inf  ;;  %vm2359_vm14 = vcmp.eq.f32.partialorder %v10641_v7, 0.0  ;;  %8531 = vrsqrt.f32 %v10689_v34  ;;  %v16359_v47 = vld [vmem:[#allocation16_spill] sm:$0xff] }
 0x15a   : > { %v2477_v62 = vsel %vm2467_vm4, %v2404_v55, %v10213_v1  ;;  %2756 = vmatprep.mubr.bf16.mxu1 %v16352_v21  ;;  %v2360_v4 = vand.u32 2147483648, %v10641_v7  ;;  %8533 = vrsqrt.f32 %v10691_v32  ;;  %v2101_v31 = vmul.f32 %v2093_v28, %v2093_v28 }
 0x15b   : > { %v8528_v49 = vpop.eup %8527  ;;  %v2490_v46 = vsel %vm2480_vm8, %v2477_v62, %v2452_v36  ;;  %vm2165_vm6 = vcmp.eq.f32.partialorder %v10652_v27, inf  ;;  %vm2167_vm5 = vcmp.eq.f32.partialorder %v10652_v27, 0.0  ;;  %v2168_v29 = vand.u32 2147483648, %v10652_v27 }
 0x15c   : > { %v2505_v5 = vpack.c.bf16 %v2490_v46, %v2490_v46  ;;  %v2356_v1 = vmul.f32 %v8528_v49, %v10641_v7  ;;  %v2037_v10 = vmul.f32 %v2029_v56, %v2029_v56  ;;  %v2069_v43 = vrot.slane %v2053_v3, 1  ;;  %v16360_v49 = vld [vmem:[#allocation27_spill] sm:$0xff]  ;;  %v16361_v46 = vld [vmem:[#allocation28_spill] sm:$0xff] }
 0x15d   : > { %v8530_v41 = vpop.eup %8529  ;;  %v2237_v57 = vrot.slane %v10224_v50, 1  ;;  %v1872_v48 = vrot.slane %v16358_v61, 1  ;;  %v2117_v38 = vrot.slane %v2101_v31, 7  ;;  %v2273_v35 = vrot.slane %v10224_v50, 2 }
 0x15e   : > { %v2553_v58 = vand.u32 %v16319_v19, %v2505_v5  ;;  %v2164_v59 = vmul.f32 %v8530_v41, %v10652_v27  ;;  %v2358_v9 = vsel %vm2357_vm12, %v10641_v7, %v2356_v1  ;;  %v2085_v8 = vadd.f32 %v2069_v43, %v2037_v10 }
 0x15f   : > { %v2261_v2 = vadd.f32 %v2237_v57, %v10224_v50  ;;  %v2361_v13 = vsel %vm2359_vm14, %v2360_v4, %v2358_v9  ;;  %v1896_v40 = vadd.f32 %v1872_v48, %v16358_v61  ;;  %v1908_v28 = vrot.slane %v16358_v61, 2 }
 0x160   : > { %2765 = vmatprep.subr.bf16.mxu0 %v2553_v58  ;;  %v2166_v44 = vsel %vm2165_vm6, %v10652_v27, %v2164_v59  ;;  %v10728_v55 = vsub.f32 %v16335_v63, %v16359_v47  ;;  %v10732_v50 = vadd.f32 %v2117_v38, %v2085_v8  ;;  %8535 = vrsqrt.f32 %v10519_v33 }
 0x161   : > { %v2169_v36 = vsel %vm2167_vm5, %v2168_v29, %v2166_v44  ;;  %v10734_v56 = vadd.f32 %v2273_v35, %v2261_v2  ;;  %8239 = vmatmul.mubr.msk.bf16.gmra.mrb[12].mxu1 %vm2516_vm13, %v10429_v26  ;;  %vm2186_vm11 = vcmp.eq.f32.partialorder %v10689_v34, inf  ;;  %v10740_v3 = vadd.f32 %v1908_v28, %v1896_v40  ;;  %v16362_v2 = vld [vmem:[#allocation46_spill] sm:$0xff] }
 0x162   : > { %v2403_v7 = vrot.slane %v2169_v36, 1  ;;  %v2451_v62 = vrot.slane %v2361_v13, 6  ;;  %8537 = vrsqrt.f32 %v10732_v50  ;;  %v2884_v27 = vsub.f32 %v9568_v18, %v16360_v49  ;;  %2848 = vmatprep.mubr.bf16.mxu1 %v16352_v21 }
 0x163   : > { %v2932_v4 = vsub.f32 %v9566_v17, %v16361_v46  ;;  %v8532_v31 = vpop.eup %8531  ;;  %vm2188_vm9 = vcmp.eq.f32.partialorder %v10689_v34, 0.0  ;;  %v2189_v1 = vand.u32 2147483648, %v10689_v34  ;;  %8539 = vrsqrt.f32 %v10734_v56 }
 0x164   : > { %v2476_v5 = vsel %vm2467_vm4, %v2403_v7, %v10278_v42  ;;  %v8534_v41 = vpop.eup %8533  ;;  %v2185_v10 = vmul.f32 %v8532_v31, %v10689_v34  ;;  %8541 = vrsqrt.f32 %v10740_v3  ;;  %v2868_v43 = vsub.f32 %v9566_v17, %v16360_v49 }
 0x165   : > { %v2489_v29 = vsel %vm2480_vm8, %v2476_v5, %v2451_v62  ;;  %v2377_v58 = vmul.f32 %v8534_v41, %v10691_v32  ;;  %vm2378_vm12 = vcmp.eq.f32.partialorder %v10691_v32, inf  ;;  %vm2380_vm14 = vcmp.eq.f32.partialorder %v10691_v32, 0.0 }
 0x166   : > { %v2504_v57 = vpack.c.bf16 %v2489_v29, %v2489_v29  ;;  %v2187_v42 = vsel %vm2186_vm11, %v10689_v34, %v2185_v10  ;;  %v2381_v59 = vand.u32 2147483648, %v10691_v32  ;;  %v2892_v9 = vmul.f32 %v2884_v27, %v2884_v27  ;;  %v16363_v27 = vld [vmem:[#allocation69_spill] sm:$0xff] }
 0x167   : > { %v2940_v61 = vmul.f32 %v2932_v4, %v2932_v4  ;;  %v2190_v8 = vsel %vm2188_vm9, %v2189_v1, %v2187_v42  ;;  %v2379_v38 = vsel %vm2378_vm12, %v10691_v32, %v2377_v58  ;;  %v3072_v35 = vrot.slane %v16362_v2, 1 }
 0x168   : > { %v2550_v48 = vand.u32 %v16319_v19, %v2504_v57  ;;  %v2382_v44 = vsel %vm2380_vm14, %v2381_v59, %v2379_v38  ;;  %v2406_v13 = vrot.slane %v2190_v8, 1  ;;  %v2876_v40 = vmul.f32 %v2868_v43, %v2868_v43  ;;  %v16364_v59 = vld [vmem:[#allocation52_spill] sm:$0xff] }
 0x169   : > { %v2908_v28 = vrot.slane %v2892_v9, 1  ;;  %v2454_v36 = vrot.slane %v2382_v44, 6  ;;  %v3096_v7 = vadd.f32 %v3072_v35, %v16362_v2  ;;  %v3108_v62 = vrot.slane %v16362_v2, 2 }
 0x16a   : > { %2766 = vmatpush1.bf16.msra.mxu0 %v2550_v48  ;;  %v1874_v4 = vrot.slane %v16363_v27, 1  ;;  %v10775_v34 = vmul.f32 %v10645_v15, %v10645_v15  ;;  %v2479_v32 = vsel %vm2467_vm4, %v2406_v13, %v10363_v37  ;;  %v2956_v5 = vrot.slane %v2940_v61, 7  ;;  %v10779_v1 = vpop.eup %8535 }
 0x16b   : > { %v2924_v31 = vadd.f32 %v2908_v28, %v2876_v40  ;;  %v2492_v41 = vsel %vm2480_vm8, %v2479_v32, %v2454_v36  ;;  %vm2179_vm6 = vcmp.eq.f32.partialorder %v10732_v50, inf  ;;  %vm2181_vm5 = vcmp.eq.f32.partialorder %v10732_v50, 0.0  ;;  %v16365_v36 = vld [vmem:[#allocation54_spill] sm:$0xff] }
 0x16c   : > { %v10784_v29 = vadd.f32 %v3108_v62, %v3096_v7  ;;  %v8538_v10 = vpop.eup %8537  ;;  %v2507_v43 = vpack.c.bf16 %v2492_v41, %v2492_v41  ;;  %v2182_v15 = vand.u32 2147483648, %v10732_v50  ;;  %v1898_v37 = vadd.f32 %v1874_v4, %v16363_v27 }
 0x16d   : > { %v10787_v57 = vadd.f32 %v2956_v5, %v2924_v31  ;;  %8240 = vmatmul.mubr.msk.bf16.vlgmr.msra.gmra.mrb[16].mxu0 %vm2516_vm13, %v10380_v16  ;;  %v8540_v58 = vpop.eup %8539  ;;  %v2178_v42 = vmul.f32 %v8538_v10, %v10732_v50  ;;  %vm2371_vm11 = vcmp.eq.f32.partialorder %v10734_v56, inf  ;;  %v2886_v9 = vsub.f32 %v9692_v20, %v16364_v59 }
 0x16e   : > { %8543 = vrsqrt.f32 %v10784_v29  ;;  %2807 = vmatprep.mubr.bf16.mxu0 %v16352_v21  ;;  %v8542_v61 = vpop.eup %8541  ;;  %v2559_v48 = vand.u32 %v16319_v19, %v2507_v43  ;;  %v2370_v8 = vmul.f32 %v8540_v58, %v10734_v56  ;;  %v1910_v38 = vrot.slane %v16363_v27, 2 }
 0x16f   : > { %8545 = vrsqrt.f32 %v10787_v57  ;;  %v2180_v2 = vsel %vm2179_vm6, %v10732_v50, %v2178_v42  ;;  %vm2373_vm9 = vcmp.eq.f32.partialorder %v10734_v56, 0.0  ;;  %v2374_v35 = vand.u32 2147483648, %v10734_v56 }
 0x170   : > { %v2870_v44 = vsub.f32 %v16313_v24, %v16364_v59  ;;  %2816 = vmatprep.subr.bf16.mxu1 %v2559_v48  ;;  %v2183_v13 = vsel %vm2181_vm5, %v2182_v15, %v2180_v2  ;;  %v2372_v40 = vsel %vm2371_vm11, %v10734_v56, %v2370_v8  ;;  %v10812_v28 = vadd.f32 %v1910_v38, %v1898_v37  ;;  %v16366_v15 = vld [vmem:[#allocation77_spill] sm:$0xff] }
 0x171   : > { %v2934_v7 = vsub.f32 %v16313_v24, %v16365_v36  ;;  %v2375_v62 = vsel %vm2373_vm9, %v2374_v35, %v2372_v40  ;;  %v2405_v27 = vrot.slane %v2183_v13, 1  ;;  %v1975_v4 = vmul.f32 %v8542_v61, %v10740_v3  ;;  %v16368_v61 = vld [vmem:[#allocation43_spill] sm:$0xff]  ;;  %v16371_v13 = vld [vmem:[#allocation22_spill] sm:$0xff] }
 0x172   : > { %v2894_v32 = vmul.f32 %v2886_v9, %v2886_v9  ;;  %v2453_v31 = vrot.slane %v2375_v62, 6  ;;  %vm1976_vm12 = vcmp.eq.f32.partialorder %v10740_v3, inf  ;;  %vm1978_vm14 = vcmp.eq.f32.partialorder %v10740_v3, 0.0 }
 0x173   : > { %8547 = vrsqrt.f32 %v10812_v28  ;;  %v2478_v50 = vsel %vm2467_vm4, %v2405_v27, %v10471_v22  ;;  %v1979_v56 = vand.u32 2147483648, %v10740_v3  ;;  %vm3152_vm6 = vcmp.eq.f32.partialorder %v10784_v29, inf  ;;  %v16367_v22 = vld [vmem:[#allocation58_spill] sm:$0xff] }
 0x174   : > { %v2878_v5 = vmul.f32 %v2870_v44, %v2870_v44  ;;  %v2491_v41 = vsel %vm2480_vm8, %v2478_v50, %v2453_v31  ;;  %v2910_v10 = vrot.slane %v2894_v32, 1  ;;  %v2942_v43 = vmul.f32 %v2934_v7, %v2934_v7  ;;  %v16370_v44 = vld [vmem:[#allocation38_spill] sm:$0xff] }
 0x175   : > { %v3074_v37 = vrot.slane %v16366_v15, 1  ;;  %8241 = vmatmul.mubr.msk.bf16.gmra.mrb[20].mxu0 %vm2516_vm13, %v10429_v26  ;;  %v2506_v58 = vpack.c.bf16 %v2491_v41, %v2491_v41  ;;  %v1977_v42 = vsel %vm1976_vm12, %v10740_v3, %v1975_v4  ;;  %v3110_v9 = vrot.slane %v16366_v15, 2 }
 0x176   : > { %v16369_v48 = vrot.slane %v16368_v61, 2  ;;  %3415 = vmatprep.mubr.bf16.mxu0 %v16352_v21  ;;  %v2926_v38 = vadd.f32 %v2910_v10, %v2878_v5  ;;  %v2958_v2 = vrot.slane %v2942_v43, 7  ;;  %v2883_v40 = vsub.f32 %v16371_v13, %v16370_v44  ;;  %v16373_v10 = vld [vmem:[#allocation26_spill] sm:$0xff] }
 0x177   : > { %v3098_v35 = vadd.f32 %v3074_v37, %v16366_v15  ;;  %v2556_v62 = vand.u32 %v16319_v19, %v2506_v58  ;;  %vm2988_vm5 = vcmp.eq.f32.partialorder %v10787_v57, inf  ;;  %vm3154_vm11 = vcmp.eq.f32.partialorder %v10784_v29, 0.0 }
 0x178   : > { %v10833_v8 = vadd.f32 %v16369_v48, %v16367_v22  ;;  %v8544_v7 = vpop.eup %8543  ;;  %v3155_v32 = vand.u32 2147483648, %v10784_v29  ;;  %v10845_v31 = vadd.f32 %v2958_v2, %v2926_v38  ;;  %v10851_v5 = vsel %vm1978_vm14, %v1979_v56, %v1977_v42 }
 0x179   : > { %v8546_v27 = vpop.eup %8545  ;;  %v3151_v4 = vmul.f32 %v8544_v7, %v10784_v29  ;;  %v10847_v50 = vadd.f32 %v3110_v9, %v3098_v35  ;;  %2817 = vmatpush1.bf16.msra.mxu1 %v2556_v62  ;;  %16372 = vst [vmem:[#allocation57_spill] sm:$0xff] %v10851_v5  ;;  %v2867_v43 = vsub.f32 %v16373_v10, %v16370_v44  ;;  %v2991_v37 = vand.u32 2147483648, %v10787_v57  ;;  %v16374_v9 = vld [vmem:[#allocation35_spill] sm:$0xff] }
 0x17a   : > { %8549 = vrsqrt.f32 %v10833_v8  ;;  %v2987_v41 = vmul.f32 %v8546_v27, %v10787_v57  ;;  %v2891_v15 = vmul.f32 %v2883_v40, %v2883_v40  ;;  %v2931_v22 = vsub.f32 %v16373_v10, %v16374_v9  ;;  %v16375_v7 = vld [vmem:[#allocation59_spill] sm:$0xff] }
 0x17b   : > { %v3153_v58 = vsel %vm3152_vm6, %v10784_v29, %v3151_v4  ;;  %8551 = vrsqrt.f32 %v10845_v31  ;;  %vm2990_vm9 = vcmp.eq.f32.partialorder %v10787_v57, 0.0  ;;  %v10871_v48 = vrot.slane %v10851_v5, 7  ;;  %v16376_v27 = vld [vmem:[#allocation75_spill] sm:$0xff]  ;;  %v16377_v4 = vld [vmem:[#allocation62_spill] sm:$0xff] }
 0x17c   : > { %v2989_v3 = vsel %vm2988_vm5, %v10787_v57, %v2987_v41  ;;  %v3156_v56 = vsel %vm3154_vm11, %v3155_v32, %v3153_v58  ;;  %8553 = vrsqrt.f32 %v10847_v50  ;;  %vm1990_vm12 = vcmp.eq.f32.partialorder %v10812_v28, inf  ;;  %8242 = vmatmul.mubr.msk.bf16.vlgmr.msra.gmra.mrb[16].mxu1 %vm2516_vm13, %v10380_v16 }
 0x17d   : > { %v8548_v42 = vpop.eup %8547  ;;  %v2992_v61 = vsel %vm2990_vm9, %v2991_v37, %v2989_v3  ;;  %vm1992_vm14 = vcmp.eq.f32.partialorder %v10812_v28, 0.0  ;;  %v2875_v2 = vmul.f32 %v2867_v43, %v2867_v43  ;;  %v2907_v29 = vrot.slane %v2891_v15, 1  ;;  %2858 = vmatprep.mubr.bf16.mxu1 %v16352_v21 }
 0x17e   : > { %v3240_v38 = vrot.slane %v2992_v61, 1  ;;  %v1989_v57 = vmul.f32 %v8548_v42, %v10812_v28  ;;  %v3288_v35 = vrot.slane %v3156_v56, 6  ;;  %v2939_v40 = vmul.f32 %v2931_v22, %v2931_v22 }
 0x17f   : > { %v3071_v62 = vrot.slane %v16375_v7, 1  ;;  %v16378_v32 = vrot.slane %v16377_v4, 2  ;;  %v1993_v16 = vand.u32 2147483648, %v10812_v28  ;;  %v2923_v58 = vadd.f32 %v2907_v29, %v2875_v2 }
 0x180   : > { %v3312_v37 = vsel %vm2467_vm4, %v3240_v38, %v10871_v48  ;;  %v3107_v43 = vrot.slane %v16375_v7, 2  ;;  %v1991_v22 = vsel %vm1990_vm12, %v10812_v28, %v1989_v57  ;;  %v2955_v3 = vrot.slane %v2939_v40, 7 }
 0x181   : > { %v10883_v41 = vadd.f32 %v16378_v32, %v16376_v27  ;;  %v3324_v15 = vsel %vm2480_vm8, %v3312_v37, %v3288_v35  ;;  %v3095_v56 = vadd.f32 %v3071_v62, %v16375_v7  ;;  %vm1969_vm6 = vcmp.eq.f32.partialorder %v10833_v8, inf  ;;  %v16379_v35 = vld [vmem:[#allocation50_spill] sm:$0xff] }
 0x182   : > { %v3336_v61 = vpack.c.bf16 %v3324_v15, %v3324_v15  ;;  %v1972_v38 = vand.u32 2147483648, %v10833_v8  ;;  %vm3002_vm5 = vcmp.eq.f32.partialorder %v10845_v31, inf  ;;  %v10898_v2 = vadd.f32 %v2955_v3, %v2923_v58 }
 0x183   : > { %8555 = vrsqrt.f32 %v10883_v41  ;;  %v10900_v29 = vadd.f32 %v3107_v43, %v3095_v56  ;;  %v2869_v57 = vsub.f32 %v16335_v63, %v16379_v35  ;;  %v10907_v7 = vsel %vm1992_vm14, %v1993_v16, %v1991_v22 }
 0x184   : > { %v8550_v42 = vpop.eup %8549  ;;  %v3351_v40 = vand.u32 %v3336_v61, %v16319_v19  ;;  %16380 = vst [vmem:[#allocation70_spill] sm:$0xff] %v10907_v7  ;;  %vm1971_vm11 = vcmp.eq.f32.partialorder %v10833_v8, 0.0  ;;  %v2885_v27 = vsub.f32 %v16333_v30, %v16379_v35  ;;  %vm3004_vm9 = vcmp.eq.f32.partialorder %v10845_v31, 0.0  ;;  %8243 = vmatmul.mubr.msk.bf16.gmra.mrb[20].mxu1 %vm2516_vm13, %v10429_v26 }
 0x185   : > { %v1968_v62 = vmul.f32 %v8550_v42, %v10833_v8  ;;  %v8552_v4 = vpop.eup %8551  ;;  %v3005_v32 = vand.u32 2147483648, %v10845_v31  ;;  %vm3166_vm12 = vcmp.eq.f32.partialorder %v10847_v50, inf  ;;  %8557 = vrsqrt.f32 %v10898_v2  ;;  %3466 = vmatprep.mubr.bf16.mxu1 %v16352_v21  ;;  %v16381_v42 = vld [vmem:[#allocation51_spill] sm:$0xff] }
 0x186   : > { %v8554_v28 = vpop.eup %8553  ;;  %3383 = vmatprep.subr.bf16.mxu0 %v3351_v40  ;;  %v3001_v37 = vmul.f32 %v8552_v4, %v10845_v31  ;;  %vm3168_vm14 = vcmp.eq.f32.partialorder %v10847_v50, 0.0  ;;  %v3169_v16 = vand.u32 2147483648, %v10847_v50  ;;  %8559 = vrsqrt.f32 %v10900_v29 }
 0x187   : > { %v3165_v58 = vmul.f32 %v8554_v28, %v10847_v50  ;;  %v10926_v43 = vrot.slane %v10907_v7, 7  ;;  %v2877_v26 = vmul.f32 %v2869_v57, %v2869_v57  ;;  %v1970_v3 = vsel %vm1969_vm6, %v10833_v8, %v1968_v62  ;;  %v16382_v57 = vld [vmem:[#allocation76_spill] sm:$0xff] }
 0x188   : > { %v3003_v22 = vsel %vm3002_vm5, %v10845_v31, %v3001_v37  ;;  %v2893_v56 = vmul.f32 %v2885_v27, %v2885_v27  ;;  %v2933_v61 = vsub.f32 %v16335_v63, %v16381_v42  ;;  %vm2981_vm3 = vcmp.eq.f32.partialorder %v10898_v2, inf }
 0x189   : > { %v3006_v40 = vsel %vm3004_vm9, %v3005_v32, %v3003_v22  ;;  %v3167_v4 = vsel %vm3166_vm12, %v10847_v50, %v3165_v58  ;;  %vm1983_vm2 = vcmp.eq.f32.partialorder %v10883_v41, inf  ;;  %v3073_v28 = vrot.slane %v16382_v57, 1 }
 0x18a   : > { %v3170_v62 = vsel %vm3168_vm14, %v3169_v16, %v3167_v4  ;;  %v3242_v27 = vrot.slane %v3006_v40, 1  ;;  %v2909_v37 = vrot.slane %v2893_v56, 1  ;;  %v2941_v15 = vmul.f32 %v2933_v61, %v2933_v61 }
 0x18b   : > { %v3290_v47 = vrot.slane %v3170_v62, 6  ;;  %v3097_v31 = vadd.f32 %v3073_v28, %v16382_v57  ;;  %v3109_v32 = vrot.slane %v16382_v57, 2  ;;  %v1608_v58 = vsub.f32 %v16343_v60, %v16360_v49 }
 0x18c   : > { %v3314_v45 = vsel %vm2467_vm4, %v3242_v27, %v10926_v43  ;;  %v2925_v7 = vadd.f32 %v2909_v37, %v2877_v26  ;;  %v2957_v5 = vrot.slane %v2941_v15, 7  ;;  %v1680_v50 = vsub.f32 %v16342_v39, %v16361_v46 }
 0x18d   : > { %v8556_v22 = vpop.eup %8555  ;;  %v3326_v16 = vsel %vm2480_vm8, %v3314_v45, %v3290_v47  ;;  %v10958_v56 = vsel %vm1971_vm11, %v1972_v38, %v1970_v3  ;;  %v10960_v61 = vadd.f32 %v3109_v32, %v3097_v31  ;;  %v1584_v40 = vsub.f32 %v16342_v39, %v16360_v49 }
 0x18e   : > { %16383 = vst [vmem:[#allocation41_spill] sm:$0xff] %v10958_v56  ;;  %v3338_v4 = vpack.c.bf16 %v3326_v16, %v3326_v16  ;;  %v1982_v57 = vmul.f32 %v8556_v22, %v10883_v41  ;;  %v10965_v28 = vadd.f32 %v2957_v5, %v2925_v7  ;;  %v1620_v15 = vmul.f32 %v1608_v58, %v1608_v58 }
 0x18f   : > { %v8558_v26 = vpop.eup %8557  ;;  %vm2983_vm6 = vcmp.eq.f32.partialorder %v10898_v2, 0.0  ;;  %v2984_v45 = vand.u32 2147483648, %v10898_v2  ;;  %vm3145_vm5 = vcmp.eq.f32.partialorder %v10900_v29, inf  ;;  %vm1985_vm11 = vcmp.eq.f32.partialorder %v10883_v41, 0.0 }
 0x190   : > { %8561 = vrsqrt.f32 %v10960_v61  ;;  %v8560_v47 = vpop.eup %8559  ;;  %v3357_v8 = vand.u32 %v3338_v4, %v16319_v19  ;;  %v2980_v38 = vmul.f32 %v8558_v26, %v10898_v2  ;;  %v1692_v5 = vmul.f32 %v1680_v50, %v1680_v50  ;;  %v16384_v50 = vld [vmem:[#allocation47_spill] sm:$0xff] }
 0x191   : > { %8563 = vrsqrt.f32 %v10965_v28  ;;  %v3144_v7 = vmul.f32 %v8560_v47, %v10900_v29  ;;  %vm3147_vm9 = vcmp.eq.f32.partialorder %v10900_v29, 0.0  ;;  %v3148_v3 = vand.u32 2147483648, %v10900_v29 }
 0x192   : > { %v10979_v62 = vrot.slane %v10958_v56, 7  ;;  %3434 = vmatprep.subr.bf16.mxu1 %v3357_v8  ;;  %v2982_v27 = vsel %vm2981_vm3, %v10898_v2, %v2980_v38  ;;  %v1984_v37 = vsel %vm1983_vm2, %v10883_v41, %v1982_v57  ;;  %v1596_v31 = vmul.f32 %v1584_v40, %v1584_v40 }
 0x193   : > { %v1644_v32 = vrot.slane %v1620_v15, 1  ;;  %v2985_v58 = vsel %vm2983_vm6, %v2984_v45, %v2982_v27  ;;  %v3146_v22 = vsel %vm3145_vm5, %v10900_v29, %v3144_v7  ;;  %vm3159_vm12 = vcmp.eq.f32.partialorder %v10960_v61, inf  ;;  %v16385_v15 = vld [vmem:[#allocation72_spill] sm:$0xff] }
 0x194   : > { %v3076_v16 = vrot.slane %v16384_v50, 1  ;;  %v3149_v4 = vsel %vm3147_vm9, %v3148_v3, %v3146_v22  ;;  %v3239_v26 = vrot.slane %v2985_v58, 1  ;;  %vm3161_vm3 = vcmp.eq.f32.partialorder %v10960_v61, 0.0  ;;  %v16386_v7 = vld [vmem:[#allocation68_spill] sm:$0xff] }
 0x195   : > { %v1668_v47 = vadd.f32 %v1644_v32, %v1596_v31  ;;  %v1716_v8 = vrot.slane %v1692_v5, 7  ;;  %v3287_v57 = vrot.slane %v3149_v4, 6  ;;  %v3112_v2 = vrot.slane %v16384_v50, 2  ;;  %v16387_v58 = vld [vmem:[#allocation80_spill] sm:$0xff] }
 0x196   : > { %v3100_v40 = vadd.f32 %v3076_v16, %v16384_v50  ;;  %v1610_v45 = vsub.f32 %v16385_v15, %v16364_v59  ;;  %v3311_v29 = vsel %vm2467_vm4, %v3239_v26, %v10979_v62  ;;  %v1586_v3 = vsub.f32 %v16386_v7, %v16364_v59  ;;  %v16390_v15 = vld [vmem:[#allocation56_spill] sm:$0xff] }
 0x197   : > { %v11001_v38 = vadd.f32 %v1716_v8, %v1668_v47  ;;  %v1682_v27 = vsub.f32 %v16386_v7, %v16365_v36  ;;  %v3323_v5 = vsel %vm2480_vm8, %v3311_v29, %v3287_v57  ;;  %v3078_v22 = vrot.slane %v16387_v58, 1 }
 0x198   : > { %v11008_v31 = vadd.f32 %v3112_v2, %v3100_v40  ;;  %v1622_v32 = vmul.f32 %v1610_v45, %v1610_v45  ;;  %v3335_v50 = vpack.c.bf16 %v3323_v5, %v3323_v5  ;;  %v16388_v16 = vand.u32 2147483648, %v10883_v41 }
 0x199   : > { %vm2995_vm2 = vcmp.eq.f32.partialorder %v10965_v28, inf  ;;  %8565 = vrsqrt.f32 %v11001_v38  ;;  %vm2997_vm14 = vcmp.eq.f32.partialorder %v10965_v28, 0.0  ;;  %v2998_v47 = vand.u32 2147483648, %v10965_v28 }
 0x19a   : > { %v11015_v4 = vsel %vm1985_vm11, %v16388_v16, %v1984_v37  ;;  %v8562_v26 = vpop.eup %8561  ;;  %v3162_v8 = vand.u32 2147483648, %v10960_v61  ;;  %8567 = vrsqrt.f32 %v11008_v31  ;;  %v3348_v40 = vand.u32 %v3335_v50, %v16319_v19 }
 0x19b   : > { %16389 = vst [vmem:[#allocation27_spill] sm:$0xff] %v11015_v4  ;;  %v8564_v57 = vpop.eup %8563  ;;  %v3158_v41 = vmul.f32 %v8562_v26, %v10960_v61  ;;  %v1598_v37 = vmul.f32 %v1586_v3, %v1586_v3  ;;  %v1646_v2 = vrot.slane %v1622_v32, 1  ;;  %v1694_v29 = vmul.f32 %v1682_v27, %v1682_v27  ;;  %v16391_v26 = vld [vmem:[#allocation53_spill] sm:$0xff] }
 0x19c   : > { %v2994_v45 = vmul.f32 %v8564_v57, %v10965_v28  ;;  %v3102_v5 = vadd.f32 %v3078_v22, %v16387_v58  ;;  %v3114_v16 = vrot.slane %v16387_v58, 2  ;;  %3384 = vmatpush1.bf16.msra.mxu0 %v3348_v40  ;;  %v1583_v50 = vsub.f32 %v16390_v15, %v16370_v44 }
 0x19d   : > { %v3160_v56 = vsel %vm3159_vm12, %v10960_v61, %v3158_v41  ;;  %v1670_v7 = vadd.f32 %v1646_v2, %v1598_v37  ;;  %v1607_v3 = vsub.f32 %v16391_v26, %v16370_v44  ;;  %v1718_v58 = vrot.slane %v1694_v29, 7 }
 0x19e   : > { %v2996_v27 = vsel %vm2995_vm2, %v10965_v28, %v2994_v45  ;;  %v3163_v32 = vsel %vm3161_vm3, %v3162_v8, %v3160_v56  ;;  %v11040_v22 = vadd.f32 %v3114_v16, %v3102_v5  ;;  %v11044_v57 = vmul.f32 %v10685_v6, %v10685_v6  ;;  %v11061_v6 = vld [vmem:[%s15762_s6] sm:$0xff]  }
 0x19f   : > { %v11048_v40 = vmul.f32 %v10728_v55, %v10728_v55  ;;  %v2999_v41 = vsel %vm2997_vm14, %v2998_v47, %v2996_v27  ;;  %v1619_v37 = vmul.f32 %v1607_v3, %v1607_v3  ;;  %v11053_v45 = vrot.slane %v11015_v4, 7  ;;  %8244 = vmatmul.mubr.msk.bf16.vlgmr.msra.gmra.mrb[24].mxu0 %vm2516_vm13, %v11061_v6 }
 0x1a0   : > { %v3241_v2 = vrot.slane %v2999_v41, 1  ;;  %v11055_v56 = vadd.f32 %v1718_v58, %v1670_v7  ;;  %8569 = vrsqrt.f32 %v11040_v22  ;;  %v3289_v55 = vrot.slane %v3163_v32, 6  ;;  %3425 = vmatprep.mubr.bf16.mxu0 %v16352_v21  ;;  %v16392_v58 = vld [vmem:[#allocation60_spill] sm:$0xff] }
 0x1a1   : > { %v1595_v61 = vmul.f32 %v1583_v50, %v1583_v50  ;;  %v1643_v28 = vrot.slane %v1619_v37, 1  ;;  %v1679_v47 = vsub.f32 %v16390_v15, %v16374_v9  ;;  %vm1784_vm6 = vcmp.eq.f32.partialorder %v11001_v38, inf }
 0x1a2   : > { %v3313_v7 = vsel %vm2467_vm4, %v3241_v2, %v11053_v45  ;;  %vm1786_vm5 = vcmp.eq.f32.partialorder %v11001_v38, 0.0  ;;  %8571 = vrsqrt.f32 %v11055_v56  ;;  %v1787_v5 = vand.u32 2147483648, %v11001_v38 }
 0x1a3   : > { %v8566_v8 = vpop.eup %8565  ;;  %v3325_v29 = vsel %vm2480_vm8, %v3313_v7, %v3289_v55  ;;  %v1667_v16 = vadd.f32 %v1643_v28, %v1595_v61  ;;  %v1691_v50 = vmul.f32 %v1679_v47, %v1679_v47  ;;  %vm3180_vm11 = vcmp.eq.f32.partialorder %v11008_v31, inf }
 0x1a4   : > { %v8568_v3 = vpop.eup %8567  ;;  %v3337_v27 = vpack.c.bf16 %v3325_v29, %v3325_v29  ;;  %v1783_v32 = vmul.f32 %v8566_v8, %v11001_v38  ;;  %v3075_v41 = vrot.slane %v16392_v58, 1  ;;  %vm3182_vm9 = vcmp.eq.f32.partialorder %v11008_v31, 0.0 }
 0x1a5   : > { %v3179_v37 = vmul.f32 %v8568_v3, %v11008_v31  ;;  %v3183_v2 = vand.u32 2147483648, %v11008_v31  ;;  %v1715_v4 = vrot.slane %v1691_v50, 7  ;;  %v3111_v47 = vrot.slane %v16392_v58, 2 }
 0x1a6   : > { %v3354_v55 = vand.u32 %v3337_v27, %v16319_v19  ;;  %v1785_v61 = vsel %vm1784_vm6, %v11001_v38, %v1783_v32  ;;  %v3099_v28 = vadd.f32 %v3075_v41, %v16392_v58  ;;  %v1609_v50 = vsub.f32 %v16354_v52, %v16379_v35  ;;  %v11104_v38 = vld [vmem:[%s15762_s6 + $0x8] ss:$0 sps:$4 sm:$0x33]  }
 0x1a7   : > { %v11089_v7 = vsel %vm1786_vm5, %v1787_v5, %v1785_v61  ;;  %v3181_v8 = vsel %vm3180_vm11, %v11008_v31, %v3179_v37  ;;  %v11092_v29 = vadd.f32 %v1715_v4, %v1667_v16  ;;  %v1681_v58 = vsub.f32 %v9868_v54, %v16381_v42  ;;  %8245 = vmatmul.mubr.msk.bf16.gmra.mrb[28].mxu0 %vm2516_vm13, %v11104_v38 }
 0x1a8   : > { %16393 = vst [vmem:[#allocation28_spill] sm:$0xff] %v11089_v7  ;;  %3435 = vmatpush1.bf16.msra.mxu1 %v3354_v55  ;;  %v3184_v3 = vsel %vm3182_vm9, %v3183_v2, %v3181_v8  ;;  %v3244_v27 = vrot.slane %v11089_v7, 1  ;;  %v11097_v32 = vadd.f32 %v3111_v47, %v3099_v28  ;;  %vm3194_vm12 = vcmp.eq.f32.partialorder %v11040_v22, inf  ;;  %3517 = vmatprep.mubr.bf16.mxu0 %v16352_v21  ;;  %v16394_v8 = vld [vmem:[#allocation78_spill] sm:$0xff] }
 0x1a9   : > { %v3292_v31 = vrot.slane %v3184_v3, 6  ;;  %8573 = vrsqrt.f32 %v11092_v29  ;;  %v1585_v4 = vsub.f32 %v9868_v54, %v16379_v35  ;;  %vm3196_vm3 = vcmp.eq.f32.partialorder %v11040_v22, 0.0 }
 0x1aa   : > { %v8570_v5 = vpop.eup %8569  ;;  %v3316_v16 = vsel %vm2467_vm4, %v3244_v27, %v10871_v48  ;;  %v3197_v41 = vand.u32 2147483648, %v11040_v22  ;;  %8575 = vrsqrt.f32 %v11097_v32  ;;  %vm1798_vm2 = vcmp.eq.f32.partialorder %v11055_v56, inf }
 0x1ab   : > { %v3328_v37 = vsel %vm2480_vm8, %v3316_v16, %v3292_v31  ;;  %vm1800_vm14 = vcmp.eq.f32.partialorder %v11055_v56, 0.0  ;;  %v3193_v2 = vmul.f32 %v8570_v5, %v11040_v22  ;;  %8246 = vmatmul.mubr.msk.bf16.vlgmr.msra.gmra.mrb[24].mxu1 %vm2516_vm13, %v11061_v6  ;;  %v1621_v28 = vmul.f32 %v1609_v50, %v1609_v50 }
 0x1ac   : > { %v8572_v55 = vpop.eup %8571  ;;  %v3340_v61 = vpack.c.bf16 %v3328_v37, %v3328_v37  ;;  %v1693_v47 = vmul.f32 %v1681_v58, %v1681_v58  ;;  %v3077_v3 = vrot.slane %v16394_v8, 1  ;;  %3476 = vmatprep.mubr.bf16.mxu1 %v16352_v21  ;;  %v1801_v31 = vand.u32 2147483648, %v11055_v56 }
 0x1ad   : > { %v1797_v27 = vmul.f32 %v8572_v55, %v11055_v56  ;;  %v3195_v16 = vsel %vm3194_vm12, %v11040_v22, %v3193_v2  ;;  %v1597_v5 = vmul.f32 %v1585_v4, %v1585_v4  ;;  %vm1777_vm6 = vcmp.eq.f32.partialorder %v11092_v29, inf }
 0x1ae   : > { %v3363_v7 = vand.u32 %v3340_v61, %v16319_v19  ;;  %v1645_v37 = vrot.slane %v1621_v28, 1  ;;  %v3113_v50 = vrot.slane %v16394_v8, 2  ;;  %v3198_v55 = vsel %vm3196_vm3, %v3197_v41, %v3195_v16 }
 0x1af   : > { %v1799_v58 = vsel %vm1798_vm2, %v11055_v56, %v1797_v27  ;;  %v1717_v54 = vrot.slane %v1693_v47, 7  ;;  %v3101_v52 = vadd.f32 %v3077_v3, %v16394_v8  ;;  %v2888_v61 = vsub.f32 %v10004_v51, %v16360_v49 }
 0x1b0   : > { %3485 = vmatprep.subr.bf16.mxu0 %v3363_v7  ;;  %v11142_v4 = vsel %vm1800_vm14, %v1801_v31, %v1799_v58  ;;  %v1669_v2 = vadd.f32 %v1645_v37, %v1597_v5  ;;  %v2936_v28 = vsub.f32 %v9992_v12, %v16361_v46  ;;  %vm1779_vm5 = vcmp.eq.f32.partialorder %v11092_v29, 0.0  ;;  %v16396_v46 = vld [vmem:[#allocation86_spill] sm:$0xff] }
 0x1b1   : > { %16395 = vst [vmem:[#allocation46_spill] sm:$0xff] %v11142_v4  ;;  %v3246_v27 = vrot.slane %v11142_v4, 1  ;;  %v1780_v22 = vand.u32 2147483648, %v11092_v29  ;;  %v11151_v41 = vadd.f32 %v3113_v50, %v3101_v52  ;;  %v3294_v7 = vrot.slane %v3198_v55, 6 }
 0x1b2   : > { %v11153_v47 = vadd.f32 %v1717_v54, %v1669_v2  ;;  %v2872_v56 = vsub.f32 %v9992_v12, %v16360_v49  ;;  %v2896_v8 = vmul.f32 %v2888_v61, %v2888_v61  ;;  %vm3173_vm11 = vcmp.eq.f32.partialorder %v11097_v32, inf }
 0x1b3   : > { %v8574_v3 = vpop.eup %8573  ;;  %v3318_v31 = vsel %vm2467_vm4, %v3246_v27, %v10926_v43  ;;  %8577 = vrsqrt.f32 %v11151_v41  ;;  %v3080_v16 = vrot.slane %v16396_v46, 1  ;;  %8247 = vmatmul.mubr.msk.bf16.gmra.mrb[28].mxu1 %vm2516_vm13, %v11104_v38  ;;  %v2944_v49 = vmul.f32 %v2936_v28, %v2936_v28 }
 0x1b4   : > { %v8576_v52 = vpop.eup %8575  ;;  %v3330_v54 = vsel %vm2480_vm8, %v3318_v31, %v3294_v7  ;;  %v1776_v5 = vmul.f32 %v8574_v3, %v11092_v29  ;;  %8579 = vrsqrt.f32 %v11153_v47  ;;  %3568 = vmatprep.mubr.bf16.mxu1 %v16352_v21  ;;  %vm3175_vm9 = vcmp.eq.f32.partialorder %v11097_v32, 0.0 }
 0x1b5   : > { %v3342_v37 = vpack.c.bf16 %v3330_v54, %v3330_v54  ;;  %v3172_v50 = vmul.f32 %v8576_v52, %v11097_v32  ;;  %v3176_v58 = vand.u32 2147483648, %v11097_v32  ;;  %v2880_v2 = vmul.f32 %v2872_v56, %v2872_v56 }
 0x1b6   : > { %v1778_v55 = vsel %vm1777_vm6, %v11092_v29, %v1776_v5  ;;  %v2912_v61 = vrot.slane %v2896_v8, 1  ;;  %v3116_v27 = vrot.slane %v16396_v46, 2  ;;  %v3104_v31 = vadd.f32 %v3080_v16, %v16396_v46  ;;  %v16397_v16 = vld [vmem:[#allocation119_spill] sm:$0xff] }
 0x1b7   : > { %v3369_v7 = vand.u32 %v3342_v37, %v16319_v19  ;;  %v11178_v28 = vsel %vm1779_vm5, %v1780_v22, %v1778_v55  ;;  %v3174_v3 = vsel %vm3173_vm11, %v11097_v32, %v3172_v50  ;;  %v2960_v56 = vrot.slane %v2944_v49, 7 }
 0x1b8   : > { %v3177_v52 = vsel %vm3175_vm9, %v3176_v58, %v3174_v3  ;;  %v3243_v54 = vrot.slane %v11178_v28, 1  ;;  %v2928_v5 = vadd.f32 %v2912_v61, %v2880_v2  ;;  %v1381_v8 = vrot.slane %v11044_v57, 1 }
 0x1b9   : > { %3536 = vmatprep.subr.bf16.mxu1 %v3369_v7  ;;  %v3291_v4 = vrot.slane %v3177_v52, 6  ;;  %v11186_v37 = vadd.f32 %v3116_v27, %v3104_v31  ;;  %v2890_v29 = vsub.f32 %v10245_v23, %v16364_v59  ;;  %v2938_v46 = vsub.f32 %v10139_v11, %v16365_v36 }
 0x1ba   : > { %v3315_v22 = vsel %vm2467_vm4, %v3243_v54, %v10979_v62  ;;  %v11192_v32 = vadd.f32 %v2960_v56, %v2928_v5  ;;  %v3082_v50 = vrot.slane %v16397_v16, 1  ;;  %vm3187_vm12 = vcmp.eq.f32.partialorder %v11151_v41, inf }
 0x1bb   : > { %v3327_v49 = vsel %vm2480_vm8, %v3315_v22, %v3291_v4  ;;  %8581 = vrsqrt.f32 %v11186_v37  ;;  %v2874_v57 = vsub.f32 %v10139_v11, %v16364_v59  ;;  %vm1791_vm3 = vcmp.eq.f32.partialorder %v11153_v47, inf }
 0x1bc   : > { %v3339_v58 = vpack.c.bf16 %v3327_v49, %v3327_v49  ;;  %vm3189_vm2 = vcmp.eq.f32.partialorder %v11151_v41, 0.0  ;;  %8583 = vrsqrt.f32 %v11192_v32  ;;  %vm1793_vm14 = vcmp.eq.f32.partialorder %v11153_v47, 0.0 }
 0x1bd   : > { %v8578_v55 = vpop.eup %8577  ;;  %v1794_v36 = vand.u32 2147483648, %v11153_v47  ;;  %v3190_v4 = vand.u32 2147483648, %v11151_v41  ;;  %v2898_v2 = vmul.f32 %v2890_v29, %v2890_v29  ;;  %v2946_v7 = vmul.f32 %v2938_v46, %v2938_v46 }
 0x1be   : > { %v8580_v61 = vpop.eup %8579  ;;  %v3360_v27 = vand.u32 %v3339_v58, %v16319_v19  ;;  %v3186_v59 = vmul.f32 %v8578_v55, %v11151_v41  ;;  %v3106_v3 = vadd.f32 %v3082_v50, %v16397_v16  ;;  %v2882_v52 = vmul.f32 %v2874_v57, %v2874_v57 }
 0x1bf   : > { %v1790_v31 = vmul.f32 %v8580_v61, %v11153_v47  ;;  %v2914_v54 = vrot.slane %v2898_v2, 1  ;;  %v3118_v5 = vrot.slane %v16397_v16, 2  ;;  %v2962_v29 = vrot.slane %v2946_v7, 7 }
 0x1c0   : > { %3486 = vmatpush1.bf16.msra.mxu0 %v3360_v27  ;;  %v3188_v56 = vsel %vm3187_vm12, %v11151_v41, %v3186_v59  ;;  %v2871_v22 = vsub.f32 %v10046_v53, %v16370_v44  ;;  %v2887_v46 = vsub.f32 %v10017_v25, %v16370_v44  ;;  %v11228_v58 = vadd.f32 %v1381_v8, %v10775_v34 }
 0x1c1   : > { %v1792_v50 = vsel %vm1791_vm3, %v11153_v47, %v1790_v31  ;;  %v3191_v49 = vsel %vm3189_vm2, %v3190_v4, %v3188_v56  ;;  %v2930_v16 = vadd.f32 %v2914_v54, %v2882_v52  ;;  %v11225_v57 = vadd.f32 %v3118_v5, %v3106_v3  ;;  %v16399_v56 = vld [vmem:[#allocation95_spill] sm:$0xff] }
 0x1c2   : > { %v1461_v55 = vrot.slane %v11048_v40, 7  ;;  %v11233_v2 = vsel %vm1793_vm14, %v1794_v36, %v1792_v50  ;;  %v2895_v44 = vmul.f32 %v2887_v46, %v2887_v46  ;;  %v2935_v34 = vsub.f32 %v10046_v53, %v16374_v9 }
 0x1c3   : > { %16398 = vst [vmem:[#allocation69_spill] sm:$0xff] %v11233_v2  ;;  %v3245_v61 = vrot.slane %v11233_v2, 1  ;;  %v11236_v27 = vadd.f32 %v2962_v29, %v2930_v16  ;;  %8585 = vrsqrt.f32 %v11225_v57  ;;  %8248 = vmatmul.mubr.msk.bf16.vlgmr.msra.gmra.mrb[32].mxu0 %vm2516_vm13, %v11061_v6  ;;  %v3293_v41 = vrot.slane %v3191_v49, 6 }
 0x1c4   : > { %vm3208_vm6 = vcmp.eq.f32.partialorder %v11186_v37, inf  ;;  %v2879_v8 = vmul.f32 %v2871_v22, %v2871_v22  ;;  %v2911_v47 = vrot.slane %v2895_v44, 1  ;;  %3527 = vmatprep.mubr.bf16.mxu0 %v16352_v21  ;;  %vm3016_vm5 = vcmp.eq.f32.partialorder %v11192_v32, inf }
 0x1c5   : > { %v8582_v36 = vpop.eup %8581  ;;  %v3317_v4 = vsel %vm2467_vm4, %v3245_v61, %v11053_v45  ;;  %vm3210_vm11 = vcmp.eq.f32.partialorder %v11186_v37, 0.0  ;;  %8587 = vrsqrt.f32 %v11236_v27  ;;  %v3211_v3 = vand.u32 2147483648, %v11186_v37 }
 0x1c6   : > { %v8584_v59 = vpop.eup %8583  ;;  %v3329_v9 = vsel %vm2480_vm8, %v3317_v4, %v3293_v41  ;;  %v3207_v7 = vmul.f32 %v8582_v36, %v11186_v37  ;;  %v2927_v31 = vadd.f32 %v2911_v47, %v2879_v8  ;;  %v2943_v5 = vmul.f32 %v2935_v34, %v2935_v34 }
 0x1c7   : > { %v3341_v52 = vpack.c.bf16 %v3329_v9, %v3329_v9  ;;  %v3015_v54 = vmul.f32 %v8584_v59, %v11192_v32  ;;  %v3079_v29 = vrot.slane %v16399_v56, 1  ;;  %vm3018_vm9 = vcmp.eq.f32.partialorder %v11192_v32, 0.0 }
 0x1c8   : > { %v3019_v22 = vand.u32 2147483648, %v11192_v32  ;;  %v3209_v46 = vsel %vm3208_vm6, %v11186_v37, %v3207_v7  ;;  %v2889_v50 = vsub.f32 %v10232_v0, %v16379_v35  ;;  %v2959_v61 = vrot.slane %v2943_v5, 7 }
 0x1c9   : > { %v3366_v49 = vand.u32 %v3341_v52, %v16319_v19  ;;  %v3017_v16 = vsel %vm3016_vm5, %v11192_v32, %v3015_v54  ;;  %v3212_v44 = vsel %vm3210_vm11, %v3211_v3, %v3209_v46  ;;  %vm3222_vm12 = vcmp.eq.f32.partialorder %v11225_v57, inf }
 0x1ca   : > { %v3020_v34 = vsel %vm3018_vm9, %v3019_v22, %v3017_v16  ;;  %v3103_v41 = vadd.f32 %v3079_v29, %v16399_v56  ;;  %v3115_v8 = vrot.slane %v16399_v56, 2  ;;  %vm3224_vm3 = vcmp.eq.f32.partialorder %v11225_v57, 0.0  ;;  %v16401_v29 = vld [vmem:[#allocation84_spill] sm:$0xff] }
 0x1cb   : > { %3537 = vmatpush1.bf16.msra.mxu1 %v3366_v49  ;;  %v3248_v47 = vrot.slane %v3020_v34, 1  ;;  %v11272_v36 = vadd.f32 %v2959_v61, %v2927_v31  ;;  %v2873_v32 = vsub.f32 %v10120_v14, %v16379_v35  ;;  %8249 = vmatmul.mubr.msk.bf16.gmra.mrb[36].mxu0 %vm2516_vm13, %v11104_v38  ;;  %v3296_v37 = vrot.slane %v3212_v44, 6  ;;  %v16400_v35 = vld [vmem:[#allocation118_spill] sm:$0xff] }
 0x1cc   : > { %v11278_v4 = vadd.f32 %v3115_v8, %v3103_v41  ;;  %v2897_v59 = vmul.f32 %v2889_v50, %v2889_v50  ;;  %v2937_v9 = vsub.f32 %v10120_v14, %v16381_v42  ;;  %3619 = vmatprep.mubr.bf16.mxu0 %v16352_v21  ;;  %v3225_v31 = vand.u32 2147483648, %v11225_v57 }
 0x1cd   : > { %v8586_v7 = vpop.eup %8585  ;;  %v3320_v3 = vsel %vm2467_vm4, %v3248_v47, %v10871_v48  ;;  %8589 = vrsqrt.f32 %v11272_v36  ;;  %v3081_v52 = vrot.slane %v16400_v35, 1  ;;  %vm3030_vm2 = vcmp.eq.f32.partialorder %v11236_v27, inf }
 0x1ce   : > { %v3332_v54 = vsel %vm2480_vm8, %v3320_v3, %v3296_v37  ;;  %v3221_v5 = vmul.f32 %v8586_v7, %v11225_v57  ;;  %8591 = vrsqrt.f32 %v11278_v4  ;;  %8250 = vmatmul.mubr.msk.bf16.vlgmr.msra.gmra.mrb[32].mxu1 %vm2516_vm13, %v11061_v6  ;;  %vm3032_vm14 = vcmp.eq.f32.partialorder %v11236_v27, 0.0 }
 0x1cf   : > { %v8588_v42 = vpop.eup %8587  ;;  %v3344_v56 = vpack.c.bf16 %v3332_v54, %v3332_v54  ;;  %v2881_v48 = vmul.f32 %v2873_v32, %v2873_v32  ;;  %v1876_v22 = vrot.slane %v16401_v29, 1  ;;  %3578 = vmatprep.mubr.bf16.mxu1 %v16352_v21  ;;  %v2913_v49 = vrot.slane %v2897_v59, 1  ;;  %v16403_v54 = vld [vmem:[#allocation73_spill] sm:$0xff] }
 0x1d0   : > { %v3029_v46 = vmul.f32 %v8588_v42, %v11236_v27  ;;  %v3223_v50 = vsel %vm3222_vm12, %v11225_v57, %v3221_v5  ;;  %v2945_v16 = vmul.f32 %v2937_v9, %v2937_v9  ;;  %v3033_v61 = vand.u32 2147483648, %v11236_v27  ;;  %v16402_v57 = vld [vmem:[#allocation71_spill] sm:$0xff] }
 0x1d1   : > { %v3375_v44 = vand.u32 %v3344_v56, %v16319_v19  ;;  %v3105_v34 = vadd.f32 %v3081_v52, %v16400_v35  ;;  %v3117_v41 = vrot.slane %v16400_v35, 2  ;;  %v3226_v47 = vsel %vm3224_vm3, %v3225_v31, %v3223_v50 }
 0x1d2   : > { %v3031_v8 = vsel %vm3030_vm2, %v11236_v27, %v3029_v46  ;;  %v2929_v32 = vadd.f32 %v2913_v49, %v2881_v48  ;;  %v2961_v37 = vrot.slane %v2945_v16, 7  ;;  %v11313_v59 = vadd.f32 %v1461_v55, %v11228_v58 }
 0x1d3   : > { %3587 = vmatprep.subr.bf16.mxu0 %v3375_v44  ;;  %v3034_v9 = vsel %vm3032_vm14, %v3033_v61, %v3031_v8  ;;  %v11317_v7 = vadd.f32 %v3117_v41, %v3105_v34  ;;  %v1900_v3 = vadd.f32 %v1876_v22, %v16401_v29  ;;  %v3706_v31 = vsub.f32 %v9568_v18, %v16402_v57 }
 0x1d4   : > { %v3250_v35 = vrot.slane %v3034_v9, 1  ;;  %v11320_v52 = vadd.f32 %v2961_v37, %v2929_v32  ;;  %v3754_v5 = vsub.f32 %v9566_v17, %v16403_v54  ;;  %v11328_v40 = vmul.f32 %v10779_v1, %v10519_v33  ;;  %v16404_v37 = vld [vmem:[#allocation87_spill] sm:$0xff] }
 0x1d5   : > { %v3298_v58 = vrot.slane %v3226_v47, 6  ;;  %8593 = vrsqrt.f32 %v11317_v7  ;;  %v1912_v55 = vrot.slane %v16401_v29, 2  ;;  %vm3009_vm6 = vcmp.eq.f32.partialorder %v11272_v36, inf }
 0x1d6   : > { %v3322_v27 = vsel %vm2467_vm4, %v3250_v35, %v10926_v43  ;;  %8595 = vrsqrt.f32 %v11320_v52  ;;  %v3690_v42 = vsub.f32 %v9566_v17, %v16402_v57  ;;  %8251 = vmatmul.mubr.msk.bf16.gmra.mrb[36].mxu1 %vm2516_vm13, %v11104_v38  ;;  %vm3011_vm5 = vcmp.eq.f32.partialorder %v11272_v36, 0.0 }
 0x1d7   : > { %v8590_v1 = vpop.eup %8589  ;;  %v3334_v56 = vsel %vm2480_vm8, %v3322_v27, %v3298_v58  ;;  %v3012_v48 = vand.u32 2147483648, %v11272_v36  ;;  %v11343_v29 = vadd.f32 %v1912_v55, %v1900_v3  ;;  %3670 = vmatprep.mubr.bf16.mxu1 %v16352_v21  ;;  %v3714_v50 = vmul.f32 %v3706_v31, %v3706_v31 }
 0x1d8   : > { %v8592_v43 = vpop.eup %8591  ;;  %v3346_v22 = vpack.c.bf16 %v3334_v56, %v3334_v56  ;;  %v3008_v46 = vmul.f32 %v8590_v1, %v11272_v36  ;;  %v3762_v49 = vmul.f32 %v3754_v5, %v3754_v5  ;;  %vm3201_vm11 = vcmp.eq.f32.partialorder %v11278_v4, inf }
 0x1d9   : > { %v3200_v16 = vmul.f32 %v8592_v43, %v11278_v4  ;;  %v3204_v44 = vand.u32 2147483648, %v11278_v4  ;;  %8597 = vrsqrt.f32 %v11343_v29  ;;  %v3698_v41 = vmul.f32 %v3690_v42, %v3690_v42  ;;  %v16405_v42 = vld [vmem:[#allocation112_spill] sm:$0xff] }
 0x1da   : > { %v3381_v61 = vand.u32 %v3346_v22, %v16319_v19  ;;  %v3010_v34 = vsel %vm3009_vm6, %v11272_v36, %v3008_v46  ;;  %v3730_v8 = vrot.slane %v3714_v50, 1  ;;  %vm3203_vm9 = vcmp.eq.f32.partialorder %v11278_v4, 0.0 }
 0x1db   : > { %v3013_v47 = vsel %vm3011_vm5, %v3012_v48, %v3010_v34  ;;  %v3202_v32 = vsel %vm3201_vm11, %v11278_v4, %v3200_v16  ;;  %v3894_v9 = vrot.slane %v16404_v37, 1  ;;  %v3778_v5 = vrot.slane %v3762_v49, 7 }
 0x1dc   : > { %3638 = vmatprep.subr.bf16.mxu1 %v3381_v61  ;;  %v3205_v3 = vsel %vm3203_vm9, %v3204_v44, %v3202_v32  ;;  %v3247_v35 = vrot.slane %v3013_v47, 1  ;;  %v3746_v31 = vadd.f32 %v3730_v8, %v3698_v41  ;;  %v3930_v27 = vrot.slane %v16404_v37, 2  ;;  %v16406_v8 = vld [vmem:[#allocation98_spill] sm:$0xff]  ;;  %v16407_v32 = vld [vmem:[#allocation105_spill] sm:$0xff] }
 0x1dd   : > { %v3295_v58 = vrot.slane %v3205_v3, 6  ;;  %v3918_v55 = vadd.f32 %v3894_v9, %v16404_v37  ;;  %v1878_v1 = vrot.slane %v16405_v42, 1  ;;  %vm3215_vm12 = vcmp.eq.f32.partialorder %v11317_v7, inf }
 0x1de   : > { %v3319_v36 = vsel %vm2467_vm4, %v3247_v35, %v10979_v62  ;;  %vm3217_vm3 = vcmp.eq.f32.partialorder %v11317_v7, 0.0  ;;  %v11367_v4 = vadd.f32 %v3778_v5, %v3746_v31  ;;  %v3218_v43 = vand.u32 2147483648, %v11317_v7 }
 0x1df   : > { %v8594_v56 = vpop.eup %8593  ;;  %v3331_v48 = vsel %vm2480_vm8, %v3319_v36, %v3295_v58  ;;  %v11371_v22 = vadd.f32 %v3930_v27, %v3918_v55  ;;  %v1902_v46 = vadd.f32 %v1878_v1, %v16405_v42  ;;  %vm3023_vm2 = vcmp.eq.f32.partialorder %v11320_v52, inf }
 0x1e0   : > { %v8596_v50 = vpop.eup %8595  ;;  %v3343_v49 = vpack.c.bf16 %v3331_v48, %v3331_v48  ;;  %v3214_v62 = vmul.f32 %v8594_v56, %v11317_v7  ;;  %8599 = vrsqrt.f32 %v11367_v4  ;;  %v3026_v44 = vand.u32 2147483648, %v11320_v52  ;;  %v16408_v48 = vld [vmem:[#allocation121_spill] sm:$0xff] }
 0x1e1   : > { %v3022_v16 = vmul.f32 %v8596_v50, %v11320_v52  ;;  %8601 = vrsqrt.f32 %v11371_v22  ;;  %v1914_v61 = vrot.slane %v16405_v42, 2  ;;  %v3708_v47 = vsub.f32 %v9692_v20, %v16406_v8 }
 0x1e2   : > { %v3372_v34 = vand.u32 %v3343_v49, %v16319_v19  ;;  %v3216_v41 = vsel %vm3215_vm12, %v11317_v7, %v3214_v62  ;;  %v3756_v37 = vsub.f32 %v16313_v24, %v16407_v32  ;;  %vm3025_vm14 = vcmp.eq.f32.partialorder %v11320_v52, 0.0 }
 0x1e3   : > { %v8598_v9 = vpop.eup %8597  ;;  %v3024_v3 = vsel %vm3023_vm2, %v11320_v52, %v3022_v16  ;;  %v3219_v35 = vsel %vm3217_vm3, %v3218_v43, %v3216_v41  ;;  %v11393_v31 = vadd.f32 %v1914_v61, %v1902_v46  ;;  %vm2004_vm6 = vcmp.eq.f32.partialorder %v11343_v29, inf  ;;  %v16409_v61 = vld [vmem:[#allocation100_spill] sm:$0xff] }
 0x1e4   : > { %3588 = vmatpush1.bf16.msra.mxu0 %v3372_v34  ;;  %v3027_v5 = vsel %vm3025_vm14, %v3026_v44, %v3024_v3  ;;  %v2003_v58 = vmul.f32 %v8598_v9, %v11343_v29  ;;  %v3692_v55 = vsub.f32 %v16313_v24, %v16406_v8  ;;  %vm2006_vm5 = vcmp.eq.f32.partialorder %v11343_v29, 0.0  ;;  %v16410_v34 = vld [vmem:[#allocation85_spill] sm:$0xff] }
 0x1e5   : > { %v3249_v27 = vrot.slane %v3027_v5, 1  ;;  %v2007_v42 = vand.u32 2147483648, %v11343_v29  ;;  %8603 = vrsqrt.f32 %v11393_v31  ;;  %v3297_v7 = vrot.slane %v3219_v35, 6 }
 0x1e6   : > { %vm3810_vm11 = vcmp.eq.f32.partialorder %v11367_v4, inf  ;;  %v3716_v52 = vmul.f32 %v3708_v47, %v3708_v47  ;;  %v3764_v1 = vmul.f32 %v3756_v37, %v3756_v37  ;;  %vm3812_vm9 = vcmp.eq.f32.partialorder %v11367_v4, 0.0  ;;  %v11425_v37 = vld [vmem:[%s15763_s7] sm:$0xff] }
 0x1e7   : > { %v3321_v36 = vsel %vm2467_vm4, %v3249_v27, %v11053_v45  ;;  %v3813_v56 = vand.u32 2147483648, %v11367_v4  ;;  %v3896_v43 = vrot.slane %v16408_v48, 1  ;;  %8252 = vmatmul.mubr.msk.bf16.vlgmr.msra.gmra.mrb[40].mxu0 %vm2516_vm13, %v11061_v6  ;;  %v2005_v50 = vsel %vm2004_vm6, %v11343_v29, %v2003_v58  ;;  %4801 = vperm.xlu0 %8381, %v11425_v37  }
 0x1e8   : > { %v3333_v46 = vsel %vm2480_vm8, %v3321_v36, %v3297_v7  ;;  %v3700_v49 = vmul.f32 %v3692_v55, %v3692_v55  ;;  %v3732_v62 = vrot.slane %v3716_v52, 1  ;;  %3629 = vmatprep.mubr.bf16.mxu0 %v16352_v21  ;;  %v3932_v44 = vrot.slane %v16408_v48, 2  ;;  %v11438_v52 = vld [vmem:[%s15763_s7 + $0x8] sm:$0xff] }
 0x1e9   : > { %v3345_v45 = vpack.c.bf16 %v3333_v46, %v3333_v46  ;;  %v3920_v16 = vadd.f32 %v3896_v43, %v16408_v48  ;;  %v16411_v41 = vrot.slane %v16410_v34, 2  ;;  %vm3974_vm12 = vcmp.eq.f32.partialorder %v11371_v22, inf  ;;  %v16413_v46 = vld [vmem:[#allocation82_spill] sm:$0xff] }
 0x1ea   : > { %v8600_v9 = vpop.eup %8599  ;;  %vm3976_vm3 = vcmp.eq.f32.partialorder %v11371_v22, 0.0  ;;  %v3748_v3 = vadd.f32 %v3732_v62, %v3700_v49  ;;  %v3780_v35 = vrot.slane %v3764_v1, 7  ;;  %v3977_v27 = vand.u32 2147483648, %v11371_v22  ;;  %v16414_v62 = vld [vmem:[#allocation79_spill] sm:$0xff] }
 0x1eb   : > { %v11420_v47 = vadd.f32 %v16411_v41, %v16409_v61  ;;  %v8602_v5 = vpop.eup %8601  ;;  %v3378_v58 = vand.u32 %v3345_v45, %v16319_v19  ;;  %v3809_v55 = vmul.f32 %v8600_v9, %v11367_v4  ;;  %v11433_v7 = vadd.f32 %v3932_v44, %v3920_v16  ;;  %v16415_v45 = vld [vmem:[#allocation96_spill] sm:$0xff]  ;;  %4806 = vperm.xlu0 %8381, %v11438_v52  }
 0x1ec   : > { %v11442_v36 = vsel %vm2006_vm5, %v2007_v42, %v2005_v50  ;;  %v3973_v1 = vmul.f32 %v8602_v5, %v11371_v22  ;;  %v11445_v48 = vadd.f32 %v3780_v35, %v3748_v3  ;;  %v3705_v49 = vsub.f32 %v16371_v13, %v16413_v46 }
 0x1ed   : > { %16412 = vst [vmem:[#allocation52_spill] sm:$0xff] %v11442_v36  ;;  %8605 = vrsqrt.f32 %v11420_v47  ;;  %3639 = vmatpush1.bf16.msra.mxu1 %v3378_v58  ;;  %v3811_v43 = vsel %vm3810_vm11, %v11367_v4, %v3809_v55  ;;  %v3753_v29 = vsub.f32 %v16373_v10, %v16414_v62  ;;  %v3893_v16 = vrot.slane %v16415_v45, 1 }
 0x1ee   : > { %8607 = vrsqrt.f32 %v11433_v7  ;;  %v3814_v42 = vsel %vm3812_vm9, %v3813_v56, %v3811_v43  ;;  %v3975_v50 = vsel %vm3974_vm12, %v11371_v22, %v3973_v1  ;;  %v11467_v34 = vrot.slane %v11442_v36, 7 }
 0x1ef   : > { %8609 = vrsqrt.f32 %v11445_v48  ;;  %v8604_v44 = vpop.eup %8603  ;;  %v3978_v13 = vsel %vm3976_vm3, %v3977_v27, %v3975_v50  ;;  %v4062_v61 = vrot.slane %v3814_v42, 1  ;;  %v3689_v4 = vsub.f32 %v16373_v10, %v16413_v46  ;;  %8253 = vmatmul.mubr.msk.bf16.gmra.mrb[44].mxu0 %vm2516_vm13, %v11104_v38  ;;  %v16418_v42 = vld [vmem:[#allocation110_spill] sm:$0xff] }
 0x1f0   : > { %vm999_vm2 = vcmp.eq.f32.partialorder %v10519_v33, inf  ;;  %8611 = vrsqrt.f32 %v11313_v59  ;;  %v4110_v56 = vrot.slane %v3978_v13, 6  ;;  %v2017_v41 = vmul.f32 %v8604_v44, %v11393_v31  ;;  %8254 = vmatmul.mubr.msk.bf16.vlgmr.msra.gmra.mrb[40].mxu1 %vm2516_vm13, %v11061_v6  ;;  %4237 = vmatprep.mubr.bf16.mxu0 %v16352_v21 }
 0x1f1   : > { %v11481_v22 = vsel %vm999_vm2, %v10519_v33, %v11328_v40  ;;  %v4134_v10 = vsel %vm2467_vm4, %v4062_v61, %v11467_v34  ;;  %v3713_v9 = vmul.f32 %v3705_v49, %v3705_v49  ;;  %v3761_v3 = vmul.f32 %v3753_v29, %v3753_v29  ;;  %3680 = vmatprep.mubr.bf16.mxu1 %v16352_v21  ;;  %v11491_v27 = vpop.f32.mrb[0].mxu0  ;;  %v16417_v29 = vld [vmem:[#allocation116_spill] sm:$0xff] }
 0x1f2   : > { %v4146_v35 = vsel %vm2480_vm8, %v4134_v10, %v4110_v56  ;;  %vm2018_vm14 = vcmp.eq.f32.partialorder %v11393_v31, inf  ;;  %v3917_v5 = vadd.f32 %v3893_v16, %v16415_v45  ;;  %v3929_v6 = vrot.slane %v16415_v45, 2  ;;  %16416 = vst [vmem:[#allocation54_spill] sm:$0xff] %v11491_v27  ;;  %v11502_v16 = vpop.f32.mrb[1].mxu0 }
 0x1f3   : > { %v4158_v58 = vpack.c.bf16 %v4146_v35, %v4146_v35  ;;  %vm2020_vm6 = vcmp.eq.f32.partialorder %v11393_v31, 0.0  ;;  %v3697_v40 = vmul.f32 %v3689_v4, %v3689_v4  ;;  %v3729_v55 = vrot.slane %v3713_v9, 1  ;;  %16420 = vst [vmem:[#allocation77_spill] sm:$0xff] %v11502_v16  ;;  %v11506_v4 = vpop.f32.mrb[2].mxu0  ;;  %v16424_v35 = vld [vmem:[#allocation97_spill] sm:$0xff] }
 0x1f4   : > { %v2019_v1 = vsel %vm2018_vm14, %v11393_v31, %v2017_v41  ;;  %v2021_v43 = vand.u32 2147483648, %v11393_v31  ;;  %v11495_v49 = vadd.f32 %v3929_v6, %v3917_v5  ;;  %v16419_v50 = vrot.slane %v16418_v42, 2  ;;  %16421 = vst [vmem:[#allocation58_spill] sm:$0xff] %v11506_v4  ;;  %v11512_v41 = vpop.f32.mrb[3].mxu0 }
 0x1f5   : > { %v4173_v45 = vand.u32 %v4158_v58, %v16319_v19  ;;  %vm1997_vm5 = vcmp.eq.f32.partialorder %v11420_v47, inf  ;;  %v3745_v13 = vadd.f32 %v3729_v55, %v3697_v40  ;;  %v3777_v61 = vrot.slane %v3761_v3, 7  ;;  %16422 = vst [vmem:[#allocation43_spill] sm:$0xff] %v11512_v41  ;;  %v16425_v55 = vld [vmem:[#allocation104_spill] sm:$0xff] }
 0x1f6   : > { %v11500_v44 = vadd.f32 %v16419_v50, %v16417_v29  ;;  %vm3824_vm11 = vcmp.eq.f32.partialorder %v11445_v48, inf  ;;  %vm3988_vm9 = vcmp.eq.f32.partialorder %v11433_v7, inf  ;;  %vm3990_vm12 = vcmp.eq.f32.partialorder %v11433_v7, 0.0 }
 0x1f7   : > { %v8606_v56 = vpop.eup %8605  ;;  %8613 = vrsqrt.f32 %v11495_v49  ;;  %4205 = vmatprep.subr.bf16.mxu0 %v4173_v45  ;;  %v11516_v9 = vsel %vm2020_vm6, %v2021_v43, %v2019_v1  ;;  %v11518_v3 = vadd.f32 %v3777_v61, %v3745_v13  ;;  %v3707_v5 = vsub.f32 %v16333_v30, %v16424_v35 }
 0x1f8   : > { %v8608_v10 = vpop.eup %8607  ;;  %16423 = vst [vmem:[#allocation38_spill] sm:$0xff] %v11516_v9  ;;  %8615 = vrsqrt.f32 %v11500_v44  ;;  %vm3826_vm3 = vcmp.eq.f32.partialorder %v11445_v48, 0.0  ;;  %v3991_v40 = vand.u32 2147483648, %v11433_v7  ;;  %v3755_v29 = vsub.f32 %v16335_v63, %v16425_v55  ;;  %8255 = vmatmul.mubr.msk.bf16.gmra.mrb[44].mxu1 %vm2516_vm13, %v11104_v38 }
 0x1f9   : > { %v8610_v6 = vpop.eup %8609  ;;  %v3987_v58 = vmul.f32 %v8608_v10, %v11433_v7  ;;  %v1996_v1 = vmul.f32 %v8606_v56, %v11420_v47  ;;  %vm1999_vm2 = vcmp.eq.f32.partialorder %v11420_v47, 0.0  ;;  %8617 = vrsqrt.f32 %v11518_v3  ;;  %4288 = vmatprep.mubr.bf16.mxu1 %v16352_v21  ;;  %v11553_v56 = vpop.f32.mrb[4].mxu0 }
 0x1fa   : > { %v3823_v31 = vmul.f32 %v8610_v6, %v11445_v48  ;;  %v3691_v30 = vsub.f32 %v16335_v63, %v16424_v35  ;;  %v11537_v43 = vpop.eup %8611  ;;  %v3827_v42 = vand.u32 2147483648, %v11445_v48  ;;  %v11544_v50 = vrot.slane %v11516_v9, 7  ;;  %16426 = vst [vmem:[#allocation22_spill] sm:$0xff] %v11553_v56  ;;  %v16427_v9 = vld [vmem:[#allocation120_spill] sm:$0xff]  ;;  %v11559_v41 = vpop.f32.mrb[5].mxu0 }
 0x1fb   : > { %v3989_v38 = vsel %vm3988_vm9, %v11433_v7, %v3987_v58  ;;  %v2000_v45 = vand.u32 2147483648, %v11420_v47  ;;  %vm3967_vm14 = vcmp.eq.f32.partialorder %v11495_v49, inf  ;;  %v3715_v61 = vmul.f32 %v3707_v5, %v3707_v5  ;;  %16428 = vst [vmem:[#allocation26_spill] sm:$0xff] %v11559_v41 }
 0x1fc   : > { %v3825_v13 = vsel %vm3824_vm11, %v11445_v48, %v3823_v31  ;;  %v3992_v63 = vsel %vm3990_vm12, %v3991_v40, %v3989_v38  ;;  %v3970_v6 = vand.u32 2147483648, %v11495_v49  ;;  %v3763_v58 = vmul.f32 %v3755_v29, %v3755_v29  ;;  %v2609_v31 = vpop.f32.mrb[6].mxu0 }
 0x1fd   : > { %v3828_v10 = vsel %vm3826_vm3, %v3827_v42, %v3825_v13  ;;  %v3895_v36 = vrot.slane %v16427_v9, 1  ;;  %v1998_v7 = vsel %vm1997_vm5, %v11420_v47, %v1996_v1  ;;  %vm3969_vm6 = vcmp.eq.f32.partialorder %v11495_v49, 0.0  ;;  %v2610_v13 = vpop.f32.mrb[7].mxu0 }
 0x1fe   : > { %v4064_v4 = vrot.slane %v3828_v10, 1  ;;  %v3699_v5 = vmul.f32 %v3691_v30, %v3691_v30  ;;  %v3731_v40 = vrot.slane %v3715_v61, 1  ;;  %v4112_v38 = vrot.slane %v3992_v63, 6 }
 0x1ff   : > { %v3919_v48 = vadd.f32 %v3895_v36, %v16427_v9  ;;  %v3931_v42 = vrot.slane %v16427_v9, 2  ;;  %v3710_v29 = vsub.f32 %v16343_v60, %v16402_v57  ;;  %v3779_v56 = vrot.slane %v3763_v58, 7  ;;  %v16429_v58 = vld [vmem:[#allocation88_spill] sm:$0xff] }
 0x200   : > { %v4136_v10 = vsel %vm2467_vm4, %v4064_v4, %v11544_v50  ;;  %v3747_v41 = vadd.f32 %v3731_v40, %v3699_v5  ;;  %v3758_v1 = vsub.f32 %v16342_v39, %v16403_v54  ;;  %vm2011_vm5 = vcmp.eq.f32.partialorder %v11500_v44, inf }
 0x201   : > { %v8614_v30 = vpop.eup %8613  ;;  %v4148_v61 = vsel %vm2480_vm8, %v4136_v10, %v4112_v38  ;;  %v11575_v36 = vadd.f32 %v3931_v42, %v3919_v48  ;;  %v3694_v9 = vsub.f32 %v16342_v39, %v16402_v57  ;;  %v3898_v5 = vrot.slane %v16429_v58, 1 }
 0x202   : > { %v8616_v63 = vpop.eup %8615  ;;  %v4160_v31 = vpack.c.bf16 %v4148_v61, %v4148_v61  ;;  %v3966_v13 = vmul.f32 %v8614_v30, %v11495_v49  ;;  %v11580_v4 = vadd.f32 %v3779_v56, %v3747_v41  ;;  %v11585_v40 = vsel %vm1999_vm2, %v2000_v45, %v1998_v7 }
 0x203   : > { %16430 = vst [vmem:[#allocation35_spill] sm:$0xff] %v11585_v40  ;;  %v2010_v38 = vmul.f32 %v8616_v63, %v11500_v44  ;;  %vm2013_vm11 = vcmp.eq.f32.partialorder %v11500_v44, 0.0  ;;  %8619 = vrsqrt.f32 %v11575_v36  ;;  %v3718_v48 = vmul.f32 %v3710_v29, %v3710_v29  ;;  %v8618_v42 = vpop.eup %8617 }
 0x204   : > { %v4179_v10 = vand.u32 %v4160_v31, %v16319_v19  ;;  %v3968_v41 = vsel %vm3967_vm14, %v11495_v49, %v3966_v13  ;;  %8621 = vrsqrt.f32 %v11580_v4  ;;  %v3766_v56 = vmul.f32 %v3758_v1, %v3758_v1 }
 0x205   : > { %v3802_v47 = vmul.f32 %v8618_v42, %v11518_v3  ;;  %vm3803_vm9 = vcmp.eq.f32.partialorder %v11518_v3, inf  ;;  %vm3805_vm12 = vcmp.eq.f32.partialorder %v11518_v3, 0.0  ;;  %v2014_v45 = vand.u32 2147483648, %v11500_v44 }
 0x206   : > { %4256 = vmatprep.subr.bf16.mxu1 %v4179_v10  ;;  %v3806_v7 = vand.u32 2147483648, %v11518_v3  ;;  %v11601_v29 = vrot.slane %v11585_v40, 7  ;;  %v3702_v30 = vmul.f32 %v3694_v9, %v3694_v9  ;;  %v3922_v61 = vadd.f32 %v3898_v5, %v16429_v58 }
 0x207   : > { %v3804_v63 = vsel %vm3803_vm9, %v11518_v3, %v3802_v47  ;;  %v3971_v1 = vsel %vm3969_vm6, %v3970_v6, %v3968_v41  ;;  %v2012_v31 = vsel %vm2011_vm5, %v11500_v44, %v2010_v38  ;;  %vm3981_vm3 = vcmp.eq.f32.partialorder %v11575_v36, inf  ;;  %v16431_v3 = vld [vmem:[#allocation72_spill] sm:$0xff]  ;;  %v16433_v38 = vld [vmem:[#allocation123_spill] sm:$0xff] }
 0x208   : > { %v3734_v13 = vrot.slane %v3718_v48, 1  ;;  %v3807_v42 = vsel %vm3805_vm12, %v3806_v7, %v3804_v63  ;;  %vm3817_vm2 = vcmp.eq.f32.partialorder %v11580_v4, inf  ;;  %vm3983_vm14 = vcmp.eq.f32.partialorder %v11575_v36, 0.0  ;;  %v16432_v41 = vld [vmem:[#allocation68_spill] sm:$0xff] }
 0x209   : > { %v3782_v9 = vrot.slane %v3766_v56, 7  ;;  %v3934_v5 = vrot.slane %v16429_v58, 2  ;;  %v3712_v10 = vsub.f32 %v16431_v3, %v16406_v8  ;;  %v4061_v49 = vrot.slane %v3807_v42, 1 }
 0x20a   : > { %v3750_v6 = vadd.f32 %v3734_v13, %v3702_v30  ;;  %v3760_v47 = vsub.f32 %v16432_v41, %v16407_v32  ;;  %v3900_v40 = vrot.slane %v16433_v38, 1  ;;  %v4109_v39 = vrot.slane %v3971_v1, 6 }
 0x20b   : > { %v11619_v48 = vadd.f32 %v3934_v5, %v3922_v61  ;;  %v3696_v7 = vsub.f32 %v16432_v41, %v16406_v8  ;;  %v3720_v63 = vmul.f32 %v3712_v10, %v3712_v10  ;;  %v4133_v58 = vsel %vm2467_vm4, %v4061_v49, %v11601_v29  ;;  %v11638_v10 = vpop.f32.mrb[0].mxu1 }
 0x20c   : > { %v11625_v56 = vadd.f32 %v3782_v9, %v3750_v6  ;;  %v3768_v3 = vmul.f32 %v3760_v47, %v3760_v47  ;;  %v3924_v30 = vadd.f32 %v3900_v40, %v16433_v38  ;;  %v4145_v13 = vsel %vm2480_vm8, %v4133_v58, %v4109_v39  ;;  %16435 = vst [vmem:[#allocation75_spill] sm:$0xff] %v11638_v10  ;;  %v11642_v49 = vpop.f32.mrb[1].mxu1 }
 0x20d   : > { %v11631_v42 = vsel %vm2013_vm11, %v2014_v45, %v2012_v31  ;;  %vm3819_vm6 = vcmp.eq.f32.partialorder %v11580_v4, 0.0  ;;  %8623 = vrsqrt.f32 %v11619_v48  ;;  %v8620_v61 = vpop.eup %8619  ;;  %v4157_v1 = vpack.c.bf16 %v4145_v13, %v4145_v13  ;;  %16436 = vst [vmem:[#allocation62_spill] sm:$0xff] %v11642_v49  ;;  %v11648_v41 = vpop.f32.mrb[2].mxu1 }
 0x20e   : > { %16434 = vst [vmem:[#allocation59_spill] sm:$0xff] %v11631_v42  ;;  %v3820_v5 = vand.u32 2147483648, %v11580_v4  ;;  %8625 = vrsqrt.f32 %v11625_v56  ;;  %v3936_v9 = vrot.slane %v16433_v38, 2  ;;  %v8622_v40 = vpop.eup %8621  ;;  %v3980_v39 = vmul.f32 %v8620_v61, %v11575_v36  ;;  %16437 = vst [vmem:[#allocation50_spill] sm:$0xff] %v11648_v41  ;;  %v11657_v60 = vpop.f32.mrb[3].mxu1 }
 0x20f   : > { %v3984_v44 = vand.u32 2147483648, %v11575_v36  ;;  %v3704_v45 = vmul.f32 %v3696_v7, %v3696_v7  ;;  %v3736_v31 = vrot.slane %v3720_v63, 1  ;;  %v4170_v6 = vand.u32 %v4157_v1, %v16319_v19  ;;  %16438 = vst [vmem:[#allocation51_spill] sm:$0xff] %v11657_v60 }
 0x210   : > { %v3816_v47 = vmul.f32 %v8622_v40, %v11580_v4  ;;  %v3784_v58 = vrot.slane %v3768_v3, 7  ;;  %v11646_v13 = vadd.f32 %v3936_v9, %v3924_v30  ;;  %v3982_v38 = vsel %vm3981_vm3, %v11575_v36, %v3980_v39 }
 0x211   : > { %v3752_v61 = vadd.f32 %v3736_v31, %v3704_v45  ;;  %v3693_v7 = vsub.f32 %v16390_v15, %v16413_v46  ;;  %v3709_v63 = vsub.f32 %v16391_v26, %v16413_v46  ;;  %4206 = vmatpush1.bf16.msra.mxu0 %v4170_v6  ;;  %v3985_v30 = vsel %vm3983_vm14, %v3984_v44, %v3982_v38 }
 0x212   : > { %v3818_v3 = vsel %vm3817_vm2, %v11580_v4, %v3816_v47  ;;  %v11665_v1 = vrot.slane %v11631_v42, 7  ;;  %8627 = vrsqrt.f32 %v11646_v13  ;;  %vm4002_vm5 = vcmp.eq.f32.partialorder %v11619_v48, inf  ;;  %v11681_v4 = vld [vmem:[%s15762_s6] sm:$0xff]  }
 0x213   : > { %v3821_v9 = vsel %vm3819_vm6, %v3820_v5, %v3818_v3  ;;  %vm4004_vm11 = vcmp.eq.f32.partialorder %v11619_v48, 0.0  ;;  %v11672_v40 = vadd.f32 %v3784_v58, %v3752_v61  ;;  %vm3838_vm9 = vcmp.eq.f32.partialorder %v11625_v56, inf  ;;  %v16439_v58 = vld [vmem:[#allocation101_spill] sm:$0xff]  ;;  %v11691_v61 = vpop.f32.mrb[4].mxu1 }
 0x214   : > { %v4063_v39 = vrot.slane %v3821_v9, 1  ;;  %vm3840_vm12 = vcmp.eq.f32.partialorder %v11625_v56, 0.0  ;;  %v3717_v36 = vmul.f32 %v3709_v63, %v3709_v63  ;;  %v4111_v44 = vrot.slane %v3985_v30, 6  ;;  %8256 = vmatmul.mubr.msk.bf16.vlgmr.msra.gmra.mrb[48].mxu0 %vm2516_vm13, %v11681_v4  ;;  %16440 = vst [vmem:[#allocation76_spill] sm:$0xff] %v11691_v61  ;;  %v16441_v9 = vld [vmem:[#allocation67_spill] sm:$0xff] }
 0x215   : > { %v3841_v45 = vand.u32 2147483648, %v11625_v56  ;;  %8629 = vrsqrt.f32 %v11672_v40  ;;  %v3701_v5 = vmul.f32 %v3693_v7, %v3693_v7  ;;  %v3757_v47 = vsub.f32 %v16390_v15, %v16414_v62  ;;  %4247 = vmatprep.mubr.bf16.mxu0 %v16352_v21 }
 0x216   : > { %v4135_v31 = vsel %vm2467_vm4, %v4063_v39, %v11665_v1  ;;  %v3733_v6 = vrot.slane %v3717_v36, 1  ;;  %v3897_v38 = vrot.slane %v16439_v58, 1  ;;  %v4005_v30 = vand.u32 2147483648, %v11619_v48  ;;  %v11698_v36 = vpop.f32.mrb[5].mxu1 }
 0x217   : > { %v8624_v63 = vpop.eup %8623  ;;  %v4147_v3 = vsel %vm2480_vm8, %v4135_v31, %v4111_v44  ;;  %v3933_v7 = vrot.slane %v16439_v58, 2  ;;  %v3711_v39 = vsub.f32 %v16441_v9, %v16424_v35  ;;  %16442 = vst [vmem:[#allocation47_spill] sm:$0xff] %v11698_v36  ;;  %v3765_v41 = vmul.f32 %v3757_v47, %v3757_v47  ;;  %v2660_v49 = vpop.f32.mrb[6].mxu1  ;;  %v16443_v31 = vld [vmem:[#allocation66_spill] sm:$0xff] }
 0x218   : > { %v8626_v42 = vpop.eup %8625  ;;  %v4159_v26 = vpack.c.bf16 %v4147_v3, %v4147_v3  ;;  %v4001_v15 = vmul.f32 %v8624_v63, %v11619_v48  ;;  %v3749_v60 = vadd.f32 %v3733_v6, %v3701_v5  ;;  %v3921_v44 = vadd.f32 %v3897_v38, %v16439_v58  ;;  %v2661_v27 = vpop.f32.mrb[7].mxu1  ;;  %v11729_v38 = vld [vmem:[%s15762_s6 + $0x8] ss:$0 sps:$4 sm:$0x33]  }
 0x219   : > { %v3837_v61 = vmul.f32 %v8626_v42, %v11625_v56  ;;  %v3695_v10 = vsub.f32 %v16443_v31, %v16424_v35  ;;  %v3719_v16 = vmul.f32 %v3711_v39, %v3711_v39  ;;  %v3781_v36 = vrot.slane %v3765_v41, 7 }
 0x21a   : > { %v4176_v9 = vand.u32 %v4159_v26, %v16319_v19  ;;  %v4003_v3 = vsel %vm4002_vm5, %v11619_v48, %v4001_v15  ;;  %v3759_v5 = vsub.f32 %v16443_v31, %v16425_v55  ;;  %vm4016_vm3 = vcmp.eq.f32.partialorder %v11646_v13, inf }
 0x21b   : > { %v3839_v42 = vsel %vm3838_vm9, %v11625_v56, %v3837_v61  ;;  %v4006_v49 = vsel %vm4004_vm11, %v4005_v30, %v4003_v3  ;;  %v11717_v27 = vadd.f32 %v3933_v7, %v3921_v44  ;;  %vm4018_vm2 = vcmp.eq.f32.partialorder %v11646_v13, 0.0  ;;  %v16444_v3 = vld [vmem:[#allocation122_spill] sm:$0xff] }
 0x21c   : > { %v8628_v26 = vpop.eup %8627  ;;  %4257 = vmatpush1.bf16.msra.mxu1 %v4176_v9  ;;  %v3842_v15 = vsel %vm3840_vm12, %v3841_v45, %v3839_v42  ;;  %v11722_v41 = vadd.f32 %v3781_v36, %v3749_v60  ;;  %v3735_v6 = vrot.slane %v3719_v16, 1  ;;  %v3767_v48 = vmul.f32 %v3759_v5, %v3759_v5  ;;  %8257 = vmatmul.mubr.msk.bf16.gmra.mrb[52].mxu0 %vm2516_vm13, %v11729_v38  ;;  %v11749_v39 = vpop.f32.mrb[8].mxu0 }
 0x21d   : > { %v4066_v47 = vrot.slane %v3842_v15, 1  ;;  %v4015_v58 = vmul.f32 %v8628_v26, %v11646_v13  ;;  %8631 = vrsqrt.f32 %v11717_v27  ;;  %v4114_v56 = vrot.slane %v4006_v49, 6  ;;  %4339 = vmatprep.mubr.bf16.mxu0 %v16352_v21  ;;  %v11753_v42 = vpop.f32.mrb[9].mxu0 }
 0x21e   : > { %v4019_v45 = vand.u32 2147483648, %v11646_v13  ;;  %8633 = vrsqrt.f32 %v11722_v41  ;;  %v3703_v60 = vmul.f32 %v3695_v10, %v3695_v10  ;;  %vm3852_vm14 = vcmp.eq.f32.partialorder %v11672_v40, inf }
 0x21f   : > { %v8630_v16 = vpop.eup %8629  ;;  %v4138_v61 = vsel %vm2467_vm4, %v4066_v47, %v11467_v34  ;;  %vm3854_vm6 = vcmp.eq.f32.partialorder %v11672_v40, 0.0  ;;  %v4017_v63 = vsel %vm4016_vm3, %v11646_v13, %v4015_v58  ;;  %8258 = vmatmul.mubr.msk.bf16.vlgmr.msra.gmra.mrb[48].mxu1 %vm2516_vm13, %v11681_v4  ;;  %v3855_v7 = vand.u32 2147483648, %v11672_v40  ;;  %v11762_v47 = vpop.f32.mrb[10].mxu0 }
 0x220   : > { %v4150_v30 = vsel %vm2480_vm8, %v4138_v61, %v4114_v56  ;;  %v3851_v10 = vmul.f32 %v8630_v16, %v11672_v40  ;;  %v3751_v9 = vadd.f32 %v3735_v6, %v3703_v60  ;;  %4298 = vmatprep.mubr.bf16.mxu1 %v16352_v21  ;;  %vm3995_vm5 = vcmp.eq.f32.partialorder %v11717_v27, inf  ;;  %16445 = vst [vmem:[#allocation80_spill] sm:$0xff] %v11762_v47  ;;  %v11770_v16 = vpop.f32.mrb[11].mxu0 }
 0x221   : > { %v4162_v36 = vpack.c.bf16 %v4150_v30, %v4150_v30  ;;  %v3783_v44 = vrot.slane %v3767_v48, 7  ;;  %v3899_v5 = vrot.slane %v16444_v3, 1  ;;  %v4020_v26 = vsel %vm4018_vm2, %v4019_v45, %v4017_v63  ;;  %16446 = vst [vmem:[#allocation60_spill] sm:$0xff] %v11770_v16 }
 0x222   : > { %v3853_v49 = vsel %vm3852_vm14, %v11672_v40, %v3851_v10  ;;  %v1588_v15 = vsub.f32 %v9992_v12, %v16402_v57  ;;  %v1612_v6 = vsub.f32 %v10004_v51, %v16402_v57  ;;  %v3935_v45 = vrot.slane %v16444_v3, 2  ;;  %v16482_v51 = vld [vmem:[#allocation36_spill] sm:$0xff] }
 0x223   : > { %v4185_v58 = vand.u32 %v4162_v36, %v16319_v19  ;;  %v3856_v48 = vsel %vm3854_vm6, %v3855_v7, %v3853_v49  ;;  %v11767_v56 = vadd.f32 %v3783_v44, %v3751_v9  ;;  %v3923_v60 = vadd.f32 %v3899_v5, %v16444_v3  ;;  %v16447_v3 = vld [vmem:[#allocation92_spill] sm:$0xff] }
 0x224   : > { %v4068_v13 = vrot.slane %v3856_v48, 1  ;;  %v1624_v61 = vmul.f32 %v1612_v6, %v1612_v6  ;;  %v1684_v57 = vsub.f32 %v9992_v12, %v16403_v54  ;;  %v4116_v63 = vrot.slane %v4020_v26, 6 }
 0x225   : > { %4307 = vmatprep.subr.bf16.mxu0 %v4185_v58  ;;  %vm3831_vm11 = vcmp.eq.f32.partialorder %v11722_v41, inf  ;;  %vm3833_vm9 = vcmp.eq.f32.partialorder %v11722_v41, 0.0  ;;  %8635 = vrsqrt.f32 %v11767_v56  ;;  %v11780_v30 = vadd.f32 %v3935_v45, %v3923_v60  ;;  %v11791_v58 = vpop.f32.mrb[12].mxu0 }
 0x226   : > { %v4140_v40 = vsel %vm2467_vm4, %v4068_v13, %v11544_v50  ;;  %v1648_v10 = vrot.slane %v1624_v61, 1  ;;  %v1696_v7 = vmul.f32 %v1684_v57, %v1684_v57  ;;  %v3834_v54 = vand.u32 2147483648, %v11722_v41  ;;  %16448 = vst [vmem:[#allocation78_spill] sm:$0xff] %v11791_v58  ;;  %v11796_v45 = vpop.f32.mrb[13].mxu0 }
 0x227   : > { %v8632_v9 = vpop.eup %8631  ;;  %v4152_v36 = vsel %vm2480_vm8, %v4140_v40, %v4116_v63  ;;  %v1600_v44 = vmul.f32 %v1588_v15, %v1588_v15  ;;  %v3902_v5 = vrot.slane %v16447_v3, 1  ;;  %8259 = vmatmul.mubr.msk.bf16.gmra.mrb[52].mxu1 %vm2516_vm13, %v11729_v38  ;;  %vm3997_vm12 = vcmp.eq.f32.partialorder %v11717_v27, 0.0  ;;  %16449 = vst [vmem:[#allocation86_spill] sm:$0xff] %v11796_v45 }
 0x228   : > { %v8634_v49 = vpop.eup %8633  ;;  %v4164_v26 = vpack.c.bf16 %v4152_v36, %v4152_v36  ;;  %v3994_v6 = vmul.f32 %v8632_v9, %v11717_v27  ;;  %8637 = vrsqrt.f32 %v11780_v30  ;;  %4390 = vmatprep.mubr.bf16.mxu1 %v16352_v21  ;;  %v3998_v15 = vand.u32 2147483648, %v11717_v27  ;;  %v2711_v9 = vpop.f32.mrb[14].mxu0 }
 0x229   : > { %v3830_v48 = vmul.f32 %v8634_v49, %v11722_v41  ;;  %v1672_v60 = vadd.f32 %v1648_v10, %v1600_v44  ;;  %v3938_v13 = vrot.slane %v16447_v3, 2  ;;  %v1720_v63 = vrot.slane %v1696_v7, 7  ;;  %v2712_v44 = vpop.f32.mrb[15].mxu0 }
 0x22a   : > { %v4191_v61 = vand.u32 %v4164_v26, %v16319_v19  ;;  %v3996_v57 = vsel %vm3995_vm5, %v11717_v27, %v3994_v6  ;;  %v3926_v40 = vadd.f32 %v3902_v5, %v16447_v3  ;;  %vm3845_vm3 = vcmp.eq.f32.partialorder %v11767_v56, inf }
 0x22b   : > { %v3832_v36 = vsel %vm3831_vm11, %v11722_v41, %v3830_v48  ;;  %v3999_v49 = vsel %vm3997_vm12, %v3998_v15, %v3996_v57  ;;  %v1614_v10 = vsub.f32 %v10245_v23, %v16406_v8  ;;  %v11811_v27 = vadd.f32 %v1720_v63, %v1672_v60  ;;  %v16450_v15 = vld [vmem:[#allocation32_spill] sm:$0xff] }
 0x22c   : > { %4358 = vmatprep.subr.bf16.mxu1 %v4191_v61  ;;  %v3835_v26 = vsel %vm3833_vm9, %v3834_v54, %v3832_v36  ;;  %v11813_v7 = vadd.f32 %v3938_v13, %v3926_v40  ;;  %v1590_v3 = vsub.f32 %v10139_v11, %v16406_v8  ;;  %v1686_v48 = vsub.f32 %v10139_v11, %v16407_v32  ;;  %v11830_v63 = vpop.f32.mrb[8].mxu1 }
 0x22d   : > { %v4065_v5 = vrot.slane %v3835_v26, 1  ;;  %v1626_v6 = vmul.f32 %v1614_v10, %v1614_v10  ;;  %v3904_v57 = vrot.slane %v16450_v15, 1  ;;  %v4113_v9 = vrot.slane %v3999_v49, 6  ;;  %16451 = vst [vmem:[#allocation119_spill] sm:$0xff] %v11830_v63  ;;  %v11834_v44 = vpop.f32.mrb[9].mxu1 }
 0x22e   : > { %vm3847_vm2 = vcmp.eq.f32.partialorder %v11767_v56, 0.0  ;;  %v3848_v41 = vand.u32 2147483648, %v11767_v56  ;;  %8639 = vrsqrt.f32 %v11811_v27  ;;  %vm4009_vm14 = vcmp.eq.f32.partialorder %v11780_v30, inf  ;;  %16452 = vst [vmem:[#allocation95_spill] sm:$0xff] %v11834_v44 }
 0x22f   : > { %v8636_v54 = vpop.eup %8635  ;;  %v4137_v60 = vsel %vm2467_vm4, %v4065_v5, %v11601_v29  ;;  %vm4011_vm6 = vcmp.eq.f32.partialorder %v11780_v30, 0.0  ;;  %8641 = vrsqrt.f32 %v11813_v7  ;;  %v1602_v13 = vmul.f32 %v1590_v3, %v1590_v3 }
 0x230   : > { %v4149_v8 = vsel %vm2480_vm8, %v4137_v60, %v4113_v9  ;;  %v3844_v32 = vmul.f32 %v8636_v54, %v11767_v56  ;;  %v1650_v61 = vrot.slane %v1626_v6, 1  ;;  %v4012_v36 = vand.u32 2147483648, %v11780_v30  ;;  %v11842_v6 = vpop.f32.mrb[10].mxu1 }
 0x231   : > { %v4161_v40 = vpack.c.bf16 %v4149_v8, %v4149_v8  ;;  %v1698_v49 = vmul.f32 %v1686_v48, %v1686_v48  ;;  %v3928_v10 = vadd.f32 %v3904_v57, %v16450_v15  ;;  %v3940_v54 = vrot.slane %v16450_v15, 2  ;;  %16453 = vst [vmem:[#allocation118_spill] sm:$0xff] %v11842_v6  ;;  %v11848_v23 = vpop.f32.mrb[11].mxu1 }
 0x232   : > { %v8638_v26 = vpop.eup %8637  ;;  %v3846_v5 = vsel %vm3845_vm3, %v11767_v56, %v3844_v32  ;;  %v1674_v9 = vadd.f32 %v1650_v61, %v1602_v13  ;;  %v1611_v3 = vsub.f32 %v10017_v25, %v16413_v46  ;;  %16454 = vst [vmem:[#allocation84_spill] sm:$0xff] %v11848_v23  ;;  %v1587_v15 = vsub.f32 %v10046_v53, %v16413_v46 }
 0x233   : > { %v4182_v60 = vand.u32 %v4161_v40, %v16319_v19  ;;  %v3849_v48 = vsel %vm3847_vm2, %v3848_v41, %v3846_v5  ;;  %v4008_v57 = vmul.f32 %v8638_v26, %v11780_v30  ;;  %v1722_v8 = vrot.slane %v1698_v49, 7  ;;  %v16455_v41 = vld [vmem:[#allocation102_spill] sm:$0xff] }
 0x234   : > { %v4067_v11 = vrot.slane %v3849_v48, 1  ;;  %v11850_v32 = vadd.f32 %v3940_v54, %v3928_v10  ;;  %v1623_v13 = vmul.f32 %v1611_v3, %v1611_v3  ;;  %v1683_v56 = vsub.f32 %v10046_v53, %v16414_v62 }
 0x235   : > { %4308 = vmatpush1.bf16.msra.mxu0 %v4182_v60  ;;  %v4010_v61 = vsel %vm4009_vm14, %v11780_v30, %v4008_v57  ;;  %v11857_v40 = vadd.f32 %v1722_v8, %v1674_v9  ;;  %v3901_v49 = vrot.slane %v16455_v41, 1  ;;  %v11864_v10 = vmul.f32 %v11537_v43, %v11313_v59 }
 0x236   : > { %v4013_v46 = vsel %vm4011_vm6, %v4012_v36, %v4010_v61  ;;  %v4139_v26 = vsel %vm2467_vm4, %v4067_v11, %v11665_v1  ;;  %8643 = vrsqrt.f32 %v11850_v32  ;;  %vm1812_vm5 = vcmp.eq.f32.partialorder %v11811_v27, inf  ;;  %v11878_v11 = vpop.f32.mrb[12].mxu1 }
 0x237   : > { %v4115_v5 = vrot.slane %v4013_v46, 6  ;;  %vm1814_vm11 = vcmp.eq.f32.partialorder %v11811_v27, 0.0  ;;  %8645 = vrsqrt.f32 %v11857_v40  ;;  %v1815_v9 = vand.u32 2147483648, %v11811_v27  ;;  %16456 = vst [vmem:[#allocation71_spill] sm:$0xff] %v11878_v11  ;;  %v11884_v57 = vpop.f32.mrb[13].mxu1 }
 0x238   : > { %v8640_v62 = vpop.eup %8639  ;;  %vm4030_vm9 = vcmp.eq.f32.partialorder %v11813_v7, inf  ;;  %8260 = vmatmul.mubr.msk.bf16.vlgmr.msra.gmra.mrb[56].mxu0 %vm2516_vm13, %v11681_v4  ;;  %v1599_v43 = vmul.f32 %v1587_v15, %v1587_v15  ;;  %v1647_v30 = vrot.slane %v1623_v13, 1  ;;  %v1695_v60 = vmul.f32 %v1683_v56, %v1683_v56  ;;  %16457 = vst [vmem:[#allocation73_spill] sm:$0xff] %v11884_v57  ;;  %v2762_v13 = vpop.f32.mrb[14].mxu1 }
 0x239   : > { %v8642_v36 = vpop.eup %8641  ;;  %v4151_v54 = vsel %vm2480_vm8, %v4139_v26, %v4115_v5  ;;  %v1811_v3 = vmul.f32 %v8640_v62, %v11811_v27  ;;  %v3925_v48 = vadd.f32 %v3901_v49, %v16455_v41  ;;  %4349 = vmatprep.mubr.bf16.mxu0 %v16352_v21  ;;  %v3937_v15 = vrot.slane %v16455_v41, 2  ;;  %v2763_v5 = vpop.f32.mrb[15].mxu1 }
 0x23a   : > { %v4163_v8 = vpack.c.bf16 %v4151_v54, %v4151_v54  ;;  %v4029_v61 = vmul.f32 %v8642_v36, %v11813_v7  ;;  %v1671_v46 = vadd.f32 %v1647_v30, %v1599_v43  ;;  %vm4032_vm12 = vcmp.eq.f32.partialorder %v11813_v7, 0.0  ;;  %v16459_v5 = vld [vmem:[#allocation20_spill] sm:$0xff] }
 0x23b   : > { %v1813_v26 = vsel %vm1812_vm5, %v11811_v27, %v1811_v3  ;;  %v4033_v56 = vand.u32 2147483648, %v11813_v7  ;;  %v1719_v49 = vrot.slane %v1695_v60, 7  ;;  %v11901_v43 = vadd.f32 %v3937_v15, %v3925_v48 }
 0x23c   : > { %v4188_v62 = vand.u32 %v4163_v8, %v16319_v19  ;;  %v11896_v54 = vsel %vm1814_vm11, %v1815_v9, %v1813_v26  ;;  %v4031_v41 = vsel %vm4030_vm9, %v11813_v7, %v4029_v61  ;;  %v1613_v60 = vsub.f32 %v10232_v0, %v16424_v35 }
 0x23d   : > { %16458 = vst [vmem:[#allocation87_spill] sm:$0xff] %v11896_v54  ;;  %v4034_v30 = vsel %vm4032_vm12, %v4033_v56, %v4031_v41  ;;  %v4070_v36 = vrot.slane %v11896_v54, 1  ;;  %v11904_v3 = vadd.f32 %v1719_v49, %v1671_v46  ;;  %vm4044_vm3 = vcmp.eq.f32.partialorder %v11850_v32, inf  ;;  %v16489_v54 = vld [vmem:[#allocation14_spill] sm:$0xff] }
 0x23e   : > { %4359 = vmatpush1.bf16.msra.mxu1 %v4188_v62  ;;  %v4118_v8 = vrot.slane %v4034_v30, 6  ;;  %8647 = vrsqrt.f32 %v11901_v43  ;;  %v1589_v27 = vsub.f32 %v10120_v14, %v16424_v35  ;;  %vm1826_vm2 = vcmp.eq.f32.partialorder %v11857_v40, inf }
 0x23f   : > { %v4142_v7 = vsel %vm2467_vm4, %v4070_v36, %v11467_v34  ;;  %vm1828_vm14 = vcmp.eq.f32.partialorder %v11857_v40, 0.0  ;;  %8649 = vrsqrt.f32 %v11904_v3  ;;  %v1829_v61 = vand.u32 2147483648, %v11857_v40 }
 0x240   : > { %v8644_v9 = vpop.eup %8643  ;;  %v4154_v48 = vsel %vm2480_vm8, %v4142_v7, %v4118_v8  ;;  %vm4046_vm6 = vcmp.eq.f32.partialorder %v11850_v32, 0.0  ;;  %v4047_v46 = vand.u32 2147483648, %v11850_v32  ;;  %8261 = vmatmul.mubr.msk.bf16.gmra.mrb[60].mxu0 %vm2516_vm13, %v11729_v38  ;;  %v1625_v13 = vmul.f32 %v1613_v60, %v1613_v60 }
 0x241   : > { %v8646_v35 = vpop.eup %8645  ;;  %v4166_v34 = vpack.c.bf16 %v4154_v48, %v4154_v48  ;;  %v4043_v15 = vmul.f32 %v8644_v9, %v11850_v32  ;;  %8262 = vmatmul.mubr.msk.bf16.vlgmr.msra.gmra.mrb[56].mxu1 %vm2516_vm13, %v11681_v4  ;;  %v1685_v26 = vsub.f32 %v10120_v14, %v16425_v55  ;;  %v1601_v49 = vmul.f32 %v1589_v27, %v1589_v27  ;;  %v11938_v55 = vpop.f32.mrb[16].mxu0 }
 0x242   : > { %v1825_v56 = vmul.f32 %v8646_v35, %v11857_v40  ;;  %v3903_v62 = vrot.slane %v16459_v5, 1  ;;  %4400 = vmatprep.mubr.bf16.mxu1 %v16352_v21  ;;  %4441 = vmatprep.mubr.bf16.mxu0 %v16352_v21  ;;  %v1649_v36 = vrot.slane %v1625_v13, 1  ;;  %v9271_v8 = vmov 1   ;;  %16460 = vst [vmem:[#allocation112_spill] sm:$0xff] %v11938_v55  ;;  %v11949_v35 = vpop.f32.mrb[17].mxu0 }
 0x243   : > { %v4197_v41 = vand.u32 %v4166_v34, %v16319_v19  ;;  %v4045_v30 = vsel %vm4044_vm3, %v11850_v32, %v4043_v15  ;;  %v1697_v60 = vmul.f32 %v1685_v26, %v1685_v26  ;;  %8382 = vset.pattern.permute.xlu1 %v9271_v8  ;;  %8385 = vset.pattern.permute.xlu0 %v9271_v8  ;;  %v3939_v48 = vrot.slane %v16459_v5, 2  ;;  %v11955_v26 = vpop.f32.mrb[18].mxu0 }
 0x244   : > { %v1827_v27 = vsel %vm1826_vm2, %v11857_v40, %v1825_v56  ;;  %v4048_v7 = vsel %vm4046_vm6, %v4047_v46, %v4045_v30  ;;  %v3927_v9 = vadd.f32 %v3903_v62, %v16459_v5  ;;  %4851 = vperm.xlu1 %8382, %v11425_v37   ;;  %4855 = vperm.xlu0 %8385, %v11438_v52   ;;  %vm1001_vm5 = vcmp.eq.f32.partialorder %v10519_v33, 0.0  ;;  %v11962_v52 = vpop.f32.mrb[19].mxu0 }
 0x245   : > { %16461 = vst [vmem:[#allocation98_spill] sm:$0xff] %v11949_v35  ;;  %4409 = vmatprep.subr.bf16.mxu0 %v4197_v41  ;;  %v11953_v34 = vsel %vm1828_vm14, %v1829_v61, %v1827_v27  ;;  %v1673_v15 = vadd.f32 %v1649_v36, %v1601_v49  ;;  %v1721_v13 = vrot.slane %v1697_v60, 7  ;;  %16463 = vst [vmem:[#allocation121_spill] sm:$0xff] %v11955_v26  ;;  %v1002_v32 = vand.u32 2147483648, %v10519_v33 }
 0x246   : > { %16462 = vst [vmem:[#allocation105_spill] sm:$0xff] %v11953_v34  ;;  %v4072_v46 = vrot.slane %v11953_v34, 1  ;;  %v11960_v56 = vadd.f32 %v3939_v48, %v3927_v9  ;;  %16464 = vst [vmem:[#allocation100_spill] sm:$0xff] %v11962_v52  ;;  %vm1511_vm11 = vcmp.eq.f32.partialorder %v11313_v59, inf  ;;  %v1514_v40 = vand.u32 2147483648, %v11313_v59  ;;  %v337_v9 = vld [vmem:[%s9373_s23] sm:$0xff] }
 0x247   : > { %v4120_v61 = vrot.slane %v4048_v7, 6  ;;  %v11966_v5 = vadd.f32 %v1721_v13, %v1673_v15  ;;  %v11969_v62 = vsel %vm1001_vm5, %v1002_v32, %v11481_v22  ;;  %v1512_v33 = vsel %vm1511_vm11, %v11313_v59, %v11864_v10  ;;  %v338_v48 = vld [vmem:[%s9373_s23 + $0x8] sm:$0xff] }
 0x248   : > { %v8648_v49 = vpop.eup %8647  ;;  %v4144_v41 = vsel %vm2467_vm4, %v4072_v46, %v11544_v50  ;;  %8651 = vrsqrt.f32 %v11960_v56  ;;  %v15981_v30 = vmov 2   ;;  %vm4023_vm9 = vcmp.eq.f32.partialorder %v11901_v43, inf  ;;  %v347_v50 = vld [vmem:[%s15763_s7 + $0x10] sm:$0x7]  ;;  %v11999_v32 = vpop.f32.mrb[20].mxu0 }
 0x249   : > { %8383 = vset.pattern.permute.xlu1 %v15981_v30  ;;  %8388 = vset.pattern.permute.xlu0 %v15981_v30  ;;  %v8650_v36 = vpop.eup %8649  ;;  %v4156_v60 = vsel %vm2480_vm8, %v4144_v41, %v4120_v61  ;;  %v4022_v22 = vmul.f32 %v8648_v49, %v11901_v43  ;;  %8653 = vrsqrt.f32 %v11966_v5  ;;  %vm4025_vm12 = vcmp.eq.f32.partialorder %v11901_v43, 0.0  ;;  %16465 = vst [vmem:[#allocation85_spill] sm:$0xff] %v11999_v32  ;;  %v12004_v41 = vpop.f32.mrb[21].mxu0 }
 0x24a   : > { %8263 = vmatmul.mubr.msk.bf16.gmra.mrb[60].mxu1 %vm2516_vm13, %v11729_v38  ;;  %4935 = vperm.xlu1 %8383, %v11425_v37   ;;  %v4168_v10 = vpack.c.bf16 %v4156_v60, %v4156_v60  ;;  %v1804_v27 = vmul.f32 %v8650_v36, %v11904_v3  ;;  %v4026_v7 = vand.u32 2147483648, %v11901_v43  ;;  %vm1805_vm3 = vcmp.eq.f32.partialorder %v11904_v3, inf  ;;  %16466 = vst [vmem:[#allocation82_spill] sm:$0xff] %v12004_v41  ;;  %v16467_v36 = vld [vmem:[#allocation115_spill] sm:$0xff] }
 0x24b   : > { %4492 = vmatprep.mubr.bf16.mxu1 %v16352_v21  ;;  %4943 = vperm.xlu0 %8388, %v347_v50   ;;  %v1808_v37 = vand.u32 2147483648, %v11904_v3  ;;  %v4024_v15 = vsel %vm4023_vm9, %v11901_v43, %v4022_v22  ;;  %v11997_v13 = vpack.i.bf16 %v338_v48, %v337_v9  ;;  %vm1807_vm2 = vcmp.eq.f32.partialorder %v11904_v3, 0.0  ;;  %v2813_v22 = vpop.f32.mrb[22].mxu0  ;;  %v16508_v41 = vld [vmem:[#allocation43_spill] sm:$0xff] }
 0x24c   : > { %v4203_v46 = vand.u32 %v4168_v10, %v16319_v19  ;;  %v1806_v61 = vsel %vm1805_vm3, %v11904_v3, %v1804_v27  ;;  %v4027_v49 = vsel %vm4025_vm12, %v4026_v7, %v4024_v15  ;;  %v5054_v60 = vrot.slane %v16467_v36, 7  ;;  %v2814_v7 = vpop.f32.mrb[23].mxu0  ;;  %v16469_v15 = vld [vmem:[#allocation7_spill] sm:$0xff] }
 0x24d   : > { %vm1513_vm14 = vcmp.eq.f32.partialorder %v11313_v59, 0.0  ;;  %v12009_v43 = vsel %vm1807_vm2, %v1808_v37, %v1806_v61  ;;  %v4117_v9 = vrot.slane %v4027_v49, 6  ;;  %v864_v59 = vmul.f32 %v9566_v17, %v9566_v17  ;;  %v9211_v37 = vld [vmem:[%s9373_s23 + $0x28] sm:$0x7] }
 0x24e   : > { %16468 = vst [vmem:[#allocation79_spill] sm:$0xff] %v12009_v43  ;;  %8384 = vset.pattern.permute.xlu1 %v16352_v21  ;;  %v12012_v10 = vsel %vm1513_vm14, %v1514_v40, %v1512_v33  ;;  %4460 = vmatprep.subr.bf16.mxu1 %v4203_v46  ;;  %v4069_v3 = vrot.slane %v12009_v43, 1  ;;  %v876_v48 = vmul.f32 %v9568_v18, %v9568_v18  ;;  %vm4037_vm6 = vcmp.eq.f32.partialorder %v11960_v56, inf }
 0x24f   : > { %4811 = vperm.xlu1 %8384, %v347_v50   ;;  %8400 = vrot.lane.b32.xlu0 %v11997_v13, %s9264_s25  ;;  %v1068_v40 = vmul.f32 %v9211_v37, %v9211_v37  ;;  %vm4039_vm5 = vcmp.eq.f32.partialorder %v11960_v56, 0.0  ;;  %v1128_v46 = vmul.f32 %v16469_v15, %v16469_v15  ;;  %vm1819_vm11 = vcmp.eq.f32.partialorder %v11966_v5, inf }
 0x250   : > { %v4141_v33 = vsel %vm2467_vm4, %v4069_v3, %v11601_v29  ;;  %v900_v49 = vrot.slane %v876_v48, 1  ;;  %v4040_v27 = vand.u32 2147483648, %v11960_v56  ;;  %v12033_v29 = vrot.slane %v9211_v37, 7 }
 0x251   : > { %v4153_v61 = vsel %vm2480_vm8, %v4141_v33, %v4117_v9  ;;  %v1076_v22 = vrot.slane %v1068_v40, 1  ;;  %v12038_v9 = vpop.f32.mrb[16].mxu1  ;;  %v948_v48 = vrot.slane %v864_v59, 7  ;;  %v1152_v15 = vrot.slane %v1128_v46, 1 }
 0x252   : > { %v8652_v7 = vpop.eup %8651  ;;  %v4165_v30 = vpack.c.bf16 %v4153_v61, %v4153_v61  ;;  %16470 = vst [vmem:[#allocation96_spill] sm:$0xff] %v12038_v9  ;;  %v924_v33 = vadd.f32 %v900_v49, %v864_v59  ;;  %v12042_v25 = vpop.f32.mrb[17].mxu1  ;;  %v1088_v53 = vrot.slane %v1068_v40, 2  ;;  %vm1821_vm9 = vcmp.eq.f32.partialorder %v11966_v5, 0.0 }
 0x253   : > { %8386 = vset.pattern.permute.xlu1 %v9271_v8  ;;  %v8654_v3 = vpop.eup %8653  ;;  %v4036_v0 = vmul.f32 %v8652_v7, %v11960_v56  ;;  %8410 = vrot.lane.b32.xlu0 %v11997_v13, %s9265_s26  ;;  %16471 = vst [vmem:[#allocation116_spill] sm:$0xff] %v12042_v25  ;;  %v1084_v8 = vadd.f32 %v1076_v22, %v1068_v40  ;;  %v12049_v12 = vpop.f32.mrb[18].mxu1  ;;  %v12060_v22 = vrot.slane %v9211_v37, 2  ;;  %v9212_v37 = vld [vmem:[%s15763_s7 + $0x8] sm:$0xff]  ;;  %v16485_v25 = vld [vmem:[#allocation28_spill] sm:$0xff] }
 0x254   : > { %4859 = vperm.xlu1 %8386, %v347_v50   ;;  %v4194_v61 = vand.u32 %v4165_v30, %v16319_v19  ;;  %v1818_v14 = vmul.f32 %v8654_v3, %v11966_v5  ;;  %v1822_v50 = vand.u32 2147483648, %v11966_v5  ;;  %16472 = vst [vmem:[#allocation110_spill] sm:$0xff] %v12049_v12  ;;  %v12051_v59 = vadd.f32 %v948_v48, %v924_v33  ;;  %v12058_v49 = vpop.f32.mrb[19].mxu1 }
 0x255   : > { %v4038_v7 = vsel %vm4037_vm6, %v11960_v56, %v4036_v0  ;;  %16473 = vst [vmem:[#allocation97_spill] sm:$0xff] %v12058_v49  ;;  %16474 = vst [vmem:[#allocation104_spill] sm:$0xff] %v12060_v22  ;;  %v16476_v0 = vmov 2   ;;  %v1176_v33 = vadd.f32 %v1152_v15, %v1128_v46  ;;  %v16477_v56 = vld [vmem:[#allocation34_spill] sm:$0xff]  ;;  %v12078_v48 = vadd.f32 %v1088_v53, %v1084_v8  ;;  %v340_v15 = vld [vmem:[%s9373_s23 + $0x18] sm:$0xff] }
 0x256   : > { %4410 = vmatpush1.bf16.msra.mxu0 %v4194_v61  ;;  %v1820_v30 = vsel %vm1819_vm11, %v11966_v5, %v1818_v14  ;;  %v4041_v40 = vsel %vm4039_vm5, %v4040_v27, %v4038_v7  ;;  %8655 = vrsqrt.f32 %v12051_v59  ;;  %v1344_v14 = vsub.f32 %v9568_v18, %v12033_v29  ;;  %v16478_v61 = vld [vmem:[#allocation17_spill] sm:$0xff]  ;;  %v339_v18 = vld [vmem:[%s9373_s23 + $0x10] sm:$0xff] }
 0x257   : > { %v12062_v3 = vsel %vm1821_vm9, %v1822_v50, %v1820_v30  ;;  %8420 = vrot.lane.b32.xlu0 %v11997_v13, %s9266_s27  ;;  %v12072_v5 = vsel %vm2480_vm8, %v16477_v56, %v5054_v60  ;;  %v4119_v7 = vrot.slane %v4041_v40, 6  ;;  %v1188_v30 = vrot.slane %v1128_v46, 2  ;;  %v12098_v46 = vpop.f32.mrb[20].mxu1 }
 0x258   : > { %16475 = vst [vmem:[#allocation120_spill] sm:$0xff] %v12062_v3  ;;  %8387 = vset.pattern.permute.xlu1 %v16476_v0  ;;  %v4071_v27 = vrot.slane %v12062_v3, 1  ;;  %v1320_v60 = vsub.f32 %v9566_v17, %v12033_v29  ;;  %v16479_v0 = vld [vmem:[#allocation42_spill] sm:$0xff]  ;;  %v16480_v3 = vrot.slane %v11969_v62, 1  ;;  %16481 = vst [vmem:[#allocation88_spill] sm:$0xff] %v12098_v46  ;;  %v1356_v50 = vmul.f32 %v1344_v14, %v1344_v14 }
 0x259   : > { %4939 = vperm.xlu1 %8387, %v9212_v37   ;;  %8264 = vmatmul.mubr.msk.bf16.vlgmr.msra.gmra.mrb[64].mxu0 %vm2516_vm13, %v11681_v4  ;;  %v5056_v56 = vrot.slane %v16479_v0, 7  ;;  %v12100_v37 = vadd.f32 %v1188_v30, %v1176_v33  ;;  %v1424_v62 = vsub.f32 %v9566_v17, %v12060_v22  ;;  %8657 = vrsqrt.f32 %v12078_v48 }
 0x25a   : > { %v5332_v53 = vsel %vm2467_vm4, %v16480_v3, %v12012_v10  ;;  %v4143_v8 = vsel %vm2467_vm4, %v4071_v27, %v11665_v1  ;;  %4451 = vmatprep.mubr.bf16.mxu0 %v16352_v21  ;;  %v12107_v1 = vpack.i.bf16 %v340_v15, %v339_v18  ;;  %v12109_v27 = vpop.f32.mrb[21].mxu1  ;;  %v1332_v14 = vmul.f32 %v1320_v60, %v1320_v60  ;;  %v9213_v18 = vld [vmem:[%s9373_s23 + $0x20] sm:$0x7] }
 0x25b   : > { %v4155_v40 = vsel %vm2480_vm8, %v4143_v8, %v4119_v7  ;;  %8430 = vrot.lane.b32.xlu0 %v11997_v13, %s9267_s10  ;;  %16483 = vst [vmem:[#allocation123_spill] sm:$0xff] %v12109_v27  ;;  %v16484_v7 = vld [vmem:[#allocation40_spill] sm:$0xff]  ;;  %v2864_v30 = vpop.f32.mrb[22].mxu1  ;;  %v1380_v8 = vrot.slane %v1356_v50, 1  ;;  %v1436_v46 = vmul.f32 %v1424_v62, %v1424_v62  ;;  %v12115_v3 = vsel %vm2480_vm8, %v5332_v53, %v5056_v56  ;;  %v16486_v62 = vld [vmem:[#allocation46_spill] sm:$0xff] }
 0x25c   : > { %v4167_v49 = vpack.c.bf16 %v4155_v40, %v4155_v40  ;;  %v2865_v12 = vpop.f32.mrb[23].mxu1  ;;  %v1067_v15 = vmul.f32 %v9213_v18, %v9213_v18  ;;  %8659 = vrsqrt.f32 %v12100_v37  ;;  %vm992_vm12 = vcmp.eq.f32.partialorder %v12051_v59, inf }
 0x25d   : > { %8390 = vrot.lane.b32.xlu1 %v11997_v13, %s9263_s24  ;;  %v1404_v60 = vadd.f32 %v1380_v8, %v1332_v14  ;;  %v1460_v50 = vrot.slane %v1436_v46, 7  ;;  %v16487_v14 = vld [vmem:[#allocation19_spill] sm:$0xff]  ;;  %vm994_vm3 = vcmp.eq.f32.partialorder %v12051_v59, 0.0  ;;  %v995_v17 = vand.u32 2147483648, %v12051_v59 }
 0x25e   : > { %v4200_v40 = vand.u32 %v4167_v49, %v16319_v19  ;;  %v1075_v56 = vrot.slane %v1067_v15, 1  ;;  %v1087_v49 = vrot.slane %v1067_v15, 2  ;;  %v1151_v46 = vrot.slane %v16487_v14, 1  ;;  %v9214_v8 = vld [vmem:[%s9373_s23 + $0x38] sm:$0x7] }
 0x25f   : > { %8440 = vrot.lane.b32.xlu0 %v11997_v13, %s9268_s11  ;;  %v12130_v13 = vadd.f32 %v1460_v50, %v1404_v60  ;;  %v1070_v18 = vmul.f32 %v9214_v8, %v9214_v8  ;;  %vm1108_vm2 = vcmp.eq.f32.partialorder %v12078_v48, inf  ;;  %vm1110_vm14 = vcmp.eq.f32.partialorder %v12078_v48, 0.0 }
 0x260   : > { %4461 = vmatpush1.bf16.msra.mxu1 %v4200_v40  ;;  %v8656_v12 = vpop.eup %8655  ;;  %v1083_v30 = vadd.f32 %v1075_v56, %v1067_v15  ;;  %v878_v15 = vmul.f32 %v9692_v20, %v9692_v20  ;;  %v16488_v56 = vld [vmem:[#allocation31_spill] sm:$0xff]  ;;  %v1175_v40 = vadd.f32 %v1151_v46, %v16487_v14  ;;  %vm1232_vm6 = vcmp.eq.f32.partialorder %v12100_v37, inf }
 0x261   : > { %8395 = vrot.lane.b32.xlu1 %v12107_v1, %s9263_s24  ;;  %8265 = vmatmul.mubr.msk.bf16.gmra.mrb[68].mxu0 %vm2516_vm13, %v11729_v38  ;;  %8661 = vrsqrt.f32 %v12130_v13  ;;  %v991_v60 = vmul.f32 %v8656_v12, %v12051_v59  ;;  %v1187_v12 = vrot.slane %v16487_v14, 2  ;;  %v1235_v27 = vand.u32 2147483648, %v12100_v37  ;;  %v16490_v14 = vld [vmem:[#allocation113_spill] sm:$0xff] }
 0x262   : > { %5565 = vmatprep.mubr.bf16.mxu0 %v16352_v21  ;;  %v12144_v50 = vadd.f32 %v1087_v49, %v1083_v30  ;;  %v866_v30 = vmul.f32 %v16313_v24, %v16313_v24  ;;  %v1111_v49 = vand.u32 2147483648, %v12078_v48  ;;  %v902_v33 = vrot.slane %v878_v15, 1 }
 0x263   : > { %8266 = vmatmul.mubr.msk.bf16.vlgmr.msra.gmra.mrb[64].mxu1 %vm2516_vm13, %v11681_v4  ;;  %v8658_v53 = vpop.eup %8657  ;;  %v993_v46 = vsel %vm992_vm12, %v12051_v59, %v991_v60  ;;  %v12167_v34 = vadd.f32 %v1187_v12, %v1175_v40  ;;  %v1078_v43 = vrot.slane %v1070_v18, 1  ;;  %v1130_v2 = vmul.f32 %v16489_v54, %v16489_v54 }
 0x264   : > { %4502 = vmatprep.mubr.bf16.mxu1 %v16352_v21  ;;  %8663 = vrsqrt.f32 %v12144_v50  ;;  %v1107_v19 = vmul.f32 %v8658_v53, %v12078_v48  ;;  %v926_v9 = vadd.f32 %v902_v33, %v866_v30  ;;  %v950_v32 = vrot.slane %v866_v30, 7  ;;  %v16491_v33 = vld [vmem:[#allocation30_spill] sm:$0xff] }
 0x265   : > { %8405 = vrot.lane.b32.xlu1 %v12107_v1, %s9264_s25  ;;  %v1090_v52 = vrot.slane %v1070_v18, 2  ;;  %v996_v60 = vsel %vm994_vm3, %v995_v17, %v993_v46  ;;  %vm1234_vm5 = vcmp.eq.f32.partialorder %v12100_v37, 0.0  ;;  %vm5354_vm11 = vcmask 1042432  }
 0x266   : > { %v8660_v4 = vpop.eup %8659  ;;  %v1086_v53 = vadd.f32 %v1078_v43, %v1070_v18  ;;  %v1154_v40 = vrot.slane %v1130_v2, 1  ;;  %vm1504_vm9 = vcmp.eq.f32.partialorder %v12130_v13, inf  ;;  %v5090_v15 = vrot.slane %v16491_v33, 6  ;;  %v16494_v33 = vld [vmem:[#allocation114_spill] sm:$0xff] }
 0x267   : > { %v1231_v54 = vmul.f32 %v8660_v4, %v12100_v37  ;;  %v12182_v30 = vadd.f32 %v950_v32, %v926_v9  ;;  %v1109_v59 = vsel %vm1108_vm2, %v12078_v48, %v1107_v19  ;;  %8665 = vrsqrt.f32 %v12167_v34 }
 0x268   : > { %v1178_v43 = vadd.f32 %v1154_v40, %v1130_v2  ;;  %v5031_v18 = vrot.slane %v996_v60, 1  ;;  %v12191_v4 = vadd.f32 %v1090_v52, %v1086_v53  ;;  %v12193_v12 = vrot.slane %v9214_v8, 7 }
 0x269   : > { %8415 = vrot.lane.b32.xlu1 %v12107_v1, %s9265_s26  ;;  %v1507_v32 = vand.u32 2147483648, %v12130_v13  ;;  %vm1101_vm12 = vcmp.eq.f32.partialorder %v12144_v50, inf  ;;  %v1190_v9 = vrot.slane %v1130_v2, 2  ;;  %v12197_v19 = vrot.slane %v9214_v8, 2 }
 0x26a   : > { %16492 = vst [vmem:[#allocation101_spill] sm:$0xff] %v12193_v12  ;;  %v1112_v40 = vsel %vm1110_vm14, %v1111_v49, %v1109_v59  ;;  %v1233_v52 = vsel %vm1232_vm6, %v12100_v37, %v1231_v54  ;;  %8667 = vrsqrt.f32 %v12182_v30  ;;  %v1104_v53 = vand.u32 2147483648, %v12144_v50 }
 0x26b   : > { %8267 = vmatmul.mubr.msk.bf16.gmra.mrb[68].mxu1 %vm2516_vm13, %v11729_v38  ;;  %v8662_v38 = vpop.eup %8661  ;;  %vm1506_vm13 = vcmp.eq.f32.partialorder %v12130_v13, 0.0  ;;  %16493 = vst [vmem:[#allocation66_spill] sm:$0xff] %v12197_v19  ;;  %v12214_v48 = vadd.f32 %v1190_v9, %v1178_v43  ;;  %vm5367_vm3 = vcmask 1043456   ;;  %vm1103_vm2 = vcmp.eq.f32.partialorder %v12144_v50, 0.0 }
 0x26c   : > { %5616 = vmatprep.mubr.bf16.mxu1 %v16352_v21  ;;  %v1503_v17 = vmul.f32 %v8662_v38, %v12130_v13  ;;  %8669 = vrsqrt.f32 %v12191_v4  ;;  %v1346_v54 = vsub.f32 %v9692_v20, %v12193_v12  ;;  %v5355_v59 = vsel %vm5354_vm11, %v12072_v5, %v5090_v15 }
 0x26d   : > { %8425 = vrot.lane.b32.xlu1 %v12107_v1, %s9266_s27  ;;  %v1426_v43 = vsub.f32 %v16313_v24, %v12197_v19  ;;  %v12235_v20 = vrot.slane %v1112_v40, 4  ;;  %v16498_v15 = vrot.slane %v16488_v56, 7  ;;  %vm5380_vm14 = vcmask 1044480  }
 0x26e   : > { %v8664_v46 = vpop.eup %8663  ;;  %v1505_v60 = vsel %vm1504_vm9, %v12130_v13, %v1503_v17  ;;  %v12233_v17 = vsel %vm1234_vm5, %v1235_v27, %v1233_v52  ;;  %8671 = vrsqrt.f32 %v12214_v48  ;;  %vm5393_vm6 = vcmask 1045504  }
 0x26f   : > { %v1508_v2 = vsel %vm1506_vm13, %v1507_v32, %v1505_v60  ;;  %v1100_v8 = vmul.f32 %v8664_v46, %v12144_v50  ;;  %16495 = vst [vmem:[#allocation122_spill] sm:$0xff] %v12233_v17  ;;  %16496 = vst [vmem:[#allocation92_spill] sm:$0xff] %v12235_v20  ;;  %v9215_v32 = vld [vmem:[%s9373_s23 + $0x30] sm:$0x7]  ;;  %vm1006_vm5 = vcmp.eq.f32.partialorder %v12182_v30, inf  ;;  %vm1122_vm9 = vcmp.eq.f32.partialorder %v12191_v4, inf }
 0x270   : > { %v5331_v49 = vsel %vm2467_vm4, %v5031_v18, %v1508_v2  ;;  %v1322_v18 = vsub.f32 %v16313_v24, %v12193_v12  ;;  %v12240_v9 = vmul.f32 %v9215_v32, %v9215_v32  ;;  %v5091_v5 = vrot.slane %v1508_v2, 6  ;;  %v16505_v24 = vld [vmem:[#allocation58_spill] sm:$0xff] }
 0x271   : > { %8435 = vrot.lane.b32.xlu1 %v12107_v1, %s9267_s10  ;;  %v1102_v13 = vsel %vm1101_vm12, %v12144_v50, %v1100_v8  ;;  %v5343_v60 = vsel %vm2480_vm8, %v5331_v49, %v16498_v15  ;;  %v1358_v2 = vmul.f32 %v1346_v54, %v1346_v54  ;;  %v8666_v8 = vpop.eup %8665  ;;  %v16502_v49 = vld [vmem:[#allocation77_spill] sm:$0xff]  ;;  %v1438_v15 = vmul.f32 %v1426_v43, %v1426_v43 }
 0x272   : > { %v12242_v46 = vpop.f32.mrb[24].mxu0  ;;  %v1105_v37 = vsel %vm1103_vm2, %v1104_v53, %v1102_v13  ;;  %v1077_v53 = vrot.slane %v12240_v9, 1  ;;  %v1009_v43 = vand.u32 2147483648, %v12182_v30  ;;  %vm1225_vm13 = vcmp.eq.f32.partialorder %v12167_v34, inf }
 0x273   : > { %16497 = vst [vmem:[#allocation32_spill] sm:$0xff] %v12242_v46  ;;  %v12258_v52 = vpop.f32.mrb[25].mxu0  ;;  %v12289_v17 = vrot.slane %v1105_v37, 4  ;;  %vm1124_vm12 = vcmp.eq.f32.partialorder %v12191_v4, 0.0  ;;  %vm1008_vm2 = vcmp.eq.f32.partialorder %v12182_v30, 0.0 }
 0x274   : > { %16501 = vst [vmem:[#allocation20_spill] sm:$0xff] %v12258_v52  ;;  %v12266_v13 = vadd.f32 %v12258_v52, %v16502_v49  ;;  %v12268_v32 = vpop.f32.mrb[26].mxu0  ;;  %v8668_v54 = vpop.eup %8667  ;;  %v1224_v49 = vmul.f32 %v8666_v8, %v12167_v34 }
 0x275   : > { %8445 = vrot.lane.b32.xlu1 %v12107_v1, %s9268_s11  ;;  %v16499_v1 = vld [vmem:[#allocation54_spill] sm:$0xff]  ;;  %16504 = vst [vmem:[#allocation7_spill] sm:$0xff] %v12268_v32  ;;  %v12276_v38 = vadd.f32 %v12268_v32, %v16505_v24  ;;  %v12278_v50 = vpop.f32.mrb[27].mxu0  ;;  %16510 = vst [vmem:[#allocation36_spill] sm:$0xff] %v12289_v17  ;;  %v5356_v32 = vsel %vm5354_vm11, %v5343_v60, %v5091_v5  ;;  %v1382_v24 = vrot.slane %v1358_v2, 1  ;;  %s8337_s11 = sshll.u32 (%p9357_p5), %s8220_s30, 5 }
 0x276   : > { %v12256_v40 = vadd.f32 %v12242_v46, %v16499_v1  ;;  %16503 = vst [vmem:[#allocation115_spill] sm:$0xff] %v12266_v13  ;;  %16507 = vst [vmem:[#allocation17_spill] sm:$0xff] %v12278_v50  ;;  %v12287_v27 = vadd.f32 %v12278_v50, %v16508_v41  ;;  %v16511_v13 = vld [vmem:[#allocation29_spill] sm:$0xff]  ;;  %v8670_v21 = vpop.eup %8669  ;;  %v1085_v5 = vadd.f32 %v1077_v53, %v12240_v9  ;;  %v16513_v50 = vld [vmem:[#allocation22_spill] sm:$0xff]  ;;  %s8132_s20 = scalar_lea.vmem (%p9357_p5), %s15764_s8, %s8337_s11 }
 0x277   : > { %16506 = vst [vmem:[#allocation34_spill] sm:$0xff] %v12276_v38  ;;  %v1334_v38 = vmul.f32 %v1322_v18, %v1322_v18  ;;  %v1089_v18 = vrot.slane %v12240_v9, 2  ;;  %v5369_v2 = vsel %vm5367_vm3, %v5356_v32, %v12235_v20  ;;  %v5368_v8 = vsel %vm5367_vm3, %v5355_v59, %v12289_v17  ;;  %v16516_v59 = vld [vmem:[#allocation26_spill] sm:$0xff]  ;;  %v16520_v41 = vld [vmem:[#allocation75_spill] sm:$0xff] }
 0x278   : > { %16500 = vst [vmem:[#allocation102_spill] sm:$0xff] %v12256_v40  ;;  %16509 = vst [vmem:[#allocation42_spill] sm:$0xff] %v12287_v27  ;;  %v1462_v27 = vrot.slane %v1438_v15, 7  ;;  %v1005_v52 = vmul.f32 %v8668_v54, %v12182_v30  ;;  %v8672_v15 = vpop.eup %8671  ;;  %v1121_v40 = vmul.f32 %v8670_v21, %v12191_v4 }
 0x279   : > { %v1406_v37 = vadd.f32 %v1382_v24, %v1334_v38  ;;  %v12336_v54 = vadd.f32 %v1089_v18, %v1085_v5 }
 0x27a   : > { %v12300_v60 = vpop.f32.mrb[28].mxu0  ;;  %v1123_v5 = vsel %vm1122_vm9, %v12191_v4, %v1121_v40  ;;  %v12394_v40 = vsel %vm1225_vm13, %v12167_v34, %v1224_v49  ;;  %vm5406_vm13 = vcmask 1046528  }
 0x27b   : > { %16512 = vst [vmem:[#allocation40_spill] sm:$0xff] %v12300_v60  ;;  %v12314_v9 = vadd.f32 %v12300_v60, %v16513_v50  ;;  %v12316_v53 = vpop.f32.mrb[29].mxu0  ;;  %v12318_v32 = vadd.f32 %v1462_v27, %v1406_v37  ;;  %v16519_v27 = vrot.slane %v16490_v14, 3  ;;  %v1125_v50 = vand.u32 2147483648, %v12191_v4 }
 0x27c   : > { %16515 = vst [vmem:[#allocation46_spill] sm:$0xff] %v12316_v53  ;;  %v12326_v38 = vadd.f32 %v12316_v53, %v16516_v59  ;;  %v3431_v24 = vpop.f32.mrb[30].mxu0  ;;  %v16542_v59 = vld [vmem:[#allocation47_spill] sm:$0xff]  ;;  %vm1115_vm1 = vcmp.eq.f32.partialorder %v12336_v54, inf  ;;  %vm1117_vm15 = vcmp.eq.f32.partialorder %v12336_v54, 0.0 }
 0x27d   : > { %16514 = vst [vmem:[#allocation28_spill] sm:$0xff] %v12314_v9  ;;  %v3432_v9 = vpop.f32.mrb[31].mxu0  ;;  %v5382_v37 = vsel %vm5380_vm14, %v5369_v2, %v16519_v27  ;;  %8673 = vrsqrt.f32 %v12318_v32  ;;  %v16523_v2 = vrot.slane %v16494_v33, 3  ;;  %vm1520_vm9 = vcmp.eq.f32.partialorder %v12318_v32, 0.0 }
 0x27e   : > { %16517 = vst [vmem:[#allocation19_spill] sm:$0xff] %v12326_v38  ;;  %v12329_v60 = vpop.f32.mrb[24].mxu1  ;;  %v16524_v38 = vld [vmem:[#allocation62_spill] sm:$0xff]  ;;  %8675 = vrsqrt.f32 %v12336_v54  ;;  %v1521_v49 = vand.u32 2147483648, %v12318_v32 }
 0x27f   : > { %16518 = vst [vmem:[#allocation31_spill] sm:$0xff] %v12329_v60  ;;  %v12344_v21 = vadd.f32 %v12329_v60, %v16520_v41  ;;  %v12346_v9 = vpop.f32.mrb[25].mxu1  ;;  %v5381_v27 = vsel %vm5380_vm14, %v5368_v8, %v16523_v2  ;;  %v16527_v60 = vld [vmem:[#allocation50_spill] sm:$0xff]  ;;  %v16532_v8 = vrot.slane %v16488_v56, 3  ;;  %v1126_v56 = vsel %vm1124_vm12, %v1125_v50, %v1123_v5  ;;  %v16538_v50 = vld [vmem:[#allocation23_spill] sm:$0xff]  ;;  %v16539_v5 = vld [vmem:[#allocation76_spill] sm:$0xff] }
 0x280   : > { %16522 = vst [vmem:[#allocation113_spill] sm:$0xff] %v12346_v9  ;;  %v12357_v53 = vadd.f32 %v12346_v9, %v16524_v38  ;;  %v12359_v24 = vpop.f32.mrb[26].mxu1  ;;  %vm1227_vm12 = vcmp.eq.f32.partialorder %v12167_v34, 0.0 }
 0x281   : > { %16521 = vst [vmem:[#allocation14_spill] sm:$0xff] %v12344_v21  ;;  %16526 = vst [vmem:[#allocation114_spill] sm:$0xff] %v12359_v24  ;;  %v1007_v21 = vsel %vm1006_vm5, %v12182_v30, %v1005_v52  ;;  %v12370_v2 = vadd.f32 %v12359_v24, %v16527_v60  ;;  %v12372_v18 = vpop.f32.mrb[27].mxu1  ;;  %v16533_v52 = vrot.slane %v16467_v36, 3  ;;  %vm1518_vm5 = vcmp.eq.f32.partialorder %v12318_v32, inf }
 0x282   : > { %16525 = vst [vmem:[#allocation30_spill] sm:$0xff] %v12357_v53  ;;  %16529 = vst [vmem:[#allocation124_spill] sm:$0xff] %v12372_v18  ;;  %v16530_v53 = vld [vmem:[#allocation51_spill] sm:$0xff]  ;;  %v16536_v36 = vrot.slane %v16511_v13, 1 }
 0x283   : > { %16528 = vst [vmem:[#allocation29_spill] sm:$0xff] %v12370_v2  ;;  %v12383_v41 = vadd.f32 %v12372_v18, %v16530_v53  ;;  %v12389_v2 = vsel %vm5393_vm6, %v5382_v37, %v16532_v8  ;;  %v1010_v18 = vsel %vm1008_vm2, %v1009_v43, %v1007_v21  ;;  %v1245_v37 = vmul.f32 %v8672_v15, %v12214_v48  ;;  %v16534_v8 = vld [vmem:[#allocation48_spill] sm:$0xff]  ;;  %v16537_v21 = vld [vmem:[#allocation45_spill] sm:$0xff] }
 0x284   : > { %v880_v30 = vmul.f32 %v16534_v8, %v16534_v8  ;;  %v1177_v43 = vadd.f32 %v16536_v36, %v16511_v13  ;;  %v868_v4 = vmul.f32 %v16537_v21, %v16537_v21  ;;  %v1132_v15 = vmul.f32 %v16538_v50, %v16538_v50 }
 0x285   : > { %16531 = vst [vmem:[#allocation125_spill] sm:$0xff] %v12383_v41  ;;  %v12401_v41 = vsel %vm5393_vm6, %v5381_v27, %v16533_v52  ;;  %v1348_v27 = vsub.f32 %v16534_v8, %v12033_v29  ;;  %vm1246_vm2 = vcmp.eq.f32.partialorder %v12214_v48, inf  ;;  %v5033_v50 = vrot.slane %v1010_v18, 1 }
 0x286   : > { %v12411_v9 = vpop.f32.mrb[28].mxu1  ;;  %v904_v60 = vrot.slane %v880_v30, 1  ;;  %v1428_v30 = vsub.f32 %v16537_v21, %v12060_v22  ;;  %v1189_v8 = vrot.slane %v16511_v13, 2  ;;  %v16545_v22 = vrot.slane %v16478_v61, 7 }
 0x287   : > { %16535 = vst [vmem:[#allocation48_spill] sm:$0xff] %v12411_v9  ;;  %v12428_v24 = vadd.f32 %v12411_v9, %v16539_v5  ;;  %v12430_v36 = vpop.f32.mrb[29].mxu1  ;;  %v8674_v38 = vpop.eup %8673  ;;  %v12445_v9 = vrot.slane %v1126_v56, 4 }
 0x288   : > { %16541 = vst [vmem:[#allocation23_spill] sm:$0xff] %v12430_v36  ;;  %v12438_v52 = vadd.f32 %v12430_v36, %v16542_v59  ;;  %v3482_v46 = vpop.f32.mrb[30].mxu1  ;;  %v928_v5 = vadd.f32 %v904_v60, %v868_v4  ;;  %v952_v36 = vrot.slane %v868_v4, 7  ;;  %v8676_v18 = vpop.eup %8675  ;;  %v1440_v60 = vmul.f32 %v1428_v30, %v1428_v30 }
 0x289   : > { %16540 = vst [vmem:[#allocation45_spill] sm:$0xff] %v12428_v24  ;;  %v3483_v53 = vpop.f32.mrb[31].mxu1  ;;  %v1517_v24 = vmul.f32 %v8674_v38, %v12318_v32  ;;  %16544 = vst [vmem:[#allocation127_spill] sm:$0xff] %v12445_v9  ;;  %v1324_v46 = vsub.f32 %v16537_v21, %v12033_v29  ;;  %v1360_v38 = vmul.f32 %v1348_v27, %v1348_v27 }
 0x28a   : > { %16543 = vst [vmem:[#allocation126_spill] sm:$0xff] %v12438_v52  ;;  %v1156_v52 = vrot.slane %v1132_v15, 1  ;;  %v12454_v53 = vadd.f32 %v1189_v8, %v1177_v43  ;;  %v12459_v13 = vadd.f32 %v952_v36, %v928_v5  ;;  %v1114_v1 = vmul.f32 %v8676_v18, %v12336_v54 }
 0x28b   : > { %v1519_v59 = vsel %vm1518_vm5, %v12318_v32, %v1517_v24  ;;  %v1384_v24 = vrot.slane %v1360_v38, 1  ;;  %v1336_v32 = vmul.f32 %v1324_v46, %v1324_v46  ;;  %v5092_v5 = vrot.slane %v12012_v10, 6 }
 0x28c   : > { %v1522_v56 = vsel %vm1520_vm9, %v1521_v49, %v1519_v59  ;;  %8677 = vrsqrt.f32 %v12459_v13  ;;  %v1180_v27 = vadd.f32 %v1156_v52, %v1132_v15  ;;  %v1118_v49 = vand.u32 2147483648, %v12336_v54 }
 0x28d   : > { %v5093_v4 = vrot.slane %v1522_v56, 6  ;;  %v5333_v21 = vsel %vm2467_vm4, %v5033_v50, %v1522_v56  ;;  %8679 = vrsqrt.f32 %v12454_v53  ;;  %v1116_v36 = vsel %vm1115_vm1, %v12336_v54, %v1114_v1 }
 0x28e   : > { %v5345_v43 = vsel %vm2480_vm8, %v5333_v21, %v16545_v22  ;;  %v1192_v50 = vrot.slane %v1132_v15, 2  ;;  %v1408_v8 = vadd.f32 %v1384_v24, %v1336_v32  ;;  %v1464_v30 = vrot.slane %v1440_v60, 7  ;;  %v16553_v32 = vld [vmem:[#allocation49_spill] sm:$0xff] }
 0x28f   : > { %v5358_v59 = vsel %vm5354_vm11, %v5345_v43, %v5093_v4  ;;  %v16546_v22 = vand.u32 2147483648, %v12167_v34  ;;  %v1247_v46 = vsel %vm1246_vm2, %v12214_v48, %v1245_v37  ;;  %v5153_v10 = vrot.slane %v16478_v61, 3 }
 0x290   : > { %v1249_v1 = vand.u32 2147483648, %v12214_v48  ;;  %v5371_v15 = vsel %vm5367_vm3, %v5358_v59, %v12445_v9  ;;  %v12489_v18 = vadd.f32 %v1192_v50, %v1180_v27  ;;  %v12491_v56 = vadd.f32 %v1464_v30, %v1408_v8 }
 0x291   : > { %v12479_v52 = vsel %vm1227_vm12, %v16546_v22, %v12394_v40  ;;  %v16547_v34 = vrot.slane %v16490_v14, 1  ;;  %v16548_v37 = vrot.slane %v16494_v33, 1  ;;  %vm1248_vm1 = vcmp.eq.f32.partialorder %v12214_v48, 0.0  ;;  %v16550_v48 = vld [vmem:[#allocation56_spill] sm:$0xff] }
 0x292   : > { %v1119_v60 = vsel %vm1117_vm15, %v1118_v49, %v1116_v36  ;;  %v12508_v4 = vsel %vm1248_vm1, %v1249_v1, %v1247_v46  ;;  %v5357_v14 = vsel %vm5354_vm11, %v12115_v3, %v5092_v5  ;;  %8681 = vrsqrt.f32 %v12491_v56  ;;  %v16552_v3 = vld [vmem:[#allocation61_spill] sm:$0xff] }
 0x293   : > { %v12497_v40 = vsel %vm5406_vm13, %v12389_v2, %v16547_v34  ;;  %v12503_v61 = vsel %vm5406_vm13, %v12401_v41, %v16548_v37  ;;  %v16549_v33 = vrot.slane %v16482_v51, 3  ;;  %vm1020_vm5 = vcmp.eq.f32.partialorder %v12459_v13, inf  ;;  %v16560_v41 = vld [vmem:[#allocation57_spill] sm:$0xff] }
 0x294   : > { %v867_v54 = vmul.f32 %v16550_v48, %v16550_v48  ;;  %v12523_v43 = vrot.slane %v1119_v60, 4  ;;  %8683 = vrsqrt.f32 %v12489_v18  ;;  %v903_v27 = vrot.slane %v16552_v3, 1 }
 0x295   : > { %v5384_v2 = vsel %vm5380_vm14, %v5371_v15, %v16549_v33  ;;  %v1155_v59 = vrot.slane %v16553_v32, 1  ;;  %v1191_v5 = vrot.slane %v16553_v32, 2  ;;  %vm1022_vm15 = vcmp.eq.f32.partialorder %v12459_v13, 0.0 }
 0x296   : > { %v12521_v24 = vpop.f32.mrb[32].mxu0  ;;  %16551 = vst [vmem:[#allocation56_spill] sm:$0xff] %v12523_v43  ;;  %v951_v8 = vrot.slane %v867_v54, 7  ;;  %v8678_v30 = vpop.eup %8677  ;;  %v927_v34 = vadd.f32 %v903_v27, %v867_v54  ;;  %v5370_v33 = vsel %vm5367_vm3, %v5357_v14, %v12523_v43  ;;  %v5397_v21 = vsel %vm5393_vm6, %v5384_v2, %v5153_v10  ;;  %v16563_v2 = vld [vmem:[#allocation10_spill] sm:$0xff] }
 0x297   : > { %v12534_v36 = vadd.f32 %v12521_v24, %v11749_v39  ;;  %v12536_v50 = vpop.f32.mrb[33].mxu0  ;;  %v8680_v37 = vpop.eup %8679  ;;  %v1019_v46 = vmul.f32 %v8678_v30, %v12459_v13  ;;  %v1179_v30 = vadd.f32 %v1155_v59, %v16553_v32  ;;  %v1023_v54 = vand.u32 2147483648, %v12459_v13 }
 0x298   : > { %16554 = vst [vmem:[#allocation61_spill] sm:$0xff] %v12536_v50  ;;  %v12544_v1 = vadd.f32 %v12536_v50, %v11753_v42  ;;  %v12546_v15 = vpop.f32.mrb[34].mxu0  ;;  %v12572_v49 = vadd.f32 %v951_v8, %v927_v34  ;;  %v1238_v14 = vmul.f32 %v8680_v37, %v12454_v53  ;;  %vm1532_vm9 = vcmp.eq.f32.partialorder %v12491_v56, inf }
 0x299   : > { %16556 = vst [vmem:[#allocation128_spill] sm:$0xff] %v12546_v15  ;;  %v12554_v3 = vadd.f32 %v12546_v15, %v11762_v47  ;;  %v12556_v22 = vpop.f32.mrb[35].mxu0  ;;  %v1021_v60 = vsel %vm1020_vm5, %v12459_v13, %v1019_v46  ;;  %v12585_v8 = vadd.f32 %v1191_v5, %v1179_v30  ;;  %vm1239_vm12 = vcmp.eq.f32.partialorder %v12454_v53, inf  ;;  %v16733_v15 = vld [vmem:[#allocation62_spill] sm:$0xff] }
 0x29a   : > { %16555 = vst [vmem:[#allocation49_spill] sm:$0xff] %v12544_v1  ;;  %16558 = vst [vmem:[#allocation130_spill] sm:$0xff] %v12556_v22  ;;  %v12565_v27 = vadd.f32 %v12556_v22, %v11770_v16  ;;  %v1024_v10 = vsel %vm1022_vm15, %v1023_v54, %v1021_v60  ;;  %vm1534_vm2 = vcmp.eq.f32.partialorder %v12491_v56, 0.0  ;;  %v1535_v13 = vand.u32 2147483648, %v12491_v56  ;;  %v16568_v22 = vld [vmem:[#allocation53_spill] sm:$0xff]  ;;  %v16569_v54 = vld [vmem:[#allocation11_spill] sm:$0xff] }
 0x29b   : > { %16557 = vst [vmem:[#allocation129_spill] sm:$0xff] %v12554_v3  ;;  %v1323_v34 = vsub.f32 %v16550_v48, %v16563_v2  ;;  %8685 = vrsqrt.f32 %v12572_v49  ;;  %v1347_v16 = vsub.f32 %v16568_v22, %v16563_v2  ;;  %v1427_v3 = vsub.f32 %v16550_v48, %v16569_v54 }
 0x29c   : > { %16559 = vst [vmem:[#allocation131_spill] sm:$0xff] %v12565_v27  ;;  %v16561_v27 = vrot.slane %v16484_v7, 3  ;;  %v8682_v59 = vpop.eup %8681  ;;  %8687 = vrsqrt.f32 %v12585_v8  ;;  %vm1241_vm1 = vcmp.eq.f32.partialorder %v12454_v53, 0.0  ;;  %vm1260_vm5 = vcmp.eq.f32.partialorder %v12489_v18, inf }
 0x29d   : > { %v1531_v38 = vmul.f32 %v8682_v59, %v12491_v56  ;;  %v16577_v2 = vrot.slane %v16485_v25, 7  ;;  %vm1262_vm15 = vcmp.eq.f32.partialorder %v12489_v18, 0.0 }
 0x29e   : > { %v5383_v46 = vsel %vm5380_vm14, %v5370_v33, %v16561_v27  ;;  %v12587_v32 = vpop.f32.mrb[36].mxu0  ;;  %v8684_v60 = vpop.eup %8683 }
 0x29f   : > { %16562 = vst [vmem:[#allocation57_spill] sm:$0xff] %v12587_v32  ;;  %v12600_v33 = vadd.f32 %v12587_v32, %v11791_v58  ;;  %v12602_v27 = vpop.f32.mrb[37].mxu0  ;;  %v5035_v58 = vrot.slane %v1024_v10, 1  ;;  %v1533_v22 = vsel %vm1532_vm9, %v12491_v56, %v1531_v38  ;;  %v1240_v56 = vsel %vm1239_vm12, %v12454_v53, %v1238_v14 }
 0x2a0   : > { %16565 = vst [vmem:[#allocation133_spill] sm:$0xff] %v12602_v27  ;;  %v12611_v37 = vadd.f32 %v12602_v27, %v11796_v45  ;;  %v3533_v5 = vpop.f32.mrb[38].mxu0  ;;  %v1536_v54 = vsel %vm1534_vm2, %v1535_v13, %v1533_v22  ;;  %v16578_v27 = vrot.slane %v16482_v51, 1  ;;  %v16579_v38 = vrot.slane %v16479_v0, 3 }
 0x2a1   : > { %16564 = vst [vmem:[#allocation132_spill] sm:$0xff] %v12600_v33  ;;  %v12614_v32 = vpop.f32.mrb[32].mxu1  ;;  %v3534_v33 = vpop.f32.mrb[39].mxu0  ;;  %v5335_v22 = vsel %vm2467_vm4, %v5035_v58, %v1536_v54  ;;  %v1263_v58 = vand.u32 2147483648, %v12489_v18  ;;  %v1335_v14 = vmul.f32 %v1323_v34, %v1323_v34  ;;  %vm1013_vm9 = vcmp.eq.f32.partialorder %v12572_v49, inf }
 0x2a2   : > { %16566 = vst [vmem:[#allocation134_spill] sm:$0xff] %v12611_v37  ;;  %16567 = vst [vmem:[#allocation135_spill] sm:$0xff] %v12614_v32  ;;  %v12627_v59 = vadd.f32 %v12614_v32, %v11830_v63  ;;  %v12629_v33 = vpop.f32.mrb[33].mxu1  ;;  %v5095_v37 = vrot.slane %v1536_v54, 6  ;;  %v5347_v45 = vsel %vm2480_vm8, %v5335_v22, %v16577_v2  ;;  %v1259_v2 = vmul.f32 %v8684_v60, %v12489_v18  ;;  %v16582_v54 = vld [vmem:[#allocation44_spill] sm:$0xff] }
 0x2a3   : > { %16571 = vst [vmem:[#allocation136_spill] sm:$0xff] %v12629_v33  ;;  %v12641_v5 = vadd.f32 %v12629_v33, %v11834_v44  ;;  %v12643_v30 = vpop.f32.mrb[34].mxu1  ;;  %v1439_v22 = vmul.f32 %v1427_v3, %v1427_v3  ;;  %v1134_v0 = vmul.f32 %v16582_v54, %v16582_v54  ;;  %v16588_v44 = vrot.slane %v16484_v7, 1 }
 0x2a4   : > { %16570 = vst [vmem:[#allocation53_spill] sm:$0xff] %v12627_v59  ;;  %16573 = vst [vmem:[#allocation138_spill] sm:$0xff] %v12643_v30  ;;  %v12653_v48 = vadd.f32 %v12643_v30, %v11842_v6  ;;  %v12655_v10 = vpop.f32.mrb[35].mxu1  ;;  %v12674_v30 = vsel %vm5406_vm13, %v5397_v21, %v16578_v27  ;;  %v5360_v21 = vsel %vm5354_vm11, %v5347_v45, %v5095_v37  ;;  %v16581_v27 = vld [vmem:[#allocation72_spill] sm:$0xff]  ;;  %vm1015_vm12 = vcmp.eq.f32.partialorder %v12572_v49, 0.0 }
 0x2a5   : > { %16572 = vst [vmem:[#allocation137_spill] sm:$0xff] %v12641_v5  ;;  %16575 = vst [vmem:[#allocation140_spill] sm:$0xff] %v12655_v10  ;;  %v12663_v13 = vadd.f32 %v12655_v10, %v11848_v23  ;;  %v8686_v51 = vpop.eup %8685  ;;  %v882_v23 = vmul.f32 %v16581_v27, %v16581_v27  ;;  %v16585_v45 = vld [vmem:[#allocation68_spill] sm:$0xff]  ;;  %v1463_v33 = vrot.slane %v1439_v22, 7  ;;  %vm1253_vm2 = vcmp.eq.f32.partialorder %v12585_v8, inf }
 0x2a6   : > { %16574 = vst [vmem:[#allocation139_spill] sm:$0xff] %v12653_v48  ;;  %v1359_v48 = vmul.f32 %v1347_v16, %v1347_v16  ;;  %v870_v34 = vmul.f32 %v16585_v45, %v16585_v45  ;;  %v8688_v37 = vpop.eup %8687  ;;  %v1012_v6 = vmul.f32 %v8686_v51, %v12572_v49  ;;  %v1430_v7 = vsub.f32 %v16585_v45, %v12197_v19  ;;  %v16608_v19 = vld [vmem:[#allocation100_spill] sm:$0xff] }
 0x2a7   : > { %16576 = vst [vmem:[#allocation141_spill] sm:$0xff] %v12663_v13  ;;  %v5396_v13 = vsel %vm5393_vm6, %v5383_v46, %v16579_v38  ;;  %v906_v38 = vrot.slane %v882_v23, 1 }
 0x2a8   : > { %v1383_v16 = vrot.slane %v1359_v48, 1  ;;  %v12723_v54 = vsel %vm5406_vm13, %v5396_v13, %v16588_v44  ;;  %v1350_v44 = vsub.f32 %v16581_v27, %v12193_v12  ;;  %v16589_v13 = vrot.slane %v16560_v41, 3 }
 0x2a9   : > { %v12685_v10 = vpop.f32.mrb[36].mxu1  ;;  %v1014_v51 = vsel %vm1013_vm9, %v12572_v49, %v1012_v6  ;;  %v1016_v6 = vand.u32 2147483648, %v12572_v49 }
 0x2aa   : > { %16580 = vst [vmem:[#allocation142_spill] sm:$0xff] %v12685_v10  ;;  %v12699_v60 = vadd.f32 %v12685_v10, %v11878_v11  ;;  %v12701_v48 = vpop.f32.mrb[37].mxu1  ;;  %v16587_v10 = vand.u32 2147483648, %v12454_v53  ;;  %v1407_v5 = vadd.f32 %v1383_v16, %v1335_v14  ;;  %v1194_v16 = vrot.slane %v1134_v0, 2 }
 0x2ab   : > { %16584 = vst [vmem:[#allocation44_spill] sm:$0xff] %v12701_v48  ;;  %v12711_v46 = vadd.f32 %v12701_v48, %v11884_v57  ;;  %v3584_v3 = vpop.f32.mrb[38].mxu1  ;;  %v1362_v14 = vmul.f32 %v1350_v44, %v1350_v44  ;;  %v16594_v44 = vld [vmem:[#allocation64_spill] sm:$0xff]  ;;  %v16703_v57 = vld [vmem:[#allocation115_spill] sm:$0xff] }
 0x2ac   : > { %16583 = vst [vmem:[#allocation72_spill] sm:$0xff] %v12699_v60  ;;  %v12717_v60 = vsel %vm1241_vm1, %v16587_v10, %v1240_v56  ;;  %v3585_v11 = vpop.f32.mrb[39].mxu1  ;;  %v5373_v3 = vsel %vm5367_vm3, %v5360_v21, %v12235_v20  ;;  %v12731_v53 = vadd.f32 %v1463_v33, %v1407_v5  ;;  %v930_v10 = vadd.f32 %v906_v38, %v870_v34 }
 0x2ad   : > { %16586 = vst [vmem:[#allocation68_spill] sm:$0xff] %v12711_v46  ;;  %v1158_v46 = vrot.slane %v1134_v0, 1  ;;  %v1261_v11 = vsel %vm1260_vm5, %v12489_v18, %v1259_v2  ;;  %v954_v56 = vrot.slane %v870_v34, 7  ;;  %v5386_v22 = vsel %vm5380_vm14, %v5373_v3, %v16589_v13  ;;  %v12764_v3 = vpop.permute.xlu0 %4801 }
 0x2ae   : > { %v1252_v2 = vmul.f32 %v8688_v37, %v12585_v8  ;;  %8689 = vrsqrt.f32 %v12731_v53  ;;  %v1326_v21 = vsub.f32 %v16585_v45, %v12193_v12  ;;  %v12751_v27 = vsel %vm1262_vm15, %v1263_v58, %v1261_v11  ;;  %v16592_v58 = vld [vmem:[#allocation41_spill] sm:$0xff] }
 0x2af   : > { %v1182_v23 = vadd.f32 %v1158_v46, %v1134_v0  ;;  %v12743_v5 = vadd.f32 %v954_v56, %v930_v10  ;;  %16590 = vst [vmem:[#allocation143_spill] sm:$0xff] %v12751_v27  ;;  %vm1255_vm1 = vcmp.eq.f32.partialorder %v12585_v8, 0.0  ;;  %v1256_v0 = vand.u32 2147483648, %v12585_v8 }
 0x2b0   : > { %v1442_v46 = vmul.f32 %v1430_v7, %v1430_v7  ;;  %v16591_v45 = vrot.slane %v16485_v25, 3  ;;  %v1017_v18 = vsel %vm1015_vm12, %v1016_v6, %v1014_v51  ;;  %v1254_v49 = vsel %vm1253_vm2, %v12585_v8, %v1252_v2 }
 0x2b1   : > { %v12745_v33 = vadd.f32 %v1194_v16, %v1182_v23  ;;  %8691 = vrsqrt.f32 %v12743_v5  ;;  %v1338_v11 = vmul.f32 %v1326_v21, %v1326_v21  ;;  %v1386_v10 = vrot.slane %v1362_v14, 1  ;;  %v16593_v23 = vld [vmem:[#allocation74_spill] sm:$0xff] }
 0x2b2   : > { %v5399_v34 = vsel %vm5393_vm6, %v5386_v22, %v16591_v45  ;;  %v869_v25 = vmul.f32 %v16443_v31, %v16443_v31  ;;  %v905_v16 = vrot.slane %v16593_v23, 1  ;;  %v1157_v7 = vrot.slane %v16594_v44, 1  ;;  %v16598_v23 = vld [vmem:[#allocation70_spill] sm:$0xff] }
 0x2b3   : > { %8693 = vrsqrt.f32 %v12745_v33  ;;  %v16595_v13 = vrot.slane %v16560_v41, 1  ;;  %v5034_v51 = vrot.slane %v1017_v18, 1  ;;  %v1410_v2 = vadd.f32 %v1386_v10, %v1338_v11  ;;  %v16600_v10 = vld [vmem:[#allocation15_spill] sm:$0xff]  ;;  %v12805_v41 = vpop.permute.xlu0 %4806 }
 0x2b4   : > { %v1466_v6 = vrot.slane %v1442_v46, 7  ;;  %v12780_v21 = vsel %vm1255_vm1, %v1256_v0, %v1254_v49  ;;  %vm1525_vm5 = vcmp.eq.f32.partialorder %v12731_v53, inf  ;;  %vm1527_vm15 = vcmp.eq.f32.partialorder %v12731_v53, 0.0 }
 0x2b5   : > { %v12776_v22 = vsel %vm5406_vm13, %v5399_v34, %v16595_v13  ;;  %16597 = vst [vmem:[#allocation74_spill] sm:$0xff] %v12780_v21  ;;  %v1528_v14 = vand.u32 2147483648, %v12731_v53  ;;  %v929_v8 = vadd.f32 %v905_v16, %v869_v25  ;;  %v953_v0 = vrot.slane %v869_v25, 7  ;;  %v16601_v13 = vld [vmem:[#allocation67_spill] sm:$0xff] }
 0x2b6   : > { %16596 = vst [vmem:[#allocation41_spill] sm:$0xff] %v12776_v22  ;;  %v12785_v45 = vadd.f32 %v1466_v6, %v1410_v2  ;;  %v1181_v49 = vadd.f32 %v1157_v7, %v16594_v44  ;;  %v1349_v56 = vsub.f32 %v16601_v13, %v16600_v10  ;;  %v16610_v12 = vrot.slane %v11178_v28, 7 }
 0x2b7   : > { %vm1034_vm9 = vcmp.eq.f32.partialorder %v12743_v5, inf  ;;  %vm1036_vm12 = vcmp.eq.f32.partialorder %v12743_v5, 0.0  ;;  %v1193_v20 = vrot.slane %v16594_v44, 2  ;;  %vm1274_vm2 = vcmp.eq.f32.partialorder %v12745_v33, inf }
 0x2b8   : > { %v8690_v11 = vpop.eup %8689  ;;  %8695 = vrsqrt.f32 %v12785_v45  ;;  %vm1276_vm1 = vcmp.eq.f32.partialorder %v12745_v33, 0.0 }
 0x2b9   : > { %v1524_v25 = vmul.f32 %v8690_v11, %v12731_v53 }
 0x2ba   : > { %v12790_v46 = vpop.f32.mrb[40].mxu0 }
 0x2bb   : > { %16599 = vst [vmem:[#allocation64_spill] sm:$0xff] %v12790_v46  ;;  %v12801_v34 = vadd.f32 %v12790_v46, %v11938_v55  ;;  %v12803_v18 = vpop.f32.mrb[41].mxu0  ;;  %v8692_v2 = vpop.eup %8691  ;;  %v1526_v37 = vsel %vm1525_vm5, %v12731_v53, %v1524_v25  ;;  %v12844_v25 = vadd.f32 %v953_v0, %v929_v8  ;;  %v12859_v8 = vmul.f32 %v1349_v56, %v1349_v56  ;;  %v16611_v0 = vld [vmem:[#allocation16_spill] sm:$0xff]  ;;  %v16614_v56 = vld [vmem:[#allocation85_spill] sm:$0xff] }
 0x2bc   : > { %16603 = vst [vmem:[#allocation67_spill] sm:$0xff] %v12803_v18  ;;  %v12814_v13 = vadd.f32 %v12803_v18, %v11949_v35  ;;  %v12816_v6 = vpop.f32.mrb[42].mxu0  ;;  %v1529_v11 = vsel %vm1527_vm15, %v1528_v14, %v1526_v37  ;;  %v1325_v14 = vsub.f32 %v16443_v31, %v16600_v10  ;;  %vm1546_vm5 = vcmp.eq.f32.partialorder %v12785_v45, inf  ;;  %v16638_v35 = vld [vmem:[#allocation65_spill] sm:$0xff] }
 0x2bd   : > { %16602 = vst [vmem:[#allocation70_spill] sm:$0xff] %v12801_v34  ;;  %16605 = vst [vmem:[#allocation145_spill] sm:$0xff] %v12816_v6  ;;  %v12825_v16 = vadd.f32 %v12816_v6, %v11955_v26  ;;  %v12827_v7 = vpop.f32.mrb[43].mxu0  ;;  %v8694_v21 = vpop.eup %8693  ;;  %v5094_v22 = vrot.slane %v1529_v11, 6  ;;  %v5334_v27 = vsel %vm2467_vm4, %v5034_v51, %v1529_v11  ;;  %v1037_v51 = vand.u32 2147483648, %v12743_v5 }
 0x2be   : > { %16604 = vst [vmem:[#allocation144_spill] sm:$0xff] %v12814_v13  ;;  %16607 = vst [vmem:[#allocation147_spill] sm:$0xff] %v12827_v7  ;;  %v12838_v38 = vadd.f32 %v12827_v7, %v16608_v19  ;;  %v5346_v6 = vsel %vm2480_vm8, %v5334_v27, %v16610_v12  ;;  %v1429_v12 = vsub.f32 %v16443_v31, %v16611_v0  ;;  %8697 = vrsqrt.f32 %v12844_v25  ;;  %v16620_v31 = vld [vmem:[#allocation82_spill] sm:$0xff] }
 0x2bf   : > { %16606 = vst [vmem:[#allocation146_spill] sm:$0xff] %v12825_v16  ;;  %v1033_v16 = vmul.f32 %v8692_v2, %v12743_v5  ;;  %v5359_v2 = vsel %vm5354_vm11, %v5346_v6, %v5094_v22  ;;  %v1273_v11 = vmul.f32 %v8694_v21, %v12745_v33  ;;  %v16617_v21 = vld [vmem:[#allocation96_spill] sm:$0xff]  ;;  %vm1548_vm15 = vcmp.eq.f32.partialorder %v12785_v45, 0.0 }
 0x2c0   : > { %16609 = vst [vmem:[#allocation148_spill] sm:$0xff] %v12838_v38  ;;  %v12869_v38 = vadd.f32 %v1193_v20, %v1181_v49  ;;  %v1136_v34 = vmul.f32 %v16638_v35, %v16638_v35  ;;  %v16640_v46 = vrot.slane %v16486_v62, 7 }
 0x2c1   : > { %v1035_v44 = vsel %vm1034_vm9, %v12743_v5, %v1033_v16  ;;  %vm1027_vm9 = vcmp.eq.f32.partialorder %v12844_v25, inf }
 0x2c2   : > { %v12863_v27 = vpop.f32.mrb[44].mxu0  ;;  %8699 = vrsqrt.f32 %v12869_v38 }
 0x2c3   : > { %v12852_v53 = vpop.permute.xlu1 %4851  ;;  %v12854_v37 = vpop.permute.xlu0 %4855  ;;  %16612 = vst [vmem:[#allocation149_spill] sm:$0xff] %v12863_v27  ;;  %v12879_v0 = vadd.f32 %v12863_v27, %v16614_v56  ;;  %v16621_v27 = vld [vmem:[#allocation116_spill] sm:$0xff] }
 0x2c4   : > { %v12871_v7 = vpop.f32.mrb[40].mxu1  ;;  %v12881_v22 = vpop.f32.mrb[45].mxu0 }
 0x2c5   : > { %16613 = vst [vmem:[#allocation150_spill] sm:$0xff] %v12871_v7  ;;  %16615 = vst [vmem:[#allocation151_spill] sm:$0xff] %v12879_v0  ;;  %v12890_v6 = vadd.f32 %v12871_v7, %v16617_v21  ;;  %v12892_v16 = vpop.f32.mrb[41].mxu1  ;;  %v3635_v0 = vpop.f32.mrb[46].mxu0 }
 0x2c6   : > { %16616 = vst [vmem:[#allocation152_spill] sm:$0xff] %v12881_v22  ;;  %16619 = vst [vmem:[#allocation154_spill] sm:$0xff] %v12892_v16  ;;  %v12902_v20 = vadd.f32 %v12892_v16, %v16621_v27  ;;  %v12904_v49 = vpop.f32.mrb[42].mxu1  ;;  %v8696_v7 = vpop.eup %8695  ;;  %v16624_v0 = vld [vmem:[#allocation110_spill] sm:$0xff]  ;;  %v12922_v16 = vadd.f32 %v12881_v22, %v16620_v31  ;;  %v1549_v27 = vand.u32 2147483648, %v12785_v45  ;;  %v1441_v22 = vmul.f32 %v1429_v12, %v1429_v12 }
 0x2c7   : > { %16618 = vst [vmem:[#allocation153_spill] sm:$0xff] %v12890_v6  ;;  %16623 = vst [vmem:[#allocation156_spill] sm:$0xff] %v12904_v49  ;;  %v3636_v6 = vpop.f32.mrb[47].mxu0  ;;  %v12916_v19 = vadd.f32 %v12904_v49, %v16624_v0  ;;  %v5372_v49 = vsel %vm5367_vm3, %v5359_v2, %v12289_v17  ;;  %v1545_v26 = vmul.f32 %v8696_v7, %v12785_v45  ;;  %v16631_v7 = vrot.slane %v16592_v58, 3 }
 0x2c8   : > { %16622 = vst [vmem:[#allocation155_spill] sm:$0xff] %v12902_v20  ;;  %v12918_v20 = vpop.f32.mrb[43].mxu1  ;;  %16627 = vst [vmem:[#allocation159_spill] sm:$0xff] %v12922_v16  ;;  %v16628_v6 = vld [vmem:[#allocation97_spill] sm:$0xff]  ;;  %v1277_v16 = vand.u32 2147483648, %v12745_v33  ;;  %v1465_v18 = vrot.slane %v1441_v22, 7 }
 0x2c9   : > { %v12908_v21 = vpop.permute.xlu1 %4935  ;;  %16625 = vst [vmem:[#allocation157_spill] sm:$0xff] %v12916_v19  ;;  %16626 = vst [vmem:[#allocation158_spill] sm:$0xff] %v12918_v20  ;;  %v12930_v10 = vadd.f32 %v12918_v20, %v16628_v6  ;;  %v1038_v19 = vsel %vm1036_vm12, %v1037_v51, %v1035_v44  ;;  %v1547_v31 = vsel %vm1546_vm5, %v12785_v45, %v1545_v26  ;;  %v1385_v51 = vrot.slane %v12859_v8, 1  ;;  %v16632_v26 = vld [vmem:[#allocation88_spill] sm:$0xff]  ;;  %v16637_v45 = vld [vmem:[#allocation91_spill] sm:$0xff] }
 0x2ca   : > { %v12932_v56 = vpop.permute.xlu0 %4943  ;;  %v5037_v5 = vrot.slane %v1038_v19, 1  ;;  %v5385_v17 = vsel %vm5380_vm14, %v5372_v49, %v16631_v7  ;;  %v1550_v12 = vsel %vm1548_vm15, %v1549_v27, %v1547_v31  ;;  %v1337_v20 = vmul.f32 %v1325_v14, %v1325_v14  ;;  %v8698_v7 = vpop.eup %8697 }
 0x2cb   : > { %16629 = vst [vmem:[#allocation160_spill] sm:$0xff] %v12930_v10  ;;  %v12949_v44 = vpop.f32.mrb[44].mxu1  ;;  %v1275_v10 = vsel %vm1274_vm2, %v12745_v33, %v1273_v11  ;;  %v5097_v49 = vrot.slane %v1550_v12, 6  ;;  %v16635_v11 = vld [vmem:[#allocation123_spill] sm:$0xff]  ;;  %v16639_v27 = vrot.slane %v11178_v28, 3  ;;  %v1026_v35 = vmul.f32 %v8698_v7, %v12844_v25 }
 0x2cc   : > { %16630 = vst [vmem:[#allocation161_spill] sm:$0xff] %v12949_v44  ;;  %v12963_v8 = vadd.f32 %v12949_v44, %v16632_v26  ;;  %v12965_v6 = vpop.f32.mrb[45].mxu1  ;;  %v5337_v26 = vsel %vm2467_vm4, %v5037_v5, %v1550_v12  ;;  %v1409_v13 = vadd.f32 %v1385_v51, %v1337_v20  ;;  %v16644_v51 = vld [vmem:[#allocation89_spill] sm:$0xff]  ;;  %v8700_v33 = vpop.eup %8699  ;;  %vm1029_vm12 = vcmp.eq.f32.partialorder %v12844_v25, 0.0 }
 0x2cd   : > { %16634 = vst [vmem:[#allocation163_spill] sm:$0xff] %v12965_v6  ;;  %v12975_v31 = vadd.f32 %v12965_v6, %v16635_v11  ;;  %v3686_v19 = vpop.f32.mrb[46].mxu1  ;;  %v5398_v14 = vsel %vm5393_vm6, %v5385_v17, %v16639_v27  ;;  %v16642_v11 = vld [vmem:[#allocation69_spill] sm:$0xff]  ;;  %v13001_v17 = vsel %vm1276_vm1, %v1277_v16, %v1275_v10  ;;  %v872_v12 = vmul.f32 %v16644_v51, %v16644_v51 }
 0x2ce   : > { %v12947_v2 = vpop.permute.xlu1 %4811  ;;  %16633 = vst [vmem:[#allocation162_spill] sm:$0xff] %v12963_v8  ;;  %v12967_v0 = vpop.permute.xlu0 %8400  ;;  %v884_v8 = vmul.f32 %v16637_v45, %v16637_v45  ;;  %v16641_v19 = vld [vmem:[#allocation27_spill] sm:$0xff]  ;;  %v12996_v20 = vadd.f32 %v1465_v18, %v1409_v13  ;;  %16643 = vst [vmem:[#allocation91_spill] sm:$0xff] %v13001_v17  ;;  %v16645_v27 = vrot.slane %v16592_v58, 1  ;;  %v1160_v18 = vrot.slane %v1136_v34, 1 }
 0x2cf   : > { %16636 = vst [vmem:[#allocation164_spill] sm:$0xff] %v12975_v31  ;;  %v3687_v44 = vpop.f32.mrb[47].mxu1  ;;  %v5349_v31 = vsel %vm2480_vm8, %v5337_v26, %v16640_v46  ;;  %v16127_v10 = vunpack.i.h.bf16 %v12967_v0  ;;  %v16128_v13 = vunpack.i.l.bf16 %v12967_v0  ;;  %v1030_v16 = vand.u32 2147483648, %v12844_v25 }
 0x2d0   : > { %v5362_v22 = vsel %vm5354_vm11, %v5349_v31, %v5097_v49  ;;  %v908_v26 = vrot.slane %v884_v8, 1  ;;  %v13010_v49 = vsel %vm5406_vm13, %v5398_v14, %v16645_v27  ;;  %8701 = vrsqrt.f32 %v12996_v20 }
 0x2d1   : > { %v5375_v46 = vsel %vm5367_vm3, %v5362_v22, %v12445_v9  ;;  %16646 = vst [vmem:[#allocation65_spill] sm:$0xff] %v13010_v49  ;;  %v16647_v8 = vrot.slane %v16598_v23, 3  ;;  %v1028_v7 = vsel %vm1027_vm9, %v12844_v25, %v1026_v35  ;;  %vm1267_vm2 = vcmp.eq.f32.partialorder %v12869_v38, inf  ;;  %v16649_v9 = vld [vmem:[#allocation4_spill] sm:$0xff] }
 0x2d2   : > { %v12992_v5 = vpop.permute.xlu0 %8410  ;;  %vm1269_vm1 = vcmp.eq.f32.partialorder %v12869_v38, 0.0  ;;  %v1266_v28 = vmul.f32 %v8700_v33, %v12869_v38  ;;  %v932_v55 = vadd.f32 %v908_v26, %v872_v12  ;;  %v1270_v6 = vand.u32 2147483648, %v12869_v38 }
 0x2d3   : > { %v12990_v44 = vpop.permute.xlu1 %4859  ;;  %v5388_v58 = vsel %vm5380_vm14, %v5375_v46, %v16647_v8  ;;  %v956_v46 = vrot.slane %v872_v12, 7  ;;  %v1184_v8 = vadd.f32 %v1160_v18, %v1136_v34  ;;  %v1196_v35 = vrot.slane %v1136_v34, 2  ;;  %v16659_v34 = vld [vmem:[#allocation104_spill] sm:$0xff] }
 0x2d4   : > { %v447_v17 = vsel %vm442_vm0, %v16128_v13, %v16127_v10  ;;  %v16650_v31 = vrot.slane %v16486_v62, 3  ;;  %v13043_v33 = vsel %vm1029_vm12, %v1030_v16, %v1028_v7  ;;  %v1352_v12 = vsub.f32 %v16637_v45, %v12033_v29 }
 0x2d5   : > { %vm1539_vm5 = vcmp.eq.f32.partialorder %v12996_v20, inf  ;;  %vm1541_vm15 = vcmp.eq.f32.partialorder %v12996_v20, 0.0  ;;  %v16651_v62 = vunpack.i.h.bf16 %v12992_v5  ;;  %v1268_v45 = vsel %vm1267_vm2, %v12869_v38, %v1266_v28 }
 0x2d6   : > { %v13028_v27 = vpop.permute.xlu0 %8420  ;;  %v5401_v22 = vsel %vm5393_vm6, %v5388_v58, %v16650_v31  ;;  %v16652_v58 = vunpack.i.l.bf16 %v12992_v5  ;;  %v13062_v16 = vadd.f32 %v956_v46, %v932_v55  ;;  %v1328_v7 = vsub.f32 %v16644_v51, %v12033_v29 }
 0x2d7   : > { %16648 = vst [vmem:[#allocation89_spill] sm:$0xff] %v13028_v27  ;;  %v16656_v10 = vrot.slane %v16598_v23, 1  ;;  %v1542_v26 = vand.u32 2147483648, %v12996_v20  ;;  %v1364_v46 = vmul.f32 %v1352_v12, %v1352_v12  ;;  %v1432_v29 = vsub.f32 %v16644_v51, %v16659_v34  ;;  %v16671_v51 = vld [vmem:[#allocation99_spill] sm:$0xff] }
 0x2d8   : > { %v13024_v14 = vpop.permute.xlu1 %4939  ;;  %v13057_v25 = vsel %vm487_vm10, %v16652_v58, %v16651_v62  ;;  %16654 = vst [vmem:[#allocation165_spill] sm:$0xff] %v13062_v16  ;;  %v5036_v62 = vrot.slane %v13043_v33, 1  ;;  %v13075_v58 = vadd.f32 %v1196_v35, %v1184_v8  ;;  %v13091_v8 = vsel %vm1269_vm1, %v1270_v6, %v1268_v45 }
 0x2d9   : > { %16653 = vst [vmem:[#allocation4_spill] sm:$0xff] %v13057_v25  ;;  %v13071_v13 = vsel %vm5406_vm13, %v5401_v22, %v16656_v10  ;;  %v16660_v10 = vunpack.i.h.bf16 %v13028_v27  ;;  %v16661_v22 = vunpack.i.l.bf16 %v13028_v27  ;;  %16663 = vst [vmem:[#allocation169_spill] sm:$0xff] %v13091_v8  ;;  %8703 = vrsqrt.f32 %v13062_v16  ;;  %v16677_v8 = vld [vmem:[#allocation93_spill] sm:$0xff] }
 0x2da   : > { %v13066_v31 = vpop.permute.xlu0 %8430  ;;  %16657 = vst [vmem:[#allocation167_spill] sm:$0xff] %v13071_v13  ;;  %16658 = vst [vmem:[#allocation168_spill] sm:$0xff] %v13075_v58  ;;  %v8702_v49 = vpop.eup %8701  ;;  %v1340_v34 = vmul.f32 %v1328_v7, %v1328_v7  ;;  %8705 = vrsqrt.f32 %v13075_v58  ;;  %vm16666_vm9 = vcmp.lt.s32.totalorder %v16649_v9, 125  ;;  %v1388_v45 = vrot.slane %v1364_v46, 1  ;;  %v16675_v46 = vld [vmem:[#allocation5_spill] sm:$0xff] }
 0x2db   : > { %16655 = vst [vmem:[#allocation166_spill] sm:$0xff] %v13066_v31  ;;  %v13087_v33 = vsel %vm512_vm7, %v16661_v22, %v16660_v10  ;;  %v1538_v12 = vmul.f32 %v8702_v49, %v12996_v20  ;;  %v16664_v10 = vunpack.i.h.bf16 %v13066_v31  ;;  %v16665_v38 = vunpack.i.l.bf16 %v13066_v31  ;;  %v13130_v27 = vld [vmem:[%s9373_s23 + $0x8] sm:$0xff] }
 0x2dc   : > { %v8391_v18 = vpop.permute.xlu1 %8390  ;;  %16662 = vst [vmem:[#allocation104_spill] sm:$0xff] %v13087_v33  ;;  %v1444_v7 = vmul.f32 %v1432_v29, %v1432_v29  ;;  %vm16668_vm12 = vcmp.lt.s32.totalorder %v16649_v9, 127  ;;  %v13117_v58 = vmul.f32 %v16671_v51, %v16671_v51 }
 0x2dd   : > { %v8393_v25 = vunpack.i.h.bf16 %v8391_v18  ;;  %v8392_v23 = vunpack.i.l.bf16 %v8391_v18  ;;  %v13104_v6 = vsel %vm16666_vm9, %v16665_v38, %v16664_v10  ;;  %v1540_v49 = vsel %vm1539_vm5, %v12996_v20, %v1538_v12  ;;  %vm16669_vm2 = vmmov %vm16668_vm12  ;;  %v16673_v10 = vld [vmem:[#allocation103_spill] sm:$0xff]  ;;  %v16684_v20 = vld [vmem:[#allocation9_spill] sm:$0xff] }
 0x2de   : > { %16667 = vst [vmem:[#allocation170_spill] sm:$0xff] %v13104_v6  ;;  %v13113_v28 = vpop.permute.xlu0 %8440  ;;  %16672 = vst [vmem:[#allocation172_spill] sm:$0xff] %v13117_v58  ;;  %v907_v38 = vrot.slane %v16673_v10, 1  ;;  %vm16676_vm5 = vcmp.lt.s32.totalorder %v16675_v46, 3  ;;  %v1543_v31 = vsel %vm1541_vm15, %v1542_v26, %v1540_v49  ;;  %v16680_v26 = vunpack.i.l.bf16 %v12967_v0 }
 0x2df   : > { %v422_v22 = vsel %vm16668_vm12, %v8392_v23, %v8393_v25  ;;  %16670 = vst [vmem:[#allocation171_spill] sm:$0xff] %v13113_v28  ;;  %vm16674_vm1 = vmmov %vm16669_vm2  ;;  %vm16685_vm12 = vcmp.lt.s32.totalorder %v16684_v20, 3  ;;  %v16707_v59 = vunpack.i.h.bf16 %v13113_v28 }
 0x2e0   : > { %v8396_v35 = vpop.permute.xlu1 %8395  ;;  %vm16678_vm9 = vmmov %vm16674_vm1  ;;  %16679 = vst [vmem:[#allocation103_spill] sm:$0xff] %v13130_v27 }
 0x2e1   : > { %v8398_v18 = vunpack.i.h.bf16 %v8396_v35  ;;  %v8397_v55 = vunpack.i.l.bf16 %v8396_v35 }
 0x2e3   : > { %v420_v35 = vsel %vm16669_vm2, %v8393_v25, %v8397_v55  ;;  %v418_v12 = vsel %vm16674_vm1, %v8397_v55, %v8398_v18  ;;  %v1159_v25 = vrot.slane %v16677_v8, 1  ;;  %v424_v13 = vsel %vm16678_vm9, %v8398_v18, %v8392_v23  ;;  %v16686_v55 = vld [vmem:[#allocation8_spill] sm:$0xff] }
 0x2e4   : > { %v8406_v6 = vpop.permute.xlu1 %8405  ;;  %v464_v29 = vsel %vm16676_vm5, %v420_v35, %v447_v17  ;;  %v1412_v35 = vadd.f32 %v1388_v45, %v1340_v34  ;;  %v16682_v34 = vld [vmem:[#allocation6_spill] sm:$0xff]  ;;  %vm16687_vm2 = vcmp.lt.s32.totalorder %v16686_v55, 3 }
 0x2e5   : > { %v8408_v33 = vunpack.i.h.bf16 %v8406_v6  ;;  %v8407_v51 = vunpack.i.l.bf16 %v8406_v6  ;;  %v5435_v10 = vpack.c.bf16 %v464_v29, %v13130_v27  ;;  %v16681_v6 = vunpack.i.h.bf16 %v12967_v0  ;;  %v13157_v0 = vld [vmem:[%s9373_s23] sm:$0xff] }
 0x2e6   : > { %v5336_v29 = vsel %vm2467_vm4, %v5036_v62, %v1543_v31  ;;  %vm16683_vm15 = vcmp.lt.s32.totalorder %v16682_v34, 3  ;;  %v13154_v27 = vadd.f32 %v907_v38, %v13117_v58  ;;  %16689 = vst [vmem:[#allocation174_spill] sm:$0xff] %v13157_v0  ;;  %v16728_v58 = vld [vmem:[#allocation75_spill] sm:$0xff] }
 0x2e7   : > { %v449_v23 = vsel %vm442_vm0, %v8408_v33, %v16680_v26  ;;  %v443_v18 = vsel %vm442_vm0, %v8407_v51, %v8408_v33  ;;  %v445_v49 = vsel %vm442_vm0, %v16681_v6, %v8407_v51  ;;  %5533 = vmatprep.subr.bf16.mxu0 %v5435_v10  ;;  %v4239_v33 = vpop.f32.mrb[48].mxu0  ;;  %v13161_v10 = vld [vmem:[%s9373_s23 + $0x18] sm:$0xff]  ;;  %v13165_v6 = vld [vmem:[%s9373_s23 + $0x10] sm:$0xff]  ;;  %vm16709_vm0 = vcmp.lt.s32.totalorder %v16649_v9, 1 }
 0x2e8   : > { %v463_v45 = vsel %vm16683_vm15, %v422_v22, %v449_v23  ;;  %v466_v17 = vsel %vm16685_vm12, %v424_v13, %v443_v18  ;;  %v465_v26 = vsel %vm16687_vm2, %v418_v12, %v445_v49  ;;  %16688 = vst [vmem:[#allocation173_spill] sm:$0xff] %v13154_v27  ;;  %16690 = vst [vmem:[#allocation175_spill] sm:$0xff] %v13161_v10  ;;  %v5096_v13 = vrot.slane %v1543_v31, 6  ;;  %v13168_v23 = vpop.eup %8703  ;;  %v16692_v12 = vld [vmem:[#allocation54_spill] sm:$0xff]  ;;  %v16693_v18 = vld [vmem:[#allocation32_spill] sm:$0xff] }
 0x2e9   : > { %v5434_v51 = vpack.c.bf16 %v463_v45, %v13157_v0  ;;  %v5437_v62 = vpack.c.bf16 %v466_v17, %v13161_v10  ;;  %16691 = vst [vmem:[#allocation176_spill] sm:$0xff] %v13165_v6  ;;  %v5436_v22 = vpack.c.bf16 %v465_v26, %v13165_v6  ;;  %v16694_v38 = vmin.f32 %v16692_v12, %v16693_v18  ;;  %v16696_v45 = vld [vmem:[#allocation102_spill] sm:$0xff]  ;;  %v4241_v0 = vpop.f32.mrb[49].mxu0  ;;  %v13180_v34 = vpop.eup %8705  ;;  %v16699_v31 = vld [vmem:[#allocation77_spill] sm:$0xff]  ;;  %v16700_v26 = vld [vmem:[#allocation20_spill] sm:$0xff] }
 0x2ea   : > { %v16695_v27 = vmax.f32 %v16692_v12, %v16693_v18  ;;  %v4691_v20 = vadd.f32 %v16696_v45, %v4239_v33  ;;  %v16697_v17 = vrot.slane %v16642_v11, 7  ;;  %16698 = vst [vmem:[#allocation54_spill] sm:$0xff] %v13180_v34  ;;  %v16701_v6 = vmin.f32 %v16699_v31, %v16700_v26  ;;  %v16704_v45 = vld [vmem:[#allocation58_spill] sm:$0xff]  ;;  %v16705_v11 = vld [vmem:[#allocation7_spill] sm:$0xff] }
 0x2eb   : > { %v4547_v49 = vmin.f32 %v16694_v38, %v4239_v33  ;;  %v16702_v38 = vmax.f32 %v16699_v31, %v16700_v26  ;;  %v4692_v12 = vadd.f32 %v16703_v57, %v4241_v0  ;;  %5534 = vmatpush1.bf16.msra.mxu0 %v5434_v51  ;;  %5584 = vmatprep.subr.bf16.mxu1 %v5437_v62  ;;  %v16714_v26 = vld [vmem:[#allocation34_spill] sm:$0xff]  ;;  %vm16927_vm15 = vcmp.lt.s32.totalorder %v16649_v9, 125 }
 0x2ec   : > { %v4619_v55 = vmax.f32 %v16695_v27, %v4239_v33  ;;  %v5348_v10 = vsel %vm2480_vm8, %v5336_v29, %v16697_v17  ;;  %v4548_v46 = vmin.f32 %v16701_v6, %v4241_v0  ;;  %v4243_v27 = vpop.f32.mrb[50].mxu0  ;;  %v1468_v33 = vrot.slane %v1444_v7, 7  ;;  %5585 = vmatpush1.bf16.msra.mxu1 %v5436_v22  ;;  %vm16931_vm12 = vmmov %vm16927_vm15 }
 0x2ed   : > { %v4620_v48 = vmax.f32 %v16702_v38, %v4241_v0  ;;  %v4727_v18 = vsub.f32 %v4691_v20, %v4547_v49  ;;  %v16706_v29 = vmin.f32 %v16704_v45, %v16705_v11  ;;  %v4245_v34 = vpop.f32.mrb[51].mxu0  ;;  %v16708_v6 = vunpack.i.l.bf16 %v13113_v28  ;;  %v16716_v28 = vld [vmem:[#allocation17_spill] sm:$0xff]  ;;  %vm16933_vm2 = vmmov %vm16931_vm12 }
 0x2ee   : > { %v4728_v0 = vsub.f32 %v4692_v12, %v4548_v46  ;;  %v16711_v7 = vmax.f32 %v16704_v45, %v16705_v11  ;;  %v13204_v51 = vadd.f32 %v1468_v33, %v1412_v35  ;;  %v13207_v62 = vadd.f32 %v1159_v25, %v16677_v8  ;;  %v16719_v33 = vld [vmem:[#allocation42_spill] sm:$0xff] }
 0x2ef   : > { %v4559_v17 = vmin.f32 %v16706_v29, %v4243_v27  ;;  %v13198_v31 = vsel %vm16709_vm0, %v16708_v6, %v16707_v59  ;;  %v4763_v22 = vsub.f32 %v4727_v18, %v4619_v55  ;;  %v4703_v38 = vadd.f32 %v16714_v26, %v4243_v27  ;;  %v16715_v29 = vld [vmem:[#allocation43_spill] sm:$0xff] }
 0x2f0   : > { %16710 = vst [vmem:[#allocation32_spill] sm:$0xff] %v13198_v31  ;;  %v4631_v20 = vmax.f32 %v16711_v7, %v4243_v27  ;;  %16712 = vst [vmem:[#allocation102_spill] sm:$0xff] %v13204_v51  ;;  %v16717_v32 = vmin.f32 %v16715_v29, %v16716_v28  ;;  %v5361_v6 = vsel %vm5354_vm11, %v5348_v10, %v5096_v13  ;;  %8707 = vrsqrt.f32 %v13204_v51 }
 0x2f1   : > { %16713 = vst [vmem:[#allocation77_spill] sm:$0xff] %v13207_v62  ;;  %v4814_v12 = vmul.f32 %v12764_v3, %v4547_v49  ;;  %v4764_v57 = vsub.f32 %v4728_v0, %v4620_v48  ;;  %v16718_v11 = vmax.f32 %v16715_v29, %v16716_v28  ;;  %v4704_v45 = vadd.f32 %v16719_v33, %v4245_v34  ;;  %v4249_v0 = vpop.f32.mrb[52].mxu0  ;;  %v16720_v29 = vld [vmem:[#allocation22_spill] sm:$0xff] }
 0x2f2   : > { %v4560_v59 = vmin.f32 %v16717_v32, %v4245_v34  ;;  %v4862_v25 = vmul.f32 %v12852_v53, %v4763_v22  ;;  %v4946_v18 = vmul.f32 %v12908_v21, %v4619_v55  ;;  %v4815_v27 = vmul.f32 %v12764_v3, %v4548_v46  ;;  %v13235_v22 = vpop.f32.mrb[53].mxu0 }
 0x2f3   : > { %v4632_v35 = vmax.f32 %v16718_v11, %v4245_v34  ;;  %v4739_v7 = vsub.f32 %v4703_v38, %v4559_v17  ;;  %v4863_v32 = vmul.f32 %v12852_v53, %v4764_v57  ;;  %v4947_v10 = vmul.f32 %v12908_v21, %v4620_v48  ;;  %v16721_v11 = vld [vmem:[#allocation40_spill] sm:$0xff]  ;;  %v4290_v48 = vpop.f32.mrb[48].mxu1 }
 0x2f4   : > { %v4826_v13 = vmul.f32 %v12805_v41, %v4559_v17  ;;  %v4740_v49 = vsub.f32 %v4704_v45, %v4560_v59  ;;  %v4898_v26 = vadd.f32 %v4862_v25, %v4814_v12  ;;  %v16722_v34 = vmin.f32 %v16720_v29, %v16721_v11  ;;  %v16724_v17 = vld [vmem:[#allocation28_spill] sm:$0xff]  ;;  %v16725_v12 = vld [vmem:[#allocation26_spill] sm:$0xff] }
 0x2f5   : > { %v4775_v28 = vsub.f32 %v4739_v7, %v4631_v20  ;;  %v16723_v55 = vmax.f32 %v16720_v29, %v16721_v11  ;;  %v4899_v57 = vadd.f32 %v4863_v32, %v4815_v27  ;;  %v4715_v45 = vadd.f32 %v16724_v17, %v4249_v0  ;;  %v16726_v25 = vld [vmem:[#allocation46_spill] sm:$0xff]  ;;  %v16729_v29 = vld [vmem:[#allocation31_spill] sm:$0xff] }
 0x2f6   : > { %v13228_v33 = vmin.f32 %v16722_v34, %v4249_v0  ;;  %v4776_v38 = vsub.f32 %v4740_v49, %v4632_v35  ;;  %v16727_v7 = vmin.f32 %v16725_v12, %v16726_v25  ;;  %v4253_v34 = vpop.f32.mrb[54].mxu0  ;;  %v13244_v62 = vadd.f32 %v4946_v18, %v4898_v26  ;;  %v16732_v49 = vld [vmem:[#allocation14_spill] sm:$0xff] }
 0x2f7   : > { %v13233_v46 = vmax.f32 %v16723_v55, %v4249_v0  ;;  %v16730_v11 = vmin.f32 %v16728_v58, %v16729_v29  ;;  %v16731_v27 = vmax.f32 %v16728_v58, %v16729_v29  ;;  %v4693_v31 = vadd.f32 %v16732_v49, %v4290_v48  ;;  %v4292_v0 = vpop.f32.mrb[49].mxu1  ;;  %v4254_v17 = vpop.f32.mrb[55].mxu0  ;;  %v16734_v34 = vld [vmem:[#allocation113_spill] sm:$0xff]  ;;  %v16738_v29 = vld [vmem:[#allocation30_spill] sm:$0xff] }
 0x2f8   : > { %v13242_v8 = vmin.f32 %v16727_v7, %v13235_v22  ;;  %v13253_v63 = vadd.f32 %v4947_v10, %v4899_v57  ;;  %v4874_v7 = vmul.f32 %v12854_v37, %v4775_v28  ;;  %v16735_v18 = vmin.f32 %v16733_v15, %v16734_v34  ;;  %v4294_v1 = vpop.f32.mrb[50].mxu1  ;;  %v16739_v17 = vld [vmem:[#allocation50_spill] sm:$0xff] }
 0x2f9   : > { %v4549_v55 = vmin.f32 %v16730_v11, %v4290_v48  ;;  %v4621_v32 = vmax.f32 %v16731_v27, %v4290_v48  ;;  %v16736_v47 = vmax.f32 %v16733_v15, %v16734_v34  ;;  %v4296_v58 = vpop.f32.mrb[51].mxu1  ;;  %v5374_v48 = vsel %vm5367_vm3, %v5361_v6, %v12523_v43  ;;  %v16740_v6 = vld [vmem:[#allocation114_spill] sm:$0xff] }
 0x2fa   : > { %v4550_v26 = vmin.f32 %v16735_v18, %v4292_v0  ;;  %v13266_v10 = vmul.f32 %v13168_v23, %v13062_v16  ;;  %v4910_v28 = vadd.f32 %v4874_v7, %v4826_v13  ;;  %v4958_v57 = vmul.f32 %v13024_v14, %v4631_v20  ;;  %v16743_v7 = vld [vmem:[#allocation29_spill] sm:$0xff] }
 0x2fb   : > { %v4622_v11 = vmax.f32 %v16736_v47, %v4292_v0  ;;  %v4729_v50 = vsub.f32 %v4693_v31, %v4549_v55  ;;  %v4694_v27 = vadd.f32 %v16738_v29, %v4292_v0  ;;  %v4827_v15 = vmul.f32 %v12805_v41, %v4560_v59  ;;  %v16744_v29 = vld [vmem:[#allocation51_spill] sm:$0xff] }
 0x2fc   : > { %16737 = vst [vmem:[#allocation20_spill] sm:$0xff] %v13266_v10  ;;  %v4875_v31 = vmul.f32 %v12854_v37, %v4776_v38  ;;  %v4959_v49 = vmul.f32 %v13024_v14, %v4632_v35  ;;  %v16741_v34 = vmin.f32 %v16739_v17, %v16740_v6  ;;  %v13277_v23 = vadd.f32 %v4958_v57, %v4910_v28  ;;  %v16745_v35 = vld [vmem:[#allocation124_spill] sm:$0xff] }
 0x2fd   : > { %v4765_v47 = vsub.f32 %v4729_v50, %v4621_v32  ;;  %v4730_v43 = vsub.f32 %v4694_v27, %v4550_v26  ;;  %v16742_v13 = vmax.f32 %v16739_v17, %v16740_v6  ;;  %v4705_v0 = vadd.f32 %v16743_v7, %v4294_v1  ;;  %v4300_v27 = vpop.f32.mrb[52].mxu1 }
 0x2fe   : > { %v4561_v18 = vmin.f32 %v16741_v34, %v4294_v1  ;;  %v4816_v59 = vmul.f32 %v12764_v3, %v4549_v55  ;;  %v4911_v38 = vadd.f32 %v4875_v31, %v4827_v15  ;;  %v16746_v10 = vmin.f32 %v16744_v29, %v16745_v35 }
 0x2ff   : > { %v4633_v20 = vmax.f32 %v16742_v13, %v4294_v1  ;;  %v4864_v50 = vmul.f32 %v12852_v53, %v4765_v47  ;;  %v4948_v34 = vmul.f32 %v12908_v21, %v4621_v32  ;;  %v4766_v28 = vsub.f32 %v4730_v43, %v4622_v11  ;;  %v16750_v47 = vld [vmem:[#allocation125_spill] sm:$0xff] }
 0x300   : > { %v4562_v51 = vmin.f32 %v16746_v10, %v4296_v58  ;;  %v4741_v57 = vsub.f32 %v4705_v0, %v4561_v18  ;;  %v16747_v16 = vrot.slane %v16641_v19, 3  ;;  %v13294_v6 = vadd.f32 %v4959_v49, %v4911_v38  ;;  %v4302_v10 = vpop.f32.mrb[53].mxu1 }
 0x301   : > { %v4900_v1 = vadd.f32 %v4864_v50, %v4816_v59  ;;  %v16749_v55 = vmax.f32 %v16744_v29, %v16745_v35  ;;  %v4706_v31 = vadd.f32 %v16750_v47, %v4296_v58  ;;  %v4817_v32 = vmul.f32 %v12764_v3, %v4550_v26  ;;  %v4304_v0 = vpop.f32.mrb[54].mxu1 }
 0x302   : > { %v13292_v17 = vsel %vm5380_vm14, %v5374_v48, %v16747_v16  ;;  %v4865_v43 = vmul.f32 %v12852_v53, %v4766_v28  ;;  %v4777_v13 = vsub.f32 %v4741_v57, %v4633_v20  ;;  %v4751_v7 = vsub.f32 %v4715_v45, %v13228_v33  ;;  %v13303_v16 = vpop.permute.xlu1 %8415  ;;  %v4305_v50 = vpop.f32.mrb[55].mxu1 }
 0x303   : > { %16748 = vst [vmem:[#allocation115_spill] sm:$0xff] %v13292_v17  ;;  %v4634_v15 = vmax.f32 %v16749_v55, %v4296_v58  ;;  %v13305_v48 = vadd.f32 %v4948_v34, %v4900_v1  ;;  %v4949_v49 = vmul.f32 %v12908_v21, %v4622_v11  ;;  %v4742_v59 = vsub.f32 %v4706_v31, %v4562_v51  ;;  %v13312_v28 = vpop.eup %8707  ;;  %v16753_v31 = vld [vmem:[#allocation19_spill] sm:$0xff] }
 0x304   : > { %v8418_v38 = vunpack.i.h.bf16 %v13303_v16  ;;  %v4901_v58 = vadd.f32 %v4865_v43, %v4817_v32  ;;  %v4828_v29 = vmul.f32 %v12805_v41, %v4561_v18  ;;  %v4876_v26 = vmul.f32 %v12854_v37, %v4777_v13  ;;  %16751 = vst [vmem:[#allocation58_spill] sm:$0xff] %v13312_v28 }
 0x305   : > { %v4787_v35 = vsub.f32 %v4751_v7, %v13233_v46  ;;  %v4960_v45 = vmul.f32 %v13024_v14, %v4633_v20  ;;  %v4778_v57 = vsub.f32 %v4742_v59, %v4634_v15  ;;  %v4838_v34 = vmul.f32 %v12947_v2, %v13228_v33  ;;  %v16754_v33 = vld [vmem:[#allocation76_spill] sm:$0xff] }
 0x306   : > { %v16752_v11 = vmax.f32 %v16725_v12, %v16726_v25  ;;  %v13321_v55 = vadd.f32 %v4949_v49, %v4901_v58  ;;  %v4912_v18 = vadd.f32 %v4876_v26, %v4828_v29  ;;  %v4716_v32 = vadd.f32 %v16753_v31, %v13235_v22  ;;  %v16755_v7 = vld [vmem:[#allocation48_spill] sm:$0xff]  ;;  %v16758_v26 = vld [vmem:[#allocation45_spill] sm:$0xff] }
 0x307   : > { %v4886_v47 = vmul.f32 %v12990_v44, %v4787_v35  ;;  %v16166_v43 = vrot.slane %v13253_v63, 7  ;;  %v4829_v20 = vmul.f32 %v12805_v41, %v4562_v51  ;;  %v4877_v13 = vmul.f32 %v12854_v37, %v4778_v57 }
 0x308   : > { %v4644_v1 = vmax.f32 %v16752_v11, %v13235_v22  ;;  %v16756_v0 = vmin.f32 %v16754_v33, %v16755_v7  ;;  %v13332_v12 = vadd.f32 %v4960_v45, %v4912_v18  ;;  %v4970_v49 = vmul.f32 %v12932_v56, %v13233_v46  ;;  %v16760_v18 = vld [vmem:[#allocation23_spill] sm:$0xff] }
 0x309   : > { %v4922_v25 = vadd.f32 %v4886_v47, %v4838_v34  ;;  %v4752_v50 = vsub.f32 %v4716_v32, %v13242_v8  ;;  %v4913_v58 = vadd.f32 %v4877_v13, %v4829_v20  ;;  %v4961_v22 = vmul.f32 %v13024_v14, %v4634_v15  ;;  %v16759_v34 = vld [vmem:[#allocation47_spill] sm:$0xff] }
 0x30a   : > { %v4573_v59 = vmin.f32 %v16756_v0, %v4300_v27  ;;  %v16757_v51 = vmax.f32 %v16754_v33, %v16755_v7  ;;  %v4717_v35 = vadd.f32 %v16758_v26, %v4300_v27  ;;  %v16165_v57 = vrot.slane %v13244_v62, 7  ;;  %v16763_v0 = vld [vmem:[#allocation126_spill] sm:$0xff] }
 0x30b   : > { %v13343_v11 = vadd.f32 %v4970_v49, %v4922_v25  ;;  %v4788_v45 = vsub.f32 %v4752_v50, %v4644_v1  ;;  %v16761_v47 = vmin.f32 %v16759_v34, %v16760_v18  ;;  %v16164_v31 = vrot.slane %v13321_v55, 7 }
 0x30c   : > { %v4645_v29 = vmax.f32 %v16757_v51, %v4300_v27  ;;  %v13349_v32 = vadd.f32 %v4961_v22, %v4913_v58  ;;  %v4753_v15 = vsub.f32 %v4717_v35, %v4573_v59  ;;  %v16762_v20 = vmax.f32 %v16759_v34, %v16760_v18  ;;  %v16764_v58 = vld [vmem:[#allocation122_spill] sm:$0xff] }
 0x30d   : > { %v4574_v46 = vmin.f32 %v16761_v47, %v4302_v10  ;;  %v16163_v27 = vrot.slane %v13305_v48, 7  ;;  %v4839_v33 = vmul.f32 %v12947_v2, %v13242_v8  ;;  %v4887_v7 = vmul.f32 %v12990_v44, %v4788_v45 }
 0x30e   : > { %v4646_v13 = vmax.f32 %v16762_v20, %v4302_v10  ;;  %v4718_v25 = vadd.f32 %v16763_v0, %v4302_v10  ;;  %v4971_v49 = vmul.f32 %v12932_v56, %v4644_v1  ;;  %v4789_v50 = vsub.f32 %v4753_v15, %v4645_v29 }
 0x30f   : > { %v5420_v22 = vsel %vm2467_vm4, %v16764_v58, %v16166_v43  ;;  %v16167_v51 = vunpack.i.l.bf16 %v13303_v16  ;;  %v4923_v26 = vadd.f32 %v4887_v7, %v4839_v33  ;;  %v5419_v8 = vsel %vm2467_vm4, %v12479_v52, %v16165_v57 }
 0x310   : > { %v4754_v35 = vsub.f32 %v4718_v25, %v4574_v46  ;;  %v5447_v34 = vpack.c.bf16 %v5420_v22, %v12497_v40  ;;  %v4840_v10 = vmul.f32 %v12947_v2, %v4573_v59  ;;  %v4888_v1 = vmul.f32 %v12990_v44, %v4789_v50 }
 0x311   : > { %v5446_v45 = vpack.c.bf16 %v5419_v8, %v12503_v61  ;;  %v5422_v18 = vsel %vm2467_vm4, %v12508_v4, %v16164_v31  ;;  %v13377_v47 = vadd.f32 %v4971_v49, %v4923_v26  ;;  %v5421_v52 = vsel %vm2467_vm4, %v12717_v60, %v16163_v27  ;;  %v4341_v61 = vpop.f32.mrb[56].mxu0 }
 0x312   : > { %v4790_v15 = vsub.f32 %v4754_v35, %v4646_v13  ;;  %5535 = vmatprep.subr.bf16.mxu0 %v5447_v34  ;;  %v5449_v40 = vpack.c.bf16 %v5422_v18, %v12674_v30  ;;  %v4924_v59 = vadd.f32 %v4888_v1, %v4840_v10  ;;  %v4972_v20 = vmul.f32 %v12932_v56, %v4645_v29  ;;  %v4343_v50 = vpop.f32.mrb[57].mxu0 }
 0x313   : > { %5536 = vmatpush1.bf16.msra.mxu0 %v5446_v45  ;;  %v16765_v33 = vunpack.i.l.bf16 %v12992_v5  ;;  %v5448_v30 = vpack.c.bf16 %v5421_v52, %v12723_v54  ;;  %v4841_v7 = vmul.f32 %v12947_v2, %v4574_v46  ;;  %v16766_v60 = vmin.f32 %v11749_v39, %v12521_v24  ;;  %v16768_v54 = vld [vmem:[#allocation61_spill] sm:$0xff]  ;;  %v4345_v8 = vpop.f32.mrb[58].mxu0 }
 0x314   : > { %v4889_v0 = vmul.f32 %v12990_v44, %v4790_v15  ;;  %v16767_v25 = vmax.f32 %v11749_v39, %v12521_v24  ;;  %5586 = vmatprep.subr.bf16.mxu1 %v5449_v40  ;;  %v13402_v58 = vadd.f32 %v4972_v20, %v4924_v59  ;;  %v4695_v22 = vadd.f32 %v12534_v36, %v4341_v61  ;;  %v16771_v24 = vld [vmem:[#allocation49_spill] sm:$0xff]  ;;  %v4347_v45 = vpop.f32.mrb[59].mxu0  ;;  %v16773_v59 = vld [vmem:[#allocation80_spill] sm:$0xff] }
 0x315   : > { %v13391_v4 = vsel %vm487_vm10, %v8418_v38, %v16765_v33  ;;  %v4551_v29 = vmin.f32 %v16766_v60, %v4341_v61  ;;  %v16769_v26 = vmin.f32 %v11753_v42, %v16768_v54  ;;  %v16770_v35 = vmax.f32 %v11753_v42, %v16768_v54  ;;  %5587 = vmatpush1.bf16.msra.mxu1 %v5448_v30  ;;  %v16774_v20 = vld [vmem:[#allocation128_spill] sm:$0xff] }
 0x316   : > { %v4623_v49 = vmax.f32 %v16767_v25, %v4341_v61  ;;  %v4925_v10 = vadd.f32 %v4889_v0, %v4841_v7  ;;  %v4973_v39 = vmul.f32 %v12932_v56, %v4646_v13  ;;  %v4696_v1 = vadd.f32 %v16771_v24, %v4343_v50  ;;  %v16777_v0 = vld [vmem:[#allocation129_spill] sm:$0xff]  ;;  %v16778_v25 = vld [vmem:[#allocation60_spill] sm:$0xff] }
 0x317   : > { %v4552_v46 = vmin.f32 %v16769_v26, %v4343_v50  ;;  %v4624_v34 = vmax.f32 %v16770_v35, %v4343_v50  ;;  %v13419_v36 = vsel %vm487_vm10, %v16167_v51, %v8418_v38  ;;  %v4731_v40 = vsub.f32 %v4695_v22, %v4551_v29  ;;  %v16779_v50 = vld [vmem:[#allocation130_spill] sm:$0xff] }
 0x318   : > { %16772 = vst [vmem:[#allocation7_spill] sm:$0xff] %v13419_v36  ;;  %v13424_v52 = vadd.f32 %v4973_v39, %v4925_v10  ;;  %v16775_v61 = vmin.f32 %v16773_v59, %v16774_v20  ;;  %v16776_v30 = vmax.f32 %v16773_v59, %v16774_v20  ;;  %v4707_v60 = vadd.f32 %v16777_v0, %v4345_v8  ;;  %v16782_v20 = vld [vmem:[#allocation131_spill] sm:$0xff]  ;;  %v13449_v0 = vpop.permute.xlu1 %8425  ;;  %v16791_v10 = vld [vmem:[#allocation53_spill] sm:$0xff] }
 0x319   : > { %v4732_v13 = vsub.f32 %v4696_v1, %v4552_v46  ;;  %v4767_v38 = vsub.f32 %v4731_v40, %v4623_v49  ;;  %v16780_v54 = vmin.f32 %v16778_v25, %v16779_v50  ;;  %v16781_v22 = vmax.f32 %v16778_v25, %v16779_v50 }
 0x31a   : > { %v4563_v33 = vmin.f32 %v16775_v61, %v4345_v8  ;;  %v4635_v7 = vmax.f32 %v16776_v30, %v4345_v8  ;;  %v4818_v39 = vmul.f32 %v12764_v3, %v4551_v29  ;;  %v4950_v24 = vmul.f32 %v12908_v21, %v4623_v49  ;;  %v13447_v30 = vpop.f32.mrb[60].mxu0  ;;  %v16783_v29 = vld [vmem:[#allocation78_spill] sm:$0xff]  ;;  %v16784_v49 = vld [vmem:[#allocation57_spill] sm:$0xff] }
 0x31b   : > { %v4564_v26 = vmin.f32 %v16780_v54, %v4347_v45  ;;  %v13439_v35 = vmax.f32 %v16781_v22, %v4347_v45  ;;  %v4768_v1 = vsub.f32 %v4732_v13, %v4624_v34  ;;  %v4866_v40 = vmul.f32 %v12852_v53, %v4767_v38  ;;  %v4392_v54 = vpop.f32.mrb[56].mxu1  ;;  %v13465_v38 = vpop.f32.mrb[61].mxu0 }
 0x31c   : > { %v4819_v8 = vmul.f32 %v12764_v3, %v4552_v46  ;;  %v4743_v59 = vsub.f32 %v4707_v60, %v4563_v33  ;;  %v4708_v61 = vadd.f32 %v16782_v20, %v4347_v45  ;;  %v4951_v50 = vmul.f32 %v12908_v21, %v4624_v34  ;;  %v16787_v20 = vld [vmem:[#allocation119_spill] sm:$0xff]  ;;  %v4394_v57 = vpop.f32.mrb[57].mxu1  ;;  %v4355_v18 = vpop.f32.mrb[62].mxu0 }
 0x31d   : > { %v4867_v25 = vmul.f32 %v12852_v53, %v4768_v1  ;;  %v16785_v13 = vmin.f32 %v16783_v29, %v16784_v49  ;;  %v16786_v46 = vmax.f32 %v16783_v29, %v16784_v49  ;;  %v4902_v60 = vadd.f32 %v4866_v40, %v4818_v39  ;;  %v16788_v1 = vld [vmem:[#allocation135_spill] sm:$0xff]  ;;  %v16793_v49 = vld [vmem:[#allocation136_spill] sm:$0xff]  ;;  %v4396_v28 = vpop.f32.mrb[58].mxu1 }
 0x31e   : > { %v16789_v27 = vmin.f32 %v16787_v20, %v16788_v1  ;;  %v16790_v15 = vmax.f32 %v16787_v20, %v16788_v1  ;;  %v4779_v42 = vsub.f32 %v4743_v59, %v4635_v7  ;;  %v16792_v29 = vld [vmem:[#allocation95_spill] sm:$0xff]  ;;  %v16796_v18 = vunpack.i.l.bf16 %v13303_v16 }
 0x31f   : > { %v13457_v22 = vmin.f32 %v16785_v13, %v13447_v30  ;;  %v13463_v45 = vmax.f32 %v16786_v46, %v13447_v30  ;;  %v4697_v13 = vadd.f32 %v16791_v10, %v4392_v54  ;;  %v4903_v43 = vadd.f32 %v4867_v25, %v4819_v8  ;;  %v4398_v10 = vpop.f32.mrb[59].mxu1 }
 0x320   : > { %v4553_v34 = vmin.f32 %v16789_v27, %v4392_v54  ;;  %v4625_v31 = vmax.f32 %v16790_v15, %v4392_v54  ;;  %v16794_v46 = vmin.f32 %v16792_v29, %v16793_v49  ;;  %v16795_v39 = vmax.f32 %v16792_v29, %v16793_v49  ;;  %v4356_v27 = vpop.f32.mrb[63].mxu0  ;;  %v16798_v29 = vld [vmem:[#allocation137_spill] sm:$0xff] }
 0x321   : > { %v13481_v20 = vadd.f32 %v4950_v24, %v4902_v60  ;;  %v16797_v8 = vunpack.i.h.bf16 %v12992_v5  ;;  %v13491_v25 = vadd.f32 %v4951_v50, %v4903_v43  ;;  %v4830_v54 = vmul.f32 %v12805_v41, %v4563_v33  ;;  %v16799_v27 = vld [vmem:[#allocation118_spill] sm:$0xff] }
 0x322   : > { %v4554_v51 = vmin.f32 %v16794_v46, %v4394_v57  ;;  %v4626_v40 = vmax.f32 %v16795_v39, %v4394_v57  ;;  %v4733_v15 = vsub.f32 %v4697_v13, %v4553_v34  ;;  %v4878_v1 = vmul.f32 %v12854_v37, %v4779_v42 }
 0x323   : > { %v13489_v59 = vsel %vm487_vm10, %v16797_v8, %v16796_v18  ;;  %v4698_v49 = vadd.f32 %v16798_v29, %v4394_v57  ;;  %v4962_v60 = vmul.f32 %v13024_v14, %v4635_v7  ;;  %v4744_v13 = vsub.f32 %v4708_v61, %v4564_v26  ;;  %v16800_v18 = vld [vmem:[#allocation138_spill] sm:$0xff]  ;;  %v16803_v7 = vld [vmem:[#allocation139_spill] sm:$0xff] }
 0x324   : > { %v4769_v24 = vsub.f32 %v4733_v15, %v4625_v31  ;;  %v4820_v5 = vmul.f32 %v12764_v3, %v4553_v34  ;;  %v4914_v46 = vadd.f32 %v4878_v1, %v4830_v54  ;;  %v16801_v43 = vmin.f32 %v16799_v27, %v16800_v18  ;;  %v16804_v54 = vld [vmem:[#allocation84_spill] sm:$0xff] }
 0x325   : > { %v4734_v39 = vsub.f32 %v4698_v49, %v4554_v51  ;;  %v4780_v42 = vsub.f32 %v4744_v13, %v13439_v35  ;;  %v16802_v57 = vmax.f32 %v16799_v27, %v16800_v18  ;;  %v4709_v61 = vadd.f32 %v16803_v7, %v4396_v28  ;;  %v16805_v1 = vld [vmem:[#allocation140_spill] sm:$0xff] }
 0x326   : > { %v4565_v50 = vmin.f32 %v16801_v43, %v4396_v28  ;;  %v4868_v33 = vmul.f32 %v12852_v53, %v4769_v24  ;;  %v13508_v8 = vadd.f32 %v4962_v60, %v4914_v46  ;;  %v4831_v34 = vmul.f32 %v12805_v41, %v4564_v26  ;;  %v4402_v43 = vpop.f32.mrb[60].mxu1  ;;  %v16808_v46 = vld [vmem:[#allocation141_spill] sm:$0xff] }
 0x327   : > { %v4637_v15 = vmax.f32 %v16802_v57, %v4396_v28  ;;  %v4770_v29 = vsub.f32 %v4734_v39, %v4626_v40  ;;  %v16806_v49 = vmin.f32 %v16804_v54, %v16805_v1  ;;  %v4952_v24 = vmul.f32 %v12908_v21, %v4625_v31  ;;  %v4404_v27 = vpop.f32.mrb[61].mxu1 }
 0x328   : > { %v4904_v16 = vadd.f32 %v4868_v33, %v4820_v5  ;;  %v4879_v13 = vmul.f32 %v12854_v37, %v4780_v42  ;;  %v4745_v17 = vsub.f32 %v4709_v61, %v4565_v50  ;;  %v4821_v18 = vmul.f32 %v12764_v3, %v4554_v51  ;;  %v4406_v57 = vpop.f32.mrb[62].mxu1 }
 0x329   : > { %v4566_v19 = vmin.f32 %v16806_v49, %v4398_v10  ;;  %v4869_v28 = vmul.f32 %v12852_v53, %v4770_v29  ;;  %v16807_v60 = vmax.f32 %v16804_v54, %v16805_v1  ;;  %v4710_v39 = vadd.f32 %v16808_v46, %v4398_v10  ;;  %v4407_v42 = vpop.f32.mrb[63].mxu1  ;;  %v16809_v29 = vld [vmem:[#allocation132_spill] sm:$0xff] }
 0x32a   : > { %v13522_v7 = vadd.f32 %v4952_v24, %v4904_v16  ;;  %v4915_v5 = vadd.f32 %v4879_v13, %v4831_v34  ;;  %v4963_v31 = vmul.f32 %v13024_v14, %v13439_v35  ;;  %v4781_v33 = vsub.f32 %v4745_v17, %v4637_v15  ;;  %v16815_v42 = vld [vmem:[#allocation71_spill] sm:$0xff] }
 0x32b   : > { %v4638_v26 = vmax.f32 %v16807_v60, %v4398_v10  ;;  %v4905_v61 = vadd.f32 %v4869_v28, %v4821_v18  ;;  %v4953_v51 = vmul.f32 %v12908_v21, %v4626_v40  ;;  %v4746_v49 = vsub.f32 %v4710_v39, %v4566_v19  ;;  %v16811_v18 = vld [vmem:[#allocation133_spill] sm:$0xff] }
 0x32c   : > { %v4719_v36 = vadd.f32 %v16809_v29, %v13447_v30  ;;  %v13529_v54 = vadd.f32 %v4963_v31, %v4915_v5  ;;  %v4832_v10 = vmul.f32 %v12805_v41, %v4565_v50  ;;  %v4880_v16 = vmul.f32 %v12854_v37, %v4781_v33  ;;  %v16810_v30 = vld [vmem:[#allocation86_spill] sm:$0xff] }
 0x32d   : > { %v8427_v34 = vunpack.i.l.bf16 %v13449_v0  ;;  %v5272_v1 = vrot.slane %v13377_v47, 7  ;;  %v13535_v35 = vadd.f32 %v4953_v51, %v4905_v61  ;;  %v4782_v17 = vsub.f32 %v4746_v49, %v4638_v26  ;;  %v16816_v61 = vld [vmem:[#allocation142_spill] sm:$0xff] }
 0x32e   : > { %v4755_v24 = vsub.f32 %v4719_v36, %v13457_v22  ;;  %v4916_v40 = vadd.f32 %v4880_v16, %v4832_v10  ;;  %v4964_v13 = vmul.f32 %v13024_v14, %v4637_v15  ;;  %v16812_v28 = vmin.f32 %v16810_v30, %v16811_v18  ;;  %v16814_v36 = vld [vmem:[#allocation134_spill] sm:$0xff] }
 0x32f   : > { %v16813_v50 = vmax.f32 %v16810_v30, %v16811_v18  ;;  %v4833_v47 = vmul.f32 %v12805_v41, %v4566_v19  ;;  %v4881_v39 = vmul.f32 %v12854_v37, %v4782_v17  ;;  %v4720_v5 = vadd.f32 %v16814_v36, %v13465_v38 }
 0x330   : > { %v4576_v60 = vmin.f32 %v16812_v28, %v13465_v38  ;;  %v4791_v57 = vsub.f32 %v4755_v24, %v13463_v45  ;;  %v13552_v15 = vadd.f32 %v4964_v13, %v4916_v40  ;;  %v4965_v31 = vmul.f32 %v13024_v14, %v4638_v26  ;;  %v16819_v40 = vld [vmem:[#allocation72_spill] sm:$0xff] }
 0x331   : > { %v4648_v46 = vmax.f32 %v16813_v50, %v13465_v38  ;;  %v4842_v33 = vmul.f32 %v12947_v2, %v13457_v22  ;;  %v16817_v51 = vmin.f32 %v16815_v42, %v16816_v61  ;;  %v4917_v29 = vadd.f32 %v4881_v39, %v4833_v47 }
 0x332   : > { %v4890_v19 = vmul.f32 %v12990_v44, %v4791_v57  ;;  %v4756_v10 = vsub.f32 %v4720_v5, %v4576_v60  ;;  %v16818_v16 = vmax.f32 %v16815_v42, %v16816_v61  ;;  %v5274_v38 = vrot.slane %v13402_v58, 7  ;;  %v16820_v57 = vld [vmem:[#allocation73_spill] sm:$0xff]  ;;  %v16821_v58 = vld [vmem:[#allocation44_spill] sm:$0xff] }
 0x333   : > { %v4577_v49 = vmin.f32 %v16817_v51, %v4402_v43  ;;  %v5276_v24 = vrot.slane %v13424_v52, 7  ;;  %v4721_v22 = vadd.f32 %v16819_v40, %v4402_v43  ;;  %v13568_v13 = vadd.f32 %v4965_v31, %v4917_v29  ;;  %v16827_v29 = vld [vmem:[#allocation68_spill] sm:$0xff] }
 0x334   : > { %v4649_v17 = vmax.f32 %v16818_v16, %v4402_v43  ;;  %v4926_v30 = vadd.f32 %v4890_v19, %v4842_v33  ;;  %v4974_v18 = vmul.f32 %v12932_v56, %v13463_v45  ;;  %v4792_v28 = vsub.f32 %v4756_v10, %v4648_v46 }
 0x335   : > { %v4843_v50 = vmul.f32 %v12947_v2, %v4576_v60  ;;  %v4975_v47 = vmul.f32 %v12932_v56, %v4648_v46  ;;  %v4757_v39 = vsub.f32 %v4721_v22, %v4577_v49  ;;  %v16822_v36 = vmin.f32 %v16820_v57, %v16821_v58  ;;  %v16824_v60 = vld [vmem:[#allocation89_spill] sm:$0xff] }
 0x336   : > { %v13577_v5 = vadd.f32 %v4974_v18, %v4926_v30  ;;  %v4891_v43 = vmul.f32 %v12990_v44, %v4792_v28  ;;  %v4844_v31 = vmul.f32 %v12947_v2, %v4577_v49  ;;  %v16823_v33 = vmax.f32 %v16820_v57, %v16821_v58 }
 0x337   : > { %v4578_v52 = vmin.f32 %v16822_v36, %v4404_v27  ;;  %vm5490_vm10 = vcmask 359424   ;;  %v4793_v42 = vsub.f32 %v4757_v39, %v4649_v17  ;;  %v16825_v61 = vunpack.i.l.bf16 %v16824_v60  ;;  %v4443_v39 = vpop.f32.mrb[64].mxu0 }
 0x338   : > { %v4650_v45 = vmax.f32 %v16823_v33, %v4404_v27  ;;  %v16826_v46 = vunpack.i.h.bf16 %v13449_v0  ;;  %v4722_v19 = vadd.f32 %v16827_v29, %v4404_v27  ;;  %v16828_v10 = vrot.slane %v13294_v6, 7 }
 0x339   : > { %v16829_v16 = vrot.slane %v13253_v63, 7  ;;  %v4927_v40 = vadd.f32 %v4891_v43, %v4843_v50  ;;  %v4976_v22 = vmul.f32 %v12932_v56, %v4649_v17  ;;  %v4892_v57 = vmul.f32 %v12990_v44, %v4793_v42  ;;  %v4445_v43 = vpop.f32.mrb[65].mxu0 }
 0x33a   : > { %v519_v51 = vsel %vm512_vm7, %v16826_v46, %v16825_v61  ;;  %v16830_v30 = vmov %v16826_v46  ;;  %v16831_v28 = vmov %v16828_v10  ;;  %v4758_v63 = vsub.f32 %v4722_v19, %v4578_v52 }
 0x33b   : > { %v5249_v49 = vsel %vm2467_vm4, %v16829_v16, %v16828_v10  ;;  %v513_v18 = vsel %vm512_vm7, %v8427_v34, %v16830_v30  ;;  %v5273_v27 = vsel %vm2467_vm4, %v16831_v28, %v5272_v1  ;;  %v16832_v50 = vrot.slane %v13277_v23, 7  ;;  %v13627_v10 = vpop.f32.mrb[66].mxu0 }
 0x33c   : > { %v5459_v58 = vpack.c.bf16 %v5273_v27, %v5249_v49  ;;  %v16833_v17 = vrot.slane %v13244_v62, 7  ;;  %v13612_v33 = vadd.f32 %v4975_v47, %v4927_v40  ;;  %v16834_v61 = vrot.slane %v13343_v11, 7  ;;  %v13630_v49 = vpop.f32.mrb[67].mxu0  ;;  %v16843_v27 = vld [vmem:[#allocation5_spill] sm:$0xff] }
 0x33d   : > { %v16835_v6 = vmov %v16832_v50  ;;  %v16836_v46 = vrot.slane %v13349_v32, 7  ;;  %v16837_v42 = vrot.slane %v13321_v55, 7  ;;  %v4928_v47 = vadd.f32 %v4892_v57, %v4844_v31  ;;  %v16842_v31 = vld [vmem:[#allocation104_spill] sm:$0xff] }
 0x33e   : > { %v5247_v36 = vsel %vm2467_vm4, %v16833_v17, %v16832_v50  ;;  %v5271_v1 = vsel %vm2467_vm4, %v16835_v6, %v16834_v61  ;;  %v4794_v16 = vsub.f32 %v4758_v63, %v4650_v45  ;;  %8270 = vmatprep.subr.msk.bf16.mxu0 %vm5393_vm6, %v5459_v58  ;;  %v4845_v40 = vmul.f32 %v12947_v2, %v4578_v52  ;;  %v16846_v17 = vld [vmem:[#allocation112_spill] sm:$0xff] }
 0x33f   : > { %v5253_v29 = vsel %vm2467_vm4, %v16837_v42, %v16836_v46  ;;  %v16838_v19 = vmov %v16836_v46  ;;  %v5458_v11 = vpack.c.bf16 %v5271_v1, %v5247_v36  ;;  %v16839_v55 = vrot.slane %v13332_v12, 7  ;;  %v13653_v12 = vld [vmem:[%s15757_s1] sm:$0xff]   ;;  %v16850_v1 = vld [vmem:[#allocation70_spill] sm:$0xff] }
 0x340   : > { %v5277_v62 = vsel %vm2467_vm4, %v16838_v19, %v5276_v24  ;;  %v16840_v30 = vrot.slane %v13305_v48, 7  ;;  %vm16844_vm1 = vcmp.lt.s32.totalorder %v16843_v27, 2  ;;  %v13645_v63 = vadd.f32 %v4976_v22, %v4928_v47  ;;  %v16847_v36 = vld [vmem:[#allocation64_spill] sm:$0xff]  ;;  %v16852_v47 = vld [vmem:[#allocation6_spill] sm:$0xff] }
 0x341   : > { %v5461_v23 = vpack.c.bf16 %v5277_v62, %v5253_v29  ;;  %v16841_v24 = vmov %v16839_v55  ;;  %v534_v57 = vsel %vm16844_vm1, %v13489_v59, %v16842_v31  ;;  %v4893_v58 = vmul.f32 %v12990_v44, %v4794_v16  ;;  %v16851_v62 = vld [vmem:[#allocation4_spill] sm:$0xff] }
 0x342   : > { %v5251_v32 = vsel %vm2467_vm4, %v16840_v30, %v16839_v55  ;;  %v5275_v28 = vsel %vm2467_vm4, %v16841_v24, %v5274_v38  ;;  %v5498_v52 = vsel %vm5393_vm6, %v5458_v11, 0  ;;  %v16845_v38 = vld [vmem:[#allocation103_spill] sm:$0xff]  ;;  %v16848_v59 = vmin.f32 %v16846_v17, %v16847_v36  ;;  %v16856_v24 = vld [vmem:[#allocation9_spill] sm:$0xff] }
 0x343   : > { %8273 = vmatprep.subr.msk.bf16.mxu1 %vm5393_vm6, %v5461_v23  ;;  %v5460_v48 = vpack.c.bf16 %v5275_v28, %v5251_v32  ;;  %5538 = vmatpush1.bf16.msra.mxu0 %v5498_v52  ;;  %v5439_v50 = vpack.c.bf16 %v534_v57, %v16845_v38  ;;  %v16849_v61 = vmax.f32 %v16846_v17, %v16847_v36  ;;  %vm16853_vm5 = vcmp.lt.s32.totalorder %v16852_v47, 2  ;;  %v16859_v28 = vld [vmem:[#allocation67_spill] sm:$0xff]  ;;  %v16863_v17 = vld [vmem:[#allocation144_spill] sm:$0xff] }
 0x344   : > { %v4555_v22 = vmin.f32 %v16848_v59, %v4443_v39  ;;  %v4699_v46 = vadd.f32 %v16850_v1, %v4443_v39  ;;  %v4929_v42 = vadd.f32 %v4893_v58, %v4845_v40  ;;  %v4977_v29 = vmul.f32 %v12932_v56, %v4650_v45  ;;  %v13676_v40 = vpop.f32.mrb[68].mxu0  ;;  %v16861_v52 = vld [vmem:[#allocation175_spill] sm:$0xff]  ;;  %v4494_v59 = vpop.f32.mrb[64].mxu1 }
 0x345   : > { %v4627_v6 = vmax.f32 %v16849_v61, %v4443_v39  ;;  %v5504_v19 = vsel %vm5393_vm6, %v5460_v48, 0  ;;  %v533_v16 = vsel %vm16853_vm5, %v16851_v62, %v519_v51  ;;  %v16854_v55 = vunpack.i.h.bf16 %v16824_v60  ;;  %5635 = vmatprep.subr.bf16.mxu0 %v5439_v50  ;;  %v16855_v51 = vld [vmem:[#allocation174_spill] sm:$0xff]  ;;  %v13689_v57 = vpop.f32.mrb[69].mxu0  ;;  %vm16944_vm5 = vmmov %vm16709_vm0 }
 0x346   : > { %5589 = vmatpush1.bf16.msra.mxu1 %v5504_v19  ;;  %v4735_v45 = vsub.f32 %v4699_v46, %v4555_v22  ;;  %v13678_v30 = vadd.f32 %v4977_v29, %v4929_v42  ;;  %8271 = vmatmul.mubr.msk.bf16.vlgmr.msra.gmra.mrb[72].mxu0 %vm5490_vm10, %v13653_v12  ;;  %v5438_v32 = vpack.c.bf16 %v533_v16, %v16855_v51  ;;  %vm16857_vm9 = vcmp.lt.s32.totalorder %v16856_v24, 2  ;;  %v16858_v60 = vld [vmem:[#allocation98_spill] sm:$0xff]  ;;  %v4457_v1 = vpop.f32.mrb[70].mxu0  ;;  %v16865_v46 = vld [vmem:[#allocation96_spill] sm:$0xff]  ;;  %v4496_v16 = vpop.f32.mrb[65].mxu1 }
 0x347   : > { %v515_v39 = vsel %vm512_vm7, %v16854_v55, %v8427_v34  ;;  %v536_v0 = vsel %vm16857_vm9, %v13391_v4, %v513_v18  ;;  %v16860_v31 = vmin.f32 %v16858_v60, %v16859_v28  ;;  %v16862_v38 = vmax.f32 %v16858_v60, %v16859_v28  ;;  %v16866_v42 = vld [vmem:[#allocation150_spill] sm:$0xff]  ;;  %v4458_v55 = vpop.f32.mrb[71].mxu0  ;;  %v16869_v60 = vld [vmem:[#allocation153_spill] sm:$0xff]  ;;  %v16879_v18 = vld [vmem:[#allocation116_spill] sm:$0xff] }
 0x348   : > { %v4771_v58 = vsub.f32 %v4735_v45, %v4627_v6  ;;  %v5441_v48 = vpack.c.bf16 %v536_v0, %v16861_v52  ;;  %v4700_v36 = vadd.f32 %v16863_v17, %v4445_v43  ;;  %v16864_v61 = vmov 0   ;;  %5636 = vmatpush1.bf16.msra.mxu0 %v5438_v32  ;;  %v16871_v17 = vld [vmem:[#allocation8_spill] sm:$0xff]  ;;  %v16880_v4 = vld [vmem:[#allocation154_spill] sm:$0xff] }
 0x349   : > { %v4556_v34 = vmin.f32 %v16860_v31, %v4445_v43  ;;  %v4628_v50 = vmax.f32 %v16862_v38, %v4445_v43  ;;  %5575 = vmatprep.mubr.bf16.mxu0 %v16864_v61  ;;  %8274 = vmatmul.mubr.msk.bf16.vlgmr.msra.gmra.mrb[72].mxu1 %vm5490_vm10, %v13653_v12  ;;  %v16867_v29 = vmin.f32 %v16865_v46, %v16866_v42  ;;  %v4498_v31 = vpop.f32.mrb[66].mxu1  ;;  %v16870_v38 = vld [vmem:[#allocation7_spill] sm:$0xff]  ;;  %vm16872_vm7 = vcmp.lt.s32.totalorder %v16871_v17, 2 }
 0x34a   : > { %v16868_v62 = vmax.f32 %v16865_v46, %v16866_v42  ;;  %v4822_v45 = vmul.f32 %v12764_v3, %v4555_v22  ;;  %v4870_v51 = vmul.f32 %v12852_v53, %v4771_v58  ;;  %5686 = vmatprep.subr.bf16.mxu1 %v5441_v48  ;;  %v4701_v28 = vadd.f32 %v16869_v60, %v4494_v59  ;;  %v16873_v46 = vld [vmem:[#allocation121_spill] sm:$0xff] }
 0x34b   : > { %v4557_v19 = vmin.f32 %v16867_v29, %v4494_v59  ;;  %v4736_v0 = vsub.f32 %v4700_v36, %v4556_v34  ;;  %v4954_v52 = vmul.f32 %v12908_v21, %v4627_v6  ;;  %v535_v1 = vsel %vm16872_vm7, %v16870_v38, %v515_v39  ;;  %v16874_v42 = vld [vmem:[#allocation145_spill] sm:$0xff]  ;;  %5626 = vmatprep.mubr.bf16.mxu1 %v16864_v61  ;;  %vm16954_vm7 = vmmov %vm16709_vm0 }
 0x34c   : > { %v4629_v43 = vmax.f32 %v16868_v62, %v4494_v59  ;;  %v16875_v29 = vmin.f32 %v16873_v46, %v16874_v42  ;;  %v13719_v62 = vpop.f32.mrb[67].mxu1  ;;  %v13724_v58 = vld [vmem:[%s15757_s1 + $0x8] ss:$0 sps:$4 sm:$0x33]   ;;  %v4906_v48 = vadd.f32 %v4870_v51, %v4822_v45  ;;  %v16876_v59 = vld [vmem:[#allocation176_spill] sm:$0xff]  ;;  %v4823_v39 = vmul.f32 %v12764_v3, %v4556_v34 }
 0x34d   : > { %v4772_v6 = vsub.f32 %v4736_v0, %v4628_v50  ;;  %v4737_v36 = vsub.f32 %v4701_v28, %v4557_v19  ;;  %v5440_v55 = vpack.c.bf16 %v535_v1, %v16876_v59  ;;  %v16877_v60 = vmax.f32 %v16873_v46, %v16874_v42 }
 0x34e   : > { %v4567_v22 = vmin.f32 %v16875_v29, %v13627_v10  ;;  %v16878_v29 = vld [vmem:[#allocation146_spill] sm:$0xff]  ;;  %v16881_v32 = vmin.f32 %v16879_v18, %v16880_v4  ;;  %v13738_v11 = vadd.f32 %v4954_v52, %v4906_v48  ;;  %v16882_v34 = vmax.f32 %v16879_v18, %v16880_v4  ;;  %8272 = vmatmul.mubr.msk.bf16.gmra.mrb[76].mxu0 %vm5490_vm10, %v13724_v58 }
 0x34f   : > { %v4639_v38 = vmax.f32 %v16877_v60, %v13627_v10  ;;  %v4711_v23 = vadd.f32 %v16878_v29, %v13627_v10  ;;  %v4871_v45 = vmul.f32 %v12852_v53, %v4772_v6  ;;  %v4773_v51 = vsub.f32 %v4737_v36, %v4629_v43  ;;  %5687 = vmatpush1.bf16.msra.mxu1 %v5440_v55  ;;  %v16883_v10 = vld [vmem:[#allocation155_spill] sm:$0xff]  ;;  %v13752_v36 = vpop.f32.mrb[68].mxu1  ;;  %v16888_v29 = vld [vmem:[#allocation148_spill] sm:$0xff] }
 0x350   : > { %v4558_v26 = vmin.f32 %v16881_v32, %v4496_v16  ;;  %v4630_v0 = vmax.f32 %v16882_v34, %v4496_v16  ;;  %v4955_v1 = vmul.f32 %v12908_v21, %v4628_v50  ;;  %v4702_v42 = vadd.f32 %v16883_v10, %v4496_v16  ;;  %5667 = vmatprep.mubr.bf16.mxu0 %v16864_v61  ;;  %v16885_v50 = vld [vmem:[#allocation147_spill] sm:$0xff]  ;;  %v16890_v34 = vld [vmem:[#allocation156_spill] sm:$0xff] }
 0x351   : > { %v4747_v46 = vsub.f32 %v4711_v23, %v4567_v22  ;;  %v4907_v32 = vadd.f32 %v4871_v45, %v4823_v39  ;;  %v4824_v52 = vmul.f32 %v12764_v3, %v4557_v19  ;;  %v4872_v48 = vmul.f32 %v12852_v53, %v4773_v51  ;;  %v16884_v23 = vld [vmem:[#allocation100_spill] sm:$0xff]  ;;  %8275 = vmatmul.mubr.msk.bf16.gmra.mrb[76].mxu1 %vm5490_vm10, %v13724_v58  ;;  %v16889_v51 = vld [vmem:[#allocation110_spill] sm:$0xff] }
 0x352   : > { %v4956_v6 = vmul.f32 %v12908_v21, %v4629_v43  ;;  %v4738_v18 = vsub.f32 %v4702_v42, %v4558_v26  ;;  %v16886_v16 = vmin.f32 %v16884_v23, %v16885_v50  ;;  %v16887_v55 = vmax.f32 %v16884_v23, %v16885_v50  ;;  %v13765_v43 = vpop.f32.mrb[69].mxu1  ;;  %5718 = vmatprep.mubr.bf16.mxu1 %v16864_v61  ;;  %v16893_v23 = vld [vmem:[#allocation157_spill] sm:$0xff] }
 0x353   : > { %v4783_v4 = vsub.f32 %v4747_v46, %v4639_v38  ;;  %v13767_v39 = vadd.f32 %v4955_v1, %v4907_v32  ;;  %v4908_v60 = vadd.f32 %v4872_v48, %v4824_v52  ;;  %v4712_v45 = vadd.f32 %v16888_v29, %v13630_v49  ;;  %v4508_v42 = vpop.f32.mrb[70].mxu1 }
 0x354   : > { %v4568_v59 = vmin.f32 %v16886_v16, %v13630_v49  ;;  %v4640_v19 = vmax.f32 %v16887_v55, %v13630_v49  ;;  %v16891_v46 = vmin.f32 %v16889_v51, %v16890_v34  ;;  %v4834_v50 = vmul.f32 %v12805_v41, %v4567_v22  ;;  %v4509_v1 = vpop.f32.mrb[71].mxu1 }
 0x355   : > { %v4882_v16 = vmul.f32 %v12854_v37, %v4783_v4  ;;  %v4774_v55 = vsub.f32 %v4738_v18, %v4630_v0  ;;  %v13778_v32 = vadd.f32 %v4956_v6, %v4908_v60  ;;  %v4966_v52 = vmul.f32 %v13024_v14, %v4639_v38  ;;  %v16895_v38 = vld [vmem:[#allocation143_spill] sm:$0xff] }
 0x356   : > { %v4569_v10 = vmin.f32 %v16891_v46, %v4498_v31  ;;  %v4748_v49 = vsub.f32 %v4712_v45, %v4568_v59  ;;  %v16892_v48 = vmax.f32 %v16889_v51, %v16890_v34  ;;  %v4825_v42 = vmul.f32 %v12764_v3, %v4558_v26  ;;  %v16897_v26 = vld [vmem:[#allocation97_spill] sm:$0xff] }
 0x357   : > { %v4918_v46 = vadd.f32 %v4882_v16, %v4834_v50  ;;  %v4873_v28 = vmul.f32 %v12852_v53, %v4774_v55  ;;  %v4713_v22 = vadd.f32 %v16893_v23, %v4498_v31  ;;  %v4957_v4 = vmul.f32 %v12908_v21, %v4630_v0  ;;  %v16896_v50 = vld [vmem:[#allocation41_spill] sm:$0xff]  ;;  %v16901_v16 = vld [vmem:[#allocation160_spill] sm:$0xff] }
 0x358   : > { %v4641_v29 = vmax.f32 %v16892_v48, %v4498_v31  ;;  %v4784_v18 = vsub.f32 %v4748_v49, %v4640_v19  ;;  %v4835_v6 = vmul.f32 %v12805_v41, %v4568_v59  ;;  %v16894_v60 = vrot.slane %v13491_v25, 7  ;;  %v16898_v31 = vld [vmem:[#allocation158_spill] sm:$0xff] }
 0x359   : > { %v13793_v1 = vadd.f32 %v4966_v52, %v4918_v46  ;;  %v4909_v51 = vadd.f32 %v4873_v28, %v4825_v42  ;;  %v4749_v34 = vsub.f32 %v4713_v22, %v4569_v10  ;;  %v16899_v21 = vmin.f32 %v16897_v26, %v16898_v31  ;;  %v16903_v46 = vld [vmem:[#allocation74_spill] sm:$0xff] }
 0x35a   : > { %v5424_v45 = vsel %vm2467_vm4, %v16895_v38, %v16894_v60  ;;  %v4883_v53 = vmul.f32 %v12854_v37, %v4784_v18  ;;  %v16900_v59 = vmax.f32 %v16897_v26, %v16898_v31  ;;  %v4714_v55 = vadd.f32 %v16901_v16, %v13719_v62  ;;  %v8436_v26 = vpop.permute.xlu1 %8435 }
 0x35b   : > { %v5451_v3 = vpack.c.bf16 %v5424_v45, %v16896_v50  ;;  %v4570_v0 = vmin.f32 %v16899_v21, %v13719_v62  ;;  %v5278_v28 = vrot.slane %v13577_v5, 7  ;;  %v13808_v52 = vadd.f32 %v4957_v4, %v4909_v51  ;;  %v16904_v50 = vld [vmem:[#allocation65_spill] sm:$0xff] }
 0x35c   : > { %v4642_v23 = vmax.f32 %v16900_v59, %v13719_v62  ;;  %v4785_v49 = vsub.f32 %v4749_v34, %v4641_v29  ;;  %v16902_v48 = vrot.slane %v13481_v20, 7  ;;  %v5280_v22 = vrot.slane %v13612_v33, 7  ;;  %v16906_v34 = vld [vmem:[#allocation91_spill] sm:$0xff] }
 0x35d   : > { %5637 = vmatprep.subr.bf16.mxu0 %v5451_v3  ;;  %v4919_v18 = vadd.f32 %v4883_v53, %v4835_v6  ;;  %v4967_v60 = vmul.f32 %v13024_v14, %v4640_v19  ;;  %v4750_v38 = vsub.f32 %v4714_v55, %v4570_v0  ;;  %v4836_v45 = vmul.f32 %v12805_v41, %v4569_v10  ;;  %v16907_v59 = vld [vmem:[#allocation167_spill] sm:$0xff]  ;;  %v16908_v10 = vld [vmem:[#allocation69_spill] sm:$0xff] }
 0x35e   : > { %v5423_v42 = vsel %vm2467_vm4, %v16903_v46, %v16902_v48  ;;  %v4884_v62 = vmul.f32 %v12854_v37, %v4785_v49  ;;  %v16905_v51 = vrot.slane %v13535_v35, 7  ;;  %v8438_v53 = vunpack.i.h.bf16 %v8436_v26  ;;  %v16910_v49 = vld [vmem:[#allocation115_spill] sm:$0xff] }
 0x35f   : > { %v5450_v4 = vpack.c.bf16 %v5423_v42, %v16904_v50  ;;  %v13823_v31 = vadd.f32 %v4967_v60, %v4919_v18  ;;  %v4786_v21 = vsub.f32 %v4750_v38, %v4642_v23  ;;  %v4968_v16 = vmul.f32 %v13024_v14, %v4641_v29  ;;  %v16912_v42 = vld [vmem:[#allocation169_spill] sm:$0xff]  ;;  %v16913_v38 = vld [vmem:[#allocation27_spill] sm:$0xff] }
 0x360   : > { %v5426_v3 = vsel %vm2467_vm4, %v16906_v34, %v16905_v51  ;;  %v4920_v19 = vadd.f32 %v4884_v62, %v4836_v45  ;;  %v16909_v55 = vrot.slane %v16908_v10, 3  ;;  %v16911_v46 = vrot.slane %v13522_v7, 7  ;;  %v16915_v62 = vld [vmem:[#allocation85_spill] sm:$0xff] }
 0x361   : > { %v5453_v6 = vpack.c.bf16 %v5426_v3, %v16907_v59  ;;  %5638 = vmatpush1.bf16.msra.mxu0 %v5450_v4  ;;  %v4837_v18 = vmul.f32 %v12805_v41, %v4570_v0  ;;  %v4885_v60 = vmul.f32 %v12854_v37, %v4786_v21  ;;  %v16914_v45 = vrot.slane %v16913_v38, 1  ;;  %v16916_v4 = vld [vmem:[#allocation149_spill] sm:$0xff]  ;;  %v16919_v21 = vld [vmem:[#allocation151_spill] sm:$0xff] }
 0x362   : > { %v5400_v48 = vsel %vm5393_vm6, %v16910_v49, %v16909_v55  ;;  %v5425_v50 = vsel %vm2467_vm4, %v16912_v42, %v16911_v46  ;;  %v16917_v51 = vmin.f32 %v16915_v62, %v16916_v4  ;;  %v13845_v59 = vadd.f32 %v4968_v16, %v4920_v19  ;;  %v16920_v46 = vld [vmem:[#allocation82_spill] sm:$0xff]  ;;  %v16921_v19 = vld [vmem:[#allocation152_spill] sm:$0xff]  ;;  %v16924_v42 = vld [vmem:[#allocation159_spill] sm:$0xff] }
 0x363   : > { %5688 = vmatprep.subr.bf16.mxu1 %v5453_v6  ;;  %v5413_v29 = vsel %vm5406_vm13, %v5400_v48, %v16914_v45  ;;  %v8437_v10 = vunpack.i.l.bf16 %v8436_v26  ;;  %v4921_v49 = vadd.f32 %v4885_v60, %v4837_v18  ;;  %v4969_v41 = vmul.f32 %v13024_v14, %v4642_v23  ;;  %v16925_v60 = vld [vmem:[#allocation166_spill] sm:$0xff]  ;;  %v16928_v45 = vld [vmem:[#allocation88_spill] sm:$0xff] }
 0x364   : > { %v4579_v34 = vmin.f32 %v16917_v51, %v13676_v40  ;;  %v5452_v55 = vpack.c.bf16 %v5425_v50, %v5413_v29  ;;  %v16918_v37 = vmax.f32 %v16915_v62, %v16916_v4  ;;  %v4723_v6 = vadd.f32 %v16919_v21, %v13676_v40  ;;  %v16929_v29 = vld [vmem:[#allocation161_spill] sm:$0xff]  ;;  %v8446_v51 = vpop.permute.xlu1 %8445 }
 0x365   : > { %v5284_v48 = vrot.slane %v13678_v30, 7  ;;  %v16922_v16 = vmin.f32 %v16920_v46, %v16921_v19  ;;  %v16923_v14 = vmax.f32 %v16920_v46, %v16921_v19  ;;  %v4724_v50 = vadd.f32 %v16924_v42, %v13689_v57 }
 0x366   : > { %v4651_v0 = vmax.f32 %v16918_v37, %v13676_v40  ;;  %5689 = vmatpush1.bf16.msra.mxu1 %v5452_v55  ;;  %v13865_v18 = vadd.f32 %v4969_v41, %v4921_v49  ;;  %v16926_v40 = vunpack.i.l.bf16 %v16925_v60  ;;  %v4759_v38 = vsub.f32 %v4723_v6, %v4579_v34 }
 0x367   : > { %v4580_v26 = vmin.f32 %v16922_v16, %v13689_v57  ;;  %v4652_v23 = vmax.f32 %v16923_v14, %v13689_v57  ;;  %v16930_v62 = vmin.f32 %v16928_v45, %v16929_v29  ;;  %v13877_v55 = vsel %vm16931_vm12, %v8437_v10, %v8438_v53  ;;  %v16935_v16 = vld [vmem:[#allocation162_spill] sm:$0xff] }
 0x368   : > { %v564_v30 = vsel %vm16927_vm15, %v8438_v53, %v16926_v40  ;;  %v16932_v57 = vunpack.i.h.bf16 %v16925_v60  ;;  %v16934_v37 = vmax.f32 %v16928_v45, %v16929_v29  ;;  %v4795_v6 = vsub.f32 %v4759_v38, %v4651_v0  ;;  %v16937_v45 = vld [vmem:[#allocation163_spill] sm:$0xff] }
 0x369   : > { %v4581_v4 = vmin.f32 %v16930_v62, %v13752_v36  ;;  %v4760_v41 = vsub.f32 %v4724_v50, %v4580_v26  ;;  %v4846_v46 = vmul.f32 %v12947_v2, %v4579_v34  ;;  %v4978_v19 = vmul.f32 %v12932_v56, %v4651_v0  ;;  %v16936_v62 = vld [vmem:[#allocation123_spill] sm:$0xff] }
 0x36a   : > { %v560_v49 = vsel %vm16933_vm2, %v16932_v57, %v8437_v10  ;;  %v4653_v21 = vmax.f32 %v16934_v37, %v13752_v36  ;;  %v4725_v53 = vadd.f32 %v16935_v16, %v13752_v36  ;;  %v4847_v42 = vmul.f32 %v12947_v2, %v4580_v26 }
 0x36b   : > { %v4796_v14 = vsub.f32 %v4760_v41, %v4652_v23  ;;  %v8448_v60 = vunpack.i.h.bf16 %v8446_v51  ;;  %v8447_v40 = vunpack.i.l.bf16 %v8446_v51  ;;  %v4894_v10 = vmul.f32 %v12990_v44, %v4795_v6  ;;  %v16940_v6 = vld [vmem:[#allocation171_spill] sm:$0xff] }
 0x36c   : > { %v4761_v50 = vsub.f32 %v4725_v53, %v4581_v4  ;;  %v16938_v29 = vmin.f32 %v16936_v62, %v16937_v45  ;;  %v16939_v34 = vmax.f32 %v16936_v62, %v16937_v45  ;;  %v4979_v57 = vmul.f32 %v12932_v56, %v4652_v23  ;;  %v16943_v62 = vld [vmem:[#allocation165_spill] sm:$0xff] }
 0x36d   : > { %v4895_v36 = vmul.f32 %v12990_v44, %v4796_v14  ;;  %v4848_v26 = vmul.f32 %v12947_v2, %v4581_v4  ;;  %v4980_v51 = vmul.f32 %v12932_v56, %v4653_v21  ;;  %v4930_v41 = vadd.f32 %v4894_v10, %v4846_v46 }
 0x36e   : > { %v4582_v38 = vmin.f32 %v16938_v29, %v13765_v43  ;;  %v4654_v0 = vmax.f32 %v16939_v34, %v13765_v43  ;;  %v4797_v37 = vsub.f32 %v4761_v50, %v4653_v21  ;;  %v16941_v16 = vunpack.i.l.bf16 %v16940_v6  ;;  %v16942_v29 = vld [vmem:[#allocation164_spill] sm:$0xff] }
 0x36f   : > { %v4726_v3 = vadd.f32 %v16942_v29, %v13765_v43  ;;  %vm1048_vm1 = vcmp.eq.f32.partialorder %v16943_v62, inf  ;;  %v4931_v45 = vadd.f32 %v4895_v36, %v4847_v42  ;;  %v583_v23 = vsel %vm16944_vm5, %v8447_v40, %v8448_v60  ;;  %v16955_v29 = vld [vmem:[#allocation102_spill] sm:$0xff] }
 0x370   : > { %v589_v53 = vsel %vm16709_vm0, %v8448_v60, %v16941_v16  ;;  %v16945_v4 = vrot.slane %v13529_v54, 7  ;;  %v16946_v14 = vrot.slane %v13491_v25, 7  ;;  %vm1050_vm9 = vcmp.eq.f32.partialorder %v16943_v62, 0.0 }
 0x371   : > { %v13925_v43 = vadd.f32 %v4978_v19, %v4930_v41  ;;  %v4896_v42 = vmul.f32 %v12990_v44, %v4797_v37  ;;  %v4762_v50 = vsub.f32 %v4726_v3, %v4582_v38  ;;  %v13928_v34 = vadd.f32 %v4979_v57, %v4931_v45 }
 0x372   : > { %v5257_v21 = vsel %vm2467_vm4, %v16946_v14, %v16945_v4  ;;  %v16947_v46 = vmov %v16945_v4  ;;  %v16948_v25 = vrot.slane %v13508_v8, 7  ;;  %v16949_v36 = vrot.slane %v13481_v20, 7 }
 0x373   : > { %v5281_v10 = vsel %vm2467_vm4, %v16947_v46, %v5280_v22  ;;  %v16951_v19 = vrot.slane %v13568_v13, 7  ;;  %v16952_v41 = vrot.slane %v13535_v35, 7  ;;  %v4932_v57 = vadd.f32 %v4896_v42, %v4848_v26  ;;  %v9220_v42 = vld [vmem:[%s9373_s23 + $0x8] sm:$0xff] }
 0x374   : > { %v5463_v60 = vpack.c.bf16 %v5281_v10, %v5257_v21  ;;  %v5255_v33 = vsel %vm2467_vm4, %v16949_v36, %v16948_v25  ;;  %v16950_v54 = vmov %v16948_v25  ;;  %v16953_v37 = vunpack.i.h.bf16 %v16940_v6  ;;  %v16962_v21 = vld [vmem:[#allocation32_spill] sm:$0xff] }
 0x375   : > { %v5279_v22 = vsel %vm2467_vm4, %v16950_v54, %v5278_v28  ;;  %v5261_v3 = vsel %vm2467_vm4, %v16952_v41, %v16951_v19  ;;  %v4798_v16 = vsub.f32 %v4762_v50, %v4654_v0  ;;  %vm1560_vm15 = vcmp.eq.f32.partialorder %v16955_v29, inf }
 0x376   : > { %v585_v20 = vsel %vm16954_vm7, %v16953_v37, %v8447_v40  ;;  %8276 = vmatprep.subr.msk.bf16.mxu0 %vm5393_vm6, %v5463_v60  ;;  %v5462_v5 = vpack.c.bf16 %v5279_v22, %v5255_v33  ;;  %v4849_v8 = vmul.f32 %v12947_v2, %v4582_v38  ;;  %v16956_v28 = vmov %v16951_v19  ;;  %v16961_v38 = vld [vmem:[#allocation168_spill] sm:$0xff]  ;;  %v16970_v33 = vld [vmem:[#allocation54_spill] sm:$0xff]  ;;  %v16972_v37 = vld [vmem:[#allocation173_spill] sm:$0xff] }
 0x377   : > { %v5285_v35 = vsel %vm2467_vm4, %v16956_v28, %v5284_v48  ;;  %v16957_v45 = vrot.slane %v13552_v15, 7  ;;  %v16958_v26 = vrot.slane %v13522_v7, 7  ;;  %v16959_v40 = vrot.slane %v13645_v63, 7  ;;  %v16964_v15 = vld [vmem:[#allocation170_spill] sm:$0xff]  ;;  %v9221_v60 = vld [vmem:[%s9373_s23] sm:$0xff] }
 0x378   : > { %v13965_v14 = vadd.f32 %v4980_v51, %v4932_v57  ;;  %v4897_v2 = vmul.f32 %v12990_v44, %v4798_v16  ;;  %v5510_v13 = vsel %vm5393_vm6, %v5462_v5, 0  ;;  %v5465_v48 = vpack.c.bf16 %v5285_v35, %v5261_v3  ;;  %v16971_v22 = vld [vmem:[#allocation58_spill] sm:$0xff] }
 0x379   : > { %v5259_v9 = vsel %vm2467_vm4, %v16958_v26, %v16957_v45  ;;  %v16960_v6 = vmov %v16957_v45  ;;  %vm1288_vm12 = vcmp.eq.f32.partialorder %v16961_v38, inf  ;;  %5640 = vmatpush1.bf16.msra.mxu0 %v5510_v13  ;;  %vm16963_vm2 = vcmp.lt.s32.totalorder %v16843_v27, 1  ;;  %v16975_v45 = vld [vmem:[#allocation77_spill] sm:$0xff] }
 0x37a   : > { %v5283_v4 = vsel %vm2467_vm4, %v16960_v6, %v16959_v40  ;;  %v604_v63 = vsel %vm16963_vm2, %v560_v49, %v16962_v21  ;;  %vm16965_vm0 = vcmp.lt.s32.totalorder %v16852_v47, 1  ;;  %vm16966_vm5 = vcmp.lt.s32.totalorder %v16856_v24, 1  ;;  %8279 = vmatprep.subr.msk.bf16.mxu1 %vm5393_vm6, %v5465_v48  ;;  %v9222_v49 = vld [vmem:[%s9373_s23 + $0x18] sm:$0xff]  ;;  %v16968_v24 = vld [vmem:[#allocation20_spill] sm:$0xff]  ;;  %v16976_v26 = vld [vmem:[#allocation93_spill] sm:$0xff] }
 0x37b   : > { %v5464_v7 = vpack.c.bf16 %v5283_v4, %v5259_v9  ;;  %v603_v46 = vsel %vm16965_vm0, %v16964_v15, %v589_v53  ;;  %v606_v51 = vsel %vm16966_vm5, %v564_v30, %v583_v23  ;;  %v4933_v44 = vadd.f32 %v4897_v2, %v4849_v8 }
 0x37c   : > { %v4981_v10 = vmul.f32 %v12932_v56, %v4654_v0  ;;  %v5443_v50 = vpack.c.bf16 %v604_v63, %v9220_v42  ;;  %v5442_v25 = vpack.c.bf16 %v603_v46, %v9221_v60  ;;  %v5445_v36 = vpack.c.bf16 %v606_v51, %v9222_v49  ;;  %8277 = vmatmul.mubr.msk.bf16.vlgmr.msra.gmra.mrb[80].mxu0 %vm5490_vm10, %v13653_v12  ;;  %v9223_v0 = vld [vmem:[%s9373_s23 + $0x10] sm:$0xff]  ;;  %v16978_v46 = vld [vmem:[#allocation87_spill] sm:$0xff] }
 0x37d   : > { %v5516_v27 = vsel %vm5393_vm6, %v5464_v7, 0  ;;  %vm16967_vm7 = vcmp.lt.s32.totalorder %v16871_v17, 1  ;;  %v1049_v30 = vsel %vm1048_vm1, %v16943_v62, %v16968_v24  ;;  %vm1290_vm2 = vcmp.eq.f32.partialorder %v16961_v38, 0.0  ;;  %5677 = vmatprep.mubr.bf16.mxu0 %v16864_v61  ;;  %v16981_v60 = vld [vmem:[#allocation10_spill] sm:$0xff] }
 0x37e   : > { %v605_v47 = vsel %vm16967_vm7, %v13877_v55, %v585_v20  ;;  %v13992_v56 = vadd.f32 %v4981_v10, %v4933_v44  ;;  %5691 = vmatpush1.bf16.msra.mxu1 %v5516_v27  ;;  %v16969_v23 = vand.u32 2147483648, %v16943_v62  ;;  %vm1562_vm0 = vcmp.eq.f32.partialorder %v16955_v29, 0.0  ;;  %5737 = vmatprep.subr.bf16.mxu0 %v5443_v50  ;;  %v16973_v20 = vld [vmem:[#allocation172_spill] sm:$0xff] }
 0x37f   : > { %v5444_v53 = vpack.c.bf16 %v605_v47, %v9223_v0  ;;  %v5242_v55 = vrot.slane %v13738_v11, 7  ;;  %5788 = vmatprep.subr.bf16.mxu1 %v5445_v36  ;;  %v1287_v54 = vmul.f32 %v16970_v33, %v16961_v38  ;;  %v1559_v19 = vmul.f32 %v16971_v22, %v16955_v29  ;;  %5738 = vmatpush1.bf16.msra.mxu0 %v5442_v25  ;;  %v16980_v44 = vld [vmem:[#allocation52_spill] sm:$0xff]  ;;  %v16982_v25 = vld [vmem:[#allocation99_spill] sm:$0xff] }
 0x380   : > { %v1052_v17 = vsel %vm1050_vm9, %v16969_v23, %v1049_v30  ;;  %v5243_v3 = vrot.slane %v13767_v39, 7  ;;  %v5244_v57 = vrot.slane %v13778_v32, 7  ;;  %v1563_v62 = vand.u32 2147483648, %v16955_v29  ;;  %v16984_v47 = vld [vmem:[#allocation92_spill] sm:$0xff]  ;;  %v16985_v30 = vld [vmem:[#allocation94_spill] sm:$0xff] }
 0x381   : > { %v5039_v41 = vrot.slane %v1052_v17, 1  ;;  %v16974_v16 = vrot.slane %v16973_v20, 7  ;;  %v5262_v8 = vrot.slane %v13793_v1, 7  ;;  %v5245_v28 = vrot.slane %v13808_v52, 7  ;;  %8280 = vmatmul.mubr.msk.bf16.vlgmr.msra.gmra.mrb[80].mxu1 %vm5490_vm10, %v13653_v12 }
 0x382   : > { %v1561_v35 = vsel %vm1560_vm15, %v16955_v29, %v1559_v19  ;;  %v16977_v9 = vrot.slane %v16976_v26, 2  ;;  %v5264_v6 = vrot.slane %v13823_v31, 7  ;;  %v5266_v4 = vrot.slane %v13845_v59, 7  ;;  %5789 = vmatpush1.bf16.msra.mxu1 %v5444_v53  ;;  %5728 = vmatprep.mubr.bf16.mxu1 %v16864_v61  ;;  %v16986_v53 = vld [vmem:[#allocation11_spill] sm:$0xff]  ;;  %v16989_v26 = vld [vmem:[#allocation90_spill] sm:$0xff] }
 0x383   : > { %v14013_v5 = vadd.f32 %v16974_v16, %v16972_v37  ;;  %v1564_v2 = vsel %vm1562_vm0, %v1563_v62, %v1561_v35  ;;  %v5268_v13 = vrot.slane %v13865_v18, 7  ;;  %v1289_v48 = vsel %vm1288_vm12, %v16961_v38, %v1287_v54  ;;  %v16987_v54 = vld [vmem:[#allocation111_spill] sm:$0xff]  ;;  %v16988_v37 = vld [vmem:[#allocation33_spill] sm:$0xff] }
 0x384   : > { %v14026_v40 = vadd.f32 %v16977_v9, %v16975_v45  ;;  %v5099_v7 = vrot.slane %v1564_v2, 6  ;;  %v5339_v21 = vsel %vm2467_vm4, %v5039_v41, %v1564_v2  ;;  %v5286_v63 = vrot.slane %v13925_v43, 7  ;;  %8278 = vmatmul.mubr.msk.bf16.gmra.mrb[84].mxu0 %vm5490_vm10, %v13724_v58 }
 0x385   : > { %8709 = vrsqrt.f32 %v14013_v5  ;;  %v5288_v15 = vrot.slane %v13928_v34, 7  ;;  %v16979_v29 = vrot.slane %v16978_v46, 7  ;;  %v5135_v10 = vrot.slane %v16980_v44, 3  ;;  %5769 = vmatprep.mubr.bf16.mxu0 %v16864_v61 }
 0x386   : > { %8711 = vrsqrt.f32 %v14026_v40  ;;  %v5159_v42 = vrot.slane %v16978_v46, 3  ;;  %v1327_v27 = vsub.f32 %v16982_v25, %v16981_v60  ;;  %v16983_v49 = vand.u32 2147483648, %v16961_v38 }
 0x387   : > { %v5351_v51 = vsel %vm2480_vm8, %v5339_v21, %v16979_v29  ;;  %v1351_v0 = vsub.f32 %v16985_v30, %v16981_v60  ;;  %v1431_v23 = vsub.f32 %v16982_v25, %v16986_v53  ;;  %v5183_v17 = vrot.slane %v16980_v44, 1  ;;  %v16991_v25 = vld [vmem:[#allocation66_spill] sm:$0xff] }
 0x388   : > { %v5364_v50 = vsel %vm5354_vm11, %v5351_v51, %v5099_v7  ;;  %v1292_v36 = vsel %vm1290_vm2, %v16983_v49, %v1289_v48  ;;  %v874_v22 = vmul.f32 %v16987_v54, %v16987_v54  ;;  %v886_v20 = vmul.f32 %v16988_v37, %v16988_v37  ;;  %v16990_v51 = vld [vmem:[#allocation101_spill] sm:$0xff] }
 0x389   : > { %v5377_v24 = vsel %vm5367_vm3, %v5364_v50, %v16984_v47  ;;  %v5428_v38 = vsel %vm2467_vm4, %v1292_v36, %v5243_v3  ;;  %v1363_v41 = vmul.f32 %v1351_v0, %v1351_v0  ;;  %v1443_v62 = vmul.f32 %v1431_v23, %v1431_v23  ;;  %8281 = vmatmul.mubr.msk.bf16.gmra.mrb[84].mxu1 %vm5490_vm10, %v13724_v58 }
 0x38a   : > { %v5390_v33 = vsel %vm5380_vm14, %v5377_v24, %v5135_v10  ;;  %v5290_v16 = vrot.slane %v13965_v14, 7  ;;  %v5292_v35 = vrot.slane %v13992_v56, 7  ;;  %v1138_v9 = vmul.f32 %v16989_v26, %v16989_v26  ;;  %5820 = vmatprep.mubr.bf16.mxu1 %v16864_v61  ;;  %v16993_v26 = vld [vmem:[#allocation79_spill] sm:$0xff] }
 0x38b   : > { %v5403_v19 = vsel %vm5393_vm6, %v5390_v33, %v5159_v42  ;;  %v1339_v48 = vmul.f32 %v1327_v27, %v1327_v27  ;;  %v1387_v7 = vrot.slane %v1363_v41, 1  ;;  %v910_v21 = vrot.slane %v886_v20, 1 }
 0x38c   : > { %v5416_v45 = vsel %vm5406_vm13, %v5403_v19, %v5183_v17  ;;  %vm1041_vm1 = vcmp.eq.f32.partialorder %v14013_v5, inf  ;;  %v958_v46 = vrot.slane %v874_v22, 7  ;;  %v1162_v29 = vrot.slane %v1138_v9, 1 }
 0x38d   : > { %v5455_v2 = vpack.c.bf16 %v5428_v38, %v5416_v45  ;;  %v1354_v44 = vsub.f32 %v16988_v37, %v16990_v51  ;;  %v1411_v42 = vadd.f32 %v1387_v7, %v1339_v48  ;;  %v1467_v50 = vrot.slane %v1443_v62, 7  ;;  %v16992_v37 = vld [vmem:[#allocation35_spill] sm:$0xff] }
 0x38e   : > { %v934_v60 = vadd.f32 %v910_v21, %v874_v22  ;;  %v1434_v49 = vsub.f32 %v16987_v54, %v16991_v25  ;;  %vm1043_vm9 = vcmp.eq.f32.partialorder %v14013_v5, 0.0  ;;  %v1186_v27 = vadd.f32 %v1162_v29, %v1138_v9 }
 0x38f   : > { %v8710_v10 = vpop.eup %8709  ;;  %5739 = vmatprep.subr.bf16.mxu0 %v5455_v2  ;;  %v1198_v36 = vrot.slane %v1138_v9, 2  ;;  %v1366_v47 = vmul.f32 %v1354_v44, %v1354_v44  ;;  %v14088_v0 = vadd.f32 %v1467_v50, %v1411_v42  ;;  %v1330_v23 = vsub.f32 %v16987_v54, %v16990_v51  ;;  %v16995_v51 = vld [vmem:[#allocation105_spill] sm:$0xff] }
 0x390   : > { %v8712_v24 = vpop.eup %8711  ;;  %v1040_v30 = vmul.f32 %v8710_v10, %v14013_v5  ;;  %v14090_v53 = vadd.f32 %v958_v46, %v934_v60  ;;  %v1044_v17 = vand.u32 2147483648, %v14013_v5  ;;  %vm1281_vm15 = vcmp.eq.f32.partialorder %v14026_v40, inf  ;;  %v16996_v10 = vld [vmem:[#allocation109_spill] sm:$0xff] }
 0x391   : > { %v1280_v33 = vmul.f32 %v8712_v24, %v14026_v40  ;;  %v14097_v38 = vadd.f32 %v1198_v36, %v1186_v27  ;;  %v1284_v22 = vand.u32 2147483648, %v14026_v40  ;;  %8713 = vrsqrt.f32 %v14088_v0  ;;  %v16997_v60 = vld [vmem:[#allocation117_spill] sm:$0xff]  ;;  %v16999_v24 = vld [vmem:[#allocation15_spill] sm:$0xff] }
 0x392   : > { %v1390_v19 = vrot.slane %v1366_v47, 1  ;;  %v1446_v41 = vmul.f32 %v1434_v49, %v1434_v49  ;;  %vm1283_vm12 = vcmp.eq.f32.partialorder %v14026_v40, 0.0  ;;  %v5134_v54 = vrot.slane %v16992_v37, 3  ;;  %v16998_v49 = vld [vmem:[#allocation106_spill] sm:$0xff] }
 0x393   : > { %v1282_v62 = vsel %vm1281_vm15, %v14026_v40, %v1280_v33  ;;  %8715 = vrsqrt.f32 %v14090_v53  ;;  %v1042_v20 = vsel %vm1041_vm1, %v14013_v5, %v1040_v30  ;;  %v5158_v9 = vrot.slane %v16993_v26, 3  ;;  %v16994_v40 = vld [vmem:[#allocation38_spill] sm:$0xff]  ;;  %v17000_v30 = vld [vmem:[#allocation21_spill] sm:$0xff] }
 0x394   : > { %v1285_v45 = vsel %vm1283_vm12, %v1284_v22, %v1282_v62  ;;  %v1342_v2 = vmul.f32 %v1330_v23, %v1330_v23  ;;  %v5182_v48 = vrot.slane %v16992_v37, 1  ;;  %8717 = vrsqrt.f32 %v14097_v38 }
 0x395   : > { %v14113_v7 = vsel %vm2467_vm4, %v1285_v45, %v5242_v55  ;;  %v5137_v21 = vrot.slane %v16994_v40, 3  ;;  %v1470_v29 = vrot.slane %v1446_v41, 7  ;;  %v5161_v44 = vrot.slane %v16995_v51, 3 }
 0x396   : > { %v1414_v46 = vadd.f32 %v1390_v19, %v1342_v2  ;;  %v873_v42 = vmul.f32 %v16996_v10, %v16996_v10  ;;  %v1045_v50 = vsel %vm1043_vm9, %v1044_v17, %v1042_v20  ;;  %vm1553_vm5 = vcmp.eq.f32.partialorder %v14088_v0, inf  ;;  %v17001_v17 = vld [vmem:[#allocation16_spill] sm:$0xff] }
 0x397   : > { %v909_v25 = vrot.slane %v16997_v60, 1  ;;  %v1161_v27 = vrot.slane %v16998_v49, 1  ;;  %vm1555_vm7 = vcmp.eq.f32.partialorder %v14088_v0, 0.0  ;;  %v1197_v47 = vrot.slane %v16998_v49, 2 }
 0x398   : > { %v14126_v36 = vadd.f32 %v1470_v29, %v1414_v46  ;;  %v1353_v23 = vsub.f32 %v17000_v30, %v16999_v24  ;;  %v957_v22 = vrot.slane %v873_v42, 7  ;;  %v1433_v19 = vsub.f32 %v16996_v10, %v17001_v17 }
 0x399   : > { %v933_v33 = vadd.f32 %v909_v25, %v873_v42  ;;  %v1185_v5 = vadd.f32 %v1161_v27, %v16998_v49  ;;  %v1556_v41 = vand.u32 2147483648, %v14088_v0  ;;  %v5038_v62 = vrot.slane %v1045_v50, 1 }
 0x39a   : > { %8719 = vrsqrt.f32 %v14126_v36  ;;  %v1329_v20 = vsub.f32 %v16996_v10, %v16999_v24  ;;  %vm1062_vm2 = vcmp.eq.f32.partialorder %v14090_v53, inf  ;;  %v1365_v46 = vmul.f32 %v1353_v23, %v1353_v23 }
 0x39b   : > { %v14139_v45 = vadd.f32 %v957_v22, %v933_v33  ;;  %v14141_v2 = vadd.f32 %v1197_v47, %v1185_v5  ;;  %v8714_v29 = vpop.eup %8713  ;;  %vm1064_vm0 = vcmp.eq.f32.partialorder %v14090_v53, 0.0  ;;  %v1065_v42 = vand.u32 2147483648, %v14090_v53 }
 0x39c   : > { %v14150_v50 = vsel %vm2467_vm4, %v5243_v3, %v5264_v6  ;;  %v14157_v10 = vsel %vm2467_vm4, %v5264_v6, %v5288_v15  ;;  %v1552_v25 = vmul.f32 %v8714_v29, %v14088_v0  ;;  %vm1302_vm1 = vcmp.eq.f32.partialorder %v14097_v38, inf }
 0x39d   : > { %v8716_v60 = vpop.eup %8715  ;;  %8721 = vrsqrt.f32 %v14139_v45  ;;  %v1445_v49 = vmul.f32 %v1433_v19, %v1433_v19  ;;  %v1305_v3 = vand.u32 2147483648, %v14097_v38  ;;  %v1341_v34 = vmul.f32 %v1329_v20, %v1329_v20 }
 0x39e   : > { %v1061_v39 = vmul.f32 %v8716_v60, %v14090_v53  ;;  %8723 = vrsqrt.f32 %v14141_v2  ;;  %v8718_v27 = vpop.eup %8717  ;;  %v1554_v31 = vsel %vm1553_vm5, %v14088_v0, %v1552_v25  ;;  %vm1304_vm9 = vcmp.eq.f32.partialorder %v14097_v38, 0.0 }
 0x39f   : > { %vm1574_vm15 = vcmp.eq.f32.partialorder %v14126_v36, inf  ;;  %vm1576_vm12 = vcmp.eq.f32.partialorder %v14126_v36, 0.0  ;;  %v1389_v6 = vrot.slane %v1365_v46, 1  ;;  %v1557_v15 = vsel %vm1555_vm7, %v1556_v41, %v1554_v31 }
 0x3a0   : > { %v1063_v47 = vsel %vm1062_vm2, %v14090_v53, %v1061_v39  ;;  %v1301_v24 = vmul.f32 %v8718_v27, %v14097_v38  ;;  %v1577_v30 = vand.u32 2147483648, %v14126_v36  ;;  %v5098_v23 = vrot.slane %v1557_v15, 6  ;;  %v17003_v53 = vld [vmem:[#allocation36_spill] sm:$0xff] }
 0x3a1   : > { %v5338_v33 = vsel %vm2467_vm4, %v5038_v62, %v1557_v15  ;;  %vm1055_vm5 = vcmp.eq.f32.partialorder %v14139_v45, inf  ;;  %v1413_v22 = vadd.f32 %v1389_v6, %v1341_v34  ;;  %v1469_v5 = vrot.slane %v1445_v49, 7 }
 0x3a2   : > { %v17002_v17 = vrot.slane %v16993_v26, 7  ;;  %v1066_v19 = vsel %vm1064_vm0, %v1065_v42, %v1063_v47  ;;  %v1058_v41 = vand.u32 2147483648, %v14139_v45  ;;  %v5467_v20 = vpack.c.bf16 %v14157_v10, %v14150_v50 }
 0x3a3   : > { %vm1295_vm7 = vcmp.eq.f32.partialorder %v14141_v2, inf  ;;  %v14190_v62 = vadd.f32 %v1469_v5, %v1413_v22  ;;  %v5263_v29 = vsel %vm2467_vm4, %v5242_v55, %v5262_v8  ;;  %v1303_v50 = vsel %vm1302_vm1, %v14097_v38, %v1301_v24 }
 0x3a4   : > { %v5350_v0 = vsel %vm2480_vm8, %v5338_v33, %v17002_v17  ;;  %v8720_v60 = vpop.eup %8719  ;;  %v5287_v10 = vsel %vm2467_vm4, %v5262_v8, %v5286_v63  ;;  %v14212_v11 = vsel %vm2467_vm4, %v5245_v28, %v5268_v13  ;;  %v5041_v49 = vrot.slane %v1066_v19, 1  ;;  %v17006_v17 = vld [vmem:[#allocation120_spill] sm:$0xff] }
 0x3a5   : > { %v5363_v46 = vsel %vm5354_vm11, %v5350_v0, %v5098_v23  ;;  %v1573_v25 = vmul.f32 %v8720_v60, %v14126_v36  ;;  %8725 = vrsqrt.f32 %v14190_v62  ;;  %vm1297_vm2 = vcmp.eq.f32.partialorder %v14141_v2, 0.0  ;;  %v17007_v60 = vld [vmem:[#allocation59_spill] sm:$0xff] }
 0x3a6   : > { %v5376_v42 = vsel %vm5367_vm3, %v5363_v46, %v17003_v53  ;;  %v1298_v43 = vand.u32 2147483648, %v14141_v2  ;;  %v5466_v8 = vpack.c.bf16 %v5287_v10, %v5263_v29  ;;  %v14235_v26 = vsel %vm2467_vm4, %v5268_v13, %v5292_v35  ;;  %v17008_v10 = vld [vmem:[#allocation56_spill] sm:$0xff] }
 0x3a7   : > { %v5389_v55 = vsel %vm5380_vm14, %v5376_v42, %v5134_v54  ;;  %v8722_v63 = vpop.eup %8721  ;;  %v1575_v54 = vsel %vm1574_vm15, %v14126_v36, %v1573_v25  ;;  %v1306_v34 = vsel %vm1304_vm9, %v1305_v3, %v1303_v50  ;;  %v5469_v31 = vpack.c.bf16 %v14235_v26, %v14212_v11 }
 0x3a8   : > { %v5402_v1 = vsel %vm5393_vm6, %v5389_v55, %v5158_v9  ;;  %v14242_v9 = vsel %vm2467_vm4, %v5244_v57, %v5266_v4  ;;  %v8724_v37 = vpop.eup %8723  ;;  %v1578_v56 = vsel %vm1576_vm12, %v1577_v30, %v1575_v54  ;;  %v1054_v18 = vmul.f32 %v8722_v63, %v14139_v45  ;;  %v17005_v30 = vld [vmem:[#allocation127_spill] sm:$0xff] }
 0x3a9   : > { %v5415_v39 = vsel %vm5406_vm13, %v5402_v1, %v5182_v48  ;;  %v5101_v13 = vrot.slane %v1578_v56, 6  ;;  %v5341_v35 = vsel %vm2467_vm4, %v5041_v49, %v1578_v56  ;;  %v1294_v27 = vmul.f32 %v8724_v37, %v14141_v2 }
 0x3aa   : > { %v5454_v48 = vpack.c.bf16 %v14113_v7, %v5415_v39  ;;  %v17004_v6 = vrot.slane %v16995_v51, 7  ;;  %v1056_v38 = vsel %vm1055_vm5, %v14139_v45, %v1054_v18  ;;  %v5291_v36 = vsel %vm2467_vm4, %v5266_v4, %v5290_v16  ;;  %v14312_v51 = vld [vmem:[%s15763_s7 + $0x10] sm:$0x7] }
 0x3ab   : > { %v1296_v15 = vsel %vm1295_vm7, %v14141_v2, %v1294_v27  ;;  %v5522_v47 = vsel %vm5393_vm6, %v5466_v8, 0  ;;  %v5468_v24 = vpack.c.bf16 %v5291_v36, %v14242_v9  ;;  %v5430_v59 = vsel %vm2467_vm4, %v1306_v34, %v5245_v28  ;;  %v14290_v28 = vld [vmem:[%s15763_s7] sm:$0xff] }
 0x3ac   : > { %5740 = vmatpush1.bf16.msra.mxu0 %v5454_v48  ;;  %v5353_v7 = vsel %vm2480_vm8, %v5341_v35, %v17004_v6  ;;  %vm1057_vm0 = vcmp.eq.f32.partialorder %v14139_v45, 0.0  ;;  %v1299_v14 = vsel %vm1297_vm2, %v1298_v43, %v1296_v15  ;;  %v9273_v4 = vmov 6   ;;  %v14296_v45 = vld [vmem:[%s15763_s7 + $0x8] sm:$0xff] }
 0x3ad   : > { %v5366_v3 = vsel %vm5354_vm11, %v5353_v7, %v5101_v13  ;;  %8282 = vmatprep.subr.msk.bf16.mxu0 %vm5393_vm6, %v5467_v20  ;;  %8449 = vset.pattern.permute.xlu0 %v9273_v4  ;;  %v5185_v16 = vrot.slane %v16994_v40, 1  ;;  %v1059_v22 = vsel %vm1057_vm0, %v1058_v41, %v1056_v38  ;;  %v5429_v52 = vsel %vm2467_vm4, %v1299_v14, %v5244_v57 }
 0x3ae   : > { %v5379_v23 = vsel %vm5367_vm3, %v5366_v3, %v17005_v30  ;;  %8450 = vset.pattern.permute.xlu1 %v9273_v4  ;;  %5471 = vperm.xlu0 %8449, %v14290_v28   ;;  %v5040_v5 = vrot.slane %v1059_v22, 1  ;;  %v5064_v0 = vrot.slane %v17006_v17, 7  ;;  %vm1567_vm1 = vcmp.eq.f32.partialorder %v14190_v62, inf }
 0x3af   : > { %v5392_v33 = vsel %vm5380_vm14, %v5379_v23, %v5137_v21  ;;  %5475 = vperm.xlu1 %8450, %v14296_v45   ;;  %v8726_v57 = vpop.eup %8725  ;;  %v1570_v19 = vand.u32 2147483648, %v14190_v62  ;;  %vm1569_vm9 = vcmp.eq.f32.partialorder %v14190_v62, 0.0  ;;  %v5136_v53 = vrot.slane %v17007_v60, 3 }
 0x3b0   : > { %v5405_v32 = vsel %vm5393_vm6, %v5392_v33, %v5161_v44  ;;  %5742 = vmatpush1.bf16.msra.mxu0 %v5522_v47  ;;  %v1566_v2 = vmul.f32 %v8726_v57, %v14190_v62  ;;  %v5160_v50 = vrot.slane %v17006_v17, 3  ;;  %v5184_v55 = vrot.slane %v17007_v60, 1 }
 0x3b1   : > { %v5418_v40 = vsel %vm5406_vm13, %v5405_v32, %v5185_v16  ;;  %v5528_v43 = vsel %vm5393_vm6, %v5468_v24, 0 }
 0x3b2   : > { %v5457_v21 = vpack.c.bf16 %v5430_v59, %v5418_v40  ;;  %v1568_v44 = vsel %vm1567_vm1, %v14190_v62, %v1566_v2 }
 0x3b3   : > { %8283 = vmatmul.mubr.msk.bf16.vlgmr.msra.gmra.mrb[88].mxu0 %vm5490_vm10, %v13653_v12  ;;  %5479 = vperm.xlu1 %8450, %v14312_v51   ;;  %v1571_v41 = vsel %vm1569_vm9, %v1570_v19, %v1568_v44 }
 0x3b4   : > { %5790 = vmatprep.subr.bf16.mxu1 %v5457_v21  ;;  %5779 = vmatprep.mubr.bf16.mxu0 %v16864_v61  ;;  %v5100_v20 = vrot.slane %v1571_v41, 6  ;;  %v5340_v46 = vsel %vm2467_vm4, %v5040_v5, %v1571_v41  ;;  %vm6102_vm4 = vcmask 154624  }
 0x3b5   : > { %v5352_v29 = vsel %vm2480_vm8, %v5340_v46, %v5064_v0  ;;  %vm7806_vm8 = vcmask 220160  }
 0x3b6   : > { %v5365_v42 = vsel %vm5354_vm11, %v5352_v29, %v5100_v20 }
 0x3b7   : > { %v5378_v11 = vsel %vm5367_vm3, %v5365_v42, %v17008_v10 }
 0x3b8   : > { %v5391_v62 = vsel %vm5380_vm14, %v5378_v11, %v5136_v53 }
 0x3b9   : > { %v5404_v25 = vsel %vm5393_vm6, %v5391_v62, %v5160_v50 }
 0x3ba   : > { %v5417_v49 = vsel %vm5406_vm13, %v5404_v25, %v5184_v55 }
 0x3bb   : > { %8284 = vmatmul.mubr.msk.bf16.gmra.mrb[92].mxu0 %vm5490_vm10, %v13724_v58  ;;  %v5456_v1 = vpack.c.bf16 %v5429_v52, %v5417_v49 }
 0x3bc   : > { %6177 = vmatprep.mubr.bf16.mxu0 %v16864_v61 }
 0x3bd   : > { %5791 = vmatpush1.bf16.msra.mxu1 %v5456_v1 }
 0x3be   : > { %8285 = vmatprep.subr.msk.bf16.mxu1 %vm5393_vm6, %v5469_v31 }
 0x3c1   : > { %5793 = vmatpush1.bf16.msra.mxu1 %v5528_v43 }
 0x3c4   : > { %8286 = vmatmul.mubr.msk.bf16.vlgmr.msra.gmra.mrb[88].mxu1 %vm5490_vm10, %v13653_v12 }
 0x3c5   : > { %5830 = vmatprep.mubr.bf16.mxu1 %v16864_v61 }
 0x3cc   : > { %8287 = vmatmul.mubr.msk.bf16.gmra.mrb[92].mxu1 %vm5490_vm10, %v13724_v58 }
 0x3cd   : > { %6228 = vmatprep.mubr.bf16.mxu1 %v16864_v61 }
 0x419   : > { %v5567_v8 = vpop.f32.mrb[72].mxu0 }
 0x41a   : > { %v5569_v63 = vpop.f32.mrb[73].mxu0 }
 0x41b   : > { %v5571_v54 = vpop.f32.mrb[74].mxu0 }
 0x41c   : > { %v5618_v39 = vpop.f32.mrb[72].mxu1  ;;  %v5573_v9 = vpop.f32.mrb[75].mxu0 }
 0x41d   : > { %v5620_v26 = vpop.f32.mrb[73].mxu1 }
 0x41e   : > { %v5622_v18 = vpop.f32.mrb[74].mxu1 }
 0x41f   : > { %v5624_v31 = vpop.f32.mrb[75].mxu1 }
 0x421   : > { %v5577_v23 = vpop.f32.mrb[76].mxu0 }
 0x422   : > { %v5579_v57 = vpop.f32.mrb[77].mxu0 }
 0x423   : > { %v5581_v17 = vpop.f32.mrb[78].mxu0 }
 0x424   : > { %v5628_v40 = vpop.f32.mrb[76].mxu1  ;;  %v5582_v41 = vpop.f32.mrb[79].mxu0 }
 0x425   : > { %v5630_v0 = vpop.f32.mrb[77].mxu1 }
 0x426   : > { %v5632_v20 = vpop.f32.mrb[78].mxu1 }
 0x427   : > { %v5633_v53 = vpop.f32.mrb[79].mxu1 }
 0x42d   : > { %v14340_v37 = vpop.permute.xlu0 %5471 }
 0x42e   : > { %v14342_v48 = vpop.permute.xlu1 %5475  ;;  %v14345_v34 = vadd.f32 %v5567_v8, %v14340_v37  ;;  %v14348_v12 = vadd.f32 %v5569_v63, %v14340_v37  ;;  %v14351_v58 = vadd.f32 %v5618_v39, %v14340_v37  ;;  %v14357_v13 = vadd.f32 %v5620_v26, %v14340_v37 }
 0x42f   : > { %v14354_v56 = vadd.f32 %v5571_v54, %v14342_v48  ;;  %v14360_v35 = vadd.f32 %v5573_v9, %v14342_v48  ;;  %v14363_v27 = vadd.f32 %v5622_v18, %v14342_v48  ;;  %v14373_v24 = vadd.f32 %v5624_v31, %v14342_v48 }
 0x430   : > { %v5839_v6 = vsub.f32 0.0, %v14345_v34  ;;  %v5840_v7 = vsub.f32 0.0, %v14348_v12  ;;  %v5841_v38 = vsub.f32 0.0, %v14351_v58  ;;  %v5842_v3 = vsub.f32 0.0, %v14357_v13 }
 0x431   : > { %v5851_v36 = vsub.f32 0.0, %v14354_v56  ;;  %v5852_v15 = vsub.f32 0.0, %v14360_v35  ;;  %v5853_v47 = vsub.f32 0.0, %v14363_v27  ;;  %v5854_v52 = vsub.f32 0.0, %v14373_v24 }
 0x432   : > { %v14375_v30 = vpop.permute.xlu1 %5479  ;;  %v5875_v59 = vmul.f32 1.442695, %v5839_v6  ;;  %v5877_v14 = vmul.f32 1.442695, %v5840_v7  ;;  %v5879_v4 = vmul.f32 1.442695, %v5841_v38 }
 0x433   : > { %v14378_v16 = vadd.f32 %v5577_v23, %v14375_v30  ;;  %v5899_v33 = vmul.f32 1.442695, %v5851_v36  ;;  %v5881_v22 = vmul.f32 1.442695, %v5842_v3  ;;  %v5901_v21 = vmul.f32 1.442695, %v5852_v15 }
 0x434   : > { %8727 = vpow2.f32 %v5875_v59  ;;  %v14383_v2 = vadd.f32 %v5579_v57, %v14375_v30  ;;  %v14386_v5 = vadd.f32 %v5628_v40, %v14375_v30  ;;  %v5903_v19 = vmul.f32 1.442695, %v5853_v47 }
 0x435   : > { %v5863_v32 = vsub.f32 0.0, %v14378_v16  ;;  %8729 = vpow2.f32 %v5877_v14  ;;  %v14389_v44 = vadd.f32 %v5630_v0, %v14375_v30  ;;  %v5905_v46 = vmul.f32 1.442695, %v5854_v52 }
 0x436   : > { %8731 = vpow2.f32 %v5879_v4  ;;  %v5864_v29 = vsub.f32 0.0, %v14383_v2  ;;  %v5865_v60 = vsub.f32 0.0, %v14386_v5 }
 0x437   : > { %8733 = vpow2.f32 %v5899_v33  ;;  %v5923_v42 = vmul.f32 1.442695, %v5863_v32  ;;  %v5866_v50 = vsub.f32 0.0, %v14389_v44 }
 0x438   : > { %8735 = vpow2.f32 %v5881_v22  ;;  %v5925_v10 = vmul.f32 1.442695, %v5864_v29  ;;  %v5927_v11 = vmul.f32 1.442695, %v5865_v60 }
 0x439   : > { %8737 = vpow2.f32 %v5901_v21  ;;  %v5929_v55 = vmul.f32 1.442695, %v5866_v50 }
 0x43a   : > { %8739 = vpow2.f32 %v5903_v19 }
 0x43b   : > { %8741 = vpow2.f32 %v5905_v46 }
 0x43c   : > { %8743 = vpow2.f32 %v5923_v42 }
 0x43d   : > { %8745 = vpow2.f32 %v5925_v10  ;;  %v9274_v10 = vmov 7  }
 0x43e   : > { %v8728_v62 = vpop.eup %8727  ;;  %8747 = vpow2.f32 %v5927_v11  ;;  %8451 = vset.pattern.permute.xlu0 %v9274_v10  ;;  %8452 = vset.pattern.permute.xlu1 %v9274_v10 }
 0x43f   : > { %v8730_v25 = vpop.eup %8729  ;;  %v5947_v49 = vadd.f32 1.0, %v8728_v62  ;;  %8749 = vpow2.f32 %v5929_v55  ;;  %6083 = vperm.xlu0 %8451, %v14290_v28   ;;  %6087 = vperm.xlu1 %8452, %v14296_v45  }
 0x440   : > { %v8732_v1 = vpop.eup %8731  ;;  %v5948_v43 = vadd.f32 1.0, %v8730_v25 }
 0x441   : > { %v8734_v8 = vpop.eup %8733  ;;  %8751 = vrcp.f32 %v5947_v49  ;;  %v5949_v63 = vadd.f32 1.0, %v8732_v1 }
 0x442   : > { %v8736_v39 = vpop.eup %8735  ;;  %8753 = vrcp.f32 %v5948_v43  ;;  %v5959_v54 = vadd.f32 1.0, %v8734_v8 }
 0x443   : > { %v8738_v26 = vpop.eup %8737  ;;  %8755 = vrcp.f32 %v5949_v63  ;;  %v5950_v9 = vadd.f32 1.0, %v8736_v39  ;;  %v17009_v63 = vld [vmem:[#allocation12_spill] sm:$0xff]  ;;  %6091 = vperm.xlu1 %8452, %v14312_v51  }
 0x444   : > { %v8740_v18 = vpop.eup %8739  ;;  %8757 = vrcp.f32 %v5959_v54  ;;  %v5960_v31 = vadd.f32 1.0, %v8738_v26 }
 0x445   : > { %v8742_v6 = vpop.eup %8741  ;;  %8759 = vrcp.f32 %v5950_v9  ;;  %v5961_v7 = vadd.f32 1.0, %v8740_v18 }
 0x446   : > { %v8744_v38 = vpop.eup %8743  ;;  %8761 = vrcp.f32 %v5960_v31  ;;  %v5962_v36 = vadd.f32 1.0, %v8742_v6 }
 0x447   : > { %v8746_v3 = vpop.eup %8745  ;;  %8763 = vrcp.f32 %v5961_v7  ;;  %v5971_v15 = vadd.f32 1.0, %v8744_v38 }
 0x448   : > { %v8748_v47 = vpop.eup %8747  ;;  %8765 = vrcp.f32 %v5962_v36  ;;  %v5972_v23 = vadd.f32 1.0, %v8746_v3 }
 0x449   : > { %v8750_v59 = vpop.eup %8749  ;;  %8767 = vrcp.f32 %v5971_v15  ;;  %v5973_v14 = vadd.f32 1.0, %v8748_v47 }
 0x44a   : > { %8769 = vrcp.f32 %v5972_v23  ;;  %v5974_v4 = vadd.f32 1.0, %v8750_v59 }
 0x44b   : > { %v8752_v33 = vpop.eup %8751  ;;  %8771 = vrcp.f32 %v5973_v14 }
 0x44c   : > { %v8754_v22 = vpop.eup %8753  ;;  %8773 = vrcp.f32 %v5974_v4  ;;  %v6019_v40 = vmul.f32 %v8752_v33, %v14345_v34 }
 0x44d   : > { %v8756_v52 = vpop.eup %8755  ;;  %v6020_v19 = vmul.f32 %v8754_v22, %v14348_v12 }
 0x44e   : > { %v8758_v32 = vpop.eup %8757  ;;  %v6021_v29 = vmul.f32 %v8756_v52, %v14351_v58 }
 0x44f   : > { %v8760_v57 = vpop.eup %8759  ;;  %v6031_v21 = vmul.f32 %v8758_v32, %v14354_v56  ;;  %v5669_v55 = vpop.f32.mrb[80].mxu0 }
 0x450   : > { %v8762_v17 = vpop.eup %8761  ;;  %v6022_v42 = vmul.f32 %v8760_v57, %v14357_v13  ;;  %v14407_v13 = vadd.f32 %v5669_v55, %v14340_v37  ;;  %v14465_v55 = vld [vmem:[%s15758_s2] sm:$0xff]  }
 0x451   : > { %v8764_v0 = vpop.eup %8763  ;;  %v6058_v41 = vpack.c.bf16 %v6031_v21, %v6019_v40  ;;  %v6032_v20 = vmul.f32 %v8762_v17, %v14360_v35 }
 0x452   : > { %v8766_v46 = vpop.eup %8765  ;;  %v6033_v60 = vmul.f32 %v8764_v0, %v14363_v27  ;;  %v5671_v27 = vpop.f32.mrb[81].mxu0 }
 0x453   : > { %v8768_v53 = vpop.eup %8767  ;;  %v6034_v50 = vmul.f32 %v8766_v46, %v14373_v24  ;;  %v6059_v34 = vpack.c.bf16 %v6032_v20, %v6020_v19  ;;  %v5673_v28 = vpop.f32.mrb[82].mxu0 }
 0x454   : > { %v8770_v56 = vpop.eup %8769  ;;  %v6060_v11 = vpack.c.bf16 %v6033_v60, %v6021_v29  ;;  %v6043_v12 = vmul.f32 %v8768_v53, %v14378_v16  ;;  %v14413_v16 = vadd.f32 %v5671_v27, %v14340_v37  ;;  %v5720_v1 = vpop.f32.mrb[80].mxu1  ;;  %v14418_v43 = vadd.f32 %v5673_v28, %v14342_v48 }
 0x455   : > { %v8772_v58 = vpop.eup %8771  ;;  %v6044_v35 = vmul.f32 %v8770_v56, %v14383_v2  ;;  %6145 = vmatprep.subr.bf16.mxu0 %v6059_v34  ;;  %v6061_v24 = vpack.c.bf16 %v6034_v50, %v6022_v42  ;;  %v5843_v2 = vsub.f32 0.0, %v14407_v13  ;;  %v5675_v8 = vpop.f32.mrb[83].mxu0  ;;  %v14423_v26 = vadd.f32 %v5720_v1, %v14340_v37 }
 0x456   : > { %v8774_v62 = vpop.eup %8773  ;;  %v6070_v25 = vpack.c.bf16 %v6043_v12, %v6043_v12  ;;  %v14410_v49 = vmul.f32 %v8772_v58, %v14386_v5  ;;  %6146 = vmatpush1.bf16.msra.mxu0 %v6058_v41  ;;  %v5844_v5 = vsub.f32 0.0, %v14413_v16  ;;  %v5722_v9 = vpop.f32.mrb[81].mxu1  ;;  %v5855_v31 = vsub.f32 0.0, %v14418_v43 }
 0x457   : > { %v6046_v45 = vmul.f32 %v8774_v62, %v14389_v44  ;;  %6196 = vmatprep.subr.bf16.mxu1 %v6061_v24  ;;  %v6071_v54 = vpack.c.bf16 %v6044_v35, %v6044_v35  ;;  %v5883_v18 = vmul.f32 1.442695, %v5843_v2  ;;  %v14430_v6 = vadd.f32 %v5722_v9, %v14340_v37  ;;  %v5724_v7 = vpop.f32.mrb[82].mxu1  ;;  %v5679_v22 = vpop.f32.mrb[84].mxu0 }
 0x458   : > { %v6110_v39 = vand.u32 %v6070_v25, %v17009_v63  ;;  %6197 = vmatpush1.bf16.msra.mxu1 %v6060_v11  ;;  %v6072_v44 = vpack.c.bf16 %v14410_v49, %v14410_v49  ;;  %v5885_v36 = vmul.f32 1.442695, %v5844_v5  ;;  %v5845_v3 = vsub.f32 0.0, %v14423_v26  ;;  %v5726_v47 = vpop.f32.mrb[83].mxu1  ;;  %v5681_v40 = vpop.f32.mrb[85].mxu0 }
 0x459   : > { %v6073_v38 = vpack.c.bf16 %v6046_v45, %v6046_v45  ;;  %v14434_v15 = vadd.f32 %v5675_v8, %v14342_v48  ;;  %8775 = vpow2.f32 %v5883_v18  ;;  %v5907_v51 = vmul.f32 1.442695, %v5855_v31  ;;  %v5683_v19 = vpop.f32.mrb[86].mxu0 }
 0x45a   : > { %v5846_v23 = vsub.f32 0.0, %v14430_v6  ;;  %v14438_v59 = vadd.f32 %v5724_v7, %v14342_v48  ;;  %8777 = vpow2.f32 %v5885_v36  ;;  %v5887_v14 = vmul.f32 1.442695, %v5845_v3  ;;  %v5684_v29 = vpop.f32.mrb[87].mxu0 }
 0x45b   : > { %v5856_v4 = vsub.f32 0.0, %v14434_v15  ;;  %v14442_v33 = vadd.f32 %v5726_v47, %v14342_v48  ;;  %8779 = vpow2.f32 %v5907_v51  ;;  %v14446_v57 = vadd.f32 %v5679_v22, %v14375_v30 }
 0x45c   : > { %v5889_v52 = vmul.f32 1.442695, %v5846_v23  ;;  %v5857_v32 = vsub.f32 0.0, %v14438_v59  ;;  %8781 = vpow2.f32 %v5887_v14  ;;  %v14450_v0 = vadd.f32 %v5681_v40, %v14375_v30  ;;  %v5730_v46 = vpop.f32.mrb[84].mxu1 }
 0x45d   : > { %v5909_v21 = vmul.f32 1.442695, %v5856_v4  ;;  %v5858_v17 = vsub.f32 0.0, %v14442_v33  ;;  %v5867_v20 = vsub.f32 0.0, %v14446_v57  ;;  %v6113_v60 = vand.u32 %v6071_v54, %v17009_v63  ;;  %v5732_v34 = vpop.f32.mrb[85].mxu1 }
 0x45e   : > { %8783 = vpow2.f32 %v5889_v52  ;;  %v5911_v41 = vmul.f32 1.442695, %v5857_v32  ;;  %v5868_v42 = vsub.f32 0.0, %v14450_v0  ;;  %v14456_v50 = vadd.f32 %v5730_v46, %v14375_v30  ;;  %v5734_v11 = vpop.f32.mrb[86].mxu1 }
 0x45f   : > { %8785 = vpow2.f32 %v5909_v21  ;;  %v5913_v53 = vmul.f32 1.442695, %v5858_v17  ;;  %v5931_v10 = vmul.f32 1.442695, %v5867_v20  ;;  %v14459_v56 = vadd.f32 %v5732_v34, %v14375_v30  ;;  %6147 = vmatprep.subr.bf16.mxu0 %v6113_v60  ;;  %v5735_v24 = vpop.f32.mrb[87].mxu1 }
 0x460   : > { %8787 = vpow2.f32 %v5911_v41  ;;  %v6119_v12 = vand.u32 %v6073_v38, %v17009_v63  ;;  %v6116_v58 = vand.u32 %v6072_v44, %v17009_v63  ;;  %v5933_v35 = vmul.f32 1.442695, %v5868_v42  ;;  %6148 = vmatpush1.bf16.msra.mxu0 %v6110_v39  ;;  %v14479_v44 = vld [vmem:[%s15758_s2 + $0x8] ss:$0 sps:$4 sm:$0x33]  }
 0x461   : > { %8789 = vpow2.f32 %v5913_v53  ;;  %v5869_v27 = vsub.f32 0.0, %v14456_v50  ;;  %v5870_v62 = vsub.f32 0.0, %v14459_v56 }
 0x462   : > { %8791 = vpow2.f32 %v5931_v10  ;;  %6198 = vmatprep.subr.bf16.mxu1 %v6119_v12 }
 0x463   : > { %8793 = vpow2.f32 %v5933_v35  ;;  %v5935_v25 = vmul.f32 1.442695, %v5869_v27  ;;  %6199 = vmatpush1.bf16.msra.mxu1 %v6116_v58  ;;  %v8776_v49 = vpop.eup %8775  ;;  %v5937_v28 = vmul.f32 1.442695, %v5870_v62  ;;  %8290 = vmatmul.mubr.msk.bf16.vlgmr.msra.gmra.mrb[96].mxu0 %vm6102_vm4, %v14465_v55 }
 0x464   : > { %v8778_v45 = vpop.eup %8777  ;;  %v5951_v2 = vadd.f32 1.0, %v8776_v49  ;;  %6187 = vmatprep.mubr.bf16.mxu0 %v16864_v61 }
 0x465   : > { %8795 = vpow2.f32 %v5935_v25  ;;  %v8780_v1 = vpop.eup %8779  ;;  %v5952_v8 = vadd.f32 1.0, %v8778_v45 }
 0x466   : > { %8797 = vpow2.f32 %v5937_v28  ;;  %8292 = vmatmul.mubr.msk.bf16.vlgmr.msra.gmra.mrb[96].mxu1 %vm6102_vm4, %v14465_v55  ;;  %v8782_v39 = vpop.eup %8781  ;;  %v5963_v54 = vadd.f32 1.0, %v8780_v1 }
 0x467   : > { %8799 = vrcp.f32 %v5951_v2  ;;  %6238 = vmatprep.mubr.bf16.mxu1 %v16864_v61  ;;  %v5953_v9 = vadd.f32 1.0, %v8782_v39 }
 0x468   : > { %v8784_v5 = vpop.eup %8783  ;;  %8801 = vrcp.f32 %v5952_v8 }
 0x469   : > { %v8786_v18 = vpop.eup %8785  ;;  %8803 = vrcp.f32 %v5963_v54  ;;  %v5954_v31 = vadd.f32 1.0, %v8784_v5 }
 0x46a   : > { %v8788_v7 = vpop.eup %8787  ;;  %8805 = vrcp.f32 %v5953_v9  ;;  %v5964_v38 = vadd.f32 1.0, %v8786_v18 }
 0x46b   : > { %v8790_v36 = vpop.eup %8789  ;;  %8807 = vrcp.f32 %v5954_v31  ;;  %v5965_v3 = vadd.f32 1.0, %v8788_v7  ;;  %8291 = vmatmul.mubr.msk.bf16.gmra.mrb[100].mxu0 %vm6102_vm4, %v14479_v44 }
 0x46c   : > { %v8792_v47 = vpop.eup %8791  ;;  %8809 = vrcp.f32 %v5964_v38  ;;  %v5966_v51 = vadd.f32 1.0, %v8790_v36  ;;  %6279 = vmatprep.mubr.bf16.mxu0 %v16864_v61 }
 0x46d   : > { %v8794_v23 = vpop.eup %8793  ;;  %8811 = vrcp.f32 %v5965_v3  ;;  %v5975_v14 = vadd.f32 1.0, %v8792_v47 }
 0x46e   : > { %8813 = vrcp.f32 %v5966_v51  ;;  %v5976_v4 = vadd.f32 1.0, %v8794_v23  ;;  %8293 = vmatmul.mubr.msk.bf16.gmra.mrb[100].mxu1 %vm6102_vm4, %v14479_v44 }
 0x46f   : > { %v8796_v22 = vpop.eup %8795  ;;  %8815 = vrcp.f32 %v5975_v14  ;;  %6330 = vmatprep.mubr.bf16.mxu1 %v16864_v61 }
 0x470   : > { %v8798_v52 = vpop.eup %8797  ;;  %8817 = vrcp.f32 %v5976_v4  ;;  %v5977_v32 = vadd.f32 1.0, %v8796_v22 }
 0x471   : > { %v8800_v40 = vpop.eup %8799  ;;  %v5978_v21 = vadd.f32 1.0, %v8798_v52 }
 0x472   : > { %v8802_v17 = vpop.eup %8801  ;;  %8819 = vrcp.f32 %v5977_v32  ;;  %v6023_v20 = vmul.f32 %v8800_v40, %v14407_v13 }
 0x473   : > { %v8804_v19 = vpop.eup %8803  ;;  %8821 = vrcp.f32 %v5978_v21  ;;  %v6024_v34 = vmul.f32 %v8802_v17, %v14413_v16 }
 0x474   : > { %v8806_v41 = vpop.eup %8805  ;;  %v6035_v46 = vmul.f32 %v8804_v19, %v14418_v43 }
 0x475   : > { %v8808_v29 = vpop.eup %8807  ;;  %v6025_v12 = vmul.f32 %v8806_v41, %v14423_v26 }
 0x476   : > { %v8810_v60 = vpop.eup %8809  ;;  %v6062_v53 = vpack.c.bf16 %v6035_v46, %v6023_v20  ;;  %v6026_v27 = vmul.f32 %v8808_v29, %v14430_v6 }
 0x477   : > { %v8812_v42 = vpop.eup %8811  ;;  %v6036_v10 = vmul.f32 %v8810_v60, %v14434_v15 }
 0x478   : > { %v8814_v11 = vpop.eup %8813  ;;  %v6037_v58 = vmul.f32 %v8812_v42, %v14438_v59 }
 0x479   : > { %v8816_v35 = vpop.eup %8815  ;;  %v6038_v13 = vmul.f32 %v8814_v11, %v14442_v33  ;;  %v6063_v24 = vpack.c.bf16 %v6036_v10, %v6024_v34 }
 0x47a   : > { %v8818_v43 = vpop.eup %8817  ;;  %v6064_v62 = vpack.c.bf16 %v6037_v58, %v6025_v12  ;;  %v6047_v25 = vmul.f32 %v8816_v35, %v14446_v57 }
 0x47b   : > { %v6048_v49 = vmul.f32 %v8818_v43, %v14450_v0  ;;  %6247 = vmatprep.subr.bf16.mxu0 %v6063_v24  ;;  %v6065_v16 = vpack.c.bf16 %v6038_v13, %v6026_v27 }
 0x47c   : > { %v8820_v15 = vpop.eup %8819  ;;  %v6074_v28 = vpack.c.bf16 %v6047_v25, %v6047_v25  ;;  %6248 = vmatpush1.bf16.msra.mxu0 %v6062_v53 }
 0x47d   : > { %v8822_v26 = vpop.eup %8821  ;;  %v6075_v45 = vpack.c.bf16 %v6048_v49, %v6048_v49  ;;  %v6049_v59 = vmul.f32 %v8820_v15, %v14456_v50  ;;  %6298 = vmatprep.subr.bf16.mxu1 %v6065_v16 }
 0x47e   : > { %v6050_v6 = vmul.f32 %v8822_v26, %v14459_v56  ;;  %6299 = vmatpush1.bf16.msra.mxu1 %v6064_v62  ;;  %v6122_v57 = vand.u32 %v6074_v28, %v17009_v63 }
 0x47f   : > { %v6076_v33 = vpack.c.bf16 %v6049_v59, %v6049_v59  ;;  %v6125_v2 = vand.u32 %v6075_v45, %v17009_v63 }
 0x480   : > { %v6077_v1 = vpack.c.bf16 %v6050_v6, %v6050_v6 }
 0x481   : > { %6249 = vmatprep.subr.bf16.mxu0 %v6125_v2  ;;  %v6128_v8 = vand.u32 %v6076_v33, %v17009_v63 }
 0x482   : > { %6250 = vmatpush1.bf16.msra.mxu0 %v6122_v57  ;;  %v6131_v0 = vand.u32 %v6077_v1, %v17009_v63 }
 0x484   : > { %6300 = vmatprep.subr.bf16.mxu1 %v6131_v0 }
 0x485   : > { %6301 = vmatpush1.bf16.msra.mxu1 %v6128_v8  ;;  %8294 = vmatmul.mubr.msk.bf16.vlgmr.msra.gmra.mrb[104].mxu0 %vm6102_vm4, %v14465_v55 }
 0x486   : > { %v5771_v39 = vpop.f32.mrb[88].mxu0  ;;  %6289 = vmatprep.mubr.bf16.mxu0 %v16864_v61 }
 0x487   : > { %v14504_v50 = vadd.f32 %v5771_v39, %v14340_v37  ;;  %v5773_v54 = vpop.f32.mrb[89].mxu0 }
 0x488   : > { %v14509_v56 = vadd.f32 %v5773_v54, %v14340_v37  ;;  %v5775_v5 = vpop.f32.mrb[90].mxu0  ;;  %8296 = vmatmul.mubr.msk.bf16.vlgmr.msra.gmra.mrb[104].mxu1 %vm6102_vm4, %v14465_v55 }
 0x489   : > { %v5847_v9 = vsub.f32 0.0, %v14504_v50  ;;  %v14514_v18 = vadd.f32 %v5775_v5, %v14342_v48  ;;  %v5777_v31 = vpop.f32.mrb[91].mxu0  ;;  %6340 = vmatprep.mubr.bf16.mxu1 %v16864_v61 }
 0x48a   : > { %v5848_v7 = vsub.f32 0.0, %v14509_v56  ;;  %v14518_v38 = vadd.f32 %v5777_v31, %v14342_v48 }
 0x48b   : > { %v5891_v36 = vmul.f32 1.442695, %v5847_v9  ;;  %v5859_v3 = vsub.f32 0.0, %v14514_v18 }
 0x48c   : > { %v5893_v47 = vmul.f32 1.442695, %v5848_v7  ;;  %v5860_v51 = vsub.f32 0.0, %v14518_v38 }
 0x48d   : > { %8823 = vpow2.f32 %v5891_v36  ;;  %v5915_v23 = vmul.f32 1.442695, %v5859_v3  ;;  %8295 = vmatmul.mubr.msk.bf16.gmra.mrb[108].mxu0 %vm6102_vm4, %v14479_v44 }
 0x48e   : > { %8825 = vpow2.f32 %v5893_v47  ;;  %v5917_v14 = vmul.f32 1.442695, %v5860_v51  ;;  %v5781_v4 = vpop.f32.mrb[92].mxu0  ;;  %6381 = vmatprep.mubr.bf16.mxu0 %v16864_v61 }
 0x48f   : > { %8827 = vpow2.f32 %v5915_v23  ;;  %v14526_v22 = vadd.f32 %v5781_v4, %v14375_v30  ;;  %v5783_v52 = vpop.f32.mrb[93].mxu0 }
 0x490   : > { %8829 = vpow2.f32 %v5917_v14  ;;  %v14531_v32 = vadd.f32 %v5783_v52, %v14375_v30  ;;  %v5785_v40 = vpop.f32.mrb[94].mxu0  ;;  %8297 = vmatmul.mubr.msk.bf16.gmra.mrb[108].mxu1 %vm6102_vm4, %v14479_v44 }
 0x491   : > { %v5871_v21 = vsub.f32 0.0, %v14526_v22  ;;  %v5786_v17 = vpop.f32.mrb[95].mxu0  ;;  %6432 = vmatprep.mubr.bf16.mxu1 %v16864_v61 }
 0x492   : > { %v5872_v19 = vsub.f32 0.0, %v14531_v32 }
 0x493   : > { %v5939_v41 = vmul.f32 1.442695, %v5871_v21 }
 0x494   : > { %v5941_v20 = vmul.f32 1.442695, %v5872_v19 }
 0x495   : > { %8831 = vpow2.f32 %v5939_v41 }
 0x496   : > { %8833 = vpow2.f32 %v5941_v20 }
 0x497   : > { %v8824_v46 = vpop.eup %8823  ;;  %v5822_v34 = vpop.f32.mrb[88].mxu1 }
 0x498   : > { %v8826_v29 = vpop.eup %8825  ;;  %v5955_v60 = vadd.f32 1.0, %v8824_v46  ;;  %v14540_v11 = vadd.f32 %v5822_v34, %v14340_v37  ;;  %v5824_v58 = vpop.f32.mrb[89].mxu1 }
 0x499   : > { %v8828_v53 = vpop.eup %8827  ;;  %v5956_v42 = vadd.f32 1.0, %v8826_v29  ;;  %v14543_v35 = vadd.f32 %v5824_v58, %v14340_v37  ;;  %v5826_v13 = vpop.f32.mrb[90].mxu1 }
 0x49a   : > { %v8830_v10 = vpop.eup %8829  ;;  %8835 = vrcp.f32 %v5955_v60  ;;  %v5967_v12 = vadd.f32 1.0, %v8828_v53  ;;  %v5849_v24 = vsub.f32 0.0, %v14540_v11  ;;  %v14547_v43 = vadd.f32 %v5826_v13, %v14342_v48  ;;  %v5828_v62 = vpop.f32.mrb[91].mxu1 }
 0x49b   : > { %8837 = vrcp.f32 %v5956_v42  ;;  %v5968_v27 = vadd.f32 1.0, %v8830_v10  ;;  %v5850_v25 = vsub.f32 0.0, %v14543_v35  ;;  %v14551_v49 = vadd.f32 %v5828_v62, %v14342_v48 }
 0x49c   : > { %8839 = vrcp.f32 %v5967_v12  ;;  %v5895_v16 = vmul.f32 1.442695, %v5849_v24  ;;  %v5861_v15 = vsub.f32 0.0, %v14547_v43 }
 0x49d   : > { %8841 = vrcp.f32 %v5968_v27  ;;  %v5897_v28 = vmul.f32 1.442695, %v5850_v25  ;;  %v5862_v26 = vsub.f32 0.0, %v14551_v49 }
 0x49e   : > { %8843 = vpow2.f32 %v5895_v16  ;;  %v5919_v59 = vmul.f32 1.442695, %v5861_v15 }
 0x49f   : > { %v8832_v37 = vpop.eup %8831  ;;  %8845 = vpow2.f32 %v5897_v28  ;;  %v5921_v33 = vmul.f32 1.442695, %v5862_v26  ;;  %v5832_v57 = vpop.f32.mrb[92].mxu1 }
 0x4a0   : > { %v8834_v45 = vpop.eup %8833  ;;  %v5979_v6 = vadd.f32 1.0, %v8832_v37  ;;  %8847 = vpow2.f32 %v5919_v59  ;;  %v14556_v1 = vadd.f32 %v5832_v57, %v14375_v30  ;;  %v5834_v48 = vpop.f32.mrb[93].mxu1 }
 0x4a1   : > { %v5980_v2 = vadd.f32 1.0, %v8834_v45  ;;  %8849 = vpow2.f32 %v5921_v33  ;;  %v14559_v0 = vadd.f32 %v5834_v48, %v14375_v30  ;;  %v5836_v8 = vpop.f32.mrb[94].mxu1 }
 0x4a2   : > { %8851 = vrcp.f32 %v5979_v6  ;;  %v5873_v54 = vsub.f32 0.0, %v14556_v1  ;;  %v5837_v5 = vpop.f32.mrb[95].mxu1 }
 0x4a3   : > { %8853 = vrcp.f32 %v5980_v2  ;;  %v5874_v31 = vsub.f32 0.0, %v14559_v0 }
 0x4a4   : > { %v8836_v39 = vpop.eup %8835  ;;  %v5943_v36 = vmul.f32 1.442695, %v5873_v54 }
 0x4a5   : > { %v8838_v9 = vpop.eup %8837  ;;  %v6027_v47 = vmul.f32 %v8836_v39, %v14504_v50  ;;  %v5945_v23 = vmul.f32 1.442695, %v5874_v31 }
 0x4a6   : > { %v8840_v7 = vpop.eup %8839  ;;  %v6028_v30 = vmul.f32 %v8838_v9, %v14509_v56  ;;  %8855 = vpow2.f32 %v5943_v36 }
 0x4a7   : > { %v8842_v3 = vpop.eup %8841  ;;  %v6039_v51 = vmul.f32 %v8840_v7, %v14514_v18  ;;  %8857 = vpow2.f32 %v5945_v23 }
 0x4a8   : > { %v6040_v14 = vmul.f32 %v8842_v3, %v14518_v38  ;;  %v8844_v52 = vpop.eup %8843 }
 0x4a9   : > { %v6066_v4 = vpack.c.bf16 %v6039_v51, %v6027_v47  ;;  %v8846_v21 = vpop.eup %8845  ;;  %v5957_v17 = vadd.f32 1.0, %v8844_v52 }
 0x4aa   : > { %v6067_v40 = vpack.c.bf16 %v6040_v14, %v6028_v30  ;;  %v8848_v19 = vpop.eup %8847  ;;  %v5958_v41 = vadd.f32 1.0, %v8846_v21 }
 0x4ab   : > { %v8850_v20 = vpop.eup %8849  ;;  %8859 = vrcp.f32 %v5957_v17  ;;  %v5969_v50 = vadd.f32 1.0, %v8848_v19 }
 0x4ac   : > { %6349 = vmatprep.subr.bf16.mxu0 %v6067_v40  ;;  %v8852_v18 = vpop.eup %8851  ;;  %8861 = vrcp.f32 %v5958_v41  ;;  %v5970_v46 = vadd.f32 1.0, %v8850_v20 }
 0x4ad   : > { %6350 = vmatpush1.bf16.msra.mxu0 %v6066_v4  ;;  %v8854_v56 = vpop.eup %8853  ;;  %8863 = vrcp.f32 %v5969_v50  ;;  %v6051_v38 = vmul.f32 %v8852_v18, %v14526_v22 }
 0x4ae   : > { %8865 = vrcp.f32 %v5970_v46  ;;  %v6052_v29 = vmul.f32 %v8854_v56, %v14531_v32 }
 0x4af   : > { %v6078_v60 = vpack.c.bf16 %v6051_v38, %v6051_v38 }
 0x4b0   : > { %v8856_v53 = vpop.eup %8855  ;;  %v6079_v42 = vpack.c.bf16 %v6052_v29, %v6052_v29 }
 0x4b1   : > { %v8858_v34 = vpop.eup %8857  ;;  %v5981_v10 = vadd.f32 1.0, %v8856_v53  ;;  %v6134_v27 = vand.u32 %v6078_v60, %v17009_v63 }
 0x4b2   : > { %v5982_v12 = vadd.f32 1.0, %v8858_v34  ;;  %v6137_v58 = vand.u32 %v6079_v42, %v17009_v63 }
 0x4b3   : > { %8867 = vrcp.f32 %v5981_v10 }
 0x4b4   : > { %8869 = vrcp.f32 %v5982_v12  ;;  %6351 = vmatprep.subr.bf16.mxu0 %v6137_v58 }
 0x4b5   : > { %v8860_v13 = vpop.eup %8859  ;;  %6352 = vmatpush1.bf16.msra.mxu0 %v6134_v27 }
 0x4b6   : > { %v8862_v24 = vpop.eup %8861  ;;  %v6029_v32 = vmul.f32 %v8860_v13, %v14540_v11 }
 0x4b7   : > { %v8864_v22 = vpop.eup %8863  ;;  %v6030_v16 = vmul.f32 %v8862_v24, %v14543_v35 }
 0x4b8   : > { %v8866_v62 = vpop.eup %8865  ;;  %v6041_v25 = vmul.f32 %v8864_v22, %v14547_v43  ;;  %8298 = vmatmul.mubr.msk.bf16.vlgmr.msra.gmra.mrb[112].mxu0 %vm6102_vm4, %v14465_v55 }
 0x4b9   : > { %v6042_v15 = vmul.f32 %v8866_v62, %v14551_v49  ;;  %6391 = vmatprep.mubr.bf16.mxu0 %v16864_v61 }
 0x4ba   : > { %v6068_v37 = vpack.c.bf16 %v6041_v25, %v6029_v32 }
 0x4bb   : > { %v6069_v28 = vpack.c.bf16 %v6042_v15, %v6030_v16 }
 0x4bd   : > { %v8868_v26 = vpop.eup %8867  ;;  %6400 = vmatprep.subr.bf16.mxu1 %v6069_v28 }
 0x4be   : > { %v8870_v45 = vpop.eup %8869  ;;  %v6053_v59 = vmul.f32 %v8868_v26, %v14556_v1  ;;  %6401 = vmatpush1.bf16.msra.mxu1 %v6068_v37  ;;  %v14591_v33 = vpop.permute.xlu0 %6083 }
 0x4bf   : > { %v6054_v11 = vmul.f32 %v8870_v45, %v14559_v0  ;;  %v14593_v57 = vpop.permute.xlu1 %6087 }
 0x4c0   : > { %v6080_v43 = vpack.c.bf16 %v6053_v59, %v6053_v59  ;;  %8299 = vmatmul.mubr.msk.bf16.gmra.mrb[116].mxu0 %vm6102_vm4, %v14479_v44 }
 0x4c1   : > { %v6081_v6 = vpack.c.bf16 %v6054_v11, %v6054_v11  ;;  %6789 = vmatprep.mubr.bf16.mxu0 %v16864_v61 }
 0x4c2   : > { %v6140_v49 = vand.u32 %v6080_v43, %v17009_v63 }
 0x4c3   : > { %v6143_v35 = vand.u32 %v6081_v6, %v17009_v63  ;;  %v14627_v46 = vpop.permute.xlu1 %6091 }
 0x4c5   : > { %6402 = vmatprep.subr.bf16.mxu1 %v6143_v35 }
 0x4c6   : > { %6403 = vmatpush1.bf16.msra.mxu1 %v6140_v49 }
 0x4c9   : > { %8300 = vmatmul.mubr.msk.bf16.vlgmr.msra.gmra.mrb[112].mxu1 %vm6102_vm4, %v14465_v55 }
 0x4ca   : > { %6442 = vmatprep.mubr.bf16.mxu1 %v16864_v61 }
 0x4d1   : > { %8301 = vmatmul.mubr.msk.bf16.gmra.mrb[116].mxu1 %vm6102_vm4, %v14479_v44 }
 0x4d2   : > { %6852 = vmatprep.mubr.bf16.mxu1 %v16864_v61 }
 0x536   : > { %v6179_v2 = vpop.f32.mrb[96].mxu0 }
 0x537   : > { %v14596_v1 = vadd.f32 %v6179_v2, %v14591_v33  ;;  %v6181_v48 = vpop.f32.mrb[97].mxu0 }
 0x538   : > { %v14599_v0 = vadd.f32 %v6181_v48, %v14591_v33  ;;  %v6183_v8 = vpop.f32.mrb[98].mxu0 }
 0x539   : > { %v6230_v55 = vpop.f32.mrb[96].mxu1  ;;  %v6451_v39 = vsub.f32 0.0, %v14596_v1  ;;  %v14606_v54 = vadd.f32 %v6183_v8, %v14593_v57  ;;  %v6185_v9 = vpop.f32.mrb[99].mxu0 }
 0x53a   : > { %v14603_v44 = vadd.f32 %v6230_v55, %v14591_v33  ;;  %v6232_v5 = vpop.f32.mrb[97].mxu1  ;;  %v6452_v31 = vsub.f32 0.0, %v14599_v0  ;;  %v14613_v36 = vadd.f32 %v6185_v9, %v14593_v57  ;;  %v9275_v55 = vmov 4  }
 0x53b   : > { %v14610_v7 = vadd.f32 %v6232_v5, %v14591_v33  ;;  %v6234_v3 = vpop.f32.mrb[98].mxu1  ;;  %v6487_v47 = vmul.f32 1.442695, %v6451_v39  ;;  %v6463_v23 = vsub.f32 0.0, %v14606_v54  ;;  %8454 = vset.pattern.permute.xlu1 %v9275_v55  ;;  %v14648_v5 = vld [vmem:[%s15763_s7] sm:$0xff] }
 0x53c   : > { %v6453_v51 = vsub.f32 0.0, %v14603_v44  ;;  %v14618_v30 = vadd.f32 %v6234_v3, %v14593_v57  ;;  %v6236_v14 = vpop.f32.mrb[99].mxu1  ;;  %v6489_v4 = vmul.f32 1.442695, %v6452_v31  ;;  %v6464_v40 = vsub.f32 0.0, %v14613_v36  ;;  %7704 = vperm.xlu1 %8454, %v14648_v5  }
 0x53d   : > { %v6454_v52 = vsub.f32 0.0, %v14610_v7  ;;  %v14623_v21 = vadd.f32 %v6236_v14, %v14593_v57  ;;  %8871 = vpow2.f32 %v6487_v47  ;;  %v6511_v19 = vmul.f32 1.442695, %v6463_v23 }
 0x53e   : > { %v6491_v17 = vmul.f32 1.442695, %v6453_v51  ;;  %v6465_v41 = vsub.f32 0.0, %v14618_v30  ;;  %8873 = vpow2.f32 %v6489_v4  ;;  %v6513_v50 = vmul.f32 1.442695, %v6464_v40  ;;  %v6189_v56 = vpop.f32.mrb[100].mxu0 }
 0x53f   : > { %v6493_v20 = vmul.f32 1.442695, %v6454_v52  ;;  %v6466_v18 = vsub.f32 0.0, %v14623_v21  ;;  %v14630_v29 = vadd.f32 %v6189_v56, %v14627_v46  ;;  %v6191_v60 = vpop.f32.mrb[101].mxu0  ;;  %v9276_v51 = vmov 3  }
 0x540   : > { %8875 = vpow2.f32 %v6491_v17  ;;  %v6515_v38 = vmul.f32 1.442695, %v6465_v41  ;;  %v14633_v42 = vadd.f32 %v6191_v60, %v14627_v46  ;;  %v6193_v10 = vpop.f32.mrb[102].mxu0  ;;  %8453 = vset.pattern.permute.xlu0 %v9276_v51  ;;  %8455 = vset.pattern.permute.xlu1 %v9276_v51 }
 0x541   : > { %8877 = vpow2.f32 %v6511_v19  ;;  %v6517_v53 = vmul.f32 1.442695, %v6466_v18  ;;  %v6240_v34 = vpop.f32.mrb[100].mxu1  ;;  %v6475_v12 = vsub.f32 0.0, %v14630_v29  ;;  %v6194_v13 = vpop.f32.mrb[103].mxu0  ;;  %7680 = vperm.xlu0 %8453, %v14648_v5   ;;  %v14655_v19 = vld [vmem:[%s15763_s7 + $0x8] sm:$0xff] }
 0x542   : > { %8879 = vpow2.f32 %v6493_v20  ;;  %v14637_v58 = vadd.f32 %v6240_v34, %v14627_v46  ;;  %v6242_v27 = vpop.f32.mrb[101].mxu1  ;;  %v6476_v24 = vsub.f32 0.0, %v14633_v42  ;;  %7684 = vperm.xlu1 %8455, %v14655_v19   ;;  %v14661_v18 = vld [vmem:[%s15763_s7 + $0x10] sm:$0x7] }
 0x543   : > { %8881 = vpow2.f32 %v6513_v50  ;;  %v14641_v22 = vadd.f32 %v6242_v27, %v14627_v46  ;;  %v6244_v62 = vpop.f32.mrb[102].mxu1  ;;  %v6535_v32 = vmul.f32 1.442695, %v6475_v12 }
 0x544   : > { %8883 = vpow2.f32 %v6515_v38  ;;  %v6477_v25 = vsub.f32 0.0, %v14637_v58  ;;  %v6245_v16 = vpop.f32.mrb[103].mxu1  ;;  %v6537_v15 = vmul.f32 1.442695, %v6476_v24 }
 0x545   : > { %8885 = vpow2.f32 %v6517_v53  ;;  %v6478_v37 = vsub.f32 0.0, %v14641_v22  ;;  %7688 = vperm.xlu0 %8453, %v14661_v18  }
 0x546   : > { %8887 = vpow2.f32 %v6535_v32  ;;  %v6539_v28 = vmul.f32 1.442695, %v6477_v25  ;;  %8456 = vset.pattern.permute.xlu1 %v9275_v55 }
 0x547   : > { %8889 = vpow2.f32 %v6537_v15  ;;  %v6541_v26 = vmul.f32 1.442695, %v6478_v37  ;;  %v8872_v45 = vpop.eup %8871  ;;  %7708 = vperm.xlu1 %8456, %v14655_v19  }
 0x548   : > { %8891 = vpow2.f32 %v6539_v28  ;;  %v8874_v59 = vpop.eup %8873  ;;  %v6559_v11 = vadd.f32 1.0, %v8872_v45 }
 0x549   : > { %8893 = vpow2.f32 %v6541_v26  ;;  %v6560_v6 = vadd.f32 1.0, %v8874_v59  ;;  %8457 = vset.pattern.permute.xlu0 %v9275_v55  ;;  %v9277_v26 = vmov 5  }
 0x54a   : > { %v8876_v43 = vpop.eup %8875  ;;  %8895 = vrcp.f32 %v6559_v11  ;;  %7712 = vperm.xlu0 %8457, %v14661_v18  }
 0x54b   : > { %v8878_v35 = vpop.eup %8877  ;;  %v6561_v49 = vadd.f32 1.0, %v8876_v43  ;;  %8897 = vrcp.f32 %v6560_v6  ;;  %8458 = vset.pattern.permute.xlu1 %v9277_v26 }
 0x54c   : > { %v8880_v2 = vpop.eup %8879  ;;  %v6571_v48 = vadd.f32 1.0, %v8878_v35  ;;  %7740 = vperm.xlu1 %8458, %v14648_v5  }
 0x54d   : > { %v8882_v8 = vpop.eup %8881  ;;  %8899 = vrcp.f32 %v6561_v49  ;;  %v6562_v39 = vadd.f32 1.0, %v8880_v2 }
 0x54e   : > { %v8884_v9 = vpop.eup %8883  ;;  %8901 = vrcp.f32 %v6571_v48  ;;  %v6572_v31 = vadd.f32 1.0, %v8882_v8  ;;  %8459 = vset.pattern.permute.xlu0 %v9277_v26 }
 0x54f   : > { %v8886_v3 = vpop.eup %8885  ;;  %8903 = vrcp.f32 %v6562_v39  ;;  %v6573_v47 = vadd.f32 1.0, %v8884_v9  ;;  %7748 = vperm.xlu0 %8459, %v14661_v18  }
 0x550   : > { %v8888_v23 = vpop.eup %8887  ;;  %8905 = vrcp.f32 %v6572_v31  ;;  %v6574_v14 = vadd.f32 1.0, %v8886_v3  ;;  %7744 = vperm.xlu1 %8458, %v14655_v19  }
 0x551   : > { %v8890_v4 = vpop.eup %8889  ;;  %8907 = vrcp.f32 %v6573_v47  ;;  %v6583_v52 = vadd.f32 1.0, %v8888_v23 }
 0x552   : > { %v8892_v40 = vpop.eup %8891  ;;  %8909 = vrcp.f32 %v6574_v14  ;;  %v6584_v17 = vadd.f32 1.0, %v8890_v4 }
 0x553   : > { %v8894_v41 = vpop.eup %8893  ;;  %8911 = vrcp.f32 %v6583_v52  ;;  %v6585_v20 = vadd.f32 1.0, %v8892_v40 }
 0x554   : > { %8913 = vrcp.f32 %v6584_v17  ;;  %v6586_v50 = vadd.f32 1.0, %v8894_v41  ;;  %v8896_v56 = vpop.eup %8895 }
 0x555   : > { %8915 = vrcp.f32 %v6585_v20  ;;  %v8898_v38 = vpop.eup %8897  ;;  %v14666_v12 = vmul.f32 %v8896_v56, %v14596_v1 }
 0x556   : > { %8917 = vrcp.f32 %v6586_v50  ;;  %v6632_v4 = vmul.f32 %v8898_v38, %v14599_v0 }
 0x557   : > { %v8900_v60 = vpop.eup %8899 }
 0x558   : > { %v8902_v53 = vpop.eup %8901  ;;  %v6281_v34 = vpop.f32.mrb[104].mxu0  ;;  %v14685_v59 = vmul.f32 %v8900_v60, %v14603_v44 }
 0x559   : > { %v8904_v10 = vpop.eup %8903  ;;  %v14669_v27 = vmul.f32 %v8902_v53, %v14606_v54  ;;  %v14672_v13 = vadd.f32 %v6281_v34, %v14591_v33  ;;  %v6283_v24 = vpop.f32.mrb[105].mxu0 }
 0x55a   : > { %v8906_v62 = vpop.eup %8905  ;;  %v14676_v32 = vadd.f32 %v6283_v24, %v14591_v33  ;;  %v6285_v25 = vpop.f32.mrb[106].mxu0  ;;  %v6634_v41 = vmul.f32 %v8904_v10, %v14610_v7 }
 0x55b   : > { %v8908_v16 = vpop.eup %8907  ;;  %v6673_v15 = vpack.c.bf16 %v14669_v27, %v14666_v12  ;;  %v6455_v1 = vsub.f32 0.0, %v14672_v13  ;;  %v6332_v37 = vpop.f32.mrb[104].mxu1  ;;  %v14682_v54 = vadd.f32 %v6285_v25, %v14593_v57  ;;  %v6644_v60 = vmul.f32 %v8906_v62, %v14613_v36 }
 0x55c   : > { %v6287_v28 = vpop.f32.mrb[107].mxu0  ;;  %v8910_v45 = vpop.eup %8909  ;;  %v14688_v11 = vmul.f32 %v8908_v16, %v14618_v30  ;;  %v6456_v43 = vsub.f32 0.0, %v14676_v32  ;;  %v14692_v6 = vadd.f32 %v6332_v37, %v14591_v33  ;;  %v9278_v12 = vmov 9  }
 0x55d   : > { %v6334_v35 = vpop.f32.mrb[105].mxu1  ;;  %v8912_v49 = vpop.eup %8911  ;;  %v6495_v2 = vmul.f32 1.442695, %v6455_v1  ;;  %v6467_v48 = vsub.f32 0.0, %v14682_v54  ;;  %v14703_v31 = vadd.f32 %v6287_v28, %v14593_v57  ;;  %v6646_v53 = vmul.f32 %v8910_v45, %v14623_v21  ;;  %8460 = vset.pattern.permute.xlu1 %v9278_v12  ;;  %8461 = vset.pattern.permute.xlu0 %v9278_v12 }
 0x55e   : > { %v14697_v55 = vadd.f32 %v6334_v35, %v14591_v33  ;;  %v6336_v44 = vpop.f32.mrb[106].mxu1  ;;  %v8914_v8 = vpop.eup %8913  ;;  %v6675_v30 = vpack.c.bf16 %v14688_v11, %v14685_v59  ;;  %v6497_v39 = vmul.f32 1.442695, %v6456_v43  ;;  %v6457_v9 = vsub.f32 0.0, %v14692_v6  ;;  %7787 = vperm.xlu1 %8460, %v14648_v5   ;;  %7795 = vperm.xlu0 %8461, %v14661_v18  }
 0x55f   : > { %v6338_v3 = vpop.f32.mrb[107].mxu1  ;;  %v8916_v47 = vpop.eup %8915  ;;  %8919 = vpow2.f32 %v6495_v2  ;;  %v6519_v51 = vmul.f32 1.442695, %v6467_v48  ;;  %v6656_v52 = vmul.f32 %v8914_v8, %v14633_v42  ;;  %v6468_v0 = vsub.f32 0.0, %v14703_v31 }
 0x560   : > { %v6458_v23 = vsub.f32 0.0, %v14697_v55  ;;  %v8918_v14 = vpop.eup %8917  ;;  %8921 = vpow2.f32 %v6497_v39  ;;  %v6499_v40 = vmul.f32 1.442695, %v6457_v9  ;;  %v6291_v17 = vpop.f32.mrb[108].mxu0  ;;  %v6655_v38 = vmul.f32 %v8912_v49, %v14630_v29 }
 0x561   : > { %v6658_v20 = vmul.f32 %v8918_v14, %v14641_v22  ;;  %8923 = vpow2.f32 %v6519_v51  ;;  %v6293_v56 = vpop.f32.mrb[109].mxu0  ;;  %v6657_v34 = vmul.f32 %v8916_v47, %v14637_v58  ;;  %v14718_v24 = vadd.f32 %v6336_v44, %v14593_v57 }
 0x562   : > { %v6501_v50 = vmul.f32 1.442695, %v6458_v23  ;;  %8925 = vpow2.f32 %v6499_v40  ;;  %v6295_v42 = vpop.f32.mrb[110].mxu0  ;;  %v14721_v7 = vadd.f32 %v6338_v3, %v14593_v57  ;;  %v6686_v25 = vpack.c.bf16 %v6656_v52, %v6656_v52  ;;  %7791 = vperm.xlu1 %8460, %v14655_v19  }
 0x563   : > { %v6342_v22 = vpop.f32.mrb[108].mxu1  ;;  %v6296_v10 = vpop.f32.mrb[111].mxu0  ;;  %v6521_v36 = vmul.f32 1.442695, %v6468_v0  ;;  %v14724_v21 = vadd.f32 %v6291_v17, %v14627_v46  ;;  %v6688_v16 = vpack.c.bf16 %v6658_v20, %v6658_v20  ;;  %v6469_v29 = vsub.f32 0.0, %v14718_v24  ;;  %v14753_v20 = vld [vmem:[%s15759_s3] sm:$0xff]  }
 0x564   : > { %8927 = vpow2.f32 %v6501_v50  ;;  %v6344_v62 = vpop.f32.mrb[109].mxu1  ;;  %v6470_v58 = vsub.f32 0.0, %v14721_v7  ;;  %v14729_v1 = vadd.f32 %v6293_v56, %v14627_v46  ;;  %v14733_v26 = vadd.f32 %v6342_v22, %v14627_v46 }
 0x565   : > { %v6346_v37 = vpop.f32.mrb[110].mxu1  ;;  %8929 = vpow2.f32 %v6521_v36  ;;  %v6479_v28 = vsub.f32 0.0, %v14724_v21  ;;  %v6674_v43 = vpack.c.bf16 %v6644_v60, %v6632_v4  ;;  %v6685_v35 = vpack.c.bf16 %v6655_v38, %v6655_v38 }
 0x566   : > { %v6347_v45 = vpop.f32.mrb[111].mxu1  ;;  %v6523_v49 = vmul.f32 1.442695, %v6469_v29  ;;  %v6525_v2 = vmul.f32 1.442695, %v6470_v58  ;;  %v14736_v44 = vadd.f32 %v6344_v62, %v14627_v46  ;;  %v6676_v8 = vpack.c.bf16 %v6646_v53, %v6634_v41 }
 0x567   : > { %v6543_v48 = vmul.f32 1.442695, %v6479_v28  ;;  %6757 = vmatprep.subr.bf16.mxu0 %v6674_v43  ;;  %v6725_v39 = vand.u32 %v6686_v25, %v17009_v63  ;;  %v6687_v3 = vpack.c.bf16 %v6657_v34, %v6657_v34  ;;  %v6480_v47 = vsub.f32 0.0, %v14729_v1  ;;  %v14769_v25 = vld [vmem:[%s15759_s3 + $0x8] sm:$0xff]  }
 0x568   : > { %8931 = vpow2.f32 %v6523_v49  ;;  %6758 = vmatpush1.bf16.msra.mxu0 %v6673_v15  ;;  %v6731_v51 = vand.u32 %v6688_v16, %v17009_v63  ;;  %v6481_v4 = vsub.f32 0.0, %v14733_v26  ;;  %6820 = vmatprep.subr.bf16.mxu1 %v6676_v8  ;;  %v6722_v40 = vand.u32 %v6685_v35, %v17009_v63 }
 0x569   : > { %v8920_v9 = vpop.eup %8919  ;;  %8933 = vpow2.f32 %v6525_v2  ;;  %6759 = vmatprep.subr.bf16.mxu0 %v6725_v39  ;;  %6821 = vmatpush1.bf16.msra.mxu1 %v6675_v30  ;;  %v6482_v41 = vsub.f32 0.0, %v14736_v44  ;;  %v6728_v50 = vand.u32 %v6687_v3, %v17009_v63  ;;  %v6545_v59 = vmul.f32 1.442695, %v6480_v47 }
 0x56a   : > { %v8922_v23 = vpop.eup %8921  ;;  %v6563_v14 = vadd.f32 1.0, %v8920_v9  ;;  %8935 = vpow2.f32 %v6543_v48  ;;  %6822 = vmatprep.subr.bf16.mxu1 %v6731_v51  ;;  %v6547_v30 = vmul.f32 1.442695, %v6481_v4  ;;  %v9279_v38 = vmov 8  }
 0x56b   : > { %v8924_v52 = vpop.eup %8923  ;;  %v6564_v17 = vadd.f32 1.0, %v8922_v23  ;;  %v6549_v53 = vmul.f32 1.442695, %v6482_v41  ;;  %8463 = vset.pattern.permute.xlu0 %v9279_v38  ;;  %8462 = vset.pattern.permute.xlu1 %v9279_v38  ;;  %v9280_v58 = vmov 10  }
 0x56c   : > { %v8926_v27 = vpop.eup %8925  ;;  %8937 = vrcp.f32 %v6563_v14  ;;  %v6575_v15 = vadd.f32 1.0, %v8924_v52  ;;  %6760 = vmatpush1.bf16.msra.mxu0 %v6722_v40  ;;  %7144 = vperm.xlu0 %8463, %v14661_v18  }
 0x56d   : > { %v6565_v56 = vadd.f32 1.0, %v8926_v27  ;;  %6823 = vmatpush1.bf16.msra.mxu1 %v6728_v50  ;;  %7136 = vperm.xlu1 %8462, %v14648_v5  }
 0x56e   : > { %v8928_v11 = vpop.eup %8927  ;;  %8939 = vrcp.f32 %v6575_v15 }
 0x56f   : > { %8941 = vrcp.f32 %v6564_v17  ;;  %v8930_v60 = vpop.eup %8929  ;;  %8305 = vmatmul.mubr.msk.bf16.vlgmr.msra.gmra.mrb[120].mxu0 %vm6102_vm4, %v14753_v20  ;;  %v6566_v0 = vadd.f32 1.0, %v8928_v11 }
 0x570   : > { %8943 = vrcp.f32 %v6565_v56  ;;  %v6576_v42 = vadd.f32 1.0, %v8930_v60  ;;  %6799 = vmatprep.mubr.bf16.mxu0 %v16864_v61  ;;  %8308 = vmatmul.mubr.msk.bf16.vlgmr.msra.gmra.mrb[120].mxu1 %vm6102_vm4, %v14753_v20 }
 0x571   : > { %8945 = vpow2.f32 %v6545_v59  ;;  %6862 = vmatprep.mubr.bf16.mxu1 %v16864_v61  ;;  %8465 = vset.pattern.permute.xlu0 %v9280_v58 }
 0x572   : > { %8947 = vpow2.f32 %v6547_v30  ;;  %v8932_v34 = vpop.eup %8931  ;;  %7408 = vperm.xlu0 %8465, %v14661_v18   ;;  %7140 = vperm.xlu1 %8462, %v14655_v19  }
 0x573   : > { %8949 = vrcp.f32 %v6576_v42  ;;  %v8934_v22 = vpop.eup %8933  ;;  %v6577_v10 = vadd.f32 1.0, %v8932_v34 }
 0x574   : > { %8951 = vpow2.f32 %v6549_v53  ;;  %v8936_v36 = vpop.eup %8935  ;;  %v6578_v62 = vadd.f32 1.0, %v8934_v22 }
 0x575   : > { %8953 = vrcp.f32 %v6566_v0  ;;  %v6587_v29 = vadd.f32 1.0, %v8936_v36 }
 0x576   : > { %v8938_v16 = vpop.eup %8937  ;;  %8955 = vrcp.f32 %v6577_v10  ;;  %8464 = vset.pattern.permute.xlu1 %v9280_v58 }
 0x577   : > { %8957 = vrcp.f32 %v6578_v62  ;;  %8306 = vmatmul.mubr.msk.bf16.gmra.mrb[124].mxu0 %vm6102_vm4, %v14769_v25  ;;  %v6635_v45 = vmul.f32 %v8938_v16, %v14672_v13  ;;  %v14785_v13 = vld [vmem:[%s15759_s3 + $0x10] sm:$0xff]   ;;  %7400 = vperm.xlu1 %8464, %v14648_v5  }
 0x578   : > { %v8940_v37 = vpop.eup %8939  ;;  %8959 = vrcp.f32 %v6587_v29  ;;  %6809 = vmatprep.mubr.bf16.mxu0 %v16864_v61  ;;  %8309 = vmatmul.mubr.msk.bf16.gmra.mrb[124].mxu1 %vm6102_vm4, %v14769_v25 }
 0x579   : > { %v8942_v28 = vpop.eup %8941  ;;  %v6647_v43 = vmul.f32 %v8940_v37, %v14682_v54  ;;  %6872 = vmatprep.mubr.bf16.mxu1 %v16864_v61 }
 0x57a   : > { %v8944_v35 = vpop.eup %8943  ;;  %v6636_v9 = vmul.f32 %v8942_v28, %v14676_v32 }
 0x57b   : > { %v8946_v49 = vpop.eup %8945  ;;  %v6677_v2 = vpack.c.bf16 %v6647_v43, %v6635_v45  ;;  %v6637_v52 = vmul.f32 %v8944_v35, %v14692_v6  ;;  %7404 = vperm.xlu1 %8464, %v14655_v19  }
 0x57c   : > { %v8948_v48 = vpop.eup %8947  ;;  %v6588_v18 = vadd.f32 1.0, %v8946_v49 }
 0x57d   : > { %v8950_v54 = vpop.eup %8949  ;;  %v6589_v8 = vadd.f32 1.0, %v8948_v48 }
 0x57e   : > { %v8952_v39 = vpop.eup %8951  ;;  %v6648_v3 = vmul.f32 %v8950_v54, %v14703_v31  ;;  %8961 = vrcp.f32 %v6588_v18 }
 0x57f   : > { %v8954_v47 = vpop.eup %8953  ;;  %8963 = vrcp.f32 %v6589_v8  ;;  %v6590_v51 = vadd.f32 1.0, %v8952_v39  ;;  %8307 = vmatmul.mubr.msk.bf16.gmra.mrb[128].mxu0 %vm6102_vm4, %v14785_v13 }
 0x580   : > { %v8956_v23 = vpop.eup %8955  ;;  %v6678_v14 = vpack.c.bf16 %v6648_v3, %v6636_v9  ;;  %6915 = vmatprep.mubr.bf16.mxu0 %v16864_v61  ;;  %v6638_v32 = vmul.f32 %v8954_v47, %v14697_v55  ;;  %8310 = vmatmul.mubr.msk.bf16.gmra.mrb[128].mxu1 %vm6102_vm4, %v14785_v13 }
 0x581   : > { %v8958_v4 = vpop.eup %8957  ;;  %v6649_v40 = vmul.f32 %v8956_v23, %v14718_v24  ;;  %8965 = vrcp.f32 %v6590_v51  ;;  %6978 = vmatprep.mubr.bf16.mxu1 %v16864_v61 }
 0x582   : > { %v6650_v5 = vmul.f32 %v8958_v4, %v14721_v7  ;;  %6883 = vmatprep.subr.bf16.mxu0 %v6678_v14  ;;  %v8960_v31 = vpop.eup %8959 }
 0x583   : > { %v6679_v17 = vpack.c.bf16 %v6649_v40, %v6637_v52  ;;  %6884 = vmatpush1.bf16.msra.mxu0 %v6677_v2  ;;  %v6659_v6 = vmul.f32 %v8960_v31, %v14724_v21 }
 0x584   : > { %v6680_v12 = vpack.c.bf16 %v6650_v5, %v6638_v32 }
 0x585   : > { %v6689_v27 = vpack.c.bf16 %v6659_v6, %v6659_v6 }
 0x586   : > { %6946 = vmatprep.subr.bf16.mxu1 %v6680_v12 }
 0x587   : > { %6947 = vmatpush1.bf16.msra.mxu1 %v6679_v17 }
 0x588   : > { %v8962_v24 = vpop.eup %8961 }
 0x589   : > { %v8964_v55 = vpop.eup %8963  ;;  %v6660_v7 = vmul.f32 %v8962_v24, %v14729_v1  ;;  %v6734_v1 = vand.u32 %v6689_v27, %v17009_v63 }
 0x58a   : > { %v6661_v15 = vmul.f32 %v8964_v55, %v14733_v26 }
 0x58b   : > { %v8966_v41 = vpop.eup %8965  ;;  %v6690_v50 = vpack.c.bf16 %v6660_v7, %v6660_v7  ;;  %v6383_v56 = vpop.f32.mrb[112].mxu0 }
 0x58c   : > { %v6662_v59 = vmul.f32 %v8966_v41, %v14736_v44  ;;  %v14806_v11 = vadd.f32 %v6383_v56, %v14591_v33  ;;  %v6385_v19 = vpop.f32.mrb[113].mxu0  ;;  %v6691_v30 = vpack.c.bf16 %v6661_v15, %v6661_v15 }
 0x58d   : > { %v14809_v21 = vadd.f32 %v6385_v19, %v14591_v33  ;;  %v6387_v60 = vpop.f32.mrb[114].mxu0  ;;  %v6737_v53 = vand.u32 %v6690_v50, %v17009_v63 }
 0x58e   : > { %v6692_v0 = vpack.c.bf16 %v6662_v59, %v6662_v59  ;;  %v6459_v26 = vsub.f32 0.0, %v14806_v11  ;;  %v14815_v42 = vadd.f32 %v6387_v60, %v14593_v57  ;;  %v6389_v44 = vpop.f32.mrb[115].mxu0  ;;  %v6740_v62 = vand.u32 %v6691_v30, %v17009_v63 }
 0x58f   : > { %v6460_v38 = vsub.f32 0.0, %v14809_v21  ;;  %v14819_v34 = vadd.f32 %v6389_v44, %v14593_v57  ;;  %6885 = vmatprep.subr.bf16.mxu0 %v6737_v53 }
 0x590   : > { %v6503_v22 = vmul.f32 1.442695, %v6459_v26  ;;  %v6471_v10 = vsub.f32 0.0, %v14815_v42  ;;  %6886 = vmatpush1.bf16.msra.mxu0 %v6734_v1  ;;  %v6743_v36 = vand.u32 %v6692_v0, %v17009_v63 }
 0x591   : > { %v6505_v16 = vmul.f32 1.442695, %v6460_v38  ;;  %v6472_v29 = vsub.f32 0.0, %v14819_v34 }
 0x592   : > { %8967 = vpow2.f32 %v6503_v22  ;;  %v6527_v58 = vmul.f32 1.442695, %v6471_v10  ;;  %6948 = vmatprep.subr.bf16.mxu1 %v6743_v36 }
 0x593   : > { %8969 = vpow2.f32 %v6505_v16  ;;  %v6529_v37 = vmul.f32 1.442695, %v6472_v29  ;;  %v6393_v28 = vpop.f32.mrb[116].mxu0  ;;  %6949 = vmatpush1.bf16.msra.mxu1 %v6740_v62  ;;  %8311 = vmatmul.mubr.msk.bf16.vlgmr.msra.gmra.mrb[132].mxu0 %vm6102_vm4, %v14753_v20 }
 0x594   : > { %8971 = vpow2.f32 %v6527_v58  ;;  %v14828_v45 = vadd.f32 %v6393_v28, %v14627_v46  ;;  %v6395_v43 = vpop.f32.mrb[117].mxu0  ;;  %6925 = vmatprep.mubr.bf16.mxu0 %v16864_v61 }
 0x595   : > { %8973 = vpow2.f32 %v6529_v37  ;;  %v14832_v35 = vadd.f32 %v6395_v43, %v14627_v46  ;;  %v6397_v49 = vpop.f32.mrb[118].mxu0 }
 0x596   : > { %v6483_v2 = vsub.f32 0.0, %v14828_v45  ;;  %v6398_v48 = vpop.f32.mrb[119].mxu0  ;;  %8314 = vmatmul.mubr.msk.bf16.vlgmr.msra.gmra.mrb[132].mxu1 %vm6102_vm4, %v14753_v20 }
 0x597   : > { %v6484_v18 = vsub.f32 0.0, %v14832_v35  ;;  %6988 = vmatprep.mubr.bf16.mxu1 %v16864_v61 }
 0x598   : > { %v6551_v54 = vmul.f32 1.442695, %v6483_v2 }
 0x599   : > { %v6553_v8 = vmul.f32 1.442695, %v6484_v18 }
 0x59a   : > { %8975 = vpow2.f32 %v6551_v54 }
 0x59b   : > { %8977 = vpow2.f32 %v6553_v8  ;;  %8312 = vmatmul.mubr.msk.bf16.gmra.mrb[136].mxu0 %vm6102_vm4, %v14769_v25 }
 0x59c   : > { %v8968_v39 = vpop.eup %8967  ;;  %v6434_v9 = vpop.f32.mrb[112].mxu1  ;;  %6935 = vmatprep.mubr.bf16.mxu0 %v16864_v61 }
 0x59d   : > { %v8970_v3 = vpop.eup %8969  ;;  %v6567_v47 = vadd.f32 1.0, %v8968_v39  ;;  %v14843_v51 = vadd.f32 %v6434_v9, %v14591_v33  ;;  %v6436_v23 = vpop.f32.mrb[113].mxu1 }
 0x59e   : > { %v8972_v14 = vpop.eup %8971  ;;  %v6568_v4 = vadd.f32 1.0, %v8970_v3  ;;  %v14846_v52 = vadd.f32 %v6436_v23, %v14591_v33  ;;  %v6438_v40 = vpop.f32.mrb[114].mxu1  ;;  %8315 = vmatmul.mubr.msk.bf16.gmra.mrb[136].mxu1 %vm6102_vm4, %v14769_v25 }
 0x59f   : > { %v8974_v32 = vpop.eup %8973  ;;  %8979 = vrcp.f32 %v6567_v47  ;;  %v6461_v5 = vsub.f32 0.0, %v14843_v51  ;;  %v6579_v31 = vadd.f32 1.0, %v8972_v14  ;;  %v14852_v17 = vadd.f32 %v6438_v40, %v14593_v57  ;;  %v6440_v12 = vpop.f32.mrb[115].mxu1  ;;  %6998 = vmatprep.mubr.bf16.mxu1 %v16864_v61 }
 0x5a0   : > { %8981 = vrcp.f32 %v6568_v4  ;;  %v6462_v6 = vsub.f32 0.0, %v14846_v52  ;;  %v6580_v33 = vadd.f32 1.0, %v8974_v32  ;;  %v14857_v24 = vadd.f32 %v6440_v12, %v14593_v57 }
 0x5a1   : > { %v6507_v55 = vmul.f32 1.442695, %v6461_v5  ;;  %8983 = vrcp.f32 %v6579_v31  ;;  %v6473_v7 = vsub.f32 0.0, %v14852_v17 }
 0x5a2   : > { %v6509_v27 = vmul.f32 1.442695, %v6462_v6  ;;  %8985 = vrcp.f32 %v6580_v33  ;;  %v6474_v15 = vsub.f32 0.0, %v14857_v24 }
 0x5a3   : > { %8987 = vpow2.f32 %v6507_v55  ;;  %v6531_v41 = vmul.f32 1.442695, %v6473_v7  ;;  %8313 = vmatmul.mubr.msk.bf16.gmra.mrb[140].mxu0 %vm6102_vm4, %v14785_v13 }
 0x5a4   : > { %v8976_v50 = vpop.eup %8975  ;;  %8989 = vpow2.f32 %v6509_v27  ;;  %v6533_v56 = vmul.f32 1.442695, %v6474_v15  ;;  %v6444_v59 = vpop.f32.mrb[116].mxu1  ;;  %7041 = vmatprep.mubr.bf16.mxu0 %v16864_v61 }
 0x5a5   : > { %v8978_v57 = vpop.eup %8977  ;;  %8991 = vpow2.f32 %v6531_v41  ;;  %v6591_v19 = vadd.f32 1.0, %v8976_v50  ;;  %v14865_v30 = vadd.f32 %v6444_v59, %v14627_v46  ;;  %v6446_v60 = vpop.f32.mrb[117].mxu1 }
 0x5a6   : > { %8993 = vpow2.f32 %v6533_v56  ;;  %v6592_v53 = vadd.f32 1.0, %v8978_v57  ;;  %v14868_v1 = vadd.f32 %v6446_v60, %v14627_v46  ;;  %v6448_v0 = vpop.f32.mrb[118].mxu1  ;;  %8316 = vmatmul.mubr.msk.bf16.gmra.mrb[140].mxu1 %vm6102_vm4, %v14785_v13 }
 0x5a7   : > { %8995 = vrcp.f32 %v6591_v19  ;;  %v6485_v26 = vsub.f32 0.0, %v14865_v30  ;;  %v6449_v44 = vpop.f32.mrb[119].mxu1  ;;  %7104 = vmatprep.mubr.bf16.mxu1 %v16864_v61 }
 0x5a8   : > { %8997 = vrcp.f32 %v6592_v53  ;;  %v6486_v38 = vsub.f32 0.0, %v14868_v1 }
 0x5a9   : > { %v8980_v22 = vpop.eup %8979  ;;  %v6555_v10 = vmul.f32 1.442695, %v6485_v26 }
 0x5aa   : > { %v8982_v36 = vpop.eup %8981  ;;  %v6557_v62 = vmul.f32 1.442695, %v6486_v38  ;;  %v6639_v29 = vmul.f32 %v8980_v22, %v14806_v11 }
 0x5ab   : > { %v8984_v16 = vpop.eup %8983  ;;  %8999 = vpow2.f32 %v6555_v10  ;;  %v6640_v28 = vmul.f32 %v8982_v36, %v14809_v21 }
 0x5ac   : > { %v8986_v46 = vpop.eup %8985  ;;  %v6651_v58 = vmul.f32 %v8984_v16, %v14815_v42  ;;  %9001 = vpow2.f32 %v6557_v62 }
 0x5ad   : > { %v8988_v37 = vpop.eup %8987  ;;  %v6652_v43 = vmul.f32 %v8986_v46, %v14819_v34 }
 0x5ae   : > { %v8990_v49 = vpop.eup %8989  ;;  %v6569_v2 = vadd.f32 1.0, %v8988_v37  ;;  %v6681_v48 = vpack.c.bf16 %v6651_v58, %v6639_v29 }
 0x5af   : > { %v8992_v18 = vpop.eup %8991  ;;  %v6570_v54 = vadd.f32 1.0, %v8990_v49  ;;  %v6682_v8 = vpack.c.bf16 %v6652_v43, %v6640_v28 }
 0x5b0   : > { %v8994_v39 = vpop.eup %8993  ;;  %9003 = vrcp.f32 %v6569_v2  ;;  %v6581_v9 = vadd.f32 1.0, %v8992_v18 }
 0x5b1   : > { %v8996_v3 = vpop.eup %8995  ;;  %9005 = vrcp.f32 %v6570_v54  ;;  %v6582_v11 = vadd.f32 1.0, %v8994_v39  ;;  %7009 = vmatprep.subr.bf16.mxu0 %v6682_v8 }
 0x5b2   : > { %v8998_v42 = vpop.eup %8997  ;;  %9007 = vrcp.f32 %v6581_v9  ;;  %v6663_v47 = vmul.f32 %v8996_v3, %v14828_v45  ;;  %7010 = vmatpush1.bf16.msra.mxu0 %v6681_v48 }
 0x5b3   : > { %9009 = vrcp.f32 %v6582_v11  ;;  %v6664_v21 = vmul.f32 %v8998_v42, %v14832_v35 }
 0x5b4   : > { %v6693_v34 = vpack.c.bf16 %v6663_v47, %v6663_v47 }
 0x5b5   : > { %v9000_v23 = vpop.eup %8999  ;;  %v6694_v14 = vpack.c.bf16 %v6664_v21, %v6664_v21 }
 0x5b6   : > { %v9002_v4 = vpop.eup %9001  ;;  %v6593_v40 = vadd.f32 1.0, %v9000_v23  ;;  %v6746_v31 = vand.u32 %v6693_v34, %v17009_v63 }
 0x5b7   : > { %v6594_v32 = vadd.f32 1.0, %v9002_v4  ;;  %v6749_v5 = vand.u32 %v6694_v14, %v17009_v63 }
 0x5b8   : > { %9011 = vrcp.f32 %v6593_v40 }
 0x5b9   : > { %9013 = vrcp.f32 %v6594_v32  ;;  %7011 = vmatprep.subr.bf16.mxu0 %v6749_v5 }
 0x5ba   : > { %v9004_v12 = vpop.eup %9003  ;;  %7012 = vmatpush1.bf16.msra.mxu0 %v6746_v31 }
 0x5bb   : > { %v9006_v45 = vpop.eup %9005  ;;  %v6641_v35 = vmul.f32 %v9004_v12, %v14843_v51  ;;  %v14909_v19 = vpop.permute.xlu1 %7704 }
 0x5bc   : > { %v9008_v6 = vpop.eup %9007  ;;  %v6642_v7 = vmul.f32 %v9006_v45, %v14846_v52 }
 0x5bd   : > { %v9010_v33 = vpop.eup %9009  ;;  %v6653_v55 = vmul.f32 %v9008_v6, %v14852_v17  ;;  %8317 = vmatmul.mubr.msk.bf16.vlgmr.msra.gmra.mrb[144].mxu0 %vm6102_vm4, %v14753_v20 }
 0x5be   : > { %v6654_v27 = vmul.f32 %v9010_v33, %v14857_v24  ;;  %7051 = vmatprep.mubr.bf16.mxu0 %v16864_v61 }
 0x5bf   : > { %v6683_v15 = vpack.c.bf16 %v6653_v55, %v6641_v35 }
 0x5c0   : > { %v6684_v41 = vpack.c.bf16 %v6654_v27, %v6642_v7  ;;  %v14917_v53 = vpop.permute.xlu0 %7680 }
 0x5c2   : > { %v9012_v50 = vpop.eup %9011  ;;  %7072 = vmatprep.subr.bf16.mxu1 %v6684_v41 }
 0x5c3   : > { %v9014_v56 = vpop.eup %9013  ;;  %v6665_v59 = vmul.f32 %v9012_v50, %v14865_v30  ;;  %7073 = vmatpush1.bf16.msra.mxu1 %v6683_v15  ;;  %v14911_v30 = vpop.permute.xlu1 %7684 }
 0x5c4   : > { %v6666_v51 = vmul.f32 %v9014_v56, %v14868_v1  ;;  %17010 = vst [vmem:[#allocation34_spill] sm:$0xff] %v14911_v30 }
 0x5c5   : > { %v6695_v17 = vpack.c.bf16 %v6665_v59, %v6665_v59  ;;  %8318 = vmatmul.mubr.msk.bf16.gmra.mrb[148].mxu0 %vm6102_vm4, %v14769_v25 }
 0x5c6   : > { %v6696_v57 = vpack.c.bf16 %v6666_v51, %v6666_v51  ;;  %7061 = vmatprep.mubr.bf16.mxu0 %v16864_v61 }
 0x5c7   : > { %v6752_v24 = vand.u32 %v6695_v17, %v17009_v63  ;;  %v14913_v60 = vpop.permute.xlu1 %7708 }
 0x5c8   : > { %v6755_v52 = vand.u32 %v6696_v57, %v17009_v63  ;;  %17011 = vst [vmem:[#allocation43_spill] sm:$0xff] %v14913_v60 }
 0x5ca   : > { %7074 = vmatprep.subr.bf16.mxu1 %v6755_v52 }
 0x5cb   : > { %7075 = vmatpush1.bf16.msra.mxu1 %v6752_v24 }
 0x5cd   : > { %8319 = vmatmul.mubr.msk.bf16.gmra.mrb[152].mxu0 %vm6102_vm4, %v14785_v13 }
 0x5ce   : > { %8320 = vmatmul.mubr.msk.bf16.vlgmr.msra.gmra.mrb[144].mxu1 %vm6102_vm4, %v14753_v20  ;;  %7859 = vmatprep.mubr.bf16.mxu0 %v16864_v61  ;;  %v14915_v20 = vpop.permute.xlu1 %7740 }
 0x5cf   : > { %7114 = vmatprep.mubr.bf16.mxu1 %v16864_v61 }
 0x5d2   : > { %v14919_v1 = vpop.permute.xlu1 %7744 }
 0x5d3   : > { %17012 = vst [vmem:[#allocation17_spill] sm:$0xff] %v14919_v1 }
 0x5d6   : > { %8321 = vmatmul.mubr.msk.bf16.gmra.mrb[148].mxu1 %vm6102_vm4, %v14769_v25  ;;  %v14921_v25 = vpop.permute.xlu0 %7688 }
 0x5d7   : > { %7124 = vmatprep.mubr.bf16.mxu1 %v16864_v61  ;;  %17013 = vst [vmem:[#allocation42_spill] sm:$0xff] %v14921_v25 }
 0x5da   : > { %v14925_v26 = vpop.permute.xlu0 %7712 }
 0x5db   : > { %17015 = vst [vmem:[#allocation40_spill] sm:$0xff] %v14925_v26 }
 0x5dd   : > { %v14923_v0 = vpop.permute.xlu1 %7787 }
 0x5de   : > { %8322 = vmatmul.mubr.msk.bf16.gmra.mrb[152].mxu1 %vm6102_vm4, %v14785_v13  ;;  %17014 = vst [vmem:[#allocation22_spill] sm:$0xff] %v14923_v0  ;;  %v14929_v44 = vpop.permute.xlu0 %7748 }
 0x5df   : > { %7910 = vmatprep.mubr.bf16.mxu1 %v16864_v61  ;;  %17017 = vst [vmem:[#allocation26_spill] sm:$0xff] %v14929_v44 }
 0x5e1   : > { %v14927_v13 = vpop.permute.xlu1 %7791 }
 0x5e2   : > { %17016 = vst [vmem:[#allocation28_spill] sm:$0xff] %v14927_v13  ;;  %v14933_v22 = vpop.permute.xlu0 %7795 }
 0x5e3   : > { %17018 = vst [vmem:[#allocation46_spill] sm:$0xff] %v14933_v22 }
 0x5eb   : > { %v14967_v14 = vpop.permute.xlu0 %7144 }
 0x5ec   : > { %v14931_v38 = vpop.permute.xlu1 %7136 }
 0x5f1   : > { %v14935_v36 = vpop.permute.xlu1 %7140 }
 0x642   : > { %v6791_v10 = vpop.f32.mrb[120].mxu0 }
 0x643   : > { %v14938_v62 = vadd.f32 %v14931_v38, %v6791_v10  ;;  %v6793_v16 = vpop.f32.mrb[121].mxu0  ;;  %v6854_v29 = vpop.f32.mrb[120].mxu1 }
 0x644   : > { %v14941_v46 = vadd.f32 %v14931_v38, %v6793_v16  ;;  %v6795_v58 = vpop.f32.mrb[122].mxu0  ;;  %v14945_v28 = vadd.f32 %v14931_v38, %v6854_v29  ;;  %v6856_v49 = vpop.f32.mrb[121].mxu1 }
 0x645   : > { %v7183_v37 = vsub.f32 0.0, %v14938_v62  ;;  %v14948_v43 = vadd.f32 %v14935_v36, %v6795_v58  ;;  %v6797_v2 = vpop.f32.mrb[123].mxu0  ;;  %v14952_v18 = vadd.f32 %v14931_v38, %v6856_v49  ;;  %v6858_v8 = vpop.f32.mrb[122].mxu1 }
 0x646   : > { %v7184_v48 = vsub.f32 0.0, %v14941_v46  ;;  %v14955_v54 = vadd.f32 %v14935_v36, %v6797_v2  ;;  %v7185_v9 = vsub.f32 0.0, %v14945_v28  ;;  %v14960_v11 = vadd.f32 %v14935_v36, %v6858_v8  ;;  %v6860_v42 = vpop.f32.mrb[123].mxu1 }
 0x647   : > { %v7219_v39 = vmul.f32 1.442695, %v7183_v37  ;;  %v7195_v3 = vsub.f32 0.0, %v14948_v43  ;;  %v7186_v21 = vsub.f32 0.0, %v14952_v18  ;;  %v14965_v23 = vadd.f32 %v14935_v36, %v6860_v42 }
 0x648   : > { %v7221_v47 = vmul.f32 1.442695, %v7184_v48  ;;  %v7196_v34 = vsub.f32 0.0, %v14955_v54  ;;  %v7223_v4 = vmul.f32 1.442695, %v7185_v9  ;;  %v7197_v32 = vsub.f32 0.0, %v14960_v11 }
 0x649   : > { %9015 = vpow2.f32 %v7219_v39  ;;  %v7243_v40 = vmul.f32 1.442695, %v7195_v3  ;;  %v7225_v5 = vmul.f32 1.442695, %v7186_v21  ;;  %v7198_v12 = vsub.f32 0.0, %v14965_v23 }
 0x64a   : > { %9017 = vpow2.f32 %v7221_v47  ;;  %v7245_v31 = vmul.f32 1.442695, %v7196_v34  ;;  %v6801_v45 = vpop.f32.mrb[124].mxu0  ;;  %v7247_v6 = vmul.f32 1.442695, %v7197_v32 }
 0x64b   : > { %9019 = vpow2.f32 %v7223_v4  ;;  %v14972_v33 = vadd.f32 %v14967_v14, %v6801_v45  ;;  %v6803_v35 = vpop.f32.mrb[125].mxu0  ;;  %v7249_v55 = vmul.f32 1.442695, %v7198_v12  ;;  %v6864_v27 = vpop.f32.mrb[124].mxu1 }
 0x64c   : > { %9021 = vpow2.f32 %v7243_v40  ;;  %v14975_v7 = vadd.f32 %v14967_v14, %v6803_v35  ;;  %v14977_v15 = vpop.f32.mrb[126].mxu0  ;;  %v14981_v50 = vadd.f32 %v14967_v14, %v6864_v27  ;;  %v6866_v56 = vpop.f32.mrb[125].mxu1 }
 0x64d   : > { %9023 = vpow2.f32 %v7225_v5  ;;  %v7207_v41 = vsub.f32 0.0, %v14972_v33  ;;  %v14983_v59 = vpop.f32.mrb[127].mxu0  ;;  %v14987_v17 = vadd.f32 %v14967_v14, %v6866_v56  ;;  %v14989_v57 = vpop.f32.mrb[126].mxu1 }
 0x64e   : > { %9025 = vpow2.f32 %v7245_v31  ;;  %v7208_v51 = vsub.f32 0.0, %v14975_v7  ;;  %17019 = vst [vmem:[#allocation75_spill] sm:$0xff] %v14989_v57  ;;  %v7209_v24 = vsub.f32 0.0, %v14981_v50  ;;  %v14992_v10 = vpop.f32.mrb[127].mxu1 }
 0x64f   : > { %9027 = vpow2.f32 %v7247_v6  ;;  %v7267_v52 = vmul.f32 1.442695, %v7207_v41  ;;  %17020 = vst [vmem:[#allocation31_spill] sm:$0xff] %v14992_v10  ;;  %v7210_v29 = vsub.f32 0.0, %v14987_v17 }
 0x650   : > { %9029 = vpow2.f32 %v7249_v55  ;;  %v7269_v16 = vmul.f32 1.442695, %v7208_v51  ;;  %v7271_v58 = vmul.f32 1.442695, %v7209_v24 }
 0x651   : > { %9031 = vpow2.f32 %v7267_v52  ;;  %v7273_v37 = vmul.f32 1.442695, %v7210_v29 }
 0x652   : > { %9033 = vpow2.f32 %v7269_v16  ;;  %v14995_v49 = vpop.f32.mrb[128].mxu0 }
 0x653   : > { %v9016_v2 = vpop.eup %9015  ;;  %9035 = vpow2.f32 %v7271_v58  ;;  %v14997_v48 = vpop.f32.mrb[129].mxu0 }
 0x654   : > { %v9018_v8 = vpop.eup %9017  ;;  %v7291_v39 = vadd.f32 1.0, %v9016_v2  ;;  %9037 = vpow2.f32 %v7273_v37  ;;  %v14999_v9 = vpop.f32.mrb[128].mxu1 }
 0x655   : > { %v15001_v3 = vpop.f32.mrb[130].mxu0  ;;  %v9020_v42 = vpop.eup %9019  ;;  %v7292_v47 = vadd.f32 1.0, %v9018_v8 }
 0x656   : > { %v15003_v21 = vpop.f32.mrb[129].mxu1  ;;  %v15005_v34 = vpop.f32.mrb[131].mxu0  ;;  %9039 = vrcp.f32 %v7291_v39  ;;  %v7293_v40 = vadd.f32 1.0, %v9020_v42 }
 0x657   : > { %v9022_v4 = vpop.eup %9021  ;;  %v15007_v32 = vpop.f32.mrb[130].mxu1  ;;  %9041 = vrcp.f32 %v7292_v47 }
 0x658   : > { %17021 = vst [vmem:[#allocation14_spill] sm:$0xff] %v15007_v32  ;;  %v9024_v5 = vpop.eup %9023  ;;  %v7303_v31 = vadd.f32 1.0, %v9022_v4  ;;  %v15009_v12 = vpop.f32.mrb[131].mxu1  ;;  %9043 = vrcp.f32 %v7293_v40 }
 0x659   : > { %17022 = vst [vmem:[#allocation62_spill] sm:$0xff] %v15009_v12  ;;  %v9026_v45 = vpop.eup %9025  ;;  %v7294_v6 = vadd.f32 1.0, %v9024_v5  ;;  %v15011_v58 = vpop.permute.xlu1 %7400 }
 0x65a   : > { %v9028_v35 = vpop.eup %9027  ;;  %9045 = vrcp.f32 %v7303_v31  ;;  %v7304_v55 = vadd.f32 1.0, %v9026_v45 }
 0x65b   : > { %v9030_v27 = vpop.eup %9029  ;;  %9047 = vrcp.f32 %v7294_v6  ;;  %v7305_v41 = vadd.f32 1.0, %v9028_v35 }
 0x65c   : > { %v9032_v56 = vpop.eup %9031  ;;  %9049 = vrcp.f32 %v7304_v55  ;;  %v7306_v51 = vadd.f32 1.0, %v9030_v27 }
 0x65d   : > { %v9034_v52 = vpop.eup %9033  ;;  %9051 = vrcp.f32 %v7305_v41  ;;  %v7315_v24 = vadd.f32 1.0, %v9032_v56  ;;  %v15016_v45 = vpop.permute.xlu1 %7404 }
 0x65e   : > { %v9036_v16 = vpop.eup %9035  ;;  %9053 = vrcp.f32 %v7306_v51  ;;  %v7316_v29 = vadd.f32 1.0, %v9034_v52 }
 0x65f   : > { %v9038_v37 = vpop.eup %9037  ;;  %9055 = vrcp.f32 %v7315_v24  ;;  %v7317_v2 = vadd.f32 1.0, %v9036_v16 }
 0x660   : > { %9057 = vrcp.f32 %v7316_v29  ;;  %v7318_v8 = vadd.f32 1.0, %v9038_v37  ;;  %v9040_v39 = vpop.eup %9039 }
 0x661   : > { %9059 = vrcp.f32 %v7317_v2  ;;  %v9042_v42 = vpop.eup %9041  ;;  %v7363_v47 = vmul.f32 %v9040_v39, %v14938_v62 }
 0x662   : > { %9061 = vrcp.f32 %v7318_v8  ;;  %v9044_v4 = vpop.eup %9043  ;;  %v7364_v40 = vmul.f32 %v9042_v42, %v14941_v46 }
 0x663   : > { %v7365_v31 = vmul.f32 %v9044_v4, %v14945_v28  ;;  %v7411_v56 = vmul.f32 %v15011_v58, %v7363_v47 }
 0x664   : > { %v9046_v5 = vpop.eup %9045  ;;  %v15026_v28 = vmul.f32 %v15011_v58, %v7364_v40 }
 0x665   : > { %v9048_v6 = vpop.eup %9047  ;;  %v7375_v35 = vmul.f32 %v9046_v5, %v14948_v43  ;;  %v15029_v24 = vmul.f32 %v15011_v58, %v7365_v31 }
 0x666   : > { %v9050_v55 = vpop.eup %9049  ;;  %v7366_v27 = vmul.f32 %v9048_v6, %v14952_v18  ;;  %v6917_v41 = vpop.f32.mrb[132].mxu0 }
 0x667   : > { %v9052_v51 = vpop.eup %9051  ;;  %v15022_v62 = vadd.f32 %v14931_v38, %v6917_v41  ;;  %v6919_v52 = vpop.f32.mrb[133].mxu0  ;;  %v7423_v46 = vmul.f32 %v15016_v45, %v7375_v35  ;;  %v15032_v16 = vmul.f32 %v9050_v55, %v14955_v54 }
 0x668   : > { %v9054_v43 = vpop.eup %9053  ;;  %v15035_v18 = vmul.f32 %v9052_v51, %v14960_v11  ;;  %v15038_v29 = vadd.f32 %v14931_v38, %v6919_v52  ;;  %v6921_v37 = vpop.f32.mrb[134].mxu0  ;;  %v15041_v2 = vmul.f32 %v15011_v58, %v7366_v27 }
 0x669   : > { %v9056_v8 = vpop.eup %9055  ;;  %v15044_v39 = vmul.f32 %v9054_v43, %v14965_v23  ;;  %v7187_v42 = vsub.f32 0.0, %v15022_v62  ;;  %v6980_v47 = vpop.f32.mrb[132].mxu1  ;;  %v15048_v54 = vadd.f32 %v14935_v36, %v6921_v37  ;;  %v15050_v11 = vadd.f32 %v7423_v46, %v7411_v56 }
 0x66a   : > { %v6923_v4 = vpop.f32.mrb[135].mxu0  ;;  %v9058_v40 = vpop.eup %9057  ;;  %v7387_v5 = vmul.f32 %v9056_v8, %v14972_v33  ;;  %v7188_v31 = vsub.f32 0.0, %v15038_v29  ;;  %v15055_v6 = vadd.f32 %v14931_v38, %v6980_v47 }
 0x66b   : > { %v6982_v35 = vpop.f32.mrb[133].mxu1  ;;  %v15058_v23 = vadd.f32 %v14935_v36, %v6923_v4  ;;  %v9060_v55 = vpop.eup %9059  ;;  %v15061_v27 = vmul.f32 %v9058_v40, %v14975_v7  ;;  %v7227_v41 = vmul.f32 1.442695, %v7187_v42  ;;  %v7199_v56 = vsub.f32 0.0, %v15048_v54 }
 0x66c   : > { %v15065_v51 = vadd.f32 %v14931_v38, %v6982_v35  ;;  %v6984_v33 = vpop.f32.mrb[134].mxu1  ;;  %v9062_v52 = vpop.eup %9061  ;;  %v15068_v46 = vmul.f32 %v9060_v55, %v14981_v50  ;;  %v7229_v43 = vmul.f32 1.442695, %v7188_v31  ;;  %v7189_v37 = vsub.f32 0.0, %v15055_v6 }
 0x66d   : > { %v7200_v8 = vsub.f32 0.0, %v15058_v23  ;;  %v6986_v47 = vpop.f32.mrb[135].mxu1  ;;  %v15073_v7 = vmul.f32 %v9062_v52, %v14987_v17  ;;  %9063 = vpow2.f32 %v7227_v41  ;;  %v7251_v42 = vmul.f32 1.442695, %v7199_v56  ;;  %v15076_v40 = vpop.permute.xlu0 %7408 }
 0x66e   : > { %v7190_v4 = vsub.f32 0.0, %v15065_v51  ;;  %9065 = vpow2.f32 %v7229_v43  ;;  %v7231_v35 = vmul.f32 1.442695, %v7189_v37  ;;  %v15079_v50 = vadd.f32 %v14935_v36, %v6984_v33  ;;  %v6927_v31 = vpop.f32.mrb[136].mxu0 }
 0x66f   : > { %v7253_v63 = vmul.f32 1.442695, %v7200_v8  ;;  %9067 = vpow2.f32 %v7251_v42  ;;  %v15082_v22 = vadd.f32 %v14935_v36, %v6986_v47  ;;  %v15085_v17 = vadd.f32 %v14967_v14, %v6927_v31  ;;  %v6929_v41 = vpop.f32.mrb[137].mxu0 }
 0x670   : > { %v7233_v55 = vmul.f32 1.442695, %v7190_v4  ;;  %9069 = vpow2.f32 %v7231_v35  ;;  %v7201_v56 = vsub.f32 0.0, %v15079_v50  ;;  %v15089_v52 = vadd.f32 %v14967_v14, %v6929_v41  ;;  %v15091_v43 = vpop.f32.mrb[138].mxu0 }
 0x671   : > { %v15094_v33 = vmul.f32 %v15076_v40, %v7387_v5  ;;  %v7202_v37 = vsub.f32 0.0, %v15082_v22  ;;  %v7211_v8 = vsub.f32 0.0, %v15085_v17  ;;  %v6990_v47 = vpop.f32.mrb[136].mxu1  ;;  %v15100_v4 = vpop.f32.mrb[139].mxu0  ;;  %v15110_v61 = vadd.f32 %v15091_v43, %v14977_v15 }
 0x672   : > { %9071 = vpow2.f32 %v7233_v55  ;;  %v7255_v35 = vmul.f32 1.442695, %v7201_v56  ;;  %v7212_v31 = vsub.f32 0.0, %v15089_v52  ;;  %v15104_v41 = vadd.f32 %v14967_v14, %v6990_v47  ;;  %v6992_v5 = vpop.f32.mrb[137].mxu1 }
 0x673   : > { %9073 = vpow2.f32 %v7253_v63  ;;  %v7257_v13 = vmul.f32 1.442695, %v7202_v37  ;;  %v7275_v55 = vmul.f32 1.442695, %v7211_v8  ;;  %v15112_v42 = vpop.f32.mrb[138].mxu1  ;;  %v15116_v44 = vadd.f32 %v14967_v14, %v6992_v5 }
 0x674   : > { %17023 = vst [vmem:[#allocation113_spill] sm:$0xff] %v15112_v42  ;;  %9075 = vpow2.f32 %v7255_v35  ;;  %v7277_v63 = vmul.f32 1.442695, %v7212_v31  ;;  %v7213_v56 = vsub.f32 0.0, %v15104_v41  ;;  %v15118_v47 = vpop.f32.mrb[139].mxu1  ;;  %v15126_v0 = vadd.f32 %v15100_v4, %v14983_v59 }
 0x675   : > { %17024 = vst [vmem:[#allocation30_spill] sm:$0xff] %v15118_v47  ;;  %9077 = vpow2.f32 %v7257_v13  ;;  %v7214_v31 = vsub.f32 0.0, %v15116_v44  ;;  %v15137_v8 = vadd.f32 %v15112_v42, %v14989_v57  ;;  %v15149_v42 = vadd.f32 %v15118_v47, %v14992_v10 }
 0x676   : > { %9079 = vpow2.f32 %v7275_v55  ;;  %v7279_v35 = vmul.f32 1.442695, %v7213_v56  ;;  %v15131_v26 = vpop.f32.mrb[140].mxu0 }
 0x677   : > { %17025 = vst [vmem:[#allocation50_spill] sm:$0xff] %v15131_v26  ;;  %v9064_v13 = vpop.eup %9063  ;;  %9081 = vpow2.f32 %v7277_v63  ;;  %17026 = vst [vmem:[#allocation114_spill] sm:$0xff] %v15137_v8  ;;  %v15141_v56 = vpop.f32.mrb[141].mxu0  ;;  %v7281_v5 = vmul.f32 1.442695, %v7214_v31 }
 0x678   : > { %17027 = vst [vmem:[#allocation29_spill] sm:$0xff] %v15141_v56  ;;  %v9066_v25 = vpop.eup %9065  ;;  %v7295_v60 = vadd.f32 1.0, %v9064_v13  ;;  %9083 = vpow2.f32 %v7279_v35  ;;  %v15145_v63 = vpop.f32.mrb[142].mxu0  ;;  %17028 = vst [vmem:[#allocation51_spill] sm:$0xff] %v15149_v42  ;;  %v15171_v57 = vadd.f32 %v15141_v56, %v14997_v48 }
 0x679   : > { %v9068_v30 = vpop.eup %9067  ;;  %v7296_v37 = vadd.f32 1.0, %v9066_v25  ;;  %v15155_v13 = vpop.f32.mrb[140].mxu1  ;;  %v15161_v25 = vadd.f32 %v15131_v26, %v14995_v49 }
 0x67a   : > { %v15157_v35 = vpop.f32.mrb[143].mxu0  ;;  %v9070_v31 = vpop.eup %9069  ;;  %9085 = vrcp.f32 %v7295_v60  ;;  %v7307_v1 = vadd.f32 1.0, %v9068_v30  ;;  %17031 = vst [vmem:[#allocation19_spill] sm:$0xff] %v15171_v57  ;;  %v15183_v8 = vadd.f32 %v15155_v13, %v14999_v9 }
 0x67b   : > { %17029 = vst [vmem:[#allocation124_spill] sm:$0xff] %v15157_v35  ;;  %17030 = vst [vmem:[#allocation125_spill] sm:$0xff] %v15161_v25  ;;  %v15165_v47 = vpop.f32.mrb[141].mxu1  ;;  %9087 = vrcp.f32 %v7296_v37  ;;  %v7297_v10 = vadd.f32 1.0, %v9070_v31 }
 0x67c   : > { %v9072_v55 = vpop.eup %9071  ;;  %v15173_v30 = vpop.f32.mrb[142].mxu1  ;;  %9089 = vrcp.f32 %v7307_v1  ;;  %17034 = vst [vmem:[#allocation45_spill] sm:$0xff] %v15183_v8  ;;  %v15199_v57 = vadd.f32 %v15165_v47, %v15003_v21 }
 0x67d   : > { %17032 = vst [vmem:[#allocation76_spill] sm:$0xff] %v15173_v30  ;;  %v9074_v60 = vpop.eup %9073  ;;  %v7298_v25 = vadd.f32 1.0, %v9072_v55  ;;  %v15179_v37 = vpop.f32.mrb[143].mxu1  ;;  %9091 = vrcp.f32 %v7297_v10  ;;  %v15191_v55 = vadd.f32 %v15145_v63, %v15001_v3  ;;  %v15215_v1 = vadd.f32 %v15173_v30, %v15007_v32 }
 0x67e   : > { %17033 = vst [vmem:[#allocation48_spill] sm:$0xff] %v15179_v37  ;;  %v7308_v31 = vadd.f32 1.0, %v9074_v60  ;;  %v9076_v56 = vpop.eup %9075  ;;  %17036 = vst [vmem:[#allocation23_spill] sm:$0xff] %v15199_v57 }
 0x67f   : > { %9093 = vrcp.f32 %v7298_v25  ;;  %17035 = vst [vmem:[#allocation47_spill] sm:$0xff] %v15191_v55  ;;  %v9078_v60 = vpop.eup %9077  ;;  %v7309_v26 = vadd.f32 1.0, %v9076_v56  ;;  %v15207_v56 = vadd.f32 %v15157_v35, %v15005_v34  ;;  %17038 = vst [vmem:[#allocation122_spill] sm:$0xff] %v15215_v1  ;;  %v7436_v55 = vmul.f32 %v15076_v40, %v15061_v27 }
 0x680   : > { %9095 = vrcp.f32 %v7308_v31  ;;  %v9080_v25 = vpop.eup %9079  ;;  %v7310_v8 = vadd.f32 1.0, %v9078_v60 }
 0x681   : > { %9097 = vpow2.f32 %v7281_v5  ;;  %v9082_v10 = vpop.eup %9081  ;;  %v7319_v31 = vadd.f32 1.0, %v9080_v25  ;;  %17037 = vst [vmem:[#allocation126_spill] sm:$0xff] %v15207_v56  ;;  %v7424_v5 = vmul.f32 %v15016_v45, %v15032_v16  ;;  %v7437_v16 = vmul.f32 %v15076_v40, %v15068_v46 }
 0x682   : > { %9099 = vrcp.f32 %v7309_v26  ;;  %v9084_v57 = vpop.eup %9083  ;;  %v7320_v60 = vadd.f32 1.0, %v9082_v10  ;;  %v7448_v10 = vsel %vm5354_vm11, %v15094_v33, 0.0  ;;  %v7425_v33 = vmul.f32 %v15016_v45, %v15035_v18 }
 0x683   : > { %9101 = vrcp.f32 %v7310_v8  ;;  %v7321_v26 = vadd.f32 1.0, %v9084_v57  ;;  %v15223_v8 = vadd.f32 %v15179_v37, %v15009_v12  ;;  %v7449_v25 = vadd.f32 %v7448_v10, %v15050_v11 }
 0x684   : > { %9103 = vrcp.f32 %v7319_v31  ;;  %v9086_v56 = vpop.eup %9085 }
 0x685   : > { %9105 = vrcp.f32 %v7320_v60  ;;  %17039 = vst [vmem:[#allocation61_spill] sm:$0xff] %v15223_v8  ;;  %v9088_v31 = vpop.eup %9087  ;;  %v7367_v57 = vmul.f32 %v9086_v56, %v15022_v62  ;;  %v7456_v8 = vadd.f32 %v7424_v5, %v15026_v28  ;;  %v7450_v11 = vrot.slane %v7449_v25, 4 }
 0x686   : > { %9107 = vrcp.f32 %v7321_v26  ;;  %v9090_v60 = vpop.eup %9089  ;;  %v7368_v42 = vmul.f32 %v9088_v31, %v15038_v29  ;;  %v7457_v26 = vsel %vm5354_vm11, %v7436_v55, 0.0  ;;  %v7465_v5 = vadd.f32 %v7425_v33, %v15029_v24 }
 0x687   : > { %v9092_v37 = vpop.eup %9091  ;;  %v7379_v62 = vmul.f32 %v9090_v60, %v15048_v54  ;;  %v7415_v56 = vmul.f32 %v15011_v58, %v7367_v57  ;;  %v7458_v28 = vadd.f32 %v7457_v26, %v7456_v8  ;;  %v7451_v12 = vadd.f32 %v7450_v11, %v7449_v25 }
 0x688   : > { %v7369_v10 = vmul.f32 %v9092_v37, %v15055_v6  ;;  %v7416_v29 = vmul.f32 %v15011_v58, %v7368_v42  ;;  %v7466_v54 = vsel %vm5354_vm11, %v7437_v16, 0.0 }
 0x689   : > { %v9094_v27 = vpop.eup %9093  ;;  %v7427_v46 = vmul.f32 %v15016_v45, %v7379_v62  ;;  %v7459_v55 = vrot.slane %v7458_v28, 4  ;;  %v7467_v6 = vadd.f32 %v7466_v54, %v7465_v5  ;;  %v7452_v8 = vrot.slane %v7451_v12, 2 }
 0x68a   : > { %v9096_v18 = vpop.eup %9095  ;;  %v7370_v31 = vmul.f32 %v9094_v27, %v15065_v51  ;;  %v7417_v1 = vmul.f32 %v15011_v58, %v7369_v10  ;;  %v15258_v10 = vmul.f32 %v15016_v45, %v15044_v39 }
 0x68b   : > { %v9098_v57 = vpop.eup %9097  ;;  %v7380_v60 = vmul.f32 %v9096_v18, %v15058_v23  ;;  %v7483_v26 = vadd.f32 %v7427_v46, %v7415_v56  ;;  %v7460_v16 = vadd.f32 %v7459_v55, %v7458_v28  ;;  %v7468_v62 = vrot.slane %v7467_v6, 4 }
 0x68c   : > { %v9100_v37 = vpop.eup %9099  ;;  %v7322_v42 = vadd.f32 1.0, %v9098_v57  ;;  %v15251_v24 = vmul.f32 %v15011_v58, %v7370_v31  ;;  %v7453_v27 = vadd.f32 %v7452_v8, %v7451_v12 }
 0x68d   : > { %v9102_v51 = vpop.eup %9101  ;;  %v7381_v33 = vmul.f32 %v9100_v37, %v15079_v50  ;;  %v7428_v25 = vmul.f32 %v15016_v45, %v7380_v60  ;;  %v7461_v18 = vrot.slane %v7460_v16, 2  ;;  %v7469_v57 = vadd.f32 %v7468_v62, %v7467_v6 }
 0x68e   : > { %v9104_v11 = vpop.eup %9103  ;;  %v7382_v23 = vmul.f32 %v9102_v51, %v15082_v22  ;;  %9109 = vrcp.f32 %v7322_v42  ;;  %v7454_v54 = vrot.slane %v7453_v27, 1 }
 0x68f   : > { %v9106_v56 = vpop.eup %9105  ;;  %v7391_v5 = vmul.f32 %v9104_v11, %v15085_v17  ;;  %v7492_v31 = vadd.f32 %v7428_v25, %v7416_v29  ;;  %v7429_v50 = vmul.f32 %v15016_v45, %v7381_v33  ;;  %v7462_v55 = vadd.f32 %v7461_v18, %v7460_v16 }
 0x690   : > { %v9108_v46 = vpop.eup %9107  ;;  %v7392_v28 = vmul.f32 %v9106_v56, %v15089_v52  ;;  %v15264_v22 = vmul.f32 %v15016_v45, %v7382_v23  ;;  %v7043_v60 = vpop.f32.mrb[144].mxu0  ;;  %v7455_v42 = vadd.f32 %v7454_v54, %v7453_v27  ;;  %v7470_v52 = vrot.slane %v7469_v57, 2  ;;  %v17040_v23 = vld [vmem:[#allocation18_spill] sm:$0xff] }
 0x691   : > { %v7393_v12 = vmul.f32 %v9108_v46, %v15104_v41  ;;  %v7439_v39 = vmul.f32 %v15076_v40, %v7391_v5  ;;  %v7501_v37 = vadd.f32 %v7429_v50, %v7417_v1  ;;  %v15269_v17 = vadd.f32 %v14931_v38, %v7043_v60  ;;  %v7045_v29 = vpop.f32.mrb[145].mxu0 }
 0x692   : > { %v7440_v8 = vmul.f32 %v15076_v40, %v7392_v28  ;;  %v15273_v6 = vadd.f32 %v14931_v38, %v7045_v29  ;;  %v7047_v51 = vpop.f32.mrb[146].mxu0  ;;  %v7463_v41 = vrot.slane %v7462_v55, 1  ;;  %v15282_v27 = vmul.f32 %v7455_v42, %v17040_v23 }
 0x693   : > { %v7484_v33 = vsel %vm5354_vm11, %v7439_v39, 0.0  ;;  %v7441_v25 = vmul.f32 %v15076_v40, %v7393_v12  ;;  %v7191_v16 = vsub.f32 0.0, %v15269_v17  ;;  %v15279_v1 = vadd.f32 %v14935_v36, %v7047_v51  ;;  %v7049_v62 = vpop.f32.mrb[147].mxu0 }
 0x694   : > { %v7485_v11 = vadd.f32 %v7484_v33, %v7483_v26  ;;  %v7192_v56 = vsub.f32 0.0, %v15273_v6  ;;  %v15286_v5 = vadd.f32 %v14935_v36, %v7049_v62  ;;  %v7464_v18 = vadd.f32 %v7463_v41, %v7462_v55  ;;  %v17041_v26 = vld [vmem:[#allocation13_spill] sm:$0xff] }
 0x695   : > { %v7493_v50 = vsel %vm5354_vm11, %v7440_v8, 0.0  ;;  %v7235_v46 = vmul.f32 1.442695, %v7191_v16  ;;  %v7203_v28 = vsub.f32 0.0, %v15279_v1  ;;  %v7471_v42 = vadd.f32 %v7470_v52, %v7469_v57 }
 0x696   : > { %v7486_v54 = vrot.slane %v7485_v11, 4  ;;  %v7494_v12 = vadd.f32 %v7493_v50, %v7492_v31  ;;  %v7237_v60 = vmul.f32 1.442695, %v7192_v56  ;;  %v7204_v39 = vsub.f32 0.0, %v15286_v5 }
 0x697   : > { %v15292_v29 = vmul.f32 %v7464_v18, %v17041_v26  ;;  %9111 = vpow2.f32 %v7235_v46  ;;  %v7259_v33 = vmul.f32 1.442695, %v7203_v28  ;;  %v7472_v16 = vrot.slane %v7471_v42, 1 }
 0x698   : > { %v9110_v51 = vpop.eup %9109  ;;  %v7487_v62 = vadd.f32 %v7486_v54, %v7485_v11  ;;  %v7495_v23 = vrot.slane %v7494_v12, 4  ;;  %9113 = vpow2.f32 %v7237_v60  ;;  %v7261_v8 = vmul.f32 1.442695, %v7204_v39  ;;  %v7053_v41 = vpop.f32.mrb[148].mxu0 }
 0x699   : > { %v7394_v55 = vmul.f32 %v9110_v51, %v15116_v44  ;;  %9115 = vpow2.f32 %v7259_v33  ;;  %v15296_v31 = vadd.f32 %v14967_v14, %v7053_v41  ;;  %v7055_v50 = vpop.f32.mrb[149].mxu0  ;;  %v7473_v52 = vadd.f32 %v7472_v16, %v7471_v42  ;;  %v17042_v51 = vld [vmem:[#allocation24_spill] sm:$0xff] }
 0x69a   : > { %v7488_v56 = vrot.slane %v7487_v62, 2  ;;  %v7496_v18 = vadd.f32 %v7495_v23, %v7494_v12  ;;  %9117 = vpow2.f32 %v7261_v8  ;;  %v15299_v57 = vadd.f32 %v14967_v14, %v7055_v50  ;;  %v7057_v46 = vpop.f32.mrb[150].mxu0 }
 0x69b   : > { %v7502_v11 = vsel %vm5354_vm11, %v7441_v25, 0.0  ;;  %v7215_v44 = vsub.f32 0.0, %v15296_v31  ;;  %v15303_v39 = vpop.f32.mrb[151].mxu0  ;;  %v15307_v33 = vmul.f32 %v7473_v52, %v17042_v51  ;;  %v17043_v12 = vmin.f32 %v14977_v15, %v15091_v43 }
 0x69c   : > { %v7489_v28 = vadd.f32 %v7488_v56, %v7487_v62  ;;  %v7497_v54 = vrot.slane %v7496_v18, 2  ;;  %v7503_v60 = vadd.f32 %v7502_v11, %v7501_v37  ;;  %v7216_v26 = vsub.f32 0.0, %v15299_v57 }
 0x69d   : > { %v7595_v23 = vmin.f32 %v17043_v12, %v7057_v46  ;;  %v17044_v25 = vmax.f32 %v14977_v15, %v15091_v43  ;;  %v7283_v8 = vmul.f32 1.442695, %v7215_v44  ;;  %v7643_v56 = vadd.f32 %v15110_v61, %v7057_v46 }
 0x69e   : > { %v7490_v41 = vrot.slane %v7489_v28, 1  ;;  %v7498_v62 = vadd.f32 %v7497_v54, %v7496_v18  ;;  %v7504_v16 = vrot.slane %v7503_v60, 4  ;;  %v7285_v37 = vmul.f32 1.442695, %v7216_v26  ;;  %v17045_v54 = vld [vmem:[#allocation39_spill] sm:$0xff] }
 0x69f   : > { %v7619_v42 = vmax.f32 %v17044_v25, %v7057_v46  ;;  %v15317_v50 = vmul.f32 %v14917_v53, %v7595_v23  ;;  %9119 = vpow2.f32 %v7283_v8  ;;  %v7655_v15 = vsub.f32 %v7643_v56, %v7595_v23 }
 0x6a0   : > { %v7491_v11 = vadd.f32 %v7490_v41, %v7489_v28  ;;  %v7499_v51 = vrot.slane %v7498_v62, 1  ;;  %v7505_v12 = vadd.f32 %v7504_v16, %v7503_v60  ;;  %9121 = vpow2.f32 %v7285_v37  ;;  %v15327_v44 = vpop.f32.mrb[152].mxu0 }
 0x6a1   : > { %v15320_v52 = vmul.f32 %v14915_v20, %v7619_v42  ;;  %v7438_v43 = vmul.f32 %v15076_v40, %v15073_v7  ;;  %v15325_v18 = vmul.f32 %v15076_v40, %v7394_v55  ;;  %v9112_v61 = vpop.eup %9111  ;;  %v7106_v46 = vpop.f32.mrb[144].mxu1  ;;  %v7474_v28 = vadd.f32 %v15258_v10, %v15041_v2  ;;  %v17046_v10 = vld [vmem:[#allocation37_spill] sm:$0xff] }
 0x6a2   : > { %v7559_v26 = vmul.f32 %v7491_v11, %v17045_v54  ;;  %v7500_v25 = vadd.f32 %v7499_v51, %v7498_v62  ;;  %v7506_v30 = vrot.slane %v7505_v12, 2  ;;  %v15332_v60 = vpop.f32.mrb[153].mxu0  ;;  %v9114_v23 = vpop.eup %9113  ;;  %v7299_v8 = vadd.f32 1.0, %v9112_v61 }
 0x6a3   : > { %v15335_v7 = vadd.f32 %v14931_v38, %v7106_v46  ;;  %v7108_v55 = vpop.f32.mrb[145].mxu1  ;;  %v7667_v41 = vsub.f32 %v7655_v15, %v7619_v42  ;;  %v7475_v16 = vsel %vm5354_vm11, %v7438_v43, 0.0  ;;  %v15338_v37 = vpop.f32.mrb[154].mxu0  ;;  %v7300_v11 = vadd.f32 1.0, %v9114_v23 }
 0x6a4   : > { %v9116_v56 = vpop.eup %9115  ;;  %v15341_v62 = vadd.f32 %v14931_v38, %v7108_v55  ;;  %v7110_v51 = vpop.f32.mrb[146].mxu1  ;;  %v15344_v2 = vadd.f32 %v7559_v26, %v15282_v27  ;;  %v7560_v61 = vmul.f32 %v7500_v25, %v17046_v10  ;;  %9123 = vrcp.f32 %v7299_v8 }
 0x6a5   : > { %v15347_v54 = vpop.f32.mrb[155].mxu0  ;;  %v9118_v46 = vpop.eup %9117  ;;  %v7193_v42 = vsub.f32 0.0, %v15335_v7  ;;  %v7311_v15 = vadd.f32 1.0, %v9116_v56  ;;  %v15351_v43 = vadd.f32 %v14935_v36, %v7110_v51  ;;  %9125 = vrcp.f32 %v7300_v11 }
 0x6a6   : > { %v7112_v23 = vpop.f32.mrb[147].mxu1  ;;  %v7194_v38 = vsub.f32 0.0, %v15341_v62  ;;  %v7312_v55 = vadd.f32 1.0, %v9118_v46  ;;  %v15359_v8 = vadd.f32 %v7560_v61, %v15292_v29  ;;  %v7507_v51 = vadd.f32 %v7506_v30, %v7505_v12 }
 0x6a7   : > { %v15355_v27 = vadd.f32 %v14935_v36, %v7112_v23  ;;  %v7239_v26 = vmul.f32 1.442695, %v7193_v42  ;;  %9127 = vrcp.f32 %v7311_v15  ;;  %v7205_v25 = vsub.f32 0.0, %v15351_v43 }
 0x6a8   : > { %v7241_v10 = vmul.f32 1.442695, %v7194_v38  ;;  %9129 = vrcp.f32 %v7312_v55  ;;  %v7715_v32 = vmul.f32 %v14909_v19, %v7667_v41  ;;  %v7476_v46 = vadd.f32 %v7475_v16, %v7474_v28 }
 0x6a9   : > { %v7206_v56 = vsub.f32 0.0, %v15355_v27  ;;  %9131 = vpow2.f32 %v7239_v26  ;;  %v7263_v11 = vmul.f32 1.442695, %v7205_v25  ;;  %v9120_v35 = vpop.eup %9119  ;;  %v7116_v42 = vpop.f32.mrb[148].mxu1  ;;  %v7508_v15 = vrot.slane %v7507_v51, 1 }
 0x6aa   : > { %9133 = vpow2.f32 %v7241_v10  ;;  %v7510_v23 = vadd.f32 %v15264_v22, %v15251_v24  ;;  %v9122_v29 = vpop.eup %9121  ;;  %v7323_v61 = vadd.f32 1.0, %v9120_v35  ;;  %v15366_v38 = vadd.f32 %v14967_v14, %v7116_v42  ;;  %v7118_v12 = vpop.f32.mrb[149].mxu1 }
 0x6ab   : > { %v7265_v36 = vmul.f32 1.442695, %v7206_v56  ;;  %9135 = vpow2.f32 %v7263_v11  ;;  %v7727_v30 = vadd.f32 %v7715_v32, %v15317_v50  ;;  %v7324_v41 = vadd.f32 1.0, %v9122_v29  ;;  %v15372_v55 = vpop.f32.mrb[150].mxu1  ;;  %v17048_v32 = vld [vmem:[#allocation55_spill] sm:$0xff] }
 0x6ac   : > { %v7509_v28 = vadd.f32 %v7508_v15, %v7507_v51  ;;  %v15370_v16 = vadd.f32 %v14967_v14, %v7118_v12  ;;  %v7217_v24 = vsub.f32 0.0, %v15366_v38  ;;  %v7477_v35 = vrot.slane %v7476_v46, 4  ;;  %v15378_v26 = vpop.f32.mrb[151].mxu1 }
 0x6ad   : > { %9137 = vpow2.f32 %v7265_v36  ;;  %v15376_v22 = vadd.f32 %v15320_v52, %v7727_v30  ;;  %v7511_v14 = vsel %vm5354_vm11, %v15325_v18, 0.0  ;;  %v17049_v52 = vmin.f32 %v14983_v59, %v15100_v4 }
 0x6ae   : > { %9139 = vrcp.f32 %v7323_v61  ;;  %v7561_v50 = vmul.f32 %v7509_v28, %v17048_v32  ;;  %v7218_v25 = vsub.f32 0.0, %v15370_v16  ;;  %v9124_v10 = vpop.eup %9123  ;;  %v7287_v56 = vmul.f32 1.442695, %v7217_v24 }
 0x6af   : > { %17047 = vst [vmem:[#allocation49_spill] sm:$0xff] %v15376_v22  ;;  %9141 = vrcp.f32 %v7324_v41  ;;  %v7478_v51 = vadd.f32 %v7477_v35, %v7476_v46  ;;  %v7512_v11 = vadd.f32 %v7511_v14, %v7510_v23  ;;  %v7596_v36 = vmin.f32 %v17049_v52, %v15303_v39  ;;  %v9126_v42 = vpop.eup %9125 }
 0x6b0   : > { %v7371_v15 = vmul.f32 %v9124_v10, %v15269_v17  ;;  %v15390_v29 = vadd.f32 %v7561_v50, %v15307_v33  ;;  %v7289_v61 = vmul.f32 1.442695, %v7218_v25  ;;  %v17050_v18 = vmax.f32 %v14983_v59, %v15100_v4 }
 0x6b1   : > { %v9128_v46 = vpop.eup %9127  ;;  %v7372_v23 = vmul.f32 %v9126_v42, %v15273_v6  ;;  %9143 = vpow2.f32 %v7287_v56  ;;  %v7479_v12 = vrot.slane %v7478_v51, 2  ;;  %v7513_v41 = vrot.slane %v7512_v11, 4  ;;  %v15403_v35 = vpop.f32.mrb[152].mxu1 }
 0x6b2   : > { %v15396_v30 = vmax.f32 %v17050_v18, %v15303_v39  ;;  %v9130_v28 = vpop.eup %9129  ;;  %v7419_v24 = vmul.f32 %v15011_v58, %v7371_v15  ;;  %v7383_v17 = vmul.f32 %v9128_v46, %v15279_v1  ;;  %9145 = vpow2.f32 %v7289_v61  ;;  %v15407_v25 = vpop.f32.mrb[153].mxu1 }
 0x6b3   : > { %v7644_v33 = vadd.f32 %v15126_v0, %v15303_v39  ;;  %v9132_v59 = vpop.eup %9131  ;;  %v7420_v4 = vmul.f32 %v15011_v58, %v7372_v23  ;;  %v7384_v32 = vmul.f32 %v9130_v28, %v15286_v5  ;;  %v7480_v6 = vadd.f32 %v7479_v12, %v7478_v51  ;;  %v15411_v42 = vpop.f32.mrb[154].mxu1 }
 0x6b4   : > { %v7514_v50 = vadd.f32 %v7513_v41, %v7512_v11  ;;  %v9134_v14 = vpop.eup %9133  ;;  %v7301_v10 = vadd.f32 1.0, %v9132_v59  ;;  %v7431_v56 = vmul.f32 %v15016_v45, %v7383_v17  ;;  %v7692_v52 = vmul.f32 %v14917_v53, %v7596_v36  ;;  %v15414_v5 = vpop.f32.mrb[155].mxu1 }
 0x6b5   : > { %v7656_v1 = vsub.f32 %v7644_v33, %v7596_v36  ;;  %v9136_v0 = vpop.eup %9135  ;;  %v7302_v39 = vadd.f32 1.0, %v9134_v14  ;;  %v7432_v15 = vmul.f32 %v15016_v45, %v7384_v32  ;;  %v7481_v61 = vrot.slane %v7480_v6, 1 }
 0x6b6   : > { %v7515_v18 = vrot.slane %v7514_v50, 2  ;;  %9147 = vrcp.f32 %v7301_v10  ;;  %v7519_v11 = vadd.f32 %v7431_v56, %v7419_v24  ;;  %v7313_v46 = vadd.f32 1.0, %v9136_v0 }
 0x6b7   : > { %v9138_v51 = vpop.eup %9137  ;;  %v7668_v23 = vsub.f32 %v7656_v1, %v15396_v30  ;;  %9149 = vrcp.f32 %v7302_v39  ;;  %v7528_v41 = vadd.f32 %v7432_v15, %v7420_v4  ;;  %v7482_v28 = vadd.f32 %v7481_v61, %v7480_v6  ;;  %v17052_v1 = vld [vmem:[#allocation75_spill] sm:$0xff]  ;;  %v17053_v4 = vld [vmem:[#allocation113_spill] sm:$0xff] }
 0x6b8   : > { %v9140_v12 = vpop.eup %9139  ;;  %v7314_v36 = vadd.f32 1.0, %v9138_v51  ;;  %9151 = vrcp.f32 %v7313_v46  ;;  %v7516_v59 = vadd.f32 %v7515_v18, %v7514_v50  ;;  %v17054_v0 = vmin.f32 %v17052_v1, %v17053_v4  ;;  %v17057_v18 = vld [vmem:[#allocation31_spill] sm:$0xff] }
 0x6b9   : > { %v9142_v17 = vpop.eup %9141  ;;  %v7395_v33 = vmul.f32 %v9140_v12, %v15296_v31  ;;  %v7716_v32 = vmul.f32 %v14909_v19, %v7668_v23  ;;  %v17055_v31 = vmax.f32 %v17052_v1, %v17053_v4 }
 0x6ba   : > { %9153 = vrcp.f32 %v7314_v36  ;;  %v7396_v14 = vmul.f32 %v9142_v17, %v15299_v57  ;;  %v7517_v10 = vrot.slane %v7516_v59, 1  ;;  %v7597_v6 = vmin.f32 %v17054_v0, %v15372_v55  ;;  %v17056_v57 = vld [vmem:[#allocation114_spill] sm:$0xff] }
 0x6bb   : > { %v7443_v24 = vmul.f32 %v15076_v40, %v7395_v33  ;;  %v15421_v56 = vadd.f32 %v7716_v32, %v7692_v52  ;;  %v9144_v39 = vpop.eup %9143  ;;  %v7621_v50 = vmax.f32 %v17055_v31, %v15372_v55  ;;  %v7645_v61 = vadd.f32 %v17056_v57, %v15372_v55  ;;  %v17058_v52 = vld [vmem:[#allocation30_spill] sm:$0xff]  ;;  %v17060_v33 = vld [vmem:[#allocation25_spill] sm:$0xff]  ;;  %v17061_v55 = vld [vmem:[#allocation63_spill] sm:$0xff] }
 0x6bc   : > { %v7444_v15 = vmul.f32 %v15076_v40, %v7396_v14  ;;  %v17059_v51 = vmin.f32 %v17057_v18, %v17058_v52  ;;  %v9146_v23 = vpop.eup %9145  ;;  %v7325_v36 = vadd.f32 1.0, %v9144_v39  ;;  %v7518_v17 = vadd.f32 %v7517_v10, %v7516_v59  ;;  %v17063_v39 = vld [vmem:[#allocation51_spill] sm:$0xff] }
 0x6bd   : > { %17051 = vst [vmem:[#allocation80_spill] sm:$0xff] %v15421_v56  ;;  %v7520_v12 = vsel %vm5354_vm11, %v7443_v24, 0.0  ;;  %v7558_v32 = vmul.f32 %v7482_v28, %v17060_v33  ;;  %v7326_v1 = vadd.f32 1.0, %v9146_v23  ;;  %v7657_v4 = vsub.f32 %v7645_v61, %v7597_v6 }
 0x6be   : > { %v7598_v46 = vmin.f32 %v17059_v51, %v15378_v26  ;;  %v7521_v14 = vadd.f32 %v7520_v12, %v7519_v11  ;;  %v7529_v0 = vsel %vm5354_vm11, %v7444_v15, 0.0  ;;  %9155 = vrcp.f32 %v7325_v36 }
 0x6bf   : > { %v7530_v31 = vadd.f32 %v7529_v0, %v7528_v41  ;;  %v7562_v57 = vmul.f32 %v7518_v17, %v17061_v55  ;;  %v7693_v22 = vmul.f32 %v14917_v53, %v7597_v6  ;;  %9157 = vrcp.f32 %v7326_v1 }
 0x6c0   : > { %v7522_v56 = vrot.slane %v7521_v14, 4  ;;  %v7669_v51 = vsub.f32 %v7657_v4, %v7621_v50  ;;  %v17062_v59 = vmax.f32 %v17057_v18, %v17058_v52  ;;  %v9148_v11 = vpop.eup %9147  ;;  %v7753_v41 = vmul.f32 %v14915_v20, %v7621_v50 }
 0x6c1   : > { %v7531_v28 = vrot.slane %v7530_v31, 4  ;;  %v15449_v10 = vadd.f32 %v7562_v57, %v7558_v32  ;;  %v7646_v15 = vadd.f32 %v17063_v39, %v15378_v26  ;;  %v9150_v61 = vpop.eup %9149  ;;  %v7373_v6 = vmul.f32 %v9148_v11, %v15335_v7  ;;  %v17064_v32 = vld [vmem:[#allocation50_spill] sm:$0xff] }
 0x6c2   : > { %v15447_v24 = vmax.f32 %v17062_v59, %v15378_v26  ;;  %v7523_v23 = vadd.f32 %v7522_v56, %v7521_v14  ;;  %v7717_v12 = vmul.f32 %v14909_v19, %v7669_v51  ;;  %v7694_v36 = vmul.f32 %v14917_v53, %v7598_v46  ;;  %v9152_v18 = vpop.eup %9151 }
 0x6c3   : > { %v7374_v52 = vmul.f32 %v9150_v61, %v15341_v62  ;;  %v7532_v17 = vadd.f32 %v7531_v28, %v7530_v31  ;;  %v7658_v33 = vsub.f32 %v7646_v15, %v7598_v46  ;;  %v17065_v50 = vmin.f32 %v14995_v49, %v17064_v32 }
 0x6c4   : > { %v9154_v1 = vpop.eup %9153  ;;  %v7421_v26 = vmul.f32 %v15011_v58, %v7373_v6  ;;  %v7385_v7 = vmul.f32 %v9152_v18, %v15351_v43  ;;  %v7524_v56 = vrot.slane %v7523_v23, 2  ;;  %v7729_v14 = vadd.f32 %v7717_v12, %v7693_v22 }
 0x6c5   : > { %v7599_v0 = vmin.f32 %v17065_v50, %v15327_v44  ;;  %v7422_v4 = vmul.f32 %v15011_v58, %v7374_v52  ;;  %v7386_v53 = vmul.f32 %v9154_v1, %v15355_v27  ;;  %v7533_v55 = vrot.slane %v7532_v17, 2  ;;  %v17067_v27 = vld [vmem:[#allocation125_spill] sm:$0xff]  ;;  %v17071_v50 = vld [vmem:[#allocation19_spill] sm:$0xff] }
 0x6c6   : > { %v7670_v62 = vsub.f32 %v7658_v33, %v15447_v24  ;;  %v7433_v46 = vmul.f32 %v15016_v45, %v7385_v7  ;;  %v7525_v31 = vadd.f32 %v7524_v56, %v7523_v23  ;;  %v15468_v57 = vadd.f32 %v7753_v41, %v7729_v14  ;;  %v17073_v56 = vld [vmem:[#allocation34_spill] sm:$0xff] }
 0x6c7   : > { %v17066_v51 = vmax.f32 %v14995_v49, %v17064_v32  ;;  %v7434_v43 = vmul.f32 %v15016_v45, %v7386_v53  ;;  %v7534_v22 = vadd.f32 %v7533_v55, %v7532_v17  ;;  %v7647_v11 = vadd.f32 %v17067_v27, %v15327_v44  ;;  %v17075_v55 = vld [vmem:[#allocation81_spill] sm:$0xff] }
 0x6c8   : > { %v7718_v58 = vmul.f32 %v14909_v19, %v7670_v62  ;;  %v7537_v28 = vadd.f32 %v7433_v46, %v7421_v26  ;;  %v7526_v39 = vrot.slane %v7525_v31, 1  ;;  %v15480_v15 = vmul.f32 %v14915_v20, %v15396_v30  ;;  %v9156_v41 = vpop.eup %9155  ;;  %v17068_v19 = vld [vmem:[#allocation29_spill] sm:$0xff]  ;;  %v17072_v26 = vld [vmem:[#allocation83_spill] sm:$0xff] }
 0x6c9   : > { %v7623_v59 = vmax.f32 %v17066_v51, %v15327_v44  ;;  %v7546_v61 = vadd.f32 %v7434_v43, %v7422_v4  ;;  %v7535_v6 = vrot.slane %v7534_v22, 1  ;;  %v7659_v49 = vsub.f32 %v7647_v11, %v7599_v0  ;;  %v9158_v12 = vpop.eup %9157  ;;  %v17074_v4 = vld [vmem:[#allocation17_spill] sm:$0xff]  ;;  %v17076_v46 = vld [vmem:[#allocation43_spill] sm:$0xff] }
 0x6ca   : > { %v15482_v23 = vadd.f32 %v7718_v58, %v7694_v36  ;;  %v7527_v45 = vadd.f32 %v7526_v39, %v7525_v31  ;;  %v7397_v18 = vmul.f32 %v9156_v41, %v15366_v38  ;;  %v17069_v44 = vmin.f32 %v14997_v48, %v17068_v19 }
 0x6cb   : > { %v17070_v30 = vmax.f32 %v14997_v48, %v17068_v19  ;;  %v7536_v33 = vadd.f32 %v7535_v6, %v7534_v22  ;;  %v7398_v32 = vmul.f32 %v9158_v12, %v15370_v16  ;;  %v7671_v36 = vsub.f32 %v7659_v49, %v7623_v59  ;;  %v17079_v6 = vld [vmem:[#allocation45_spill] sm:$0xff] }
 0x6cc   : > { %v7600_v52 = vmin.f32 %v17069_v44, %v15332_v60  ;;  %v7648_v1 = vadd.f32 %v17071_v50, %v15332_v60  ;;  %v7563_v7 = vmul.f32 %v7527_v45, %v17072_v26  ;;  %v7445_v38 = vmul.f32 %v15076_v40, %v7397_v18 }
 0x6cd   : > { %v7624_v17 = vmax.f32 %v17070_v30, %v15332_v60  ;;  %v7695_v14 = vmul.f32 %v17073_v56, %v7599_v0  ;;  %v7755_v53 = vmul.f32 %v17074_v4, %v7623_v59  ;;  %v7564_v62 = vmul.f32 %v7536_v33, %v17075_v55  ;;  %v9231_v30 = vld [vmem:[%s9373_s23 + $0x28] sm:$0x7] }
 0x6ce   : > { %v7446_v48 = vmul.f32 %v15076_v40, %v7398_v32  ;;  %v7719_v31 = vmul.f32 %v17076_v46, %v7671_v36  ;;  %v7660_v51 = vsub.f32 %v7648_v1, %v7600_v52  ;;  %v7571_v16 = vadd.f32 %v15344_v2, %v7563_v7 }
 0x6cf   : > { %v7538_v60 = vsel %vm5354_vm11, %v7445_v38, 0.0  ;;  %v17077_v43 = vmin.f32 %v14999_v9, %v15155_v13  ;;  %v17078_v0 = vmax.f32 %v14999_v9, %v15155_v13  ;;  %v7572_v40 = vadd.f32 %v15359_v8, %v7564_v62  ;;  %v9230_v13 = vld [vmem:[%s9373_s23 + $0x20] sm:$0x7] }
 0x6d0   : > { %v7539_v58 = vadd.f32 %v7538_v60, %v7537_v28  ;;  %v7547_v27 = vsel %vm5354_vm11, %v7446_v48, 0.0  ;;  %v7731_v2 = vadd.f32 %v7719_v31, %v7695_v14  ;;  %v7575_v11 = vmul.f32 0.33333334, %v7571_v16  ;;  %v17082_v14 = vld [vmem:[#allocation47_spill] sm:$0xff] }
 0x6d1   : > { %v7601_v22 = vmin.f32 %v17077_v43, %v15403_v35  ;;  %v7625_v59 = vmax.f32 %v17078_v0, %v15403_v35  ;;  %v7548_v39 = vadd.f32 %v7547_v27, %v7546_v61  ;;  %v7672_v41 = vsub.f32 %v7660_v51, %v7624_v17 }
 0x6d2   : > { %v7649_v49 = vadd.f32 %v17079_v6, %v15403_v35  ;;  %v7576_v12 = vmul.f32 0.33333334, %v7572_v40  ;;  %v7540_v45 = vrot.slane %v7539_v58, 4  ;;  %v15517_v18 = vadd.f32 %v7755_v53, %v7731_v2 }
 0x6d3   : > { %v7696_v9 = vmul.f32 %v17073_v56, %v7600_v52  ;;  %v7579_v8 = vadd.f32 %v9230_v13, %v7575_v11  ;;  %v7549_v28 = vrot.slane %v7548_v39, 4  ;;  %v7720_v19 = vmul.f32 %v17076_v46, %v7672_v41 }
 0x6d4   : > { %v7661_v44 = vsub.f32 %v7649_v49, %v7601_v22  ;;  %v7580_v33 = vadd.f32 %v9231_v30, %v7576_v12  ;;  %v7541_v61 = vadd.f32 %v7540_v45, %v7539_v58  ;;  %v7756_v32 = vmul.f32 %v17074_v4, %v7624_v17  ;;  %v17086_v58 = vld [vmem:[#allocation124_spill] sm:$0xff] }
 0x6d5   : > { %v17080_v35 = vmin.f32 %v15001_v3, %v15145_v63  ;;  %8119 = vst [vmem:[%s15529_s16 + $0x20] sm:$0x7] %v7579_v8  ;;  %v7550_v52 = vadd.f32 %v7549_v28, %v7548_v39  ;;  %v7732_v50 = vadd.f32 %v7720_v19, %v7696_v9  ;;  %v17081_v26 = vmax.f32 %v15001_v3, %v15145_v63  ;;  %v17088_v39 = vld [vmem:[#allocation42_spill] sm:$0xff]  ;;  %v17091_v9 = vld [vmem:[#allocation40_spill] sm:$0xff] }
 0x6d6   : > { %v7673_v1 = vsub.f32 %v7661_v44, %v7625_v59  ;;  %8120 = vst [vmem:[%s15529_s16 + $0x28] sm:$0x7] %v7580_v33  ;;  %v7542_v17 = vrot.slane %v7541_v61, 2  ;;  %v15539_v38 = vmul.f32 %v14915_v20, %v15447_v24  ;;  %v7651_v53 = vadd.f32 %v17082_v14, %v15338_v37  ;;  %v17092_v8 = vld [vmem:[#allocation26_spill] sm:$0xff] }
 0x6d7   : > { %v7603_v36 = vmin.f32 %v17080_v35, %v15338_v37  ;;  %v7627_v7 = vmax.f32 %v17081_v26, %v15338_v37  ;;  %v17083_v55 = vmin.f32 %v15003_v21, %v15165_v47  ;;  %v7551_v48 = vrot.slane %v7550_v52, 2  ;;  %v17085_v37 = vld [vmem:[#allocation23_spill] sm:$0xff] }
 0x6d8   : > { %v15547_v31 = vadd.f32 %v7756_v32, %v7732_v50  ;;  %v7697_v3 = vmul.f32 %v17073_v56, %v7601_v22  ;;  %v7721_v63 = vmul.f32 %v17076_v46, %v7673_v1  ;;  %v7543_v51 = vadd.f32 %v7542_v17, %v7541_v61  ;;  %v17093_v61 = vld [vmem:[#allocation14_spill] sm:$0xff]  ;;  %v17094_v32 = vld [vmem:[#allocation76_spill] sm:$0xff] }
 0x6d9   : > { %v7602_v62 = vmin.f32 %v17083_v55, %v15407_v25  ;;  %v7663_v16 = vsub.f32 %v7651_v53, %v7603_v36  ;;  %v17084_v20 = vmax.f32 %v15003_v21, %v15165_v47  ;;  %v7650_v60 = vadd.f32 %v17085_v37, %v15407_v25  ;;  %v17099_v53 = vld [vmem:[#allocation122_spill] sm:$0xff] }
 0x6da   : > { %v7552_v43 = vadd.f32 %v7551_v48, %v7550_v52  ;;  %v7733_v0 = vadd.f32 %v7721_v63, %v7697_v3  ;;  %v7757_v40 = vmul.f32 %v17074_v4, %v7625_v59  ;;  %v17087_v22 = vmin.f32 %v15005_v34, %v17086_v58  ;;  %v17090_v59 = vld [vmem:[#allocation126_spill] sm:$0xff] }
 0x6db   : > { %v7626_v24 = vmax.f32 %v17084_v20, %v15407_v25  ;;  %v7544_v2 = vrot.slane %v7543_v51, 1  ;;  %v7675_v11 = vsub.f32 %v7663_v16, %v7627_v7  ;;  %v7699_v41 = vmul.f32 %v17088_v39, %v7603_v36  ;;  %v17100_v20 = vld [vmem:[#allocation62_spill] sm:$0xff] }
 0x6dc   : > { %v7604_v27 = vmin.f32 %v17087_v22, %v15347_v54  ;;  %v7662_v6 = vsub.f32 %v7650_v60, %v7602_v62  ;;  %v7553_v49 = vrot.slane %v7552_v43, 1  ;;  %v15563_v21 = vadd.f32 %v7757_v40, %v7733_v0  ;;  %v17104_v0 = vld [vmem:[#allocation61_spill] sm:$0xff] }
 0x6dd   : > { %v17089_v47 = vmax.f32 %v15005_v34, %v17086_v58  ;;  %v7652_v12 = vadd.f32 %v17090_v59, %v15347_v54  ;;  %v7545_v45 = vadd.f32 %v7544_v2, %v7543_v51  ;;  %v7723_v13 = vmul.f32 %v17091_v9, %v7675_v11  ;;  %v17096_v34 = vld [vmem:[#allocation107_spill] sm:$0xff]  ;;  %v9232_v2 = vld [vmem:[%s9373_s23 + $0x30] sm:$0x7] }
 0x6de   : > { %v7759_v28 = vmul.f32 %v17092_v8, %v7627_v7  ;;  %v7674_v19 = vsub.f32 %v7662_v6, %v7626_v24  ;;  %v7554_v44 = vadd.f32 %v7553_v49, %v7552_v43  ;;  %v7698_v30 = vmul.f32 %v17073_v56, %v7602_v62  ;;  %v17098_v7 = vld [vmem:[#allocation108_spill] sm:$0xff]  ;;  %v9233_v59 = vld [vmem:[%s9373_s23 + $0x38] sm:$0x7] }
 0x6df   : > { %v7628_v25 = vmax.f32 %v17089_v47, %v15347_v54  ;;  %v7664_v33 = vsub.f32 %v7652_v12, %v7604_v27  ;;  %v17095_v35 = vmin.f32 %v17093_v61, %v17094_v32  ;;  %v7565_v52 = vmul.f32 %v7545_v45, %v17096_v34  ;;  %v17105_v49 = vld [vmem:[#allocation80_spill] sm:$0xff] }
 0x6e0   : > { %v7735_v50 = vadd.f32 %v7723_v13, %v7699_v41  ;;  %v7722_v54 = vmul.f32 %v17076_v46, %v7674_v19  ;;  %v17097_v1 = vmax.f32 %v17093_v61, %v17094_v32  ;;  %v7566_v17 = vmul.f32 %v7554_v44, %v17098_v7  ;;  %v15616_v44 = vld [vmem:[%s9373_s23] sm:$0xff] }
 0x6e1   : > { %v7605_v36 = vmin.f32 %v17095_v35, %v15411_v42  ;;  %v7758_v56 = vmul.f32 %v17074_v4, %v7626_v24  ;;  %v7676_v14 = vsub.f32 %v7664_v33, %v7628_v25  ;;  %v7653_v55 = vadd.f32 %v17099_v53, %v15411_v42  ;;  %v17101_v4 = vld [vmem:[#allocation48_spill] sm:$0xff] }
 0x6e2   : > { %v7629_v26 = vmax.f32 %v17097_v1, %v15411_v42  ;;  %v7573_v62 = vadd.f32 %v15390_v29, %v7565_v52  ;;  %v7771_v48 = vadd.f32 %v7759_v28, %v7735_v50  ;;  %v7734_v3 = vadd.f32 %v7722_v54, %v7698_v30  ;;  %v15612_v28 = vld [vmem:[%s9373_s23 + $0x8] sm:$0xff]  ;;  %v15630_v54 = vld [vmem:[%s9373_s23 + $0x18] sm:$0xff] }
 0x6e3   : > { %v7700_v46 = vmul.f32 %v17088_v39, %v7604_v27  ;;  %v7574_v63 = vadd.f32 %v15449_v10, %v7566_v17  ;;  %v7724_v51 = vmul.f32 %v17091_v9, %v7676_v14  ;;  %v7665_v16 = vsub.f32 %v7653_v55, %v7605_v36  ;;  %v17106_v30 = vld [vmem:[#allocation49_spill] sm:$0xff]  ;;  %v8477_v14 = vld [vmem:[%s15760_s4] sm:$0xff]  }
 0x6e4   : > { %v17102_v24 = vmin.f32 %v17100_v20, %v17101_v4  ;;  %v7577_v60 = vmul.f32 0.33333334, %v7573_v62  ;;  %v7770_v42 = vadd.f32 %v7758_v56, %v7734_v3  ;;  %v17103_v29 = vmax.f32 %v17100_v20, %v17101_v4 }
 0x6e5   : > { %v7654_v10 = vadd.f32 %v17104_v0, %v15414_v5  ;;  %v7578_v40 = vmul.f32 0.33333334, %v7574_v63  ;;  %v7736_v58 = vadd.f32 %v7724_v51, %v7700_v46  ;;  %v7760_v22 = vmul.f32 %v17092_v8, %v7628_v25  ;;  %v17109_v46 = vld [vmem:[#allocation22_spill] sm:$0xff] }
 0x6e6   : > { %v7606_v37 = vmin.f32 %v17102_v24, %v15414_v5  ;;  %v7630_v43 = vmax.f32 %v17103_v29, %v15414_v5  ;;  %v7677_v27 = vsub.f32 %v7665_v16, %v7629_v26  ;;  %v7581_v11 = vadd.f32 %v9232_v2, %v7577_v60  ;;  %v17110_v24 = vld [vmem:[#allocation28_spill] sm:$0xff] }
 0x6e7   : > { %v7701_v41 = vmul.f32 %v17088_v39, %v7605_v36  ;;  %v7764_v47 = vadd.f32 %v15480_v15, %v17105_v49  ;;  %v7582_v12 = vadd.f32 %v9233_v59, %v7578_v40  ;;  %v7772_v45 = vadd.f32 %v7760_v22, %v7736_v58 }
 0x6e8   : > { %v7666_v6 = vsub.f32 %v7654_v10, %v7606_v37  ;;  %v7725_v5 = vmul.f32 %v17091_v9, %v7677_v27  ;;  %v7761_v13 = vmul.f32 %v17092_v8, %v7629_v26  ;;  %8121 = vst [vmem:[%s15529_s16 + $0x30] sm:$0x7] %v7581_v11  ;;  %v7778_v15 = vpack.c.bf16 %v17106_v30, %v15616_v44  ;;  %v15635_v26 = vld [vmem:[%s9373_s23 + $0x10] sm:$0xff] }
 0x6e9   : > { %v7779_v19 = vpack.c.bf16 %v7764_v47, %v15612_v28  ;;  %v7766_v33 = vadd.f32 %v15539_v38, %v15482_v23  ;;  %8122 = vst [vmem:[%s15529_s16 + $0x38] sm:$0x7] %v7582_v12  ;;  %v7783_v32 = vpack.c.bf16 %v7772_v45, %v15547_v31  ;;  %v17107_v35 = vmov 65535   ;;  %v17111_v45 = vld [vmem:[#allocation46_spill] sm:$0xff] }
 0x6ea   : > { %v7678_v25 = vsub.f32 %v7666_v6, %v7630_v43  ;;  %v7737_v61 = vadd.f32 %v7725_v5, %v7701_v41  ;;  %v7813_v36 = vsel %vm5380_vm14, 4294967295, %v17107_v35  ;;  %v7782_v34 = vpack.c.bf16 %v7771_v48, %v15517_v18  ;;  %v9238_v48 = vld [vmem:[%s15763_s7] sm:$0xff] }
 0x6eb   : > { %v7702_v52 = vmul.f32 %v17088_v39, %v7606_v37  ;;  %7827 = vmatprep.subr.bf16.mxu0 %v7779_v19  ;;  %v7781_v1 = vpack.c.bf16 %v7766_v33, %v15630_v54  ;;  %v7814_v23 = vsel %vm5393_vm6, %v7813_v36, 0  ;;  %v7780_v31 = vpack.c.bf16 %v15468_v57, %v15635_v26 }
 0x6ec   : > { %v7726_v50 = vmul.f32 %v17091_v9, %v7678_v25  ;;  %v7773_v38 = vadd.f32 %v7761_v13, %v7737_v61  ;;  %7828 = vmatpush1.bf16.msra.mxu0 %v7778_v15  ;;  %v7819_v7 = vand.u32 %v7814_v23, %v7783_v32  ;;  %v7762_v39 = vmul.f32 %v17092_v8, %v7630_v43  ;;  %v8478_v8 = vld [vmem:[%s15760_s4 + $0x8] ss:$0 sps:$4 sm:$0x33]  }
 0x6ed   : > { %7878 = vmatprep.subr.bf16.mxu1 %v7781_v1  ;;  %v7816_v9 = vand.u32 %v7814_v23, %v7782_v34  ;;  %v17108_v62 = vmov 0  }
 0x6ee   : > { %v7738_v18 = vadd.f32 %v7726_v50, %v7702_v52  ;;  %7879 = vmatpush1.bf16.msra.mxu1 %v7780_v31  ;;  %7829 = vmatprep.subr.bf16.mxu0 %v7819_v7  ;;  %v7784_v17 = vpack.c.bf16 %v7773_v38, %v15563_v21  ;;  %v9281_v21 = vmov 11  }
 0x6ef   : > { %8466 = vset.pattern.permute.xlu1 %v9281_v21  ;;  %8467 = vset.pattern.permute.xlu0 %v9281_v21 }
 0x6f0   : > { %v7774_v56 = vadd.f32 %v7762_v39, %v7738_v18  ;;  %7830 = vmatpush1.bf16.msra.mxu0 %v7816_v9  ;;  %v7822_v57 = vand.u32 %v7814_v23, %v7784_v17  ;;  %8011 = vperm.xlu1 %8466, %v9238_v48  }
 0x6f2   : > { %v7785_v53 = vpack.c.bf16 %v7774_v56, %v7770_v42 }
 0x6f3   : > { %8325 = vmatmul.mubr.msk.bf16.vlgmr.msra.gmra.mrb[156].mxu0 %vm7806_vm8, %v8477_v14 }
 0x6f4   : > { %v7825_v55 = vand.u32 %v7814_v23, %v7785_v53  ;;  %7869 = vmatprep.mubr.bf16.mxu0 %v17108_v62 }
 0x6f6   : > { %7880 = vmatprep.subr.bf16.mxu1 %v7825_v55 }
 0x6f7   : > { %7881 = vmatpush1.bf16.msra.mxu1 %v7822_v57 }
 0x6fa   : > { %8327 = vmatmul.mubr.msk.bf16.vlgmr.msra.gmra.mrb[156].mxu1 %vm7806_vm8, %v8477_v14 }
 0x6fb   : > { %7920 = vmatprep.mubr.bf16.mxu1 %v17108_v62  ;;  %8326 = vmatmul.mubr.msk.bf16.gmra.mrb[160].mxu0 %vm7806_vm8, %v8478_v8 }
 0x6fc   : > { %8061 = vmatprep.mubr.bf16.mxu0 %v17108_v62 }
 0x702   : > { %8328 = vmatmul.mubr.msk.bf16.gmra.mrb[160].mxu1 %vm7806_vm8, %v8478_v8 }
 0x703   : > { %8102 = vmatprep.mubr.bf16.mxu1 %v17108_v62 }
 0x7c6   : > { %v7861_v3 = vpop.f32.mrb[156].mxu0 }
 0x7c7   : > { %v15655_v63 = vadd.f32 %v7861_v3, %v17109_v46  ;;  %v7863_v51 = vpop.f32.mrb[157].mxu0 }
 0x7c8   : > { %v15658_v16 = vadd.f32 %v7863_v51, %v17109_v46  ;;  %v7865_v20 = vpop.f32.mrb[158].mxu0 }
 0x7c9   : > { %v7929_v4 = vsub.f32 0.0, %v15655_v63  ;;  %v15662_v37 = vadd.f32 %v7865_v20, %v17110_v24  ;;  %v7867_v60 = vpop.f32.mrb[159].mxu0 }
 0x7ca   : > { %v7930_v42 = vsub.f32 0.0, %v15658_v16  ;;  %v15666_v29 = vadd.f32 %v7867_v60, %v17110_v24 }
 0x7cb   : > { %v7941_v43 = vmul.f32 1.442695, %v7929_v4  ;;  %v7933_v0 = vsub.f32 0.0, %v15662_v37 }
 0x7cc   : > { %v7943_v10 = vmul.f32 1.442695, %v7930_v42  ;;  %v7934_v58 = vsub.f32 0.0, %v15666_v29 }
 0x7cd   : > { %v7912_v40 = vpop.f32.mrb[156].mxu1  ;;  %9159 = vpow2.f32 %v7941_v43  ;;  %v7949_v27 = vmul.f32 1.442695, %v7933_v0 }
 0x7ce   : > { %v15671_v22 = vadd.f32 %v7912_v40, %v17109_v46  ;;  %v7914_v2 = vpop.f32.mrb[157].mxu1  ;;  %9161 = vpow2.f32 %v7943_v10  ;;  %v7951_v41 = vmul.f32 1.442695, %v7934_v58  ;;  %v7871_v49 = vpop.f32.mrb[160].mxu0 }
 0x7cf   : > { %v15674_v11 = vadd.f32 %v7914_v2, %v17109_v46  ;;  %v7916_v6 = vpop.f32.mrb[158].mxu1  ;;  %9163 = vpow2.f32 %v7949_v27  ;;  %v15681_v5 = vadd.f32 %v7871_v49, %v17111_v45  ;;  %v7873_v13 = vpop.f32.mrb[161].mxu0 }
 0x7d0   : > { %v7931_v47 = vsub.f32 0.0, %v15671_v22  ;;  %v15678_v59 = vadd.f32 %v7916_v6, %v17110_v24  ;;  %v7918_v12 = vpop.f32.mrb[159].mxu1  ;;  %9165 = vpow2.f32 %v7951_v41  ;;  %v15688_v30 = vadd.f32 %v7873_v13, %v17111_v45  ;;  %v7875_v15 = vpop.f32.mrb[162].mxu0 }
 0x7d1   : > { %v7932_v25 = vsub.f32 0.0, %v15674_v11  ;;  %v15685_v19 = vadd.f32 %v7918_v12, %v17110_v24  ;;  %v7937_v32 = vsub.f32 0.0, %v15681_v5  ;;  %v7876_v35 = vpop.f32.mrb[163].mxu0 }
 0x7d2   : > { %v7945_v33 = vmul.f32 1.442695, %v7931_v47  ;;  %v7935_v61 = vsub.f32 0.0, %v15678_v59  ;;  %v7938_v52 = vsub.f32 0.0, %v15688_v30 }
 0x7d3   : > { %v7947_v36 = vmul.f32 1.442695, %v7932_v25  ;;  %v7936_v34 = vsub.f32 0.0, %v15685_v19  ;;  %v7957_v1 = vmul.f32 1.442695, %v7937_v32 }
 0x7d4   : > { %9167 = vpow2.f32 %v7945_v33  ;;  %v7953_v50 = vmul.f32 1.442695, %v7935_v61  ;;  %v7959_v38 = vmul.f32 1.442695, %v7938_v52 }
 0x7d5   : > { %9169 = vpow2.f32 %v7947_v36  ;;  %v7955_v23 = vmul.f32 1.442695, %v7936_v34  ;;  %v7922_v31 = vpop.f32.mrb[160].mxu1 }
 0x7d6   : > { %9171 = vpow2.f32 %v7953_v50  ;;  %v15695_v7 = vadd.f32 %v7922_v31, %v17111_v45  ;;  %v7924_v18 = vpop.f32.mrb[161].mxu1 }
 0x7d7   : > { %9173 = vpow2.f32 %v7955_v23  ;;  %v15698_v39 = vadd.f32 %v7924_v18, %v17111_v45  ;;  %v7926_v9 = vpop.f32.mrb[162].mxu1  ;;  %v9160_v17 = vpop.eup %9159 }
 0x7d8   : > { %9175 = vpow2.f32 %v7957_v1  ;;  %v7939_v56 = vsub.f32 0.0, %v15695_v7  ;;  %v7927_v14 = vpop.f32.mrb[163].mxu1  ;;  %v9162_v53 = vpop.eup %9161  ;;  %v7965_v55 = vadd.f32 1.0, %v9160_v17 }
 0x7d9   : > { %9177 = vpow2.f32 %v7959_v38  ;;  %v7940_v57 = vsub.f32 0.0, %v15698_v39  ;;  %v9164_v62 = vpop.eup %9163  ;;  %v7966_v8 = vadd.f32 1.0, %v9162_v53 }
 0x7da   : > { %v9166_v21 = vpop.eup %9165  ;;  %9179 = vrcp.f32 %v7965_v55  ;;  %v7969_v48 = vadd.f32 1.0, %v9164_v62  ;;  %v7961_v3 = vmul.f32 1.442695, %v7939_v56 }
 0x7db   : > { %9181 = vrcp.f32 %v7966_v8  ;;  %v7970_v46 = vadd.f32 1.0, %v9166_v21  ;;  %v7963_v51 = vmul.f32 1.442695, %v7940_v57 }
 0x7dc   : > { %9183 = vrcp.f32 %v7969_v48 }
 0x7dd   : > { %9185 = vrcp.f32 %v7970_v46 }
 0x7de   : > { %v9168_v20 = vpop.eup %9167  ;;  %9187 = vpow2.f32 %v7961_v3 }
 0x7df   : > { %v9170_v4 = vpop.eup %9169  ;;  %v7967_v24 = vadd.f32 1.0, %v9168_v20  ;;  %9189 = vpow2.f32 %v7963_v51 }
 0x7e0   : > { %v9172_v60 = vpop.eup %9171  ;;  %v7968_v42 = vadd.f32 1.0, %v9170_v4 }
 0x7e1   : > { %v9174_v43 = vpop.eup %9173  ;;  %9191 = vrcp.f32 %v7967_v24  ;;  %v7971_v0 = vadd.f32 1.0, %v9172_v60 }
 0x7e2   : > { %v9176_v10 = vpop.eup %9175  ;;  %9193 = vrcp.f32 %v7968_v42  ;;  %v7972_v40 = vadd.f32 1.0, %v9174_v43 }
 0x7e3   : > { %v9178_v58 = vpop.eup %9177  ;;  %9195 = vrcp.f32 %v7971_v0  ;;  %v7973_v27 = vadd.f32 1.0, %v9176_v10 }
 0x7e4   : > { %9197 = vrcp.f32 %v7972_v40  ;;  %v7974_v2 = vadd.f32 1.0, %v9178_v58  ;;  %v9180_v41 = vpop.eup %9179 }
 0x7e5   : > { %9199 = vrcp.f32 %v7973_v27  ;;  %v9182_v6 = vpop.eup %9181  ;;  %v7989_v12 = vmul.f32 %v9180_v41, %v15655_v63  ;;  %v8155_v41 = vld [vmem:[%s15529_s16 + $0x28] sm:$0xff] (%p9357_p5) }
 0x7e6   : > { %9201 = vrcp.f32 %v7974_v2  ;;  %v9184_v49 = vpop.eup %9183  ;;  %v7990_v25 = vmul.f32 %v9182_v6, %v15658_v16  ;;  %v8153_v2 = vld [vmem:[%s15529_s16 + $0x20] sm:$0xff] (%p9357_p5)  ;;  %8156 = vst [vmem:[%s8132_s20 + $0x108] sm:$0xff] (%p9357_p5), %v8155_v41  ;;  %v8157_v6 = vld [vmem:[%s15529_s16 + $0x30] sm:$0xff] (%p9357_p5) }
 0x7e7   : > { %v9186_v47 = vpop.eup %9185  ;;  %v7993_v45 = vmul.f32 %v9184_v49, %v15662_v37  ;;  %8154 = vst [vmem:[%s8132_s20 + $0x100] sm:$0xff] (%p9357_p5), %v8153_v2  ;;  %v8159_v49 = vld [vmem:[%s15529_s16 + $0x38] sm:$0xff] (%p9357_p5)  ;;  %8158 = vst [vmem:[%s8132_s20 + $0x110] sm:$0xff] (%p9357_p5), %v8157_v6 }
 0x7e8   : > { %v9188_v13 = vpop.eup %9187  ;;  %v7994_v15 = vmul.f32 %v9186_v47, %v15666_v29  ;;  %8160 = vst [vmem:[%s8132_s20 + $0x118] sm:$0xff] (%p9357_p5), %v8159_v49 }
 0x7e9   : > { %v9190_v33 = vpop.eup %9189  ;;  %v8002_v61 = vpack.c.bf16 %v7993_v45, %v7989_v12  ;;  %v7975_v32 = vadd.f32 1.0, %v9188_v13 }
 0x7ea   : > { %v7976_v36 = vadd.f32 1.0, %v9190_v33  ;;  %v8003_v34 = vpack.c.bf16 %v7994_v15, %v7990_v25 }
 0x7eb   : > { %v9192_v35 = vpop.eup %9191  ;;  %9203 = vrcp.f32 %v7975_v32 }
 0x7ec   : > { %v9194_v52 = vpop.eup %9193  ;;  %9205 = vrcp.f32 %v7976_v36  ;;  %8029 = vmatprep.subr.bf16.mxu0 %v8003_v34  ;;  %v7991_v63 = vmul.f32 %v9192_v35, %v15671_v22  ;;  %v17112_v22 = vld [vmem:[#allocation12_spill] sm:$0xff] }
 0x7ed   : > { %v9196_v50 = vpop.eup %9195  ;;  %8030 = vmatpush1.bf16.msra.mxu0 %v8002_v61  ;;  %v7992_v29 = vmul.f32 %v9194_v52, %v15674_v11 }
 0x7ee   : > { %v9198_v1 = vpop.eup %9197  ;;  %v7995_v37 = vmul.f32 %v9196_v50, %v15678_v59 }
 0x7ef   : > { %v9200_v16 = vpop.eup %9199  ;;  %v7996_v23 = vmul.f32 %v9198_v1, %v15685_v19 }
 0x7f0   : > { %v9202_v38 = vpop.eup %9201  ;;  %v8004_v31 = vpack.c.bf16 %v7995_v37, %v7991_v63  ;;  %v7997_v18 = vmul.f32 %v9200_v16, %v15681_v5  ;;  %v8001_v5 = vld [vmem:[%s15761_s5] sm:$0xf] }
 0x7f1   : > { %v7998_v9 = vmul.f32 %v9202_v38, %v15688_v30  ;;  %v8005_v17 = vpack.c.bf16 %v7996_v23, %v7992_v29 }
 0x7f2   : > { %v8006_v56 = vpack.c.bf16 %v7997_v18, %v7997_v18 }
 0x7f3   : > { %v8007_v14 = vpack.c.bf16 %v7998_v9, %v7998_v9  ;;  %8070 = vmatprep.subr.bf16.mxu1 %v8005_v17 }
 0x7f4   : > { %8071 = vmatpush1.bf16.msra.mxu1 %v8004_v31  ;;  %v8018_v55 = vand.u32 %v8006_v56, %v17112_v22 }
 0x7f5   : > { %v8021_v53 = vand.u32 %v8007_v14, %v17112_v22  ;;  %v9204_v59 = vpop.eup %9203 }
 0x7f6   : > { %v9206_v57 = vpop.eup %9205  ;;  %v7999_v11 = vmul.f32 %v9204_v59, %v15695_v7  ;;  %v8012_v7 = vpop.permute.xlu1 %8011 }
 0x7f7   : > { %8031 = vmatprep.subr.bf16.mxu0 %v8021_v53  ;;  %v8000_v19 = vmul.f32 %v9206_v57, %v15698_v39 }
 0x7f8   : > { %8032 = vmatpush1.bf16.msra.mxu0 %v8018_v55  ;;  %v8008_v30 = vpack.c.bf16 %v7999_v11, %v7999_v11 }
 0x7f9   : > { %v8009_v62 = vpack.c.bf16 %v8000_v19, %v8000_v19 }
 0x7fa   : > { %v8024_v21 = vand.u32 %v8008_v30, %v17112_v22 }
 0x7fb   : > { %8329 = vmatmul.mubr.msk.bf16.vlgmr.msra.gmra.mrb[164].mxu0 %vm6102_vm4, %v8001_v5  ;;  %v8027_v8 = vand.u32 %v8009_v62, %v17112_v22 }
 0x7fd   : > { %8072 = vmatprep.subr.bf16.mxu1 %v8027_v8 }
 0x7fe   : > { %8073 = vmatpush1.bf16.msra.mxu1 %v8024_v21 }
 0x801   : > { %8330 = vmatmul.mubr.msk.bf16.vlgmr.msra.gmra.mrb[164].mxu1 %vm6102_vm4, %v8001_v5 }
 0x8ce   : > { %v8063_v39 = vpop.f32.mrb[164].mxu0 }
 0x8cf   : > { %v8065_v48 = vpop.f32.mrb[165].mxu0  ;;  %v8064_v3 = vadd.f32 %v8063_v39, %v8012_v7 }
 0x8d0   : > { %v8067_v46 = vpop.f32.mrb[166].mxu0  ;;  %v8066_v51 = vadd.f32 %v8065_v48, %v8012_v7 }
 0x8d1   : > { %v8111_v20 = vadd.f32 %v15616_v44, %v8064_v3  ;;  %v8068_v4 = vpop.f32.mrb[167].mxu0 }
 0x8d2   : > { %v8112_v24 = vadd.f32 %v15612_v28, %v8066_v51 }
 0x8d3   : > { %8115 = vst [vmem:[%s15529_s16] sm:$0xff] %v8111_v20 }
 0x8d4   : > { %8116 = vst [vmem:[%s15529_s16 + $0x8] sm:$0xff] %v8112_v24  ;;  %v8104_v60 = vpop.f32.mrb[164].mxu1  ;;  %8129 = sbr.rel (!%p9357_p5) target bundleno = 2275 (0x8e3), region = 79 }
 0x8d5   : > { %v8106_v42 = vpop.f32.mrb[165].mxu1  ;;  %v8105_v43 = vadd.f32 %v8104_v60, %v8012_v7 }
 0x8d6   : > { %v8108_v0 = vpop.f32.mrb[166].mxu1  ;;  %v8107_v10 = vadd.f32 %v8106_v42, %v8012_v7 }
 0x8d7   : > { %v8113_v40 = vadd.f32 %v15635_v26, %v8105_v43  ;;  %v8109_v58 = vpop.f32.mrb[167].mxu1 }
 0x8d8   : > { %v8114_v27 = vadd.f32 %v15630_v54, %v8107_v10 }
 0x8d9   : > { %8117 = vst [vmem:[%s15529_s16 + $0x10] sm:$0xff] %v8113_v40 }
 0x8da   : > { %8118 = vst [vmem:[%s15529_s16 + $0x18] sm:$0xff] %v8114_v27  ;;  %v8145_v28 = vld [vmem:[%s15529_s16] sm:$0xff] (%p9357_p5) }
 0x8db   : > { %v8147_v44 = vld [vmem:[%s15529_s16 + $0x8] sm:$0xff]  ;;  %8146 = vst [vmem:[%s8132_s20] sm:$0xff] %v8145_v28 }
 0x8dc   : > { %8148 = vst [vmem:[%s8132_s20 + $0x8] sm:$0xff] %v8147_v44 }
 0x8e0   : > { %v8149_v26 = vld [vmem:[%s15529_s16 + $0x10] sm:$0xff] }
 0x8e1   : > { %v8151_v54 = vld [vmem:[%s15529_s16 + $0x18] sm:$0xff]  ;;  %8150 = vst [vmem:[%s8132_s20 + $0x10] sm:$0xff] %v8149_v26 }
 0x8e2   : > { %8152 = vst [vmem:[%s8132_s20 + $0x18] sm:$0xff] %v8151_v54 }
 0x8e3 PF: > { %p15_p10 = scmp.ge.s32.totalorder %s9344_s9, 10   ;;  %s17113_s27 = smov %s9257_s28 }
 0x8e4   : > { %s17114_s28 = smov %s9355_s12  ;;  %s17115_s29 = smov %s9344_s9 }
 0x8e5   :  { %17 = sbr.rel (!%p15_p10) target bundleno = 2 (0x2), region = 133 }

</bundles_post_ra>
